<compile_context>
chip_gen: v5e
topology: v5e:2x2
jax: 0.10.0
libtpu: 0.0.40
codegen_flags: <defaults>
</compile_context>

<pallas_src>
import jax
import jax.numpy as jnp
from jax import lax
from jax.experimental import pallas as pl
from jax.experimental.pallas import tpu as pltpu

EPS = 1e-6


# ------------------------- generation-aware sizing --------------------------

def _vmem_capacity_bytes():
    try:
        info = pltpu.get_tpu_info()
        cap = getattr(info, "vmem_capacity_bytes", None)
        if cap:
            return int(cap)
    except Exception:
        pass
    return 128 * 1024 * 1024          # v5e/v6e default if query unavailable


_VMEM_CAP = _vmem_capacity_bytes()
_SMALL_VMEM = _VMEM_CAP <= 96 * 1024 * 1024          # v7x-class (64 MiB) parts
_VMEM_LIMIT = min((48 if _SMALL_VMEM else 64) * 1024 * 1024, (3 * _VMEM_CAP) // 4)
_TM_CAP = 256 if _SMALL_VMEM else 1024


def _cp(sem):
    return pltpu.CompilerParams(
        dimension_semantics=sem,
        vmem_limit_bytes=int(_VMEM_LIMIT),
    )


def _pick_tm(npix):
    """Largest row tile (<= generation cap) dividing npix, preferring >=8 grid steps."""
    cands = [t for t in (1024, 512, 256, 128, 64, 32, 16) if t <= _TM_CAP]
    for min_steps in (8, 2, 1):
        for tm in cands:
            if npix % tm == 0 and npix // tm >= min_steps:
                return tm
    # TODO(synk): ragged npix (not divisible by 16) needs a padded-tail path.
    return npix


def _pick_strip(H, B):
    """Row-strip for the depthwise conv: prefer >= 8 total grid steps."""
    for min_steps in (8, 2, 1):
        for strip in (64, 32, 16, 8, 4, 2, 1):
            if strip <= H and H % strip == 0 and B * (H // strip) >= min_steps:
                return strip
    return H


# ----------------------------- Pallas kernels ------------------------------

def make_ln_projin_kernel(d0):
    """channels-first LayerNorm (over C per pixel) + 1x1 conv C -> 2C.

    Writes two lane-dense bf16 outputs: pwa (first d0 cols) and abc (rest).
    """
    def kernel(x_ref, lnw_ref, lnb_ref, w_ref, b_ref, pwa_ref, abc_ref):
        x = x_ref[...]                                        # (TM, C) f32
        mu = jnp.mean(x, axis=-1, keepdims=True)              # fused moments
        msq = jnp.mean(x * x, axis=-1, keepdims=True)
        var = msq - mu * mu
        xn = (x - mu) * lax.rsqrt(var + EPS)                  # EUP rsqrt
        xn = xn * lnw_ref[...] + lnb_ref[...]
        y = jnp.dot(xn.astype(jnp.bfloat16), w_ref[...],
                    preferred_element_type=jnp.float32) + b_ref[...]
        pwa_ref[...] = y[:, :d0].astype(jnp.bfloat16)
        abc_ref[...] = y[:, d0:].astype(jnp.bfloat16)
    return kernel


def make_dwconv_kernel(H, W, Cd, strip):
    """Depthwise 7x7 conv (padding=3, bias), halo built in a padded VMEM scratch.

    Grid is (B, H//strip): the padded scratch is filled once per batch (strip 0)
    and each step writes one row strip of the output.
    """
    # TODO(synk): replace the 49 sublane-shifted value slices with pltpu.roll
    #             taps (XLU) and optionally bf16 accumulation on v6e/v7x.
    def kernel(x_ref, w_ref, b_ref, o_ref, xpad_ref):
        s = pl.program_id(1)

        @pl.when(s == 0)
        def _():
            xpad_ref[...] = jnp.zeros_like(xpad_ref)
            xpad_ref[3:3 + H, 3:3 + W, :] = x_ref[0].astype(jnp.float32)

        row0 = pl.multiple_of(s * strip, strip)
        w = w_ref[...]                                        # (49, Cd) f32
        acc = jnp.broadcast_to(b_ref[...].reshape(1, 1, Cd), (strip, W, Cd))
        for ky in range(7):
            rows = xpad_ref[pl.ds(row0 + ky, strip), :, :]    # (strip, W+6, Cd)
            for kx in range(7):
                acc = acc + rows[:, kx:kx + W, :] * w[ky * 7 + kx][None, None, :]
        o_ref[0] = acc.astype(o_ref.dtype)
    return kernel


def make_gn_ffn_kernel(dims):
    """Fused: gating + proj_out + gn_gamma + residual + LN + FFN + ffn_gamma + residual."""
    order = len(dims)
    d0 = dims[0]
    offs, off = [], 0
    for d in dims:
        offs.append(off)
        off += d

    def _proj(x, w, b):
        """dims[i] -> dims[i+1] projection.  Small K stays off the MXU (VPU FMAs)."""
        K, N = w.shape
        if K <= 32:
            xb = x.astype(jnp.bfloat16).astype(jnp.float32)   # match bf16 dot rounding
            wf = w.astype(jnp.float32)
            acc = jnp.broadcast_to(b, (x.shape[0], N)).astype(jnp.float32)
            for k in range(K):
                acc = acc + xb[:, k:k + 1] * wf[k][None, :]
            return acc
        return jnp.dot(x.astype(jnp.bfloat16), w,
                       preferred_element_type=jnp.float32) + b

    def kernel(pwa_ref, dw_ref, x_ref, *rest):
        o_ref = rest[-1]
        params = rest[:-1]
        pwa = pwa_ref[...].astype(jnp.float32)                # (TM, d0)
        dwv = dw_ref[...].astype(jnp.float32)                 # (TM, Cd)
        res = x_ref[...]                                      # (TM, C) f32

        # recursive gating: x = pwa*dw0; x = pw_i(x) * dw_{i+1}
        x = pwa * dwv[:, :d0]
        idx = 0
        for i in range(order - 1):
            w = params[idx][...]
            b = params[idx + 1][...]
            idx += 2
            x = _proj(x, w, b)
            x = x * dwv[:, offs[i + 1]:offs[i + 1] + dims[i + 1]]

        po_w, po_b, gn_g = params[idx][...], params[idx + 1][...], params[idx + 2][...]
        ln2w, ln2b = params[idx + 3][...], params[idx + 4][...]
        fc1w, fc1b = params[idx + 5][...], params[idx + 6][...]
        fc2w, fc2b = params[idx + 7][...], params[idx + 8][...]
        ffn_g = params[idx + 9][...]

        y = jnp.dot(x.astype(jnp.bfloat16), po_w,
                    preferred_element_type=jnp.float32) + po_b
        x1 = res + gn_g * y                                   # layer scale + residual

        # channels-last LayerNorm -> Linear -> GELU -> Linear -> gamma -> residual
        mu = jnp.mean(x1, axis=-1, keepdims=True)
        msq = jnp.mean(x1 * x1, axis=-1, keepdims=True)
        var = msq - mu * mu
        xn = (x1 - mu) * lax.rsqrt(var + EPS) * ln2w + ln2b
        h = jnp.dot(xn.astype(jnp.bfloat16), fc1w,
                    preferred_element_type=jnp.float32) + fc1b
        # TODO(synk): PyTorch nn.GELU default is exact erf; tanh approximation used.
        h = jax.nn.gelu(h, approximate=True)
        y2 = jnp.dot(h.astype(jnp.bfloat16), fc2w,
                     preferred_element_type=jnp.float32) + fc2b
        o_ref[...] = x1 + ffn_g * y2
    return kernel


# ------------------------------ Pallas wrappers -----------------------------

def ln_projin(x2d, lnw, lnb, w_bf16, b, d0, tm):
    npix, C = x2d.shape
    C2 = w_bf16.shape[1]
    Cd = C2 - d0
    # TODO(synk): single-buffer the constant-index weight blocks
    #             (pipeline_mode=pl.Buffered(1)) once stable, to halve their VMEM.
    return pl.pallas_call(
        make_ln_projin_kernel(d0),
        out_shape=(jax.ShapeDtypeStruct((npix, d0), jnp.bfloat16),
                   jax.ShapeDtypeStruct((npix, Cd), jnp.bfloat16)),
        grid=(npix // tm,),
        in_specs=[
            pl.BlockSpec((tm, C), lambda i: (i, 0)),
            pl.BlockSpec((1, C), lambda i: (0, 0)),
            pl.BlockSpec((1, C), lambda i: (0, 0)),
            pl.BlockSpec((C, C2), lambda i: (0, 0)),
            pl.BlockSpec((1, C2), lambda i: (0, 0)),
        ],
        out_specs=(pl.BlockSpec((tm, d0), lambda i: (i, 0)),
                   pl.BlockSpec((tm, Cd), lambda i: (i, 0))),
        compiler_params=_cp(("parallel",)),
    )(x2d, lnw, lnb, w_bf16, b)


def dwconv7x7(abc4, w, b):
    B, H, W, Cd = abc4.shape
    strip = _pick_strip(H, B)
    n_strips = H // strip
    w49 = w.reshape(49, Cd)
    b2 = b.reshape(1, Cd)
    return pl.pallas_call(
        make_dwconv_kernel(H, W, Cd, strip),
        out_shape=jax.ShapeDtypeStruct((B, H, W, Cd), jnp.bfloat16),
        grid=(B, n_strips),
        in_specs=[
            pl.BlockSpec((1, H, W, Cd), lambda bi, si: (bi, 0, 0, 0)),
            pl.BlockSpec((49, Cd), lambda bi, si: (0, 0)),
            pl.BlockSpec((1, Cd), lambda bi, si: (0, 0)),
        ],
        out_specs=pl.BlockSpec((1, strip, W, Cd), lambda bi, si: (bi, si, 0, 0)),
        scratch_shapes=[pltpu.VMEM((H + 6, W + 6, Cd), jnp.float32)],
        compiler_params=_cp(("parallel", "arbitrary")),
    )(abc4, w49, b2)


def gn_ffn_fused(pwa, dw, x2d, p, tm):
    npix, C = x2d.shape
    dims = p['dims']
    order = len(dims)
    row_inputs = [pwa, dw, x2d]
    params = []
    for i in range(order - 1):
        params += [p['pw_w'][i], p['pw_b'][i]]
    params += [p['po_w'], p['po_b'], p['gn_gamma'],
               p['ln2_w'], p['ln2_b'], p['fc1_w'], p['fc1_b'],
               p['fc2_w'], p['fc2_b'], p['ffn_gamma']]
    in_specs = [pl.BlockSpec((tm, a.shape[1]), lambda i: (i, 0)) for a in row_inputs]
    in_specs += [pl.BlockSpec(a.shape, lambda i, nd=a.ndim: (0,) * nd) for a in params]
    # TODO(synk): for tiny C (<128) fold pixel rows into the lane dim so stores
    #             are unmasked vst (lane-dense); moot at production C >= 128.
    return pl.pallas_call(
        make_gn_ffn_kernel(dims),
        out_shape=jax.ShapeDtypeStruct((npix, C), jnp.float32),
        grid=(npix // tm,),
        in_specs=in_specs,
        out_specs=pl.BlockSpec((tm, C), lambda i: (i, 0)),
        input_output_aliases={2: 0},          # residual x2d aliases the output
        compiler_params=_cp(("parallel",)),
    )(*(row_inputs + params))


# ------------------------------- model glue ---------------------------------

def hor_unit_forward(x_nhwc, p):
    B, H, W, C = x_nhwc.shape
    npix = B * H * W
    tm = _pick_tm(npix)
    x2d = x_nhwc.reshape(npix, C)
    dims = p['dims']
    d0, Cd = dims[0], sum(dims)

    # A) LN(channels_first) + proj_in -> pwa (bf16), abc (bf16)
    pwa, abc = ln_projin(x2d, p['ln1_w'], p['ln1_b'],
                         p['proj_in_w'], p['proj_in_b'], d0, tm)

    # B) depthwise 7x7 on (B,H,W,Cd) (scale s = 1.0), in-kernel halo, strip grid
    dw = dwconv7x7(abc.reshape(B, H, W, Cd), p['dw_w'], p['dw_b']).reshape(npix, Cd)

    # C) gating + proj_out + gamma + residual + LN + FFN + gamma + residual
    out2d = gn_ffn_fused(pwa, dw, x2d, p, tm)
    return out2d.reshape(B, H, W, C)


def hor_stage_forward(x_nchw, unit_params):
    # downsample = Identity (in_channels == out_channels, stride == 1)
    x = jnp.transpose(x_nchw, (0, 2, 3, 1))          # NCHW -> NHWC
    for p in unit_params:
        x = hor_unit_forward(x, p)
    return jnp.transpose(x, (0, 3, 1, 2))            # NHWC -> NCHW


# ------------------------- deterministic parameters --------------------------

def init_unit_params(key, C, order=3, ffn_expansion=4, layer_scale_init=1e-6):
    dims = [C // (2 ** i) for i in range(order)]
    dims.reverse()                                   # e.g. [C/4, C/2, C]
    Cd = sum(dims)
    keys = jax.random.split(key, 8 + 2 * (order - 1))
    std = 0.02
    nrm = lambda k, s: std * jax.random.normal(k, s, jnp.float32)
    bf = lambda a: a.astype(jnp.bfloat16)            # matmul weights live in bf16
    p = {
        'dims': tuple(dims),
        'ln1_w': jnp.ones((1, C), jnp.float32),
        'ln1_b': jnp.zeros((1, C), jnp.float32),
        'proj_in_w': bf(nrm(keys[0], (C, 2 * C))),
        'proj_in_b': 0.01 * jax.random.normal(keys[1], (1, 2 * C), jnp.float32),
        'dw_w': nrm(keys[2], (7, 7, Cd)),
        'dw_b': 0.01 * jax.random.normal(keys[3], (Cd,), jnp.float32),
        'po_w': bf(nrm(keys[4], (C, C))),
        'po_b': jnp.zeros((1, C), jnp.float32),
        'gn_gamma': layer_scale_init * jnp.ones((1, C), jnp.float32),
        'ln2_w': jnp.ones((1, C), jnp.float32),
        'ln2_b': jnp.zeros((1, C), jnp.float32),
        'fc1_w': bf(nrm(keys[5], (C, ffn_expansion * C))),
        'fc1_b': jnp.zeros((1, ffn_expansion * C), jnp.float32),
        'fc2_w': bf(nrm(keys[6], (ffn_expansion * C, C))),
        'fc2_b': jnp.zeros((1, C), jnp.float32),
        'ffn_gamma': layer_scale_init * jnp.ones((1, C), jnp.float32),
    }
    pw_w, pw_b = [], []
    for i in range(order - 1):
        pw_w.append(bf(nrm(keys[7 + i], (dims[i], dims[i + 1]))))
        pw_b.append(jnp.zeros((1, dims[i + 1]), jnp.float32))
    p['pw_w'], p['pw_b'] = pw_w, pw_b
    return p


# ------------------------------ pure-JAX reference ---------------------------
# Mirrors the kernels' precision contract (bf16 weights + bf16 hand-off
# intermediates, f32 elementwise / accumulation) so the check is tight.

def _dotb(a, w_bf16):
    return jnp.dot(a.astype(jnp.bfloat16), w_bf16, preferred_element_type=jnp.float32)


def _bf16_round(a):
    return a.astype(jnp.bfloat16).astype(jnp.float32)


def _ref_dwconv7x7(abc, w, b):
    B, H, W, Cd = abc.shape
    xp = jnp.pad(abc, ((0, 0), (3, 3), (3, 3), (0, 0)))
    acc = jnp.zeros_like(abc) + b.reshape(1, 1, 1, Cd)
    for ky in range(7):
        for kx in range(7):
            acc = acc + xp[:, ky:ky + H, kx:kx + W, :] * w[ky, kx].reshape(1, 1, 1, Cd)
    return acc


def reference_unit(x_nhwc, p):
    B, H, W, C = x_nhwc.shape
    dims = p['dims']
    d0 = dims[0]
    mu = x_nhwc.mean(-1, keepdims=True)
    msq = (x_nhwc * x_nhwc).mean(-1, keepdims=True)
    var = msq - mu * mu
    xn = (x_nhwc - mu) * lax.rsqrt(var + EPS)
    xn = xn * p['ln1_w'].reshape(C) + p['ln1_b'].reshape(C)
    fused = _dotb(xn, p['proj_in_w']) + p['proj_in_b'].reshape(-1)
    pwa = _bf16_round(fused[..., :d0])
    abc = _bf16_round(fused[..., d0:])
    dw = _bf16_round(_ref_dwconv7x7(abc, p['dw_w'], p['dw_b']))
    y = pwa * dw[..., :d0]
    off = d0
    for i in range(len(dims) - 1):
        y = (_dotb(y, p['pw_w'][i]) + p['pw_b'][i].reshape(-1)) * dw[..., off:off + dims[i + 1]]
        off += dims[i + 1]
    y = _dotb(y, p['po_w']) + p['po_b'].reshape(-1)
    x1 = x_nhwc + p['gn_gamma'].reshape(C) * y
    mu = x1.mean(-1, keepdims=True)
    msq = (x1 * x1).mean(-1, keepdims=True)
    var = msq - mu * mu
    xn = (x1 - mu) * lax.rsqrt(var + EPS) * p['ln2_w'].reshape(C) + p['ln2_b'].reshape(C)
    h = jax.nn.gelu(_dotb(xn, p['fc1_w']) + p['fc1_b'].reshape(-1), approximate=True)
    y = _dotb(h, p['fc2_w']) + p['fc2_b'].reshape(-1)
    return x1 + p['ffn_gamma'].reshape(C) * y


def reference_stage(x_nchw, unit_params):
    x = jnp.transpose(x_nchw, (0, 2, 3, 1))
    for p in unit_params:
        x = reference_unit(x, p)
    return jnp.transpose(x, (0, 3, 1, 2))


# ------------------------------------ main -----------------------------------

if __name__ == "__main__":
    B, C, H, W = 2, 32, 16, 16          # NCHW input, like the PyTorch module
    num_units = 2
    key = jax.random.PRNGKey(0)
    kx, kp = jax.random.split(key)
    x = jax.random.normal(kx, (B, C, H, W), jnp.float32)
    unit_keys = jax.random.split(kp, num_units)
    # layer_scale_init=1.0 (instead of the 1e-6 default) so the gn/FFN branches
    # contribute meaningfully and the numerical check actually exercises them.
    unit_params = [init_unit_params(k, C, layer_scale_init=1.0) for k in unit_keys]

    stage_fn = jax.jit(lambda xin: hor_stage_forward(xin, unit_params))
    out = jax.block_until_ready(stage_fn(x))
    assert out.shape == (B, C, H, W) and out.dtype == jnp.float32

    ref = jax.block_until_ready(reference_stage(x, unit_params))
    err = float(jnp.max(jnp.abs(out - ref)))
    assert err < 2e-3, f"max abs err {err}"

    print("KERNEL_OK")
</pallas_src>

<mosaic_0001>
module attributes {stable_mosaic.version = 11 : i64} {
  func.func @kernel(%arg0: i32, %arg1: memref<64x32xf32, #tpu.memory_space<vmem>>, %arg2: memref<1x32xf32, #tpu.memory_space<vmem>>, %arg3: memref<1x32xf32, #tpu.memory_space<vmem>>, %arg4: memref<32x64xbf16, #tpu.memory_space<vmem>>, %arg5: memref<1x64xf32, #tpu.memory_space<vmem>>, %arg6: memref<64x8xbf16, #tpu.memory_space<vmem>>, %arg7: memref<64x56xbf16, #tpu.memory_space<vmem>>) attributes {dimension_semantics = [#tpu.dimension_semantics<parallel>], iteration_bounds = array<i64: 8>, scalar_prefetch = 0 : i64, scratch_operands = 0 : i64, tpu.core_type = #tpu.core_type<tc>, window_params = [{transform_indices = @transform_0, window_bounds = array<i64: 64, 32>}, {pipeline_mode = #tpu.pipeline_mode<synchronous>, transform_indices = @transform_1, window_bounds = array<i64: 1, 32>}, {pipeline_mode = #tpu.pipeline_mode<synchronous>, transform_indices = @transform_2, window_bounds = array<i64: 1, 32>}, {pipeline_mode = #tpu.pipeline_mode<synchronous>, transform_indices = @transform_3, window_bounds = array<i64: 32, 64>}, {pipeline_mode = #tpu.pipeline_mode<synchronous>, transform_indices = @transform_4, window_bounds = array<i64: 1, 64>}, {transform_indices = @transform_5, window_bounds = array<i64: 64, 8>}, {transform_indices = @transform_6, window_bounds = array<i64: 64, 56>}]} {
    %c0 = arith.constant 0 : index
    %c0_0 = arith.constant 0 : index
    %0 = vector.load %arg1[%c0, %c0_0] : memref<64x32xf32, #tpu.memory_space<vmem>>, vector<64x32xf32>
    %cst = arith.constant dense<0.000000e+00> : vector<64xf32>
    %1 = vector.multi_reduction <add>, %0, %cst [1] : vector<64x32xf32> to vector<64xf32>
    %2 = vector.shape_cast %1 : vector<64xf32> to vector<64x1xf32>
    %cst_1 = arith.constant 3.200000e+01 : f32
    %3 = vector.broadcast %cst_1 : f32 to vector<64x1xf32>
    %4 = arith.divf %2, %3 : vector<64x1xf32>
    %5 = arith.mulf %0, %0 : vector<64x32xf32>
    %cst_2 = arith.constant dense<0.000000e+00> : vector<64xf32>
    %6 = vector.multi_reduction <add>, %5, %cst_2 [1] : vector<64x32xf32> to vector<64xf32>
    %7 = vector.shape_cast %6 : vector<64xf32> to vector<64x1xf32>
    %cst_3 = arith.constant 3.200000e+01 : f32
    %8 = vector.broadcast %cst_3 : f32 to vector<64x1xf32>
    %9 = arith.divf %7, %8 : vector<64x1xf32>
    %10 = arith.mulf %4, %4 : vector<64x1xf32>
    %11 = arith.subf %9, %10 : vector<64x1xf32>
    %12 = vector.broadcast %4 : vector<64x1xf32> to vector<64x32xf32>
    %13 = arith.subf %0, %12 : vector<64x32xf32>
    %cst_4 = arith.constant 9.99999997E-7 : f32
    %14 = vector.broadcast %cst_4 : f32 to vector<64x1xf32>
    %15 = arith.addf %11, %14 : vector<64x1xf32>
    %16 = math.rsqrt %15 : vector<64x1xf32>
    %17 = vector.broadcast %16 : vector<64x1xf32> to vector<64x32xf32>
    %18 = arith.mulf %13, %17 : vector<64x32xf32>
    %c0_5 = arith.constant 0 : index
    %c0_6 = arith.constant 0 : index
    %19 = vector.load %arg2[%c0_5, %c0_6] : memref<1x32xf32, #tpu.memory_space<vmem>>, vector<1x32xf32>
    %20 = vector.broadcast %19 : vector<1x32xf32> to vector<64x32xf32>
    %21 = arith.mulf %18, %20 : vector<64x32xf32>
    %c0_7 = arith.constant 0 : index
    %c0_8 = arith.constant 0 : index
    %22 = vector.load %arg3[%c0_7, %c0_8] : memref<1x32xf32, #tpu.memory_space<vmem>>, vector<1x32xf32>
    %23 = vector.broadcast %22 : vector<1x32xf32> to vector<64x32xf32>
    %24 = arith.addf %21, %23 : vector<64x32xf32>
    %25 = arith.truncf %24 : vector<64x32xf32> to vector<64x32xbf16>
    %c0_9 = arith.constant 0 : index
    %c0_10 = arith.constant 0 : index
    %26 = vector.load %arg4[%c0_9, %c0_10] : memref<32x64xbf16, #tpu.memory_space<vmem>>, vector<32x64xbf16>
    %cst_11 = arith.constant dense<0.000000e+00> : vector<64x64xf32>
    %27 = tpu.matmul %25, %26, %cst_11 {dimension_numbers = #tpu.dot_dimension_numbers<[1], [0], [0], [1], [0, 0, 1, 1], [], []>} : vector<64x32xbf16>, vector<32x64xbf16>, vector<64x64xf32> -> vector<64x64xf32>
    %c0_12 = arith.constant 0 : index
    %c0_13 = arith.constant 0 : index
    %28 = vector.load %arg5[%c0_12, %c0_13] : memref<1x64xf32, #tpu.memory_space<vmem>>, vector<1x64xf32>
    %29 = vector.broadcast %28 : vector<1x64xf32> to vector<64x64xf32>
    %30 = arith.addf %27, %29 : vector<64x64xf32>
    %31 = vector.extract_strided_slice %30 {offsets = [0, 0], sizes = [64, 8], strides = [1, 1]} : vector<64x64xf32> to vector<64x8xf32>
    %32 = arith.truncf %31 : vector<64x8xf32> to vector<64x8xbf16>
    %c0_14 = arith.constant 0 : index
    %c0_15 = arith.constant 0 : index
    %33 = vector.load %arg6[%c0_14, %c0_15] : memref<64x8xbf16, #tpu.memory_space<vmem>>, vector<64x8xbf16>
    tpu.vector_store %arg6[%c0_14, %c0_15], %32 {strides = array<i32>} : memref<64x8xbf16, #tpu.memory_space<vmem>>, vector<64x8xbf16>,
    %34 = vector.extract_strided_slice %30 {offsets = [0, 8], sizes = [64, 56], strides = [1, 1]} : vector<64x64xf32> to vector<64x56xf32>
    %35 = arith.truncf %34 : vector<64x56xf32> to vector<64x56xbf16>
    %c0_16 = arith.constant 0 : index
    %c0_17 = arith.constant 0 : index
    %36 = vector.load %arg7[%c0_16, %c0_17] : memref<64x56xbf16, #tpu.memory_space<vmem>>, vector<64x56xbf16>
    tpu.vector_store %arg7[%c0_16, %c0_17], %35 {strides = array<i32>} : memref<64x56xbf16, #tpu.memory_space<vmem>>, vector<64x56xbf16>,
    return
  }
  func.func @transform_0(%arg0: i32) -> (i32, i32) {
    %c0_i32 = arith.constant 0 : i32
    %c0_i32_0 = arith.constant 0 : i32
    return %arg0, %c0_i32 : i32, i32
  }
  func.func @transform_1(%arg0: i32) -> (i32, i32) {
    %c0_i32 = arith.constant 0 : i32
    %c0_i32_0 = arith.constant 0 : i32
    %c0_i32_1 = arith.constant 0 : i32
    return %c0_i32, %c0_i32_0 : i32, i32
  }
  func.func @transform_2(%arg0: i32) -> (i32, i32) {
    %c0_i32 = arith.constant 0 : i32
    %c0_i32_0 = arith.constant 0 : i32
    %c0_i32_1 = arith.constant 0 : i32
    return %c0_i32, %c0_i32_0 : i32, i32
  }
  func.func @transform_3(%arg0: i32) -> (i32, i32) {
    %c0_i32 = arith.constant 0 : i32
    %c0_i32_0 = arith.constant 0 : i32
    %c0_i32_1 = arith.constant 0 : i32
    return %c0_i32, %c0_i32_0 : i32, i32
  }
  func.func @transform_4(%arg0: i32) -> (i32, i32) {
    %c0_i32 = arith.constant 0 : i32
    %c0_i32_0 = arith.constant 0 : i32
    %c0_i32_1 = arith.constant 0 : i32
    return %c0_i32, %c0_i32_0 : i32, i32
  }
  func.func @transform_5(%arg0: i32) -> (i32, i32) {
    %c0_i32 = arith.constant 0 : i32
    %c0_i32_0 = arith.constant 0 : i32
    return %arg0, %c0_i32 : i32, i32
  }
  func.func @transform_6(%arg0: i32) -> (i32, i32) {
    %c0_i32 = arith.constant 0 : i32
    %c0_i32_0 = arith.constant 0 : i32
    return %arg0, %c0_i32 : i32, i32
  }
}

module attributes {stable_mosaic.version = 11 : i64} {
  func.func @kernel(%arg0: i32, %arg1: i32, %arg2: memref<1x16x16x56xbf16, #tpu.memory_space<vmem>>, %arg3: memref<49x56xf32, #tpu.memory_space<vmem>>, %arg4: memref<1x56xf32, #tpu.memory_space<vmem>>, %arg5: memref<1x4x16x56xbf16, #tpu.memory_space<vmem>>, %arg6: memref<22x22x56xf32, #tpu.memory_space<vmem>>) attributes {dimension_semantics = [#tpu.dimension_semantics<parallel>, #tpu.dimension_semantics<arbitrary>], iteration_bounds = array<i64: 2, 4>, scalar_prefetch = 0 : i64, scratch_operands = 1 : i64, tpu.core_type = #tpu.core_type<tc>, window_params = [{transform_indices = @transform_0, window_bounds = array<i64: 1, 16, 16, 56>}, {pipeline_mode = #tpu.pipeline_mode<synchronous>, transform_indices = @transform_1, window_bounds = array<i64: 49, 56>}, {pipeline_mode = #tpu.pipeline_mode<synchronous>, transform_indices = @transform_2, window_bounds = array<i64: 1, 56>}, {transform_indices = @transform_3, window_bounds = array<i64: 1, 4, 16, 56>}]} {
    %c0_i32 = arith.constant 0 : i32
    %0 = arith.cmpi eq, %arg1, %c0_i32 : i32
    %1 = arith.extui %0 : i1 to i32
    %c0_i32_0 = arith.constant 0 : i32
    %2 = arith.cmpi ne, %1, %c0_i32_0 : i32
    scf.if %2 {
      %cst = arith.constant 0.000000e+00 : f32
      %378 = vector.broadcast %cst : f32 to vector<22x22x56xf32>
      %c0_24 = arith.constant 0 : index
      %c0_25 = arith.constant 0 : index
      %c0_26 = arith.constant 0 : index
      %379 = vector.load %arg6[%c0_24, %c0_25, %c0_26] : memref<22x22x56xf32, #tpu.memory_space<vmem>>, vector<22x22x56xf32>
      tpu.vector_store %arg6[%c0_24, %c0_25, %c0_26], %378 {strides = array<i32>} : memref<22x22x56xf32, #tpu.memory_space<vmem>>, vector<22x22x56xf32>,
      %c0_27 = arith.constant 0 : index
      %c0_28 = arith.constant 0 : index
      %c0_29 = arith.constant 0 : index
      %c0_30 = arith.constant 0 : index
      %380 = vector.load %arg2[%c0_27, %c0_28, %c0_29, %c0_30] : memref<1x16x16x56xbf16, #tpu.memory_space<vmem>>, vector<1x16x16x56xbf16>
      %381 = vector.shape_cast %380 : vector<1x16x16x56xbf16> to vector<16x16x56xbf16>
      %382 = arith.extf %381 : vector<16x16x56xbf16> to vector<16x16x56xf32>
      %c3 = arith.constant 3 : index
      %c3_31 = arith.constant 3 : index
      %c0_32 = arith.constant 0 : index
      %383 = vector.load %arg6[%c3, %c3_31, %c0_32] : memref<22x22x56xf32, #tpu.memory_space<vmem>>, vector<16x16x56xf32>
      tpu.vector_store %arg6[%c3, %c3_31, %c0_32], %382 {strides = array<i32>} : memref<22x22x56xf32, #tpu.memory_space<vmem>>, vector<16x16x56xf32>,
    } else {
    }
    %c4_i32 = arith.constant 4 : i32
    %3 = arith.muli %arg1, %c4_i32 : i32
    %4 = tpu.assume_multiple %3, 4 : i32
    %c0 = arith.constant 0 : index
    %c0_1 = arith.constant 0 : index
    %5 = vector.load %arg3[%c0, %c0_1] : memref<49x56xf32, #tpu.memory_space<vmem>>, vector<49x56xf32>
    %c0_2 = arith.constant 0 : index
    %c0_3 = arith.constant 0 : index
    %6 = vector.load %arg4[%c0_2, %c0_3] : memref<1x56xf32, #tpu.memory_space<vmem>>, vector<1x56xf32>
    %7 = vector.shape_cast %6 : vector<1x56xf32> to vector<1x1x56xf32>
    %8 = vector.shape_cast %7 : vector<1x1x56xf32> to vector<1x1x56xf32>
    %9 = vector.broadcast %8 : vector<1x1x56xf32> to vector<4x16x56xf32>
    %c0_i32_4 = arith.constant 0 : i32
    %10 = arith.addi %4, %c0_i32_4 : i32
    %11 = arith.index_cast %10 : i32 to index
    %c0_5 = arith.constant 0 : index
    %c0_6 = arith.constant 0 : index
    %12 = vector.load %arg6[%11, %c0_5, %c0_6] : memref<22x22x56xf32, #tpu.memory_space<vmem>>, vector<4x22x56xf32>
    %13 = vector.extract_strided_slice %12 {offsets = [0, 0, 0], sizes = [4, 16, 56], strides = [1, 1, 1]} : vector<4x22x56xf32> to vector<4x16x56xf32>
    %14 = vector.extract_strided_slice %5 {offsets = [0, 0], sizes = [1, 56], strides = [1, 1]} : vector<49x56xf32> to vector<1x56xf32>
    %15 = vector.shape_cast %14 : vector<1x56xf32> to vector<56xf32>
    %16 = vector.shape_cast %15 : vector<56xf32> to vector<1x1x56xf32>
    %17 = vector.broadcast %16 : vector<1x1x56xf32> to vector<4x16x56xf32>
    %18 = arith.mulf %13, %17 : vector<4x16x56xf32>
    %19 = arith.addf %9, %18 : vector<4x16x56xf32>
    %20 = vector.extract_strided_slice %12 {offsets = [0, 1, 0], sizes = [4, 16, 56], strides = [1, 1, 1]} : vector<4x22x56xf32> to vector<4x16x56xf32>
    %21 = vector.extract_strided_slice %5 {offsets = [1, 0], sizes = [1, 56], strides = [1, 1]} : vector<49x56xf32> to vector<1x56xf32>
    %22 = vector.shape_cast %21 : vector<1x56xf32> to vector<56xf32>
    %23 = vector.shape_cast %22 : vector<56xf32> to vector<1x1x56xf32>
    %24 = vector.broadcast %23 : vector<1x1x56xf32> to vector<4x16x56xf32>
    %25 = arith.mulf %20, %24 : vector<4x16x56xf32>
    %26 = arith.addf %19, %25 : vector<4x16x56xf32>
    %27 = vector.extract_strided_slice %12 {offsets = [0, 2, 0], sizes = [4, 16, 56], strides = [1, 1, 1]} : vector<4x22x56xf32> to vector<4x16x56xf32>
    %28 = vector.extract_strided_slice %5 {offsets = [2, 0], sizes = [1, 56], strides = [1, 1]} : vector<49x56xf32> to vector<1x56xf32>
    %29 = vector.shape_cast %28 : vector<1x56xf32> to vector<56xf32>
    %30 = vector.shape_cast %29 : vector<56xf32> to vector<1x1x56xf32>
    %31 = vector.broadcast %30 : vector<1x1x56xf32> to vector<4x16x56xf32>
    %32 = arith.mulf %27, %31 : vector<4x16x56xf32>
    %33 = arith.addf %26, %32 : vector<4x16x56xf32>
    %34 = vector.extract_strided_slice %12 {offsets = [0, 3, 0], sizes = [4, 16, 56], strides = [1, 1, 1]} : vector<4x22x56xf32> to vector<4x16x56xf32>
    %35 = vector.extract_strided_slice %5 {offsets = [3, 0], sizes = [1, 56], strides = [1, 1]} : vector<49x56xf32> to vector<1x56xf32>
    %36 = vector.shape_cast %35 : vector<1x56xf32> to vector<56xf32>
    %37 = vector.shape_cast %36 : vector<56xf32> to vector<1x1x56xf32>
    %38 = vector.broadcast %37 : vector<1x1x56xf32> to vector<4x16x56xf32>
    %39 = arith.mulf %34, %38 : vector<4x16x56xf32>
    %40 = arith.addf %33, %39 : vector<4x16x56xf32>
    %41 = vector.extract_strided_slice %12 {offsets = [0, 4, 0], sizes = [4, 16, 56], strides = [1, 1, 1]} : vector<4x22x56xf32> to vector<4x16x56xf32>
    %42 = vector.extract_strided_slice %5 {offsets = [4, 0], sizes = [1, 56], strides = [1, 1]} : vector<49x56xf32> to vector<1x56xf32>
    %43 = vector.shape_cast %42 : vector<1x56xf32> to vector<56xf32>
    %44 = vector.shape_cast %43 : vector<56xf32> to vector<1x1x56xf32>
    %45 = vector.broadcast %44 : vector<1x1x56xf32> to vector<4x16x56xf32>
    %46 = arith.mulf %41, %45 : vector<4x16x56xf32>
    %47 = arith.addf %40, %46 : vector<4x16x56xf32>
    %48 = vector.extract_strided_slice %12 {offsets = [0, 5, 0], sizes = [4, 16, 56], strides = [1, 1, 1]} : vector<4x22x56xf32> to vector<4x16x56xf32>
    %49 = vector.extract_strided_slice %5 {offsets = [5, 0], sizes = [1, 56], strides = [1, 1]} : vector<49x56xf32> to vector<1x56xf32>
    %50 = vector.shape_cast %49 : vector<1x56xf32> to vector<56xf32>
    %51 = vector.shape_cast %50 : vector<56xf32> to vector<1x1x56xf32>
    %52 = vector.broadcast %51 : vector<1x1x56xf32> to vector<4x16x56xf32>
    %53 = arith.mulf %48, %52 : vector<4x16x56xf32>
    %54 = arith.addf %47, %53 : vector<4x16x56xf32>
    %55 = vector.extract_strided_slice %12 {offsets = [0, 6, 0], sizes = [4, 16, 56], strides = [1, 1, 1]} : vector<4x22x56xf32> to vector<4x16x56xf32>
    %56 = vector.extract_strided_slice %5 {offsets = [6, 0], sizes = [1, 56], strides = [1, 1]} : vector<49x56xf32> to vector<1x56xf32>
    %57 = vector.shape_cast %56 : vector<1x56xf32> to vector<56xf32>
    %58 = vector.shape_cast %57 : vector<56xf32> to vector<1x1x56xf32>
    %59 = vector.broadcast %58 : vector<1x1x56xf32> to vector<4x16x56xf32>
    %60 = arith.mulf %55, %59 : vector<4x16x56xf32>
    %61 = arith.addf %54, %60 : vector<4x16x56xf32>
    %c1_i32 = arith.constant 1 : i32
    %62 = arith.addi %4, %c1_i32 : i32
    %63 = arith.index_cast %62 : i32 to index
    %c0_7 = arith.constant 0 : index
    %c0_8 = arith.constant 0 : index
    %64 = vector.load %arg6[%63, %c0_7, %c0_8] : memref<22x22x56xf32, #tpu.memory_space<vmem>>, vector<4x22x56xf32>
    %65 = vector.extract_strided_slice %64 {offsets = [0, 0, 0], sizes = [4, 16, 56], strides = [1, 1, 1]} : vector<4x22x56xf32> to vector<4x16x56xf32>
    %66 = vector.extract_strided_slice %5 {offsets = [7, 0], sizes = [1, 56], strides = [1, 1]} : vector<49x56xf32> to vector<1x56xf32>
    %67 = vector.shape_cast %66 : vector<1x56xf32> to vector<56xf32>
    %68 = vector.shape_cast %67 : vector<56xf32> to vector<1x1x56xf32>
    %69 = vector.broadcast %68 : vector<1x1x56xf32> to vector<4x16x56xf32>
    %70 = arith.mulf %65, %69 : vector<4x16x56xf32>
    %71 = arith.addf %61, %70 : vector<4x16x56xf32>
    %72 = vector.extract_strided_slice %64 {offsets = [0, 1, 0], sizes = [4, 16, 56], strides = [1, 1, 1]} : vector<4x22x56xf32> to vector<4x16x56xf32>
    %73 = vector.extract_strided_slice %5 {offsets = [8, 0], sizes = [1, 56], strides = [1, 1]} : vector<49x56xf32> to vector<1x56xf32>
    %74 = vector.shape_cast %73 : vector<1x56xf32> to vector<56xf32>
    %75 = vector.shape_cast %74 : vector<56xf32> to vector<1x1x56xf32>
    %76 = vector.broadcast %75 : vector<1x1x56xf32> to vector<4x16x56xf32>
    %77 = arith.mulf %72, %76 : vector<4x16x56xf32>
    %78 = arith.addf %71, %77 : vector<4x16x56xf32>
    %79 = vector.extract_strided_slice %64 {offsets = [0, 2, 0], sizes = [4, 16, 56], strides = [1, 1, 1]} : vector<4x22x56xf32> to vector<4x16x56xf32>
    %80 = vector.extract_strided_slice %5 {offsets = [9, 0], sizes = [1, 56], strides = [1, 1]} : vector<49x56xf32> to vector<1x56xf32>
    %81 = vector.shape_cast %80 : vector<1x56xf32> to vector<56xf32>
    %82 = vector.shape_cast %81 : vector<56xf32> to vector<1x1x56xf32>
    %83 = vector.broadcast %82 : vector<1x1x56xf32> to vector<4x16x56xf32>
    %84 = arith.mulf %79, %83 : vector<4x16x56xf32>
    %85 = arith.addf %78, %84 : vector<4x16x56xf32>
    %86 = vector.extract_strided_slice %64 {offsets = [0, 3, 0], sizes = [4, 16, 56], strides = [1, 1, 1]} : vector<4x22x56xf32> to vector<4x16x56xf32>
    %87 = vector.extract_strided_slice %5 {offsets = [10, 0], sizes = [1, 56], strides = [1, 1]} : vector<49x56xf32> to vector<1x56xf32>
    %88 = vector.shape_cast %87 : vector<1x56xf32> to vector<56xf32>
    %89 = vector.shape_cast %88 : vector<56xf32> to vector<1x1x56xf32>
    %90 = vector.broadcast %89 : vector<1x1x56xf32> to vector<4x16x56xf32>
    %91 = arith.mulf %86, %90 : vector<4x16x56xf32>
    %92 = arith.addf %85, %91 : vector<4x16x56xf32>
    %93 = vector.extract_strided_slice %64 {offsets = [0, 4, 0], sizes = [4, 16, 56], strides = [1, 1, 1]} : vector<4x22x56xf32> to vector<4x16x56xf32>
    %94 = vector.extract_strided_slice %5 {offsets = [11, 0], sizes = [1, 56], strides = [1, 1]} : vector<49x56xf32> to vector<1x56xf32>
    %95 = vector.shape_cast %94 : vector<1x56xf32> to vector<56xf32>
    %96 = vector.shape_cast %95 : vector<56xf32> to vector<1x1x56xf32>
    %97 = vector.broadcast %96 : vector<1x1x56xf32> to vector<4x16x56xf32>
    %98 = arith.mulf %93, %97 : vector<4x16x56xf32>
    %99 = arith.addf %92, %98 : vector<4x16x56xf32>
    %100 = vector.extract_strided_slice %64 {offsets = [0, 5, 0], sizes = [4, 16, 56], strides = [1, 1, 1]} : vector<4x22x56xf32> to vector<4x16x56xf32>
    %101 = vector.extract_strided_slice %5 {offsets = [12, 0], sizes = [1, 56], strides = [1, 1]} : vector<49x56xf32> to vector<1x56xf32>
    %102 = vector.shape_cast %101 : vector<1x56xf32> to vector<56xf32>
    %103 = vector.shape_cast %102 : vector<56xf32> to vector<1x1x56xf32>
    %104 = vector.broadcast %103 : vector<1x1x56xf32> to vector<4x16x56xf32>
    %105 = arith.mulf %100, %104 : vector<4x16x56xf32>
    %106 = arith.addf %99, %105 : vector<4x16x56xf32>
    %107 = vector.extract_strided_slice %64 {offsets = [0, 6, 0], sizes = [4, 16, 56], strides = [1, 1, 1]} : vector<4x22x56xf32> to vector<4x16x56xf32>
    %108 = vector.extract_strided_slice %5 {offsets = [13, 0], sizes = [1, 56], strides = [1, 1]} : vector<49x56xf32> to vector<1x56xf32>
    %109 = vector.shape_cast %108 : vector<1x56xf32> to vector<56xf32>
    %110 = vector.shape_cast %109 : vector<56xf32> to vector<1x1x56xf32>
    %111 = vector.broadcast %110 : vector<1x1x56xf32> to vector<4x16x56xf32>
    %112 = arith.mulf %107, %111 : vector<4x16x56xf32>
    %113 = arith.addf %106, %112 : vector<4x16x56xf32>
    %c2_i32 = arith.constant 2 : i32
    %114 = arith.addi %4, %c2_i32 : i32
    %115 = arith.index_cast %114 : i32 to index
    %c0_9 = arith.constant 0 : index
    %c0_10 = arith.constant 0 : index
    %116 = vector.load %arg6[%115, %c0_9, %c0_10] : memref<22x22x56xf32, #tpu.memory_space<vmem>>, vector<4x22x56xf32>
    %117 = vector.extract_strided_slice %116 {offsets = [0, 0, 0], sizes = [4, 16, 56], strides = [1, 1, 1]} : vector<4x22x56xf32> to vector<4x16x56xf32>
    %118 = vector.extract_strided_slice %5 {offsets = [14, 0], sizes = [1, 56], strides = [1, 1]} : vector<49x56xf32> to vector<1x56xf32>
    %119 = vector.shape_cast %118 : vector<1x56xf32> to vector<56xf32>
    %120 = vector.shape_cast %119 : vector<56xf32> to vector<1x1x56xf32>
    %121 = vector.broadcast %120 : vector<1x1x56xf32> to vector<4x16x56xf32>
    %122 = arith.mulf %117, %121 : vector<4x16x56xf32>
    %123 = arith.addf %113, %122 : vector<4x16x56xf32>
    %124 = vector.extract_strided_slice %116 {offsets = [0, 1, 0], sizes = [4, 16, 56], strides = [1, 1, 1]} : vector<4x22x56xf32> to vector<4x16x56xf32>
    %125 = vector.extract_strided_slice %5 {offsets = [15, 0], sizes = [1, 56], strides = [1, 1]} : vector<49x56xf32> to vector<1x56xf32>
    %126 = vector.shape_cast %125 : vector<1x56xf32> to vector<56xf32>
    %127 = vector.shape_cast %126 : vector<56xf32> to vector<1x1x56xf32>
    %128 = vector.broadcast %127 : vector<1x1x56xf32> to vector<4x16x56xf32>
    %129 = arith.mulf %124, %128 : vector<4x16x56xf32>
    %130 = arith.addf %123, %129 : vector<4x16x56xf32>
    %131 = vector.extract_strided_slice %116 {offsets = [0, 2, 0], sizes = [4, 16, 56], strides = [1, 1, 1]} : vector<4x22x56xf32> to vector<4x16x56xf32>
    %132 = vector.extract_strided_slice %5 {offsets = [16, 0], sizes = [1, 56], strides = [1, 1]} : vector<49x56xf32> to vector<1x56xf32>
    %133 = vector.shape_cast %132 : vector<1x56xf32> to vector<56xf32>
    %134 = vector.shape_cast %133 : vector<56xf32> to vector<1x1x56xf32>
    %135 = vector.broadcast %134 : vector<1x1x56xf32> to vector<4x16x56xf32>
    %136 = arith.mulf %131, %135 : vector<4x16x56xf32>
    %137 = arith.addf %130, %136 : vector<4x16x56xf32>
    %138 = vector.extract_strided_slice %116 {offsets = [0, 3, 0], sizes = [4, 16, 56], strides = [1, 1, 1]} : vector<4x22x56xf32> to vector<4x16x56xf32>
    %139 = vector.extract_strided_slice %5 {offsets = [17, 0], sizes = [1, 56], strides = [1, 1]} : vector<49x56xf32> to vector<1x56xf32>
    %140 = vector.shape_cast %139 : vector<1x56xf32> to vector<56xf32>
    %141 = vector.shape_cast %140 : vector<56xf32> to vector<1x1x56xf32>
    %142 = vector.broadcast %141 : vector<1x1x56xf32> to vector<4x16x56xf32>
    %143 = arith.mulf %138, %142 : vector<4x16x56xf32>
    %144 = arith.addf %137, %143 : vector<4x16x56xf32>
    %145 = vector.extract_strided_slice %116 {offsets = [0, 4, 0], sizes = [4, 16, 56], strides = [1, 1, 1]} : vector<4x22x56xf32> to vector<4x16x56xf32>
    %146 = vector.extract_strided_slice %5 {offsets = [18, 0], sizes = [1, 56], strides = [1, 1]} : vector<49x56xf32> to vector<1x56xf32>
    %147 = vector.shape_cast %146 : vector<1x56xf32> to vector<56xf32>
    %148 = vector.shape_cast %147 : vector<56xf32> to vector<1x1x56xf32>
    %149 = vector.broadcast %148 : vector<1x1x56xf32> to vector<4x16x56xf32>
    %150 = arith.mulf %145, %149 : vector<4x16x56xf32>
    %151 = arith.addf %144, %150 : vector<4x16x56xf32>
    %152 = vector.extract_strided_slice %116 {offsets = [0, 5, 0], sizes = [4, 16, 56], strides = [1, 1, 1]} : vector<4x22x56xf32> to vector<4x16x56xf32>
    %153 = vector.extract_strided_slice %5 {offsets = [19, 0], sizes = [1, 56], strides = [1, 1]} : vector<49x56xf32> to vector<1x56xf32>
    %154 = vector.shape_cast %153 : vector<1x56xf32> to vector<56xf32>
    %155 = vector.shape_cast %154 : vector<56xf32> to vector<1x1x56xf32>
    %156 = vector.broadcast %155 : vector<1x1x56xf32> to vector<4x16x56xf32>
    %157 = arith.mulf %152, %156 : vector<4x16x56xf32>
    %158 = arith.addf %151, %157 : vector<4x16x56xf32>
    %159 = vector.extract_strided_slice %116 {offsets = [0, 6, 0], sizes = [4, 16, 56], strides = [1, 1, 1]} : vector<4x22x56xf32> to vector<4x16x56xf32>
    %160 = vector.extract_strided_slice %5 {offsets = [20, 0], sizes = [1, 56], strides = [1, 1]} : vector<49x56xf32> to vector<1x56xf32>
    %161 = vector.shape_cast %160 : vector<1x56xf32> to vector<56xf32>
    %162 = vector.shape_cast %161 : vector<56xf32> to vector<1x1x56xf32>
    %163 = vector.broadcast %162 : vector<1x1x56xf32> to vector<4x16x56xf32>
    %164 = arith.mulf %159, %163 : vector<4x16x56xf32>
    %165 = arith.addf %158, %164 : vector<4x16x56xf32>
    %c3_i32 = arith.constant 3 : i32
    %166 = arith.addi %4, %c3_i32 : i32
    %167 = arith.index_cast %166 : i32 to index
    %c0_11 = arith.constant 0 : index
    %c0_12 = arith.constant 0 : index
    %168 = vector.load %arg6[%167, %c0_11, %c0_12] : memref<22x22x56xf32, #tpu.memory_space<vmem>>, vector<4x22x56xf32>
    %169 = vector.extract_strided_slice %168 {offsets = [0, 0, 0], sizes = [4, 16, 56], strides = [1, 1, 1]} : vector<4x22x56xf32> to vector<4x16x56xf32>
    %170 = vector.extract_strided_slice %5 {offsets = [21, 0], sizes = [1, 56], strides = [1, 1]} : vector<49x56xf32> to vector<1x56xf32>
    %171 = vector.shape_cast %170 : vector<1x56xf32> to vector<56xf32>
    %172 = vector.shape_cast %171 : vector<56xf32> to vector<1x1x56xf32>
    %173 = vector.broadcast %172 : vector<1x1x56xf32> to vector<4x16x56xf32>
    %174 = arith.mulf %169, %173 : vector<4x16x56xf32>
    %175 = arith.addf %165, %174 : vector<4x16x56xf32>
    %176 = vector.extract_strided_slice %168 {offsets = [0, 1, 0], sizes = [4, 16, 56], strides = [1, 1, 1]} : vector<4x22x56xf32> to vector<4x16x56xf32>
    %177 = vector.extract_strided_slice %5 {offsets = [22, 0], sizes = [1, 56], strides = [1, 1]} : vector<49x56xf32> to vector<1x56xf32>
    %178 = vector.shape_cast %177 : vector<1x56xf32> to vector<56xf32>
    %179 = vector.shape_cast %178 : vector<56xf32> to vector<1x1x56xf32>
    %180 = vector.broadcast %179 : vector<1x1x56xf32> to vector<4x16x56xf32>
    %181 = arith.mulf %176, %180 : vector<4x16x56xf32>
    %182 = arith.addf %175, %181 : vector<4x16x56xf32>
    %183 = vector.extract_strided_slice %168 {offsets = [0, 2, 0], sizes = [4, 16, 56], strides = [1, 1, 1]} : vector<4x22x56xf32> to vector<4x16x56xf32>
    %184 = vector.extract_strided_slice %5 {offsets = [23, 0], sizes = [1, 56], strides = [1, 1]} : vector<49x56xf32> to vector<1x56xf32>
    %185 = vector.shape_cast %184 : vector<1x56xf32> to vector<56xf32>
    %186 = vector.shape_cast %185 : vector<56xf32> to vector<1x1x56xf32>
    %187 = vector.broadcast %186 : vector<1x1x56xf32> to vector<4x16x56xf32>
    %188 = arith.mulf %183, %187 : vector<4x16x56xf32>
    %189 = arith.addf %182, %188 : vector<4x16x56xf32>
    %190 = vector.extract_strided_slice %168 {offsets = [0, 3, 0], sizes = [4, 16, 56], strides = [1, 1, 1]} : vector<4x22x56xf32> to vector<4x16x56xf32>
    %191 = vector.extract_strided_slice %5 {offsets = [24, 0], sizes = [1, 56], strides = [1, 1]} : vector<49x56xf32> to vector<1x56xf32>
    %192 = vector.shape_cast %191 : vector<1x56xf32> to vector<56xf32>
    %193 = vector.shape_cast %192 : vector<56xf32> to vector<1x1x56xf32>
    %194 = vector.broadcast %193 : vector<1x1x56xf32> to vector<4x16x56xf32>
    %195 = arith.mulf %190, %194 : vector<4x16x56xf32>
    %196 = arith.addf %189, %195 : vector<4x16x56xf32>
    %197 = vector.extract_strided_slice %168 {offsets = [0, 4, 0], sizes = [4, 16, 56], strides = [1, 1, 1]} : vector<4x22x56xf32> to vector<4x16x56xf32>
    %198 = vector.extract_strided_slice %5 {offsets = [25, 0], sizes = [1, 56], strides = [1, 1]} : vector<49x56xf32> to vector<1x56xf32>
    %199 = vector.shape_cast %198 : vector<1x56xf32> to vector<56xf32>
    %200 = vector.shape_cast %199 : vector<56xf32> to vector<1x1x56xf32>
    %201 = vector.broadcast %200 : vector<1x1x56xf32> to vector<4x16x56xf32>
    %202 = arith.mulf %197, %201 : vector<4x16x56xf32>
    %203 = arith.addf %196, %202 : vector<4x16x56xf32>
    %204 = vector.extract_strided_slice %168 {offsets = [0, 5, 0], sizes = [4, 16, 56], strides = [1, 1, 1]} : vector<4x22x56xf32> to vector<4x16x56xf32>
    %205 = vector.extract_strided_slice %5 {offsets = [26, 0], sizes = [1, 56], strides = [1, 1]} : vector<49x56xf32> to vector<1x56xf32>
    %206 = vector.shape_cast %205 : vector<1x56xf32> to vector<56xf32>
    %207 = vector.shape_cast %206 : vector<56xf32> to vector<1x1x56xf32>
    %208 = vector.broadcast %207 : vector<1x1x56xf32> to vector<4x16x56xf32>
    %209 = arith.mulf %204, %208 : vector<4x16x56xf32>
    %210 = arith.addf %203, %209 : vector<4x16x56xf32>
    %211 = vector.extract_strided_slice %168 {offsets = [0, 6, 0], sizes = [4, 16, 56], strides = [1, 1, 1]} : vector<4x22x56xf32> to vector<4x16x56xf32>
    %212 = vector.extract_strided_slice %5 {offsets = [27, 0], sizes = [1, 56], strides = [1, 1]} : vector<49x56xf32> to vector<1x56xf32>
    %213 = vector.shape_cast %212 : vector<1x56xf32> to vector<56xf32>
    %214 = vector.shape_cast %213 : vector<56xf32> to vector<1x1x56xf32>
    %215 = vector.broadcast %214 : vector<1x1x56xf32> to vector<4x16x56xf32>
    %216 = arith.mulf %211, %215 : vector<4x16x56xf32>
    %217 = arith.addf %210, %216 : vector<4x16x56xf32>
    %c4_i32_13 = arith.constant 4 : i32
    %218 = arith.addi %4, %c4_i32_13 : i32
    %219 = arith.index_cast %218 : i32 to index
    %c0_14 = arith.constant 0 : index
    %c0_15 = arith.constant 0 : index
    %220 = vector.load %arg6[%219, %c0_14, %c0_15] : memref<22x22x56xf32, #tpu.memory_space<vmem>>, vector<4x22x56xf32>
    %221 = vector.extract_strided_slice %220 {offsets = [0, 0, 0], sizes = [4, 16, 56], strides = [1, 1, 1]} : vector<4x22x56xf32> to vector<4x16x56xf32>
    %222 = vector.extract_strided_slice %5 {offsets = [28, 0], sizes = [1, 56], strides = [1, 1]} : vector<49x56xf32> to vector<1x56xf32>
    %223 = vector.shape_cast %222 : vector<1x56xf32> to vector<56xf32>
    %224 = vector.shape_cast %223 : vector<56xf32> to vector<1x1x56xf32>
    %225 = vector.broadcast %224 : vector<1x1x56xf32> to vector<4x16x56xf32>
    %226 = arith.mulf %221, %225 : vector<4x16x56xf32>
    %227 = arith.addf %217, %226 : vector<4x16x56xf32>
    %228 = vector.extract_strided_slice %220 {offsets = [0, 1, 0], sizes = [4, 16, 56], strides = [1, 1, 1]} : vector<4x22x56xf32> to vector<4x16x56xf32>
    %229 = vector.extract_strided_slice %5 {offsets = [29, 0], sizes = [1, 56], strides = [1, 1]} : vector<49x56xf32> to vector<1x56xf32>
    %230 = vector.shape_cast %229 : vector<1x56xf32> to vector<56xf32>
    %231 = vector.shape_cast %230 : vector<56xf32> to vector<1x1x56xf32>
    %232 = vector.broadcast %231 : vector<1x1x56xf32> to vector<4x16x56xf32>
    %233 = arith.mulf %228, %232 : vector<4x16x56xf32>
    %234 = arith.addf %227, %233 : vector<4x16x56xf32>
    %235 = vector.extract_strided_slice %220 {offsets = [0, 2, 0], sizes = [4, 16, 56], strides = [1, 1, 1]} : vector<4x22x56xf32> to vector<4x16x56xf32>
    %236 = vector.extract_strided_slice %5 {offsets = [30, 0], sizes = [1, 56], strides = [1, 1]} : vector<49x56xf32> to vector<1x56xf32>
    %237 = vector.shape_cast %236 : vector<1x56xf32> to vector<56xf32>
    %238 = vector.shape_cast %237 : vector<56xf32> to vector<1x1x56xf32>
    %239 = vector.broadcast %238 : vector<1x1x56xf32> to vector<4x16x56xf32>
    %240 = arith.mulf %235, %239 : vector<4x16x56xf32>
    %241 = arith.addf %234, %240 : vector<4x16x56xf32>
    %242 = vector.extract_strided_slice %220 {offsets = [0, 3, 0], sizes = [4, 16, 56], strides = [1, 1, 1]} : vector<4x22x56xf32> to vector<4x16x56xf32>
    %243 = vector.extract_strided_slice %5 {offsets = [31, 0], sizes = [1, 56], strides = [1, 1]} : vector<49x56xf32> to vector<1x56xf32>
    %244 = vector.shape_cast %243 : vector<1x56xf32> to vector<56xf32>
    %245 = vector.shape_cast %244 : vector<56xf32> to vector<1x1x56xf32>
    %246 = vector.broadcast %245 : vector<1x1x56xf32> to vector<4x16x56xf32>
    %247 = arith.mulf %242, %246 : vector<4x16x56xf32>
    %248 = arith.addf %241, %247 : vector<4x16x56xf32>
    %249 = vector.extract_strided_slice %220 {offsets = [0, 4, 0], sizes = [4, 16, 56], strides = [1, 1, 1]} : vector<4x22x56xf32> to vector<4x16x56xf32>
    %250 = vector.extract_strided_slice %5 {offsets = [32, 0], sizes = [1, 56], strides = [1, 1]} : vector<49x56xf32> to vector<1x56xf32>
    %251 = vector.shape_cast %250 : vector<1x56xf32> to vector<56xf32>
    %252 = vector.shape_cast %251 : vector<56xf32> to vector<1x1x56xf32>
    %253 = vector.broadcast %252 : vector<1x1x56xf32> to vector<4x16x56xf32>
    %254 = arith.mulf %249, %253 : vector<4x16x56xf32>
    %255 = arith.addf %248, %254 : vector<4x16x56xf32>
    %256 = vector.extract_strided_slice %220 {offsets = [0, 5, 0], sizes = [4, 16, 56], strides = [1, 1, 1]} : vector<4x22x56xf32> to vector<4x16x56xf32>
    %257 = vector.extract_strided_slice %5 {offsets = [33, 0], sizes = [1, 56], strides = [1, 1]} : vector<49x56xf32> to vector<1x56xf32>
    %258 = vector.shape_cast %257 : vector<1x56xf32> to vector<56xf32>
    %259 = vector.shape_cast %258 : vector<56xf32> to vector<1x1x56xf32>
    %260 = vector.broadcast %259 : vector<1x1x56xf32> to vector<4x16x56xf32>
    %261 = arith.mulf %256, %260 : vector<4x16x56xf32>
    %262 = arith.addf %255, %261 : vector<4x16x56xf32>
    %263 = vector.extract_strided_slice %220 {offsets = [0, 6, 0], sizes = [4, 16, 56], strides = [1, 1, 1]} : vector<4x22x56xf32> to vector<4x16x56xf32>
    %264 = vector.extract_strided_slice %5 {offsets = [34, 0], sizes = [1, 56], strides = [1, 1]} : vector<49x56xf32> to vector<1x56xf32>
    %265 = vector.shape_cast %264 : vector<1x56xf32> to vector<56xf32>
    %266 = vector.shape_cast %265 : vector<56xf32> to vector<1x1x56xf32>
    %267 = vector.broadcast %266 : vector<1x1x56xf32> to vector<4x16x56xf32>
    %268 = arith.mulf %263, %267 : vector<4x16x56xf32>
    %269 = arith.addf %262, %268 : vector<4x16x56xf32>
    %c5_i32 = arith.constant 5 : i32
    %270 = arith.addi %4, %c5_i32 : i32
    %271 = arith.index_cast %270 : i32 to index
    %c0_16 = arith.constant 0 : index
    %c0_17 = arith.constant 0 : index
    %272 = vector.load %arg6[%271, %c0_16, %c0_17] : memref<22x22x56xf32, #tpu.memory_space<vmem>>, vector<4x22x56xf32>
    %273 = vector.extract_strided_slice %272 {offsets = [0, 0, 0], sizes = [4, 16, 56], strides = [1, 1, 1]} : vector<4x22x56xf32> to vector<4x16x56xf32>
    %274 = vector.extract_strided_slice %5 {offsets = [35, 0], sizes = [1, 56], strides = [1, 1]} : vector<49x56xf32> to vector<1x56xf32>
    %275 = vector.shape_cast %274 : vector<1x56xf32> to vector<56xf32>
    %276 = vector.shape_cast %275 : vector<56xf32> to vector<1x1x56xf32>
    %277 = vector.broadcast %276 : vector<1x1x56xf32> to vector<4x16x56xf32>
    %278 = arith.mulf %273, %277 : vector<4x16x56xf32>
    %279 = arith.addf %269, %278 : vector<4x16x56xf32>
    %280 = vector.extract_strided_slice %272 {offsets = [0, 1, 0], sizes = [4, 16, 56], strides = [1, 1, 1]} : vector<4x22x56xf32> to vector<4x16x56xf32>
    %281 = vector.extract_strided_slice %5 {offsets = [36, 0], sizes = [1, 56], strides = [1, 1]} : vector<49x56xf32> to vector<1x56xf32>
    %282 = vector.shape_cast %281 : vector<1x56xf32> to vector<56xf32>
    %283 = vector.shape_cast %282 : vector<56xf32> to vector<1x1x56xf32>
    %284 = vector.broadcast %283 : vector<1x1x56xf32> to vector<4x16x56xf32>
    %285 = arith.mulf %280, %284 : vector<4x16x56xf32>
    %286 = arith.addf %279, %285 : vector<4x16x56xf32>
    %287 = vector.extract_strided_slice %272 {offsets = [0, 2, 0], sizes = [4, 16, 56], strides = [1, 1, 1]} : vector<4x22x56xf32> to vector<4x16x56xf32>
    %288 = vector.extract_strided_slice %5 {offsets = [37, 0], sizes = [1, 56], strides = [1, 1]} : vector<49x56xf32> to vector<1x56xf32>
    %289 = vector.shape_cast %288 : vector<1x56xf32> to vector<56xf32>
    %290 = vector.shape_cast %289 : vector<56xf32> to vector<1x1x56xf32>
    %291 = vector.broadcast %290 : vector<1x1x56xf32> to vector<4x16x56xf32>
    %292 = arith.mulf %287, %291 : vector<4x16x56xf32>
    %293 = arith.addf %286, %292 : vector<4x16x56xf32>
    %294 = vector.extract_strided_slice %272 {offsets = [0, 3, 0], sizes = [4, 16, 56], strides = [1, 1, 1]} : vector<4x22x56xf32> to vector<4x16x56xf32>
    %295 = vector.extract_strided_slice %5 {offsets = [38, 0], sizes = [1, 56], strides = [1, 1]} : vector<49x56xf32> to vector<1x56xf32>
    %296 = vector.shape_cast %295 : vector<1x56xf32> to vector<56xf32>
    %297 = vector.shape_cast %296 : vector<56xf32> to vector<1x1x56xf32>
    %298 = vector.broadcast %297 : vector<1x1x56xf32> to vector<4x16x56xf32>
    %299 = arith.mulf %294, %298 : vector<4x16x56xf32>
    %300 = arith.addf %293, %299 : vector<4x16x56xf32>
    %301 = vector.extract_strided_slice %272 {offsets = [0, 4, 0], sizes = [4, 16, 56], strides = [1, 1, 1]} : vector<4x22x56xf32> to vector<4x16x56xf32>
    %302 = vector.extract_strided_slice %5 {offsets = [39, 0], sizes = [1, 56], strides = [1, 1]} : vector<49x56xf32> to vector<1x56xf32>
    %303 = vector.shape_cast %302 : vector<1x56xf32> to vector<56xf32>
    %304 = vector.shape_cast %303 : vector<56xf32> to vector<1x1x56xf32>
    %305 = vector.broadcast %304 : vector<1x1x56xf32> to vector<4x16x56xf32>
    %306 = arith.mulf %301, %305 : vector<4x16x56xf32>
    %307 = arith.addf %300, %306 : vector<4x16x56xf32>
    %308 = vector.extract_strided_slice %272 {offsets = [0, 5, 0], sizes = [4, 16, 56], strides = [1, 1, 1]} : vector<4x22x56xf32> to vector<4x16x56xf32>
    %309 = vector.extract_strided_slice %5 {offsets = [40, 0], sizes = [1, 56], strides = [1, 1]} : vector<49x56xf32> to vector<1x56xf32>
    %310 = vector.shape_cast %309 : vector<1x56xf32> to vector<56xf32>
    %311 = vector.shape_cast %310 : vector<56xf32> to vector<1x1x56xf32>
    %312 = vector.broadcast %311 : vector<1x1x56xf32> to vector<4x16x56xf32>
    %313 = arith.mulf %308, %312 : vector<4x16x56xf32>
    %314 = arith.addf %307, %313 : vector<4x16x56xf32>
    %315 = vector.extract_strided_slice %272 {offsets = [0, 6, 0], sizes = [4, 16, 56], strides = [1, 1, 1]} : vector<4x22x56xf32> to vector<4x16x56xf32>
    %316 = vector.extract_strided_slice %5 {offsets = [41, 0], sizes = [1, 56], strides = [1, 1]} : vector<49x56xf32> to vector<1x56xf32>
    %317 = vector.shape_cast %316 : vector<1x56xf32> to vector<56xf32>
    %318 = vector.shape_cast %317 : vector<56xf32> to vector<1x1x56xf32>
    %319 = vector.broadcast %318 : vector<1x1x56xf32> to vector<4x16x56xf32>
    %320 = arith.mulf %315, %319 : vector<4x16x56xf32>
    %321 = arith.addf %314, %320 : vector<4x16x56xf32>
    %c6_i32 = arith.constant 6 : i32
    %322 = arith.addi %4, %c6_i32 : i32
    %323 = arith.index_cast %322 : i32 to index
    %c0_18 = arith.constant 0 : index
    %c0_19 = arith.constant 0 : index
    %324 = vector.load %arg6[%323, %c0_18, %c0_19] : memref<22x22x56xf32, #tpu.memory_space<vmem>>, vector<4x22x56xf32>
    %325 = vector.extract_strided_slice %324 {offsets = [0, 0, 0], sizes = [4, 16, 56], strides = [1, 1, 1]} : vector<4x22x56xf32> to vector<4x16x56xf32>
    %326 = vector.extract_strided_slice %5 {offsets = [42, 0], sizes = [1, 56], strides = [1, 1]} : vector<49x56xf32> to vector<1x56xf32>
    %327 = vector.shape_cast %326 : vector<1x56xf32> to vector<56xf32>
    %328 = vector.shape_cast %327 : vector<56xf32> to vector<1x1x56xf32>
    %329 = vector.broadcast %328 : vector<1x1x56xf32> to vector<4x16x56xf32>
    %330 = arith.mulf %325, %329 : vector<4x16x56xf32>
    %331 = arith.addf %321, %330 : vector<4x16x56xf32>
    %332 = vector.extract_strided_slice %324 {offsets = [0, 1, 0], sizes = [4, 16, 56], strides = [1, 1, 1]} : vector<4x22x56xf32> to vector<4x16x56xf32>
    %333 = vector.extract_strided_slice %5 {offsets = [43, 0], sizes = [1, 56], strides = [1, 1]} : vector<49x56xf32> to vector<1x56xf32>
    %334 = vector.shape_cast %333 : vector<1x56xf32> to vector<56xf32>
    %335 = vector.shape_cast %334 : vector<56xf32> to vector<1x1x56xf32>
    %336 = vector.broadcast %335 : vector<1x1x56xf32> to vector<4x16x56xf32>
    %337 = arith.mulf %332, %336 : vector<4x16x56xf32>
    %338 = arith.addf %331, %337 : vector<4x16x56xf32>
    %339 = vector.extract_strided_slice %324 {offsets = [0, 2, 0], sizes = [4, 16, 56], strides = [1, 1, 1]} : vector<4x22x56xf32> to vector<4x16x56xf32>
    %340 = vector.extract_strided_slice %5 {offsets = [44, 0], sizes = [1, 56], strides = [1, 1]} : vector<49x56xf32> to vector<1x56xf32>
    %341 = vector.shape_cast %340 : vector<1x56xf32> to vector<56xf32>
    %342 = vector.shape_cast %341 : vector<56xf32> to vector<1x1x56xf32>
    %343 = vector.broadcast %342 : vector<1x1x56xf32> to vector<4x16x56xf32>
    %344 = arith.mulf %339, %343 : vector<4x16x56xf32>
    %345 = arith.addf %338, %344 : vector<4x16x56xf32>
    %346 = vector.extract_strided_slice %324 {offsets = [0, 3, 0], sizes = [4, 16, 56], strides = [1, 1, 1]} : vector<4x22x56xf32> to vector<4x16x56xf32>
    %347 = vector.extract_strided_slice %5 {offsets = [45, 0], sizes = [1, 56], strides = [1, 1]} : vector<49x56xf32> to vector<1x56xf32>
    %348 = vector.shape_cast %347 : vector<1x56xf32> to vector<56xf32>
    %349 = vector.shape_cast %348 : vector<56xf32> to vector<1x1x56xf32>
    %350 = vector.broadcast %349 : vector<1x1x56xf32> to vector<4x16x56xf32>
    %351 = arith.mulf %346, %350 : vector<4x16x56xf32>
    %352 = arith.addf %345, %351 : vector<4x16x56xf32>
    %353 = vector.extract_strided_slice %324 {offsets = [0, 4, 0], sizes = [4, 16, 56], strides = [1, 1, 1]} : vector<4x22x56xf32> to vector<4x16x56xf32>
    %354 = vector.extract_strided_slice %5 {offsets = [46, 0], sizes = [1, 56], strides = [1, 1]} : vector<49x56xf32> to vector<1x56xf32>
    %355 = vector.shape_cast %354 : vector<1x56xf32> to vector<56xf32>
    %356 = vector.shape_cast %355 : vector<56xf32> to vector<1x1x56xf32>
    %357 = vector.broadcast %356 : vector<1x1x56xf32> to vector<4x16x56xf32>
    %358 = arith.mulf %353, %357 : vector<4x16x56xf32>
    %359 = arith.addf %352, %358 : vector<4x16x56xf32>
    %360 = vector.extract_strided_slice %324 {offsets = [0, 5, 0], sizes = [4, 16, 56], strides = [1, 1, 1]} : vector<4x22x56xf32> to vector<4x16x56xf32>
    %361 = vector.extract_strided_slice %5 {offsets = [47, 0], sizes = [1, 56], strides = [1, 1]} : vector<49x56xf32> to vector<1x56xf32>
    %362 = vector.shape_cast %361 : vector<1x56xf32> to vector<56xf32>
    %363 = vector.shape_cast %362 : vector<56xf32> to vector<1x1x56xf32>
    %364 = vector.broadcast %363 : vector<1x1x56xf32> to vector<4x16x56xf32>
    %365 = arith.mulf %360, %364 : vector<4x16x56xf32>
    %366 = arith.addf %359, %365 : vector<4x16x56xf32>
    %367 = vector.extract_strided_slice %324 {offsets = [0, 6, 0], sizes = [4, 16, 56], strides = [1, 1, 1]} : vector<4x22x56xf32> to vector<4x16x56xf32>
    %368 = vector.extract_strided_slice %5 {offsets = [48, 0], sizes = [1, 56], strides = [1, 1]} : vector<49x56xf32> to vector<1x56xf32>
    %369 = vector.shape_cast %368 : vector<1x56xf32> to vector<56xf32>
    %370 = vector.shape_cast %369 : vector<56xf32> to vector<1x1x56xf32>
    %371 = vector.broadcast %370 : vector<1x1x56xf32> to vector<4x16x56xf32>
    %372 = arith.mulf %367, %371 : vector<4x16x56xf32>
    %373 = arith.addf %366, %372 : vector<4x16x56xf32>
    %374 = arith.truncf %373 : vector<4x16x56xf32> to vector<4x16x56xbf16>
    %c0_20 = arith.constant 0 : index
    %c0_21 = arith.constant 0 : index
    %c0_22 = arith.constant 0 : index
    %c0_23 = arith.constant 0 : index
    %375 = vector.load %arg5[%c0_20, %c0_21, %c0_22, %c0_23] : memref<1x4x16x56xbf16, #tpu.memory_space<vmem>>, vector<1x4x16x56xbf16>
    %376 = vector.shape_cast %375 : vector<1x4x16x56xbf16> to vector<4x16x56xbf16>
    %377 = vector.shape_cast %374 : vector<4x16x56xbf16> to vector<1x4x16x56xbf16>
    tpu.vector_store %arg5[%c0_20, %c0_21, %c0_22, %c0_23], %377 {strides = array<i32>} : memref<1x4x16x56xbf16, #tpu.memory_space<vmem>>, vector<1x4x16x56xbf16>,
    return
  }
  func.func @transform_0(%arg0: i32, %arg1: i32) -> (i32, i32, i32, i32) {
    %c0_i32 = arith.constant 0 : i32
    %c0_i32_0 = arith.constant 0 : i32
    %c0_i32_1 = arith.constant 0 : i32
    %c0_i32_2 = arith.constant 0 : i32
    return %arg0, %c0_i32, %c0_i32_0, %c0_i32_1 : i32, i32, i32, i32
  }
  func.func @transform_1(%arg0: i32, %arg1: i32) -> (i32, i32) {
    %c0_i32 = arith.constant 0 : i32
    %c0_i32_0 = arith.constant 0 : i32
    %c0_i32_1 = arith.constant 0 : i32
    return %c0_i32, %c0_i32_0 : i32, i32
  }
  func.func @transform_2(%arg0: i32, %arg1: i32) -> (i32, i32) {
    %c0_i32 = arith.constant 0 : i32
    %c0_i32_0 = arith.constant 0 : i32
    %c0_i32_1 = arith.constant 0 : i32
    return %c0_i32, %c0_i32_0 : i32, i32
  }
  func.func @transform_3(%arg0: i32, %arg1: i32) -> (i32, i32, i32, i32) {
    %c0_i32 = arith.constant 0 : i32
    %c0_i32_0 = arith.constant 0 : i32
    %c0_i32_1 = arith.constant 0 : i32
    return %arg0, %arg1, %c0_i32, %c0_i32_0 : i32, i32, i32, i32
  }
}

module attributes {stable_mosaic.version = 11 : i64} {
  func.func @kernel(%arg0: i32, %arg1: memref<64x8xbf16, #tpu.memory_space<vmem>>, %arg2: memref<64x56xbf16, #tpu.memory_space<vmem>>, %arg3: memref<64x32xf32, #tpu.memory_space<vmem>>, %arg4: memref<8x16xbf16, #tpu.memory_space<vmem>>, %arg5: memref<1x16xf32, #tpu.memory_space<vmem>>, %arg6: memref<16x32xbf16, #tpu.memory_space<vmem>>, %arg7: memref<1x32xf32, #tpu.memory_space<vmem>>, %arg8: memref<32x32xbf16, #tpu.memory_space<vmem>>, %arg9: memref<1x32xf32, #tpu.memory_space<vmem>>, %arg10: memref<1x32xf32, #tpu.memory_space<vmem>>, %arg11: memref<1x32xf32, #tpu.memory_space<vmem>>, %arg12: memref<1x32xf32, #tpu.memory_space<vmem>>, %arg13: memref<32x128xbf16, #tpu.memory_space<vmem>>, %arg14: memref<1x128xf32, #tpu.memory_space<vmem>>, %arg15: memref<128x32xbf16, #tpu.memory_space<vmem>>, %arg16: memref<1x32xf32, #tpu.memory_space<vmem>>, %arg17: memref<1x32xf32, #tpu.memory_space<vmem>>, %arg18: memref<64x32xf32, #tpu.memory_space<vmem>>) attributes {dimension_semantics = [#tpu.dimension_semantics<parallel>], iteration_bounds = array<i64: 8>, scalar_prefetch = 0 : i64, scratch_operands = 0 : i64, tpu.core_type = #tpu.core_type<tc>, window_params = [{transform_indices = @transform_0, window_bounds = array<i64: 64, 8>}, {transform_indices = @transform_1, window_bounds = array<i64: 64, 56>}, {transform_indices = @transform_2, window_bounds = array<i64: 64, 32>}, {pipeline_mode = #tpu.pipeline_mode<synchronous>, transform_indices = @transform_3, window_bounds = array<i64: 8, 16>}, {pipeline_mode = #tpu.pipeline_mode<synchronous>, transform_indices = @transform_4, window_bounds = array<i64: 1, 16>}, {pipeline_mode = #tpu.pipeline_mode<synchronous>, transform_indices = @transform_5, window_bounds = array<i64: 16, 32>}, {pipeline_mode = #tpu.pipeline_mode<synchronous>, transform_indices = @transform_6, window_bounds = array<i64: 1, 32>}, {pipeline_mode = #tpu.pipeline_mode<synchronous>, transform_indices = @transform_7, window_bounds = array<i64: 32, 32>}, {pipeline_mode = #tpu.pipeline_mode<synchronous>, transform_indices = @transform_8, window_bounds = array<i64: 1, 32>}, {pipeline_mode = #tpu.pipeline_mode<synchronous>, transform_indices = @transform_9, window_bounds = array<i64: 1, 32>}, {pipeline_mode = #tpu.pipeline_mode<synchronous>, transform_indices = @transform_10, window_bounds = array<i64: 1, 32>}, {pipeline_mode = #tpu.pipeline_mode<synchronous>, transform_indices = @transform_11, window_bounds = array<i64: 1, 32>}, {pipeline_mode = #tpu.pipeline_mode<synchronous>, transform_indices = @transform_12, window_bounds = array<i64: 32, 128>}, {pipeline_mode = #tpu.pipeline_mode<synchronous>, transform_indices = @transform_13, window_bounds = array<i64: 1, 128>}, {pipeline_mode = #tpu.pipeline_mode<synchronous>, transform_indices = @transform_14, window_bounds = array<i64: 128, 32>}, {pipeline_mode = #tpu.pipeline_mode<synchronous>, transform_indices = @transform_15, window_bounds = array<i64: 1, 32>}, {pipeline_mode = #tpu.pipeline_mode<synchronous>, transform_indices = @transform_16, window_bounds = array<i64: 1, 32>}, {transform_indices = @transform_17, window_bounds = array<i64: 64, 32>}]} {
    %c0 = arith.constant 0 : index
    %c0_0 = arith.constant 0 : index
    %0 = vector.load %arg1[%c0, %c0_0] : memref<64x8xbf16, #tpu.memory_space<vmem>>, vector<64x8xbf16>
    %1 = arith.extf %0 : vector<64x8xbf16> to vector<64x8xf32>
    %c0_1 = arith.constant 0 : index
    %c0_2 = arith.constant 0 : index
    %2 = vector.load %arg2[%c0_1, %c0_2] : memref<64x56xbf16, #tpu.memory_space<vmem>>, vector<64x56xbf16>
    %3 = arith.extf %2 : vector<64x56xbf16> to vector<64x56xf32>
    %c0_3 = arith.constant 0 : index
    %c0_4 = arith.constant 0 : index
    %4 = vector.load %arg3[%c0_3, %c0_4] : memref<64x32xf32, #tpu.memory_space<vmem>>, vector<64x32xf32>
    %5 = vector.extract_strided_slice %3 {offsets = [0, 0], sizes = [64, 8], strides = [1, 1]} : vector<64x56xf32> to vector<64x8xf32>
    %6 = arith.mulf %1, %5 : vector<64x8xf32>
    %c0_5 = arith.constant 0 : index
    %c0_6 = arith.constant 0 : index
    %7 = vector.load %arg4[%c0_5, %c0_6] : memref<8x16xbf16, #tpu.memory_space<vmem>>, vector<8x16xbf16>
    %c0_7 = arith.constant 0 : index
    %c0_8 = arith.constant 0 : index
    %8 = vector.load %arg5[%c0_7, %c0_8] : memref<1x16xf32, #tpu.memory_space<vmem>>, vector<1x16xf32>
    %9 = arith.truncf %6 : vector<64x8xf32> to vector<64x8xbf16>
    %10 = arith.extf %9 : vector<64x8xbf16> to vector<64x8xf32>
    %11 = arith.extf %7 : vector<8x16xbf16> to vector<8x16xf32>
    %12 = vector.shape_cast %8 : vector<1x16xf32> to vector<1x16xf32>
    %13 = vector.broadcast %12 : vector<1x16xf32> to vector<64x16xf32>
    %14 = vector.extract_strided_slice %10 {offsets = [0, 0], sizes = [64, 1], strides = [1, 1]} : vector<64x8xf32> to vector<64x1xf32>
    %15 = vector.extract_strided_slice %11 {offsets = [0, 0], sizes = [1, 16], strides = [1, 1]} : vector<8x16xf32> to vector<1x16xf32>
    %16 = vector.shape_cast %15 : vector<1x16xf32> to vector<16xf32>
    %17 = vector.shape_cast %16 : vector<16xf32> to vector<1x16xf32>
    %18 = vector.broadcast %14 : vector<64x1xf32> to vector<64x16xf32>
    %19 = vector.broadcast %17 : vector<1x16xf32> to vector<64x16xf32>
    %20 = arith.mulf %18, %19 : vector<64x16xf32>
    %21 = arith.addf %13, %20 : vector<64x16xf32>
    %22 = vector.extract_strided_slice %10 {offsets = [0, 1], sizes = [64, 1], strides = [1, 1]} : vector<64x8xf32> to vector<64x1xf32>
    %23 = vector.extract_strided_slice %11 {offsets = [1, 0], sizes = [1, 16], strides = [1, 1]} : vector<8x16xf32> to vector<1x16xf32>
    %24 = vector.shape_cast %23 : vector<1x16xf32> to vector<16xf32>
    %25 = vector.shape_cast %24 : vector<16xf32> to vector<1x16xf32>
    %26 = vector.broadcast %22 : vector<64x1xf32> to vector<64x16xf32>
    %27 = vector.broadcast %25 : vector<1x16xf32> to vector<64x16xf32>
    %28 = arith.mulf %26, %27 : vector<64x16xf32>
    %29 = arith.addf %21, %28 : vector<64x16xf32>
    %30 = vector.extract_strided_slice %10 {offsets = [0, 2], sizes = [64, 1], strides = [1, 1]} : vector<64x8xf32> to vector<64x1xf32>
    %31 = vector.extract_strided_slice %11 {offsets = [2, 0], sizes = [1, 16], strides = [1, 1]} : vector<8x16xf32> to vector<1x16xf32>
    %32 = vector.shape_cast %31 : vector<1x16xf32> to vector<16xf32>
    %33 = vector.shape_cast %32 : vector<16xf32> to vector<1x16xf32>
    %34 = vector.broadcast %30 : vector<64x1xf32> to vector<64x16xf32>
    %35 = vector.broadcast %33 : vector<1x16xf32> to vector<64x16xf32>
    %36 = arith.mulf %34, %35 : vector<64x16xf32>
    %37 = arith.addf %29, %36 : vector<64x16xf32>
    %38 = vector.extract_strided_slice %10 {offsets = [0, 3], sizes = [64, 1], strides = [1, 1]} : vector<64x8xf32> to vector<64x1xf32>
    %39 = vector.extract_strided_slice %11 {offsets = [3, 0], sizes = [1, 16], strides = [1, 1]} : vector<8x16xf32> to vector<1x16xf32>
    %40 = vector.shape_cast %39 : vector<1x16xf32> to vector<16xf32>
    %41 = vector.shape_cast %40 : vector<16xf32> to vector<1x16xf32>
    %42 = vector.broadcast %38 : vector<64x1xf32> to vector<64x16xf32>
    %43 = vector.broadcast %41 : vector<1x16xf32> to vector<64x16xf32>
    %44 = arith.mulf %42, %43 : vector<64x16xf32>
    %45 = arith.addf %37, %44 : vector<64x16xf32>
    %46 = vector.extract_strided_slice %10 {offsets = [0, 4], sizes = [64, 1], strides = [1, 1]} : vector<64x8xf32> to vector<64x1xf32>
    %47 = vector.extract_strided_slice %11 {offsets = [4, 0], sizes = [1, 16], strides = [1, 1]} : vector<8x16xf32> to vector<1x16xf32>
    %48 = vector.shape_cast %47 : vector<1x16xf32> to vector<16xf32>
    %49 = vector.shape_cast %48 : vector<16xf32> to vector<1x16xf32>
    %50 = vector.broadcast %46 : vector<64x1xf32> to vector<64x16xf32>
    %51 = vector.broadcast %49 : vector<1x16xf32> to vector<64x16xf32>
    %52 = arith.mulf %50, %51 : vector<64x16xf32>
    %53 = arith.addf %45, %52 : vector<64x16xf32>
    %54 = vector.extract_strided_slice %10 {offsets = [0, 5], sizes = [64, 1], strides = [1, 1]} : vector<64x8xf32> to vector<64x1xf32>
    %55 = vector.extract_strided_slice %11 {offsets = [5, 0], sizes = [1, 16], strides = [1, 1]} : vector<8x16xf32> to vector<1x16xf32>
    %56 = vector.shape_cast %55 : vector<1x16xf32> to vector<16xf32>
    %57 = vector.shape_cast %56 : vector<16xf32> to vector<1x16xf32>
    %58 = vector.broadcast %54 : vector<64x1xf32> to vector<64x16xf32>
    %59 = vector.broadcast %57 : vector<1x16xf32> to vector<64x16xf32>
    %60 = arith.mulf %58, %59 : vector<64x16xf32>
    %61 = arith.addf %53, %60 : vector<64x16xf32>
    %62 = vector.extract_strided_slice %10 {offsets = [0, 6], sizes = [64, 1], strides = [1, 1]} : vector<64x8xf32> to vector<64x1xf32>
    %63 = vector.extract_strided_slice %11 {offsets = [6, 0], sizes = [1, 16], strides = [1, 1]} : vector<8x16xf32> to vector<1x16xf32>
    %64 = vector.shape_cast %63 : vector<1x16xf32> to vector<16xf32>
    %65 = vector.shape_cast %64 : vector<16xf32> to vector<1x16xf32>
    %66 = vector.broadcast %62 : vector<64x1xf32> to vector<64x16xf32>
    %67 = vector.broadcast %65 : vector<1x16xf32> to vector<64x16xf32>
    %68 = arith.mulf %66, %67 : vector<64x16xf32>
    %69 = arith.addf %61, %68 : vector<64x16xf32>
    %70 = vector.extract_strided_slice %10 {offsets = [0, 7], sizes = [64, 1], strides = [1, 1]} : vector<64x8xf32> to vector<64x1xf32>
    %71 = vector.extract_strided_slice %11 {offsets = [7, 0], sizes = [1, 16], strides = [1, 1]} : vector<8x16xf32> to vector<1x16xf32>
    %72 = vector.shape_cast %71 : vector<1x16xf32> to vector<16xf32>
    %73 = vector.shape_cast %72 : vector<16xf32> to vector<1x16xf32>
    %74 = vector.broadcast %70 : vector<64x1xf32> to vector<64x16xf32>
    %75 = vector.broadcast %73 : vector<1x16xf32> to vector<64x16xf32>
    %76 = arith.mulf %74, %75 : vector<64x16xf32>
    %77 = arith.addf %69, %76 : vector<64x16xf32>
    %78 = vector.extract_strided_slice %3 {offsets = [0, 8], sizes = [64, 16], strides = [1, 1]} : vector<64x56xf32> to vector<64x16xf32>
    %79 = arith.mulf %77, %78 : vector<64x16xf32>
    %c0_9 = arith.constant 0 : index
    %c0_10 = arith.constant 0 : index
    %80 = vector.load %arg6[%c0_9, %c0_10] : memref<16x32xbf16, #tpu.memory_space<vmem>>, vector<16x32xbf16>
    %c0_11 = arith.constant 0 : index
    %c0_12 = arith.constant 0 : index
    %81 = vector.load %arg7[%c0_11, %c0_12] : memref<1x32xf32, #tpu.memory_space<vmem>>, vector<1x32xf32>
    %82 = arith.truncf %79 : vector<64x16xf32> to vector<64x16xbf16>
    %83 = arith.extf %82 : vector<64x16xbf16> to vector<64x16xf32>
    %84 = arith.extf %80 : vector<16x32xbf16> to vector<16x32xf32>
    %85 = vector.shape_cast %81 : vector<1x32xf32> to vector<1x32xf32>
    %86 = vector.broadcast %85 : vector<1x32xf32> to vector<64x32xf32>
    %87 = vector.extract_strided_slice %83 {offsets = [0, 0], sizes = [64, 1], strides = [1, 1]} : vector<64x16xf32> to vector<64x1xf32>
    %88 = vector.extract_strided_slice %84 {offsets = [0, 0], sizes = [1, 32], strides = [1, 1]} : vector<16x32xf32> to vector<1x32xf32>
    %89 = vector.shape_cast %88 : vector<1x32xf32> to vector<32xf32>
    %90 = vector.shape_cast %89 : vector<32xf32> to vector<1x32xf32>
    %91 = vector.broadcast %87 : vector<64x1xf32> to vector<64x32xf32>
    %92 = vector.broadcast %90 : vector<1x32xf32> to vector<64x32xf32>
    %93 = arith.mulf %91, %92 : vector<64x32xf32>
    %94 = arith.addf %86, %93 : vector<64x32xf32>
    %95 = vector.extract_strided_slice %83 {offsets = [0, 1], sizes = [64, 1], strides = [1, 1]} : vector<64x16xf32> to vector<64x1xf32>
    %96 = vector.extract_strided_slice %84 {offsets = [1, 0], sizes = [1, 32], strides = [1, 1]} : vector<16x32xf32> to vector<1x32xf32>
    %97 = vector.shape_cast %96 : vector<1x32xf32> to vector<32xf32>
    %98 = vector.shape_cast %97 : vector<32xf32> to vector<1x32xf32>
    %99 = vector.broadcast %95 : vector<64x1xf32> to vector<64x32xf32>
    %100 = vector.broadcast %98 : vector<1x32xf32> to vector<64x32xf32>
    %101 = arith.mulf %99, %100 : vector<64x32xf32>
    %102 = arith.addf %94, %101 : vector<64x32xf32>
    %103 = vector.extract_strided_slice %83 {offsets = [0, 2], sizes = [64, 1], strides = [1, 1]} : vector<64x16xf32> to vector<64x1xf32>
    %104 = vector.extract_strided_slice %84 {offsets = [2, 0], sizes = [1, 32], strides = [1, 1]} : vector<16x32xf32> to vector<1x32xf32>
    %105 = vector.shape_cast %104 : vector<1x32xf32> to vector<32xf32>
    %106 = vector.shape_cast %105 : vector<32xf32> to vector<1x32xf32>
    %107 = vector.broadcast %103 : vector<64x1xf32> to vector<64x32xf32>
    %108 = vector.broadcast %106 : vector<1x32xf32> to vector<64x32xf32>
    %109 = arith.mulf %107, %108 : vector<64x32xf32>
    %110 = arith.addf %102, %109 : vector<64x32xf32>
    %111 = vector.extract_strided_slice %83 {offsets = [0, 3], sizes = [64, 1], strides = [1, 1]} : vector<64x16xf32> to vector<64x1xf32>
    %112 = vector.extract_strided_slice %84 {offsets = [3, 0], sizes = [1, 32], strides = [1, 1]} : vector<16x32xf32> to vector<1x32xf32>
    %113 = vector.shape_cast %112 : vector<1x32xf32> to vector<32xf32>
    %114 = vector.shape_cast %113 : vector<32xf32> to vector<1x32xf32>
    %115 = vector.broadcast %111 : vector<64x1xf32> to vector<64x32xf32>
    %116 = vector.broadcast %114 : vector<1x32xf32> to vector<64x32xf32>
    %117 = arith.mulf %115, %116 : vector<64x32xf32>
    %118 = arith.addf %110, %117 : vector<64x32xf32>
    %119 = vector.extract_strided_slice %83 {offsets = [0, 4], sizes = [64, 1], strides = [1, 1]} : vector<64x16xf32> to vector<64x1xf32>
    %120 = vector.extract_strided_slice %84 {offsets = [4, 0], sizes = [1, 32], strides = [1, 1]} : vector<16x32xf32> to vector<1x32xf32>
    %121 = vector.shape_cast %120 : vector<1x32xf32> to vector<32xf32>
    %122 = vector.shape_cast %121 : vector<32xf32> to vector<1x32xf32>
    %123 = vector.broadcast %119 : vector<64x1xf32> to vector<64x32xf32>
    %124 = vector.broadcast %122 : vector<1x32xf32> to vector<64x32xf32>
    %125 = arith.mulf %123, %124 : vector<64x32xf32>
    %126 = arith.addf %118, %125 : vector<64x32xf32>
    %127 = vector.extract_strided_slice %83 {offsets = [0, 5], sizes = [64, 1], strides = [1, 1]} : vector<64x16xf32> to vector<64x1xf32>
    %128 = vector.extract_strided_slice %84 {offsets = [5, 0], sizes = [1, 32], strides = [1, 1]} : vector<16x32xf32> to vector<1x32xf32>
    %129 = vector.shape_cast %128 : vector<1x32xf32> to vector<32xf32>
    %130 = vector.shape_cast %129 : vector<32xf32> to vector<1x32xf32>
    %131 = vector.broadcast %127 : vector<64x1xf32> to vector<64x32xf32>
    %132 = vector.broadcast %130 : vector<1x32xf32> to vector<64x32xf32>
    %133 = arith.mulf %131, %132 : vector<64x32xf32>
    %134 = arith.addf %126, %133 : vector<64x32xf32>
    %135 = vector.extract_strided_slice %83 {offsets = [0, 6], sizes = [64, 1], strides = [1, 1]} : vector<64x16xf32> to vector<64x1xf32>
    %136 = vector.extract_strided_slice %84 {offsets = [6, 0], sizes = [1, 32], strides = [1, 1]} : vector<16x32xf32> to vector<1x32xf32>
    %137 = vector.shape_cast %136 : vector<1x32xf32> to vector<32xf32>
    %138 = vector.shape_cast %137 : vector<32xf32> to vector<1x32xf32>
    %139 = vector.broadcast %135 : vector<64x1xf32> to vector<64x32xf32>
    %140 = vector.broadcast %138 : vector<1x32xf32> to vector<64x32xf32>
    %141 = arith.mulf %139, %140 : vector<64x32xf32>
    %142 = arith.addf %134, %141 : vector<64x32xf32>
    %143 = vector.extract_strided_slice %83 {offsets = [0, 7], sizes = [64, 1], strides = [1, 1]} : vector<64x16xf32> to vector<64x1xf32>
    %144 = vector.extract_strided_slice %84 {offsets = [7, 0], sizes = [1, 32], strides = [1, 1]} : vector<16x32xf32> to vector<1x32xf32>
    %145 = vector.shape_cast %144 : vector<1x32xf32> to vector<32xf32>
    %146 = vector.shape_cast %145 : vector<32xf32> to vector<1x32xf32>
    %147 = vector.broadcast %143 : vector<64x1xf32> to vector<64x32xf32>
    %148 = vector.broadcast %146 : vector<1x32xf32> to vector<64x32xf32>
    %149 = arith.mulf %147, %148 : vector<64x32xf32>
    %150 = arith.addf %142, %149 : vector<64x32xf32>
    %151 = vector.extract_strided_slice %83 {offsets = [0, 8], sizes = [64, 1], strides = [1, 1]} : vector<64x16xf32> to vector<64x1xf32>
    %152 = vector.extract_strided_slice %84 {offsets = [8, 0], sizes = [1, 32], strides = [1, 1]} : vector<16x32xf32> to vector<1x32xf32>
    %153 = vector.shape_cast %152 : vector<1x32xf32> to vector<32xf32>
    %154 = vector.shape_cast %153 : vector<32xf32> to vector<1x32xf32>
    %155 = vector.broadcast %151 : vector<64x1xf32> to vector<64x32xf32>
    %156 = vector.broadcast %154 : vector<1x32xf32> to vector<64x32xf32>
    %157 = arith.mulf %155, %156 : vector<64x32xf32>
    %158 = arith.addf %150, %157 : vector<64x32xf32>
    %159 = vector.extract_strided_slice %83 {offsets = [0, 9], sizes = [64, 1], strides = [1, 1]} : vector<64x16xf32> to vector<64x1xf32>
    %160 = vector.extract_strided_slice %84 {offsets = [9, 0], sizes = [1, 32], strides = [1, 1]} : vector<16x32xf32> to vector<1x32xf32>
    %161 = vector.shape_cast %160 : vector<1x32xf32> to vector<32xf32>
    %162 = vector.shape_cast %161 : vector<32xf32> to vector<1x32xf32>
    %163 = vector.broadcast %159 : vector<64x1xf32> to vector<64x32xf32>
    %164 = vector.broadcast %162 : vector<1x32xf32> to vector<64x32xf32>
    %165 = arith.mulf %163, %164 : vector<64x32xf32>
    %166 = arith.addf %158, %165 : vector<64x32xf32>
    %167 = vector.extract_strided_slice %83 {offsets = [0, 10], sizes = [64, 1], strides = [1, 1]} : vector<64x16xf32> to vector<64x1xf32>
    %168 = vector.extract_strided_slice %84 {offsets = [10, 0], sizes = [1, 32], strides = [1, 1]} : vector<16x32xf32> to vector<1x32xf32>
    %169 = vector.shape_cast %168 : vector<1x32xf32> to vector<32xf32>
    %170 = vector.shape_cast %169 : vector<32xf32> to vector<1x32xf32>
    %171 = vector.broadcast %167 : vector<64x1xf32> to vector<64x32xf32>
    %172 = vector.broadcast %170 : vector<1x32xf32> to vector<64x32xf32>
    %173 = arith.mulf %171, %172 : vector<64x32xf32>
    %174 = arith.addf %166, %173 : vector<64x32xf32>
    %175 = vector.extract_strided_slice %83 {offsets = [0, 11], sizes = [64, 1], strides = [1, 1]} : vector<64x16xf32> to vector<64x1xf32>
    %176 = vector.extract_strided_slice %84 {offsets = [11, 0], sizes = [1, 32], strides = [1, 1]} : vector<16x32xf32> to vector<1x32xf32>
    %177 = vector.shape_cast %176 : vector<1x32xf32> to vector<32xf32>
    %178 = vector.shape_cast %177 : vector<32xf32> to vector<1x32xf32>
    %179 = vector.broadcast %175 : vector<64x1xf32> to vector<64x32xf32>
    %180 = vector.broadcast %178 : vector<1x32xf32> to vector<64x32xf32>
    %181 = arith.mulf %179, %180 : vector<64x32xf32>
    %182 = arith.addf %174, %181 : vector<64x32xf32>
    %183 = vector.extract_strided_slice %83 {offsets = [0, 12], sizes = [64, 1], strides = [1, 1]} : vector<64x16xf32> to vector<64x1xf32>
    %184 = vector.extract_strided_slice %84 {offsets = [12, 0], sizes = [1, 32], strides = [1, 1]} : vector<16x32xf32> to vector<1x32xf32>
    %185 = vector.shape_cast %184 : vector<1x32xf32> to vector<32xf32>
    %186 = vector.shape_cast %185 : vector<32xf32> to vector<1x32xf32>
    %187 = vector.broadcast %183 : vector<64x1xf32> to vector<64x32xf32>
    %188 = vector.broadcast %186 : vector<1x32xf32> to vector<64x32xf32>
    %189 = arith.mulf %187, %188 : vector<64x32xf32>
    %190 = arith.addf %182, %189 : vector<64x32xf32>
    %191 = vector.extract_strided_slice %83 {offsets = [0, 13], sizes = [64, 1], strides = [1, 1]} : vector<64x16xf32> to vector<64x1xf32>
    %192 = vector.extract_strided_slice %84 {offsets = [13, 0], sizes = [1, 32], strides = [1, 1]} : vector<16x32xf32> to vector<1x32xf32>
    %193 = vector.shape_cast %192 : vector<1x32xf32> to vector<32xf32>
    %194 = vector.shape_cast %193 : vector<32xf32> to vector<1x32xf32>
    %195 = vector.broadcast %191 : vector<64x1xf32> to vector<64x32xf32>
    %196 = vector.broadcast %194 : vector<1x32xf32> to vector<64x32xf32>
    %197 = arith.mulf %195, %196 : vector<64x32xf32>
    %198 = arith.addf %190, %197 : vector<64x32xf32>
    %199 = vector.extract_strided_slice %83 {offsets = [0, 14], sizes = [64, 1], strides = [1, 1]} : vector<64x16xf32> to vector<64x1xf32>
    %200 = vector.extract_strided_slice %84 {offsets = [14, 0], sizes = [1, 32], strides = [1, 1]} : vector<16x32xf32> to vector<1x32xf32>
    %201 = vector.shape_cast %200 : vector<1x32xf32> to vector<32xf32>
    %202 = vector.shape_cast %201 : vector<32xf32> to vector<1x32xf32>
    %203 = vector.broadcast %199 : vector<64x1xf32> to vector<64x32xf32>
    %204 = vector.broadcast %202 : vector<1x32xf32> to vector<64x32xf32>
    %205 = arith.mulf %203, %204 : vector<64x32xf32>
    %206 = arith.addf %198, %205 : vector<64x32xf32>
    %207 = vector.extract_strided_slice %83 {offsets = [0, 15], sizes = [64, 1], strides = [1, 1]} : vector<64x16xf32> to vector<64x1xf32>
    %208 = vector.extract_strided_slice %84 {offsets = [15, 0], sizes = [1, 32], strides = [1, 1]} : vector<16x32xf32> to vector<1x32xf32>
    %209 = vector.shape_cast %208 : vector<1x32xf32> to vector<32xf32>
    %210 = vector.shape_cast %209 : vector<32xf32> to vector<1x32xf32>
    %211 = vector.broadcast %207 : vector<64x1xf32> to vector<64x32xf32>
    %212 = vector.broadcast %210 : vector<1x32xf32> to vector<64x32xf32>
    %213 = arith.mulf %211, %212 : vector<64x32xf32>
    %214 = arith.addf %206, %213 : vector<64x32xf32>
    %215 = vector.extract_strided_slice %3 {offsets = [0, 24], sizes = [64, 32], strides = [1, 1]} : vector<64x56xf32> to vector<64x32xf32>
    %216 = arith.mulf %214, %215 : vector<64x32xf32>
    %c0_13 = arith.constant 0 : index
    %c0_14 = arith.constant 0 : index
    %217 = vector.load %arg8[%c0_13, %c0_14] : memref<32x32xbf16, #tpu.memory_space<vmem>>, vector<32x32xbf16>
    %c0_15 = arith.constant 0 : index
    %c0_16 = arith.constant 0 : index
    %218 = vector.load %arg9[%c0_15, %c0_16] : memref<1x32xf32, #tpu.memory_space<vmem>>, vector<1x32xf32>
    %c0_17 = arith.constant 0 : index
    %c0_18 = arith.constant 0 : index
    %219 = vector.load %arg10[%c0_17, %c0_18] : memref<1x32xf32, #tpu.memory_space<vmem>>, vector<1x32xf32>
    %c0_19 = arith.constant 0 : index
    %c0_20 = arith.constant 0 : index
    %220 = vector.load %arg11[%c0_19, %c0_20] : memref<1x32xf32, #tpu.memory_space<vmem>>, vector<1x32xf32>
    %c0_21 = arith.constant 0 : index
    %c0_22 = arith.constant 0 : index
    %221 = vector.load %arg12[%c0_21, %c0_22] : memref<1x32xf32, #tpu.memory_space<vmem>>, vector<1x32xf32>
    %c0_23 = arith.constant 0 : index
    %c0_24 = arith.constant 0 : index
    %222 = vector.load %arg13[%c0_23, %c0_24] : memref<32x128xbf16, #tpu.memory_space<vmem>>, vector<32x128xbf16>
    %c0_25 = arith.constant 0 : index
    %c0_26 = arith.constant 0 : index
    %223 = vector.load %arg14[%c0_25, %c0_26] : memref<1x128xf32, #tpu.memory_space<vmem>>, vector<1x128xf32>
    %c0_27 = arith.constant 0 : index
    %c0_28 = arith.constant 0 : index
    %224 = vector.load %arg15[%c0_27, %c0_28] : memref<128x32xbf16, #tpu.memory_space<vmem>>, vector<128x32xbf16>
    %c0_29 = arith.constant 0 : index
    %c0_30 = arith.constant 0 : index
    %225 = vector.load %arg16[%c0_29, %c0_30] : memref<1x32xf32, #tpu.memory_space<vmem>>, vector<1x32xf32>
    %c0_31 = arith.constant 0 : index
    %c0_32 = arith.constant 0 : index
    %226 = vector.load %arg17[%c0_31, %c0_32] : memref<1x32xf32, #tpu.memory_space<vmem>>, vector<1x32xf32>
    %227 = arith.truncf %216 : vector<64x32xf32> to vector<64x32xbf16>
    %cst = arith.constant dense<0.000000e+00> : vector<64x32xf32>
    %228 = tpu.matmul %227, %217, %cst {dimension_numbers = #tpu.dot_dimension_numbers<[1], [0], [0], [1], [0, 0, 1, 1], [], []>} : vector<64x32xbf16>, vector<32x32xbf16>, vector<64x32xf32> -> vector<64x32xf32>
    %229 = vector.broadcast %218 : vector<1x32xf32> to vector<64x32xf32>
    %230 = arith.addf %228, %229 : vector<64x32xf32>
    %231 = vector.broadcast %219 : vector<1x32xf32> to vector<64x32xf32>
    %232 = arith.mulf %231, %230 : vector<64x32xf32>
    %233 = arith.addf %4, %232 : vector<64x32xf32>
    %cst_33 = arith.constant dense<0.000000e+00> : vector<64xf32>
    %234 = vector.multi_reduction <add>, %233, %cst_33 [1] : vector<64x32xf32> to vector<64xf32>
    %235 = vector.shape_cast %234 : vector<64xf32> to vector<64x1xf32>
    %cst_34 = arith.constant 3.200000e+01 : f32
    %236 = vector.broadcast %cst_34 : f32 to vector<64x1xf32>
    %237 = arith.divf %235, %236 : vector<64x1xf32>
    %238 = arith.mulf %233, %233 : vector<64x32xf32>
    %cst_35 = arith.constant dense<0.000000e+00> : vector<64xf32>
    %239 = vector.multi_reduction <add>, %238, %cst_35 [1] : vector<64x32xf32> to vector<64xf32>
    %240 = vector.shape_cast %239 : vector<64xf32> to vector<64x1xf32>
    %cst_36 = arith.constant 3.200000e+01 : f32
    %241 = vector.broadcast %cst_36 : f32 to vector<64x1xf32>
    %242 = arith.divf %240, %241 : vector<64x1xf32>
    %243 = arith.mulf %237, %237 : vector<64x1xf32>
    %244 = arith.subf %242, %243 : vector<64x1xf32>
    %245 = vector.broadcast %237 : vector<64x1xf32> to vector<64x32xf32>
    %246 = arith.subf %233, %245 : vector<64x32xf32>
    %cst_37 = arith.constant 9.99999997E-7 : f32
    %247 = vector.broadcast %cst_37 : f32 to vector<64x1xf32>
    %248 = arith.addf %244, %247 : vector<64x1xf32>
    %249 = math.rsqrt %248 : vector<64x1xf32>
    %250 = vector.broadcast %249 : vector<64x1xf32> to vector<64x32xf32>
    %251 = arith.mulf %246, %250 : vector<64x32xf32>
    %252 = vector.broadcast %220 : vector<1x32xf32> to vector<64x32xf32>
    %253 = arith.mulf %251, %252 : vector<64x32xf32>
    %254 = vector.broadcast %221 : vector<1x32xf32> to vector<64x32xf32>
    %255 = arith.addf %253, %254 : vector<64x32xf32>
    %256 = arith.truncf %255 : vector<64x32xf32> to vector<64x32xbf16>
    %cst_38 = arith.constant dense<0.000000e+00> : vector<64x128xf32>
    %257 = tpu.matmul %256, %222, %cst_38 {dimension_numbers = #tpu.dot_dimension_numbers<[1], [0], [0], [1], [0, 0, 1, 1], [], []>} : vector<64x32xbf16>, vector<32x128xbf16>, vector<64x128xf32> -> vector<64x128xf32>
    %258 = vector.broadcast %223 : vector<1x128xf32> to vector<64x128xf32>
    %259 = arith.addf %257, %258 : vector<64x128xf32>
    %260 = arith.mulf %259, %259 : vector<64x128xf32>
    %261 = arith.mulf %259, %260 : vector<64x128xf32>
    %cst_39 = arith.constant 4.471500e-02 : f32
    %262 = vector.broadcast %cst_39 : f32 to vector<64x128xf32>
    %263 = arith.mulf %262, %261 : vector<64x128xf32>
    %264 = arith.addf %259, %263 : vector<64x128xf32>
    %cst_40 = arith.constant 0.797884583 : f32
    %265 = vector.broadcast %cst_40 : f32 to vector<64x128xf32>
    %266 = arith.mulf %265, %264 : vector<64x128xf32>
    %267 = math.tanh %266 : vector<64x128xf32>
    %cst_41 = arith.constant 1.000000e+00 : f32
    %268 = vector.broadcast %cst_41 : f32 to vector<64x128xf32>
    %269 = arith.addf %268, %267 : vector<64x128xf32>
    %cst_42 = arith.constant 5.000000e-01 : f32
    %270 = vector.broadcast %cst_42 : f32 to vector<64x128xf32>
    %271 = arith.mulf %270, %269 : vector<64x128xf32>
    %272 = arith.mulf %259, %271 : vector<64x128xf32>
    %273 = arith.truncf %272 : vector<64x128xf32> to vector<64x128xbf16>
    %cst_43 = arith.constant dense<0.000000e+00> : vector<64x32xf32>
    %274 = tpu.matmul %273, %224, %cst_43 {dimension_numbers = #tpu.dot_dimension_numbers<[1], [0], [0], [1], [0, 0, 1, 1], [], []>} : vector<64x128xbf16>, vector<128x32xbf16>, vector<64x32xf32> -> vector<64x32xf32>
    %275 = vector.broadcast %225 : vector<1x32xf32> to vector<64x32xf32>
    %276 = arith.addf %274, %275 : vector<64x32xf32>
    %277 = vector.broadcast %226 : vector<1x32xf32> to vector<64x32xf32>
    %278 = arith.mulf %277, %276 : vector<64x32xf32>
    %279 = arith.addf %233, %278 : vector<64x32xf32>
    %c0_44 = arith.constant 0 : index
    %c0_45 = arith.constant 0 : index
    %280 = vector.load %arg18[%c0_44, %c0_45] : memref<64x32xf32, #tpu.memory_space<vmem>>, vector<64x32xf32>
    tpu.vector_store %arg18[%c0_44, %c0_45], %279 {strides = array<i32>} : memref<64x32xf32, #tpu.memory_space<vmem>>, vector<64x32xf32>,
    return
  }
  func.func @transform_0(%arg0: i32) -> (i32, i32) {
    %c0_i32 = arith.constant 0 : i32
    %c0_i32_0 = arith.constant 0 : i32
    return %arg0, %c0_i32 : i32, i32
  }
  func.func @transform_1(%arg0: i32) -> (i32, i32) {
    %c0_i32 = arith.constant 0 : i32
    %c0_i32_0 = arith.constant 0 : i32
    return %arg0, %c0_i32 : i32, i32
  }
  func.func @transform_2(%arg0: i32) -> (i32, i32) {
    %c0_i32 = arith.constant 0 : i32
    %c0_i32_0 = arith.constant 0 : i32
    return %arg0, %c0_i32 : i32, i32
  }
  func.func @transform_3(%arg0: i32) -> (i32, i32) {
    %c0_i32 = arith.constant 0 : i32
    %c0_i32_0 = arith.constant 0 : i32
    %c0_i32_1 = arith.constant 0 : i32
    return %c0_i32, %c0_i32_0 : i32, i32
  }
  func.func @transform_4(%arg0: i32) -> (i32, i32) {
    %c0_i32 = arith.constant 0 : i32
    %c0_i32_0 = arith.constant 0 : i32
    %c0_i32_1 = arith.constant 0 : i32
    return %c0_i32, %c0_i32_0 : i32, i32
  }
  func.func @transform_5(%arg0: i32) -> (i32, i32) {
    %c0_i32 = arith.constant 0 : i32
    %c0_i32_0 = arith.constant 0 : i32
    %c0_i32_1 = arith.constant 0 : i32
    return %c0_i32, %c0_i32_0 : i32, i32
  }
  func.func @transform_6(%arg0: i32) -> (i32, i32) {
    %c0_i32 = arith.constant 0 : i32
    %c0_i32_0 = arith.constant 0 : i32
    %c0_i32_1 = arith.constant 0 : i32
    return %c0_i32, %c0_i32_0 : i32, i32
  }
  func.func @transform_7(%arg0: i32) -> (i32, i32) {
    %c0_i32 = arith.constant 0 : i32
    %c0_i32_0 = arith.constant 0 : i32
    %c0_i32_1 = arith.constant 0 : i32
    return %c0_i32, %c0_i32_0 : i32, i32
  }
  func.func @transform_8(%arg0: i32) -> (i32, i32) {
    %c0_i32 = arith.constant 0 : i32
    %c0_i32_0 = arith.constant 0 : i32
    %c0_i32_1 = arith.constant 0 : i32
    return %c0_i32, %c0_i32_0 : i32, i32
  }
  func.func @transform_9(%arg0: i32) -> (i32, i32) {
    %c0_i32 = arith.constant 0 : i32
    %c0_i32_0 = arith.constant 0 : i32
    %c0_i32_1 = arith.constant 0 : i32
    return %c0_i32, %c0_i32_0 : i32, i32
  }
  func.func @transform_10(%arg0: i32) -> (i32, i32) {
    %c0_i32 = arith.constant 0 : i32
    %c0_i32_0 = arith.constant 0 : i32
    %c0_i32_1 = arith.constant 0 : i32
    return %c0_i32, %c0_i32_0 : i32, i32
  }
  func.func @transform_11(%arg0: i32) -> (i32, i32) {
    %c0_i32 = arith.constant 0 : i32
    %c0_i32_0 = arith.constant 0 : i32
    %c0_i32_1 = arith.constant 0 : i32
    return %c0_i32, %c0_i32_0 : i32, i32
  }
  func.func @transform_12(%arg0: i32) -> (i32, i32) {
    %c0_i32 = arith.constant 0 : i32
    %c0_i32_0 = arith.constant 0 : i32
    %c0_i32_1 = arith.constant 0 : i32
    return %c0_i32, %c0_i32_0 : i32, i32
  }
  func.func @transform_13(%arg0: i32) -> (i32, i32) {
    %c0_i32 = arith.constant 0 : i32
    %c0_i32_0 = arith.constant 0 : i32
    %c0_i32_1 = arith.constant 0 : i32
    return %c0_i32, %c0_i32_0 : i32, i32
  }
  func.func @transform_14(%arg0: i32) -> (i32, i32) {
    %c0_i32 = arith.constant 0 : i32
    %c0_i32_0 = arith.constant 0 : i32
    %c0_i32_1 = arith.constant 0 : i32
    return %c0_i32, %c0_i32_0 : i32, i32
  }
  func.func @transform_15(%arg0: i32) -> (i32, i32) {
    %c0_i32 = arith.constant 0 : i32
    %c0_i32_0 = arith.constant 0 : i32
    %c0_i32_1 = arith.constant 0 : i32
    return %c0_i32, %c0_i32_0 : i32, i32
  }
  func.func @transform_16(%arg0: i32) -> (i32, i32) {
    %c0_i32 = arith.constant 0 : i32
    %c0_i32_0 = arith.constant 0 : i32
    %c0_i32_1 = arith.constant 0 : i32
    return %c0_i32, %c0_i32_0 : i32, i32
  }
  func.func @transform_17(%arg0: i32) -> (i32, i32) {
    %c0_i32 = arith.constant 0 : i32
    %c0_i32_0 = arith.constant 0 : i32
    return %arg0, %c0_i32 : i32, i32
  }
}

</mosaic_0001>

<bundles_post_ra>
// kernel: _lambda_.6
= control target key start
LH: loop header
LB: loop body
LE: loop exit
PB: predicated region body
PF: predicated region fallthrough
CT: control target
= control target key end

     0   :  { %s824_s21 = smov 0   ;;  %s1049_s0 = inlined_call_operand.vmem [shape: f32[512,32], index: 0, kind: input, shape index: {}]   ;;  %s1050_s1 = inlined_call_operand.vmem [shape: f32[1,32], index: 1, kind: input, shape index: {}]   ;;  %s1051_s2 = inlined_call_operand.vmem [shape: f32[1,32], index: 2, kind: input, shape index: {}]   ;;  %s1052_s3 = inlined_call_operand.vmem [shape: bf16[32,64], index: 3, kind: input, shape index: {}]   ;;  %s1053_s4 = inlined_call_operand.vmem [shape: f32[1,64], index: 4, kind: input, shape index: {}]   ;;  %s1054_s5 = inlined_call_operand.vmem [shape: bf16[512,8], index: 5, kind: output, shape index: {0}]   ;;  %s1055_s6 = inlined_call_operand.vmem [shape: bf16[512,56], index: 6, kind: output, shape index: {1}]  }
   0x1 LB: > { %s715_s22 = sadd.s32 4294967295, %s785_s21   ;;  %p719_p0 = scmp.ge.s32.totalorder %s785_s21, 1  ;;  %s785_s21 = sphi %s824_s21, %s17_s21  }
   0x2   : > { %p216_p1 = scmp.lt.s32.totalorder %s785_s21, 9 }
   0x4   : > { %p217_p2 = pnand %p719_p0, %p216_p1 }
   0x5   : > { %s720_s23 = sshll.u32 (!%p217_p2), %s715_s22, 3  ;;  %s788_s18 = smov (!%p217_p2), 120  }
   0x6   : > { %220 = sbr.rel (%p217_p2) target bundleno = 459 (0x1cb), region = 40  ;;  %p252_p3 = scmp.lt.s32.totalorder (!%p217_p2), %s720_s23, 63 }
   0xb   : > { %s1057_s23 = smov (!%p252_p3, %s720_s23), 63  ;;  %vm278_vm0 = vcmask 261120   ;;  %v787_v32 = vmov 32.0   ;;  %v741_v44 = vld [vmem:[%s1052_s3 + $0x8] sm:$0xff]  ;;  %v740_v47 = vld [vmem:[%s1052_s3] sm:$0xff] }
   0xc   : > { %s721_s24 = sshll.u32 %s1057_s23, 3  ;;  %761 = vrcp.f32 %v787_v32  ;;  %743 = vmatpush.bf16.msra.mxu2 %v741_v44  ;;  %744 = vmatpush.bf16.msra.mxu3 %v741_v44  ;;  %s723_s14 = sshll.u32 %s1057_s23, 2 }
   0xd   : > { %s255_s27 = scalar_lea.vmem %s1049_s0, %s721_s24  ;;  %544 = vmatpush.bf16.msra.mxu0 %v741_v44  ;;  %742 = vmatpush.bf16.msra.mxu1 %v741_v44  ;;  %s1015_s17 = scalar_lea.vmem %s1054_s5, %s723_s14 }
   0xe   : > { %v838_v0 = vld [vmem:[%s255_s27 + $0x30] sm:$0xff]  ;;  %v840_v1 = vld [vmem:[%s255_s27 + $0x20] sm:$0xff]  ;;  %v848_v5 = vld [vmem:[%s255_s27 + $0x28] sm:$0xff]  ;;  %s267_s22 = scalar_lea.vmem %s1055_s6, %s723_s14 }
   0xf   : > { %v297_v2 = vsel %vm278_vm0, %v838_v0, 0.0  ;;  %v291_v3 = vsel %vm278_vm0, %v840_v1, 0.0  ;;  %v322_v4 = vmul.f32 %v840_v1, %v840_v1  ;;  %v851_v7 = vld [vmem:[%s255_s27 + $0x38] sm:$0xff]  ;;  %v323_v8 = vmul.f32 %v848_v5, %v848_v5  ;;  %v864_v14 = vld [vmem:[%s255_s27] sm:$0xff]  ;;  %v870_v18 = vld [vmem:[%s255_s27 + $0x10] sm:$0xff] }
  0x10   : > { %298 = vadd.xlane.f32.xlu1 %v297_v2  ;;  %292 = vadd.xlane.f32.xlu0 %v291_v3  ;;  %v300_v9 = vsel %vm278_vm0, %v851_v7, 0.0  ;;  %v294_v10 = vsel %vm278_vm0, %v848_v5, 0.0  ;;  %v325_v12 = vmul.f32 %v851_v7, %v851_v7  ;;  %v324_v13 = vmul.f32 %v838_v0, %v838_v0  ;;  %v872_v19 = vld [vmem:[%s255_s27 + $0x8] sm:$0xff]  ;;  %v874_v20 = vld [vmem:[%s255_s27 + $0x18] sm:$0xff] }
  0x11   : > { %v338_v6 = vsel %vm278_vm0, %v322_v4, 0.0  ;;  %v341_v11 = vsel %vm278_vm0, %v323_v8, 0.0  ;;  %v279_v17 = vsel %vm278_vm0, %v864_v14, 0.0  ;;  %v285_v21 = vsel %vm278_vm0, %v870_v18, 0.0  ;;  %746 = vmatpush.bf16.msra.mxu2 %v740_v47  ;;  %747 = vmatpush.bf16.msra.mxu3 %v740_v47 }
  0x12   : > { %339 = vadd.xlane.f32.xlu2 %v338_v6  ;;  %v347_v15 = vsel %vm278_vm0, %v325_v12, 0.0  ;;  %v344_v16 = vsel %vm278_vm0, %v324_v13, 0.0  ;;  %v282_v22 = vsel %vm278_vm0, %v872_v19, 0.0  ;;  %v288_v23 = vsel %vm278_vm0, %v874_v20, 0.0  ;;  %v762_v33 = vpop.eup %761  ;;  %545 = vmatpush.bf16.msra.mxu0 %v740_v47 }
  0x13   : > { %v319_v24 = vmul.f32 %v872_v19, %v872_v19  ;;  %v318_v25 = vmul.f32 %v864_v14, %v864_v14  ;;  %v320_v26 = vmul.f32 %v870_v18, %v870_v18  ;;  %v321_v30 = vmul.f32 %v874_v20, %v874_v20  ;;  %745 = vmatpush.bf16.msra.mxu1 %v740_v47 }
  0x14   : > { %v304_v34 = vmul.f32 32.0, %v762_v33  ;;  %vm308_vm1 = vweird.f32 %v762_v33 }
  0x15   : > { %v329_v27 = vsel %vm278_vm0, %v319_v24, 0.0  ;;  %v326_v28 = vsel %vm278_vm0, %v318_v25, 0.0  ;;  %v332_v29 = vsel %vm278_vm0, %v320_v26, 0.0  ;;  %v335_v31 = vsel %vm278_vm0, %v321_v30, 0.0 }
  0x16   : > { %v305_v35 = vsub.f32 1.0, %v304_v34 }
  0x18   : > { %301 = vadd.xlane.f32.xlu1 %v300_v9  ;;  %295 = vadd.xlane.f32.xlu0 %v294_v10  ;;  %v306_v36 = vmul.f32 %v762_v33, %v305_v35 }
  0x1a   : > { %342 = vadd.xlane.f32.xlu2 %v341_v11  ;;  %v307_v37 = vadd.f32 %v762_v33, %v306_v36 }
  0x1c   : > { %v894_v38 = vsel %vm308_vm1, %v762_v33, %v307_v37  ;;  %v951_v37 = vld [vmem:[%s1050_s1] ss:$0 sm:$0xff] }
  0x20   : > { %348 = vadd.xlane.f32.xlu1 %v347_v15  ;;  %345 = vadd.xlane.f32.xlu0 %v344_v16 }
  0x22   : > { %280 = vadd.xlane.f32.xlu2 %v279_v17 }
  0x28   : > { %286 = vadd.xlane.f32.xlu1 %v285_v21  ;;  %283 = vadd.xlane.f32.xlu0 %v282_v22 }
  0x2a   : > { %289 = vadd.xlane.f32.xlu2 %v288_v23 }
  0x30   : > { %330 = vadd.xlane.f32.xlu1 %v329_v27  ;;  %327 = vadd.xlane.f32.xlu0 %v326_v28 }
  0x32   : > { %333 = vadd.xlane.f32.xlu2 %v332_v29 }
  0x38   : > { %336 = vadd.xlane.f32.xlu0 %v335_v31 }
  0x83   : > { %v299_v39 = vpop.xlane.xlu1 %298  ;;  %v293_v40 = vpop.xlane.xlu0 %292 }
  0x84   : > { %v897_v41 = vmul.f32 %v894_v38, %v293_v40  ;;  %v914_v54 = vmul.f32 %v894_v38, %v299_v39 }
  0x85   : > { %v340_v42 = vpop.xlane.xlu2 %339 }
  0x86   : > { %v362_v43 = vmul.f32 %v897_v41, %v897_v41  ;;  %v354_v45 = vmul.f32 %v340_v42, %v894_v38  ;;  %v364_v59 = vmul.f32 %v914_v54, %v914_v54  ;;  %v378_v27 = vsub.f32 %v840_v1, %v897_v41 }
  0x87   : > { %v380_v31 = vsub.f32 %v838_v0, %v914_v54 }
  0x88   : > { %v370_v46 = vsub.f32 %v354_v45, %v362_v43 }
  0x8a   : > { %v386_v48 = vadd.f32 1e-06, %v370_v46 }
  0x8b   : > { %v302_v49 = vpop.xlane.xlu1 %301  ;;  %v296_v50 = vpop.xlane.xlu0 %295 }
  0x8c   : > { %v909_v51 = vmul.f32 %v894_v38, %v296_v50  ;;  %763 = vrsqrt.f32 %v386_v48  ;;  %v918_v56 = vmul.f32 %v894_v38, %v302_v49  ;;  %vm436_vm3 = vweird.f32 %v386_v48 }
  0x8d   : > { %v343_v52 = vpop.xlane.xlu2 %342 }
  0x8e   : > { %v363_v53 = vmul.f32 %v909_v51, %v909_v51  ;;  %v355_v55 = vmul.f32 %v343_v52, %v894_v38  ;;  %v365_v2 = vmul.f32 %v918_v56, %v918_v56  ;;  %v381_v34 = vsub.f32 %v851_v7, %v918_v56 }
  0x8f   : > { %v379_v39 = vsub.f32 %v848_v5, %v909_v51 }
  0x90   : > { %v371_v57 = vsub.f32 %v355_v55, %v363_v53 }
  0x92   : > { %v764_v58 = vpop.eup %763  ;;  %v387_v60 = vadd.f32 1e-06, %v371_v57  ;;  %v971_v57 = vld [vmem:[%s1051_s2] ss:$0 sm:$0xff] }
  0x93   : > { %v349_v61 = vpop.xlane.xlu1 %348  ;;  %v346_v62 = vpop.xlane.xlu0 %345  ;;  %v431_v63 = vmul.f32 %v764_v58, %v386_v48  ;;  %vm437_vm2 = vweird.f32 %v764_v58 }
  0x94   : > { %v357_v3 = vmul.f32 %v349_v61, %v894_v38  ;;  %v356_v4 = vmul.f32 %v346_v62, %v894_v38  ;;  %765 = vrsqrt.f32 %v387_v60  ;;  %vm438_vm4 = vmor %vm436_vm3, %vm437_vm2  ;;  %vm446_vm6 = vweird.f32 %v387_v60 }
  0x95   : > { %v281_v6 = vpop.xlane.xlu2 %280  ;;  %v432_v8 = vmul.f32 %v764_v58, %v431_v63 }
  0x96   : > { %v373_v9 = vsub.f32 %v357_v3, %v365_v2  ;;  %v372_v10 = vsub.f32 %v356_v4, %v364_v59  ;;  %v935_v28 = vmul.f32 %v894_v38, %v281_v6 }
  0x97   : > { %v433_v11 = vmul.f32 0.5, %v432_v8 }
  0x98   : > { %v926_v12 = vadd.f32 1e-06, %v373_v9  ;;  %v928_v13 = vadd.f32 1e-06, %v372_v10  ;;  %v358_v41 = vmul.f32 %v935_v28, %v935_v28 }
  0x99   : > { %v434_v15 = vsub.f32 1.5, %v433_v11 }
  0x9a   : > { %767 = vrsqrt.f32 %v926_v12  ;;  %v766_v16 = vpop.eup %765  ;;  %vm466_vm10 = vweird.f32 %v926_v12  ;;  %vm456_vm12 = vweird.f32 %v928_v13 }
  0x9b   : > { %769 = vrsqrt.f32 %v928_v13  ;;  %v287_v17 = vpop.xlane.xlu1 %286  ;;  %v284_v21 = vpop.xlane.xlu0 %283  ;;  %v435_v22 = vmul.f32 %v764_v58, %v434_v15  ;;  %v441_v23 = vmul.f32 %v766_v16, %v387_v60  ;;  %vm447_vm5 = vweird.f32 %v766_v16 }
  0x9c   : > { %v938_v29 = vmul.f32 %v894_v38, %v284_v21  ;;  %v946_v36 = vmul.f32 %v894_v38, %v287_v17  ;;  %vm448_vm7 = vmor %vm446_vm6, %vm447_vm5 }
  0x9d   : > { %v290_v24 = vpop.xlane.xlu2 %289  ;;  %v439_v25 = vsel %vm438_vm4, %v764_v58, %v435_v22  ;;  %v442_v26 = vmul.f32 %v766_v16, %v441_v23 }
  0x9e   : > { %v474_v1 = vmul.f32 %v439_v25, %v378_v27  ;;  %v359_v42 = vmul.f32 %v938_v29, %v938_v29  ;;  %v360_v49 = vmul.f32 %v946_v36, %v946_v36  ;;  %v965_v50 = vmul.f32 %v894_v38, %v290_v24 }
  0x9f   : > { %v443_v32 = vmul.f32 0.5, %v442_v26 }
  0xa0   : > { %v768_v30 = vpop.eup %767  ;;  %v486_v52 = vmul.f32 %v951_v37, %v474_v1 }
  0xa1   : > { %v770_v33 = vpop.eup %769  ;;  %v461_v35 = vmul.f32 %v768_v30, %v926_v12  ;;  %v444_v0 = vsub.f32 1.5, %v443_v32  ;;  %vm467_vm8 = vweird.f32 %v768_v30  ;;  %v361_v12 = vmul.f32 %v965_v50, %v965_v50 }
  0xa2   : > { %v451_v40 = vmul.f32 %v770_v33, %v928_v13  ;;  %vm457_vm9 = vweird.f32 %v770_v33  ;;  %vm468_vm11 = vmor %vm466_vm10, %vm467_vm8  ;;  %v498_v8 = vadd.f32 %v971_v57, %v486_v52 }
  0xa3   : > { %v462_v7 = vmul.f32 %v768_v30, %v461_v35  ;;  %v331_v43 = vpop.xlane.xlu1 %330  ;;  %v328_v44 = vpop.xlane.xlu0 %327  ;;  %v445_v45 = vmul.f32 %v766_v16, %v444_v0  ;;  %vm458_vm13 = vmor %vm456_vm12, %vm457_vm9 }
  0xa4   : > { %v452_v46 = vmul.f32 %v770_v33, %v451_v40  ;;  %v351_v47 = vmul.f32 %v331_v43, %v894_v38  ;;  %v350_v5 = vmul.f32 %v328_v44, %v894_v38 }
  0xa5   : > { %v463_v48 = vmul.f32 0.5, %v462_v7  ;;  %v334_v51 = vpop.xlane.xlu2 %333  ;;  %v449_v53 = vsel %vm448_vm7, %v766_v16, %v445_v45 }
  0xa6   : > { %v453_v54 = vmul.f32 0.5, %v452_v46  ;;  %v367_v55 = vsub.f32 %v351_v47, %v359_v42  ;;  %v366_v56 = vsub.f32 %v350_v5, %v358_v41  ;;  %v352_v59 = vmul.f32 %v334_v51, %v894_v38 }
  0xa7   : > { %v464_v58 = vsub.f32 1.5, %v463_v48  ;;  %v475_v60 = vmul.f32 %v449_v53, %v379_v39  ;;  %v375_v46 = vsub.f32 %v872_v19, %v938_v29  ;;  %v374_v51 = vsub.f32 %v864_v14, %v935_v28 }
  0xa8   : > { %v454_v61 = vsub.f32 1.5, %v453_v54  ;;  %v383_v62 = vadd.f32 1e-06, %v367_v55  ;;  %v382_v63 = vadd.f32 1e-06, %v366_v56  ;;  %v368_v3 = vsub.f32 %v352_v59, %v360_v49 }
  0xa9   : > { %v465_v2 = vmul.f32 %v768_v30, %v464_v58  ;;  %v487_v4 = vmul.f32 %v951_v37, %v475_v60  ;;  %v376_v58 = vsub.f32 %v870_v18, %v946_v36 }
  0xaa   : > { %v455_v6 = vmul.f32 %v770_v33, %v454_v61  ;;  %771 = vrsqrt.f32 %v383_v62  ;;  %v384_v10 = vadd.f32 1e-06, %v368_v3  ;;  %vm406_vm1 = vweird.f32 %v383_v62 }
  0xab   : > { %v469_v9 = vsel %vm468_vm11, %v768_v30, %v465_v2  ;;  %773 = vrsqrt.f32 %v382_v63  ;;  %v337_v11 = vpop.xlane.xlu0 %336  ;;  %v499_v15 = vadd.f32 %v971_v57, %v487_v4  ;;  %vm396_vm3 = vweird.f32 %v382_v63 }
  0xac   : > { %v459_v16 = vsel %vm458_vm13, %v770_v33, %v455_v6  ;;  %v353_v17 = vmul.f32 %v337_v11, %v894_v38  ;;  %v477_v21 = vmul.f32 %v469_v9, %v381_v34  ;;  %775 = vrsqrt.f32 %v384_v10 }
  0xad   : > { %v504_v22 = vpack.c.bf16 %v499_v15, %v498_v8  ;;  %v476_v13 = vmul.f32 %v459_v16, %v380_v31  ;;  %vm416_vm6 = vweird.f32 %v384_v10  ;;  %v377_v3 = vsub.f32 %v874_v20, %v965_v50  ;;  %v760_v20 = vld [vmem:[%s1053_s4] ss:$0 sm:$0xff] }
  0xae   : > { %v369_v23 = vsub.f32 %v353_v17, %v361_v12  ;;  %v489_v24 = vmul.f32 %v951_v37, %v477_v21  ;;  %vm575_vm11 = vcmask 60416  }
  0xaf   : > { %736 = vmatmul.msk.bf16.vlgmr.msra.gmra.mxu2 %vm278_vm0, %v504_v22  ;;  %v488_v25 = vmul.f32 %v951_v37, %v476_v13 }
  0xb0   : > { %v772_v26 = vpop.eup %771  ;;  %v385_v27 = vadd.f32 1e-06, %v369_v23  ;;  %v501_v30 = vadd.f32 %v971_v57, %v489_v24 }
  0xb1   : > { %v774_v32 = vpop.eup %773  ;;  %v401_v33 = vmul.f32 %v772_v26, %v383_v62  ;;  %v500_v35 = vadd.f32 %v971_v57, %v488_v25  ;;  %vm407_vm14 = vweird.f32 %v772_v26 }
  0xb2   : > { %v391_v38 = vmul.f32 %v774_v32, %v382_v63  ;;  %777 = vrsqrt.f32 %v385_v27  ;;  %v776_v34 = vpop.eup %775  ;;  %vm397_vm15 = vweird.f32 %v774_v32  ;;  %vm408_vm2 = vmor %vm406_vm1, %vm407_vm14  ;;  %vm426_vm9 = vweird.f32 %v385_v27 }
  0xb3   : > { %v402_v1 = vmul.f32 %v772_v26, %v401_v33  ;;  %v505_v31 = vpack.c.bf16 %v501_v30, %v500_v35  ;;  %v411_v0 = vmul.f32 %v776_v34, %v384_v10  ;;  %vm417_vm4 = vweird.f32 %v776_v34  ;;  %vm398_vm5 = vmor %vm396_vm3, %vm397_vm15 }
  0xb4   : > { %v392_v39 = vmul.f32 %v774_v32, %v391_v38  ;;  %vm418_vm7 = vmor %vm416_vm6, %vm417_vm4 }
  0xb5   : > { %v403_v40 = vmul.f32 0.5, %v402_v1  ;;  %737 = vmatmul.msk.bf16.vlgmr.msra.gmra.mxu3 %vm278_vm0, %v505_v31  ;;  %v412_v41 = vmul.f32 %v776_v34, %v411_v0 }
  0xb6   : > { %v393_v7 = vmul.f32 0.5, %v392_v39 }
  0xb7   : > { %v404_v42 = vsub.f32 1.5, %v403_v40  ;;  %v413_v45 = vmul.f32 0.5, %v412_v41 }
  0xb8   : > { %v778_v43 = vpop.eup %777  ;;  %v394_v44 = vsub.f32 1.5, %v393_v7 }
  0xb9   : > { %v405_v47 = vmul.f32 %v772_v26, %v404_v42  ;;  %v421_v5 = vmul.f32 %v778_v43, %v385_v27  ;;  %v414_v49 = vsub.f32 1.5, %v413_v45  ;;  %vm427_vm8 = vweird.f32 %v778_v43 }
  0xba   : > { %v395_v48 = vmul.f32 %v774_v32, %v394_v44  ;;  %vm428_vm10 = vmor %vm426_vm9, %vm427_vm8 }
  0xbb   : > { %v409_v52 = vsel %vm408_vm2, %v772_v26, %v405_v47  ;;  %v422_v53 = vmul.f32 %v778_v43, %v421_v5  ;;  %v415_v55 = vmul.f32 %v776_v34, %v414_v49 }
  0xbc   : > { %v399_v54 = vsel %vm398_vm5, %v774_v32, %v395_v48  ;;  %v471_v56 = vmul.f32 %v409_v52, %v375_v46 }
  0xbd   : > { %v423_v19 = vmul.f32 0.5, %v422_v53  ;;  %v470_v29 = vmul.f32 %v399_v54, %v374_v51  ;;  %v419_v59 = vsel %vm418_vm7, %v776_v34, %v415_v55 }
  0xbe   : > { %v483_v60 = vmul.f32 %v951_v37, %v471_v56  ;;  %v472_v62 = vmul.f32 %v419_v59, %v376_v58 }
  0xbf   : > { %v424_v61 = vsub.f32 1.5, %v423_v19  ;;  %v482_v14 = vmul.f32 %v951_v37, %v470_v29 }
  0xc0   : > { %v495_v28 = vadd.f32 %v971_v57, %v483_v60  ;;  %v484_v6 = vmul.f32 %v951_v37, %v472_v62 }
  0xc1   : > { %v425_v63 = vmul.f32 %v778_v43, %v424_v61  ;;  %v494_v2 = vadd.f32 %v971_v57, %v482_v14 }
  0xc2   : > { %v496_v9 = vadd.f32 %v971_v57, %v484_v6 }
  0xc3   : > { %v429_v18 = vsel %vm428_vm10, %v778_v43, %v425_v63  ;;  %v502_v36 = vpack.c.bf16 %v495_v28, %v494_v2 }
  0xc4   : > { %v473_v4 = vmul.f32 %v429_v18, %v377_v3 }
  0xc5   : > { %734 = vmatmul.msk.bf16.vlgmr.msra.gmra.mxu0 %vm278_vm0, %v502_v36 }
  0xc6   : > { %v485_v8 = vmul.f32 %v951_v37, %v473_v4 }
  0xc8   : > { %v497_v10 = vadd.f32 %v971_v57, %v485_v8 }
  0xca   : > { %v503_v11 = vpack.c.bf16 %v497_v10, %v496_v9 }
  0xcc   : > { %735 = vmatmul.msk.bf16.vlgmr.msra.gmra.mxu1 %vm278_vm0, %v503_v11  ;;  %vm616_vm0 = vcmask 453632  }
 0x132   : > { %v557_v50 = vpop.f32.mrf.mxu2 }
 0x133   : > { %v558_v15 = vadd.f32 %v760_v20, %v557_v50 }
 0x135   : > { %v571_v37 = vpack.c.bf16 %v558_v15, %v558_v15 }
 0x137   : > { %580 = vst.msk [vmem:[%s1015_s17 + $0x10] sm:$0xf] %vm575_vm11, %v571_v37 }
 0x138   : > { %v562_v57 = vpop.f32.mrf.mxu3 }
 0x139   : > { %v563_v16 = vadd.f32 %v760_v20, %v562_v57 }
 0x13a   : > { %v559_v12 = vpop.f32.mrf.mxu2 }
 0x13b   : > { %v573_v17 = vpack.c.bf16 %v563_v16, %v563_v16  ;;  %v560_v21 = vadd.f32 %v760_v20, %v559_v12 }
 0x13d   : > { %582 = vst.msk [vmem:[%s1015_s17 + $0x18] sm:$0xf] %vm575_vm11, %v573_v17  ;;  %v572_v22 = vpack.c.bf16 %v560_v21, %v560_v21 }
 0x13f   : > { %581 = vst.msk [vmem:[%s1015_s17 + $0x14] sm:$0xf] %vm575_vm11, %v572_v22 }
 0x140   : > { %v564_v13 = vpop.f32.mrf.mxu3 }
 0x141   : > { %v565_v23 = vadd.f32 %v760_v20, %v564_v13 }
 0x142   : > { %v547_v24 = vpop.f32.mrf.mxu0 }
 0x143   : > { %v574_v25 = vpack.c.bf16 %v565_v23, %v565_v23  ;;  %v548_v26 = vadd.f32 %v760_v20, %v547_v24 }
 0x145   : > { %583 = vst.msk [vmem:[%s1015_s17 + $0x1c] sm:$0xf] %vm575_vm11, %v574_v25  ;;  %v567_v27 = vpack.c.bf16 %v548_v26, %v548_v26 }
 0x147   : > { %576 = vst.msk [vmem:[%s1015_s17] sm:$0xf] %vm575_vm11, %v567_v27  ;;  %592 = vrot.lane.b32.xlu1 %v567_v27, %s788_s18 }
 0x149   : > { %v552_v30 = vpop.f32.mrf.mxu1 }
 0x14a   : > { %v549_v32 = vpop.f32.mrf.mxu0  ;;  %v553_v33 = vadd.f32 %v760_v20, %v552_v30 }
 0x14b   : > { %v550_v35 = vadd.f32 %v760_v20, %v549_v32 }
 0x14c   : > { %v569_v38 = vpack.c.bf16 %v553_v33, %v553_v33 }
 0x14d   : > { %v568_v34 = vpack.c.bf16 %v550_v35, %v550_v35 }
 0x14e   : > { %578 = vst.msk [vmem:[%s1015_s17 + $0x8] sm:$0xf] %vm575_vm11, %v569_v38  ;;  %596 = vrot.lane.b32.xlu0 %v569_v38, %s788_s18 }
 0x14f   : > { %577 = vst.msk [vmem:[%s1015_s17 + $0x4] sm:$0xf] %vm575_vm11, %v568_v34  ;;  %594 = vrot.lane.b32.xlu2 %v568_v34, %s788_s18  ;;  %600 = vrot.lane.b32.xlu1 %v571_v37, %s788_s18 }
 0x151   : > { %v554_v1 = vpop.f32.mrf.mxu1 }
 0x152   : > { %v555_v31 = vadd.f32 %v760_v20, %v554_v1 }
 0x154   : > { %v570_v39 = vpack.c.bf16 %v555_v31, %v555_v31 }
 0x156   : > { %579 = vst.msk [vmem:[%s1015_s17 + $0xc] sm:$0xf] %vm575_vm11, %v570_v39  ;;  %602 = vrot.lane.b32.xlu0 %v572_v22, %s788_s18 }
 0x157   : > { %606 = vrot.lane.b32.xlu1 %v574_v25, %s788_s18  ;;  %598 = vrot.lane.b32.xlu2 %v570_v39, %s788_s18 }
 0x15f   : > { %604 = vrot.lane.b32.xlu2 %v573_v17, %s788_s18 }
 0x1a9   : > { %v595_v0 = vpop.permute.xlu2 %594 }
 0x1aa   : > { %618 = vst.msk [vmem:[%s267_s22 + $0x4] sm:$0xf] %vm616_vm0, %v595_v0 }
 0x1b1   : > { %v599_v40 = vpop.permute.xlu2 %598 }
 0x1b2   : > { %620 = vst.msk [vmem:[%s267_s22 + $0xc] sm:$0xf] %vm616_vm0, %v599_v40 }
 0x1b9   : > { %v593_v7 = vpop.permute.xlu1 %592  ;;  %v605_v41 = vpop.permute.xlu2 %604 }
 0x1ba   : > { %617 = vst.msk [vmem:[%s267_s22] sm:$0xf] %vm616_vm0, %v593_v7 }
 0x1bb   : > { %623 = vst.msk [vmem:[%s267_s22 + $0x18] sm:$0xf] %vm616_vm0, %v605_v41 }
 0x1c0   : > { %v597_v42 = vpop.permute.xlu0 %596 }
 0x1c1   : > { %v601_v43 = vpop.permute.xlu1 %600  ;;  %619 = vst.msk [vmem:[%s267_s22 + $0x8] sm:$0xf] %vm616_vm0, %v597_v42 }
 0x1c2   : > { %621 = vst.msk [vmem:[%s267_s22 + $0x10] sm:$0xf] %vm616_vm0, %v601_v43 }
 0x1c8   : > { %v603_v44 = vpop.permute.xlu0 %602 }
 0x1c9   : > { %v607_v45 = vpop.permute.xlu1 %606  ;;  %622 = vst.msk [vmem:[%s267_s22 + $0x14] sm:$0xf] %vm616_vm0, %v603_v44 }
 0x1ca   : > { %624 = vst.msk [vmem:[%s267_s22 + $0x1c] sm:$0xf] %vm616_vm0, %v607_v45 }
 0x1cb PF: > { %s17_s21 = sadd.s32 1, %s785_s21  }
 0x1cc   : > { %p14_p4 = scmp.ge.s32.totalorder %s17_s21, 10  }
 0x1ce   :  { %16 = sbr.rel (!%p14_p4) target bundleno = 1 (0x1), region = 82 }

// kernel: _lambda_.8
= control target key start
LH: loop header
LB: loop body
LE: loop exit
PB: predicated region body
PF: predicated region fallthrough
CT: control target
= control target key end

     0   :  { %s3531_s24 = smov 0   ;;  %s4536_s0 = inlined_call_operand.vmem [shape: bf16[512,8], index: 0, kind: input, shape index: {}]   ;;  %s4537_s1 = inlined_call_operand.vmem [shape: bf16[512,56], index: 1, kind: input, shape index: {}]   ;;  %s4538_s2 = inlined_call_operand.vmem [shape: f32[512,32], index: 2, kind: input, shape index: {}, may-alias: {2,17}]   ;;  %s4539_s3 = inlined_call_operand.vmem [shape: bf16[8,16], index: 3, kind: input, shape index: {}]   ;;  %s4540_s4 = inlined_call_operand.vmem [shape: f32[1,16], index: 4, kind: input, shape index: {}]   ;;  %s4541_s5 = inlined_call_operand.vmem [shape: bf16[16,32], index: 5, kind: input, shape index: {}]   ;;  %s4542_s6 = inlined_call_operand.vmem [shape: f32[1,32], index: 6, kind: input, shape index: {}, may-alias: {6,8,11,15}]   ;;  %s4543_s7 = inlined_call_operand.vmem [shape: bf16[32,32], index: 7, kind: input, shape index: {}]   ;;  %s4544_s8 = inlined_call_operand.vmem [shape: f32[1,32], index: 8, kind: input, shape index: {}, may-alias: {6,8,11,15}]   ;;  %s4545_s9 = inlined_call_operand.vmem [shape: f32[1,32], index: 9, kind: input, shape index: {}, may-alias: {9,10,16}]   ;;  %s4546_s10 = inlined_call_operand.vmem [shape: f32[1,32], index: 10, kind: input, shape index: {}, may-alias: {9,10,16}]   ;;  %s4547_s11 = inlined_call_operand.vmem [shape: f32[1,32], index: 11, kind: input, shape index: {}, may-alias: {6,8,11,15}]   ;;  %s4548_s12 = inlined_call_operand.vmem [shape: bf16[32,128], index: 12, kind: input, shape index: {}]   ;;  %s4549_s13 = inlined_call_operand.vmem [shape: f32[1,128], index: 13, kind: input, shape index: {}]   ;;  %s4550_s14 = inlined_call_operand.vmem [shape: bf16[128,32], index: 14, kind: input, shape index: {}]   ;;  %s4551_s15 = inlined_call_operand.vmem [shape: f32[1,32], index: 15, kind: input, shape index: {}, may-alias: {6,8,11,15}]   ;;  %s4552_s16 = inlined_call_operand.vmem [shape: f32[1,32], index: 16, kind: input, shape index: {}, may-alias: {9,10,16}]   ;;  %s4553_s17 = inlined_call_operand.vmem [shape: f32[512,32], index: 17, kind: output, shape index: {}, may-alias: {2,17}]  }
   0x1   :  { %4556 = sst [smem:[#allocation2_spill]] %s4536_s0 }
   0x2   :  { %4557 = sst [smem:[#allocation3_spill]] %s4537_s1 }
   0x3 LB: > { %s2610_s25 = sadd.s32 4294967295, %s3420_s24   ;;  %p2614_p0 = scmp.ge.s32.totalorder %s3420_s24, 1  ;;  %s3420_s24 = sphi %s3531_s24, %s27_s24  }
   0x4   : > { %p510_p1 = scmp.lt.s32.totalorder %s3420_s24, 9 }
   0x6   : > { %p511_p2 = pnand %p2614_p0, %p510_p1 }
   0x7   : > { %s2615_s26 = sshll.u32 (!%p511_p2), %s2610_s25, 3  ;;  %s4558_s0 = sld [smem:[#allocation2_spill]] (!%p511_p2) }
   0x8   : > { %514 = sbr.rel (%p511_p2) target bundleno = 1200 (0x4b0), region = 88  ;;  %p573_p3 = scmp.lt.s32.totalorder (!%p511_p2), %s2615_s26, 63 }
   0x9   : > { %s4559_s1 = sld [smem:[#allocation3_spill]] (!%p511_p2)  ;;  %s3430_s21 = smov (!%p511_p2), 120  }
   0xa   : > { %s3439_s18 = smov (!%p511_p2), 104  }
   0xd   : > { %v3422_v0 = vmov 1   ;;  %v3423_v1 = vmov 0   ;;  %s4562_s26 = smov (!%p573_p3, %s2615_s26), 63  ;;  %v3424_v38 = vmov 2   ;;  %v3425_v39 = vmov 4  }
   0xe   : > { %2792 = vset.pattern.permute.xlu0 %v3422_v0  ;;  %2770 = vset.pattern.permute.xlu1 %v3423_v1  ;;  %s2616_s27 = sshll.u32 %s4562_s26, 2  ;;  %v3426_v40 = vmov 5   ;;  %v3427_v41 = vmov 3   ;;  %v4554_v42 = vmov 6   ;;  %v3429_v43 = vmov 7   ;;  %s2620_s22 = sshll.u32 %s4562_s26, 3 }
   0xf   : > { %2781 = vset.pattern.permute.xlu2 %v3422_v0  ;;  %s576_s30 = scalar_lea.vmem %s4558_s0, %s2616_s27  ;;  %s582_s20 = scalar_lea.vmem %s4559_s1, %s2616_s27  ;;  %v645_v48 = vld [vmem:[%s4539_s3] sm:$0xf]  ;;  %vm2005_vm0 = vcmask 261120  }
  0x10   : > { %v2730_v2 = vld [vmem:[%s576_s30 + $0x10] sm:$0xff]   ;;  %v2694_v4 = vld [vmem:[%s576_s30] sm:$0xff]   ;;  %v2731_v10 = vld [vmem:[%s576_s30 + $0x18] sm:$0xff]   ;;  %v3639_v52 = vunpack.c.l.bf16 %v645_v48  ;;  %s4309_s29 = scalar_lea.vmem %s4538_s2, %s2620_s22  ;;  %s4507_s28 = scalar_lea.vmem %s4553_s17, %s2620_s22 }
  0x11   : > { %v3551_v3 = vld [vmem:[%s582_s20 + $0x10] sm:$0xff]   ;;  %v2703_v5 = vunpack.c.l.bf16 %v2730_v2  ;;  %v2704_v6 = vunpack.c.h.bf16 %v2730_v2  ;;  %v3555_v9 = vld [vmem:[%s582_s20] sm:$0xff]   ;;  %v3557_v11 = vld [vmem:[%s582_s20 + $0x18] sm:$0xff]   ;;  %v2695_v12 = vunpack.c.l.bf16 %v2694_v4  ;;  %v2696_v13 = vunpack.c.h.bf16 %v2694_v4 }
  0x12   : > { %v2719_v7 = vunpack.c.l.bf16 %v3551_v3  ;;  %v2720_v8 = vunpack.c.h.bf16 %v3551_v3  ;;  %v2711_v14 = vunpack.c.l.bf16 %v3555_v9  ;;  %v2712_v15 = vunpack.c.h.bf16 %v3555_v9  ;;  %v2729_v16 = vld [vmem:[%s576_s30 + $0x8] sm:$0xff]   ;;  %v3652_v57 = vld [vmem:[%s4540_s4] ss:$0 sm:$0xff] }
  0x13   : > { %v2707_v19 = vunpack.c.l.bf16 %v2731_v10  ;;  %v2708_v20 = vunpack.c.h.bf16 %v2731_v10  ;;  %v2723_v23 = vunpack.c.l.bf16 %v3557_v11  ;;  %v2724_v24 = vunpack.c.h.bf16 %v3557_v11  ;;  %v3571_v25 = vld [vmem:[%s582_s20 + $0x8] sm:$0xff]  }
  0x14   : > { %v641_v17 = vmul.f32 %v2719_v7, %v2703_v5  ;;  %v642_v18 = vmul.f32 %v2720_v8, %v2704_v6  ;;  %v637_v21 = vmul.f32 %v2711_v14, %v2695_v12  ;;  %v638_v22 = vmul.f32 %v2712_v15, %v2696_v13 }
  0x15   : > { %v2699_v26 = vunpack.c.l.bf16 %v2729_v16  ;;  %v2700_v27 = vunpack.c.h.bf16 %v2729_v16  ;;  %v643_v28 = vmul.f32 %v2723_v23, %v2707_v19  ;;  %v644_v29 = vmul.f32 %v2724_v24, %v2708_v20 }
  0x16   : > { %v2715_v30 = vunpack.c.l.bf16 %v3571_v25  ;;  %v2716_v31 = vunpack.c.h.bf16 %v3571_v25  ;;  %v2793_v32 = vpack.i.bf16 %v642_v18, %v641_v17  ;;  %v2782_v35 = vpack.i.bf16 %v638_v22, %v637_v21 }
  0x17   : > { %v2776_v36 = vpack.i.bf16 %v644_v29, %v643_v28  ;;  %v3610_v46 = vpack.i.bf16 %v2712_v15, %v2711_v14  ;;  %v3629_v49 = vpack.i.bf16 %v2720_v8, %v2719_v7  ;;  %v3637_v51 = vpack.i.bf16 %v2724_v24, %v2723_v23 }
  0x18   : > { %v639_v33 = vmul.f32 %v2715_v30, %v2699_v26  ;;  %v640_v34 = vmul.f32 %v2716_v31, %v2700_v27  ;;  %2794 = vperm.xlu0 %2792, %v2793_v32   ;;  %2772 = vperm.xlu1 %2770, %v2793_v32   ;;  %v3616_v47 = vpack.i.bf16 %v2716_v31, %v2715_v30  ;;  %v3643_v53 = vperm.slane %v3639_v52, 0 }
  0x19   : > { %2783 = vperm.xlu2 %2781, %v2782_v35   ;;  %v3647_v54 = vperm.slane %v3639_v52, 1  ;;  %v3655_v62 = vperm.slane %v3639_v52, 2 }
  0x1a   : > { %v2787_v37 = vpack.i.bf16 %v640_v34, %v639_v33 }
  0x20   : > { %2821 = vset.pattern.permute.xlu0 %v3424_v38  ;;  %2777 = vperm.xlu1 %2770, %v2776_v36  }
  0x21   : > { %2823 = vperm.xlu0 %2821, %v2776_v36   ;;  %2788 = vperm.xlu2 %2781, %v2787_v37  }
  0x28   : > { %2798 = vset.pattern.permute.xlu1 %v3422_v0 }
  0x29   : > { %2849 = vset.pattern.permute.xlu0 %v3425_v39  ;;  %2800 = vperm.xlu1 %2798, %v2776_v36  }
  0x2a   : > { %2851 = vperm.xlu0 %2849, %v2782_v35   ;;  %2804 = vset.pattern.permute.xlu2 %v3424_v38 }
  0x2b   : > { %2806 = vperm.xlu2 %2804, %v2782_v35  }
  0x31   : > { %2810 = vset.pattern.permute.xlu1 %v3424_v38 }
  0x32   : > { %2812 = vperm.xlu1 %2810, %v2787_v37   ;;  %2878 = vset.pattern.permute.xlu0 %v3426_v40 }
  0x33   : > { %2880 = vperm.xlu0 %2878, %v2787_v37   ;;  %2817 = vperm.xlu2 %2804, %v2793_v32  }
  0x3a   : > { %2827 = vset.pattern.permute.xlu1 %v3427_v41 }
  0x3b   : > { %2907 = vset.pattern.permute.xlu0 %v4554_v42  ;;  %2829 = vperm.xlu1 %2827, %v2782_v35  }
  0x3c   : > { %2909 = vperm.xlu0 %2907, %v2793_v32   ;;  %2833 = vset.pattern.permute.xlu2 %v3427_v41 }
  0x3d   : > { %2835 = vperm.xlu2 %2833, %v2787_v37  }
  0x43   : > { %2840 = vperm.xlu1 %2827, %v2793_v32  }
  0x44   : > { %2935 = vset.pattern.permute.xlu0 %v3429_v43 }
  0x45   : > { %2937 = vperm.xlu0 %2935, %v2776_v36   ;;  %2845 = vperm.xlu2 %2833, %v2776_v36  }
  0x4b   : > { %2855 = vset.pattern.permute.xlu1 %v3425_v39 }
  0x4c   : > { %2857 = vperm.xlu1 %2855, %v2787_v37  }
  0x4d   : > { %2941 = vset.pattern.permute.xlu0 %v3423_v1  ;;  %2861 = vset.pattern.permute.xlu2 %v3425_v39 }
  0x4e   : > { %2943 = vperm.xlu0 %2941, %v2782_v35   ;;  %2863 = vperm.xlu2 %2861, %v2793_v32  }
  0x54   : > { %2868 = vperm.xlu1 %2855, %v2776_v36  }
  0x56   : > { %2948 = vperm.xlu0 %2941, %v2787_v37   ;;  %2872 = vset.pattern.permute.xlu2 %v3426_v40 }
  0x57   : > { %2874 = vperm.xlu2 %2872, %v2782_v35  }
  0x5c   : > { %2884 = vset.pattern.permute.xlu1 %v3426_v40 }
  0x5d   : > { %2886 = vperm.xlu1 %2884, %v2793_v32  }
  0x5f   : > { %2891 = vperm.xlu2 %2872, %v2776_v36  }
  0x65   : > { %2895 = vset.pattern.permute.xlu1 %v4554_v42 }
  0x66   : > { %2897 = vperm.xlu1 %2895, %v2782_v35  }
  0x67   : > { %2901 = vset.pattern.permute.xlu2 %v4554_v42 }
  0x68   : > { %2903 = vperm.xlu2 %2901, %v2787_v37  }
  0x6e   : > { %2914 = vperm.xlu1 %2895, %v2776_v36  }
  0x70   : > { %2918 = vset.pattern.permute.xlu2 %v3429_v43 }
  0x71   : > { %2920 = vperm.xlu2 %2918, %v2782_v35  }
  0x73   : > { %v3601_v44 = vpop.permute.xlu2 %2783 }
  0x76   : > { %2924 = vset.pattern.permute.xlu1 %v3429_v43 }
  0x77   : > { %2926 = vperm.xlu1 %2924, %v2787_v37  }
  0x79   : > { %2931 = vperm.xlu2 %2918, %v2793_v32  }
  0x7b   : > { %v3604_v45 = vpop.permute.xlu2 %2788 }
  0x7f   : > { %2953 = vrot.lane.b32.xlu1 %v3610_v46, %s3430_s21 }
  0x80   : > { %2977 = vset.pattern.permute.xlu1 %v3423_v1 }
  0x81   : > { %2958 = vrot.lane.b32.xlu2 %v3616_v47, %s3430_s21 }
  0x82   : > { %2983 = vset.pattern.permute.xlu2 %v3423_v1 }
  0x85   : > { %v3631_v50 = vpop.permute.xlu2 %2806 }
  0x87   : > { %2963 = vrot.lane.b32.xlu1 %v3629_v49, %s3430_s21 }
  0x89   : > { %2968 = vrot.lane.b32.xlu2 %v3637_v51, %s3430_s21 }
  0x8a   : > { %v2773_v55 = vpop.permute.xlu1 %2772  ;;  %v2795_v56 = vpop.permute.xlu0 %2794 }
  0x8b   : > { %v2775_v58 = vunpack.i.h.bf16 %v2773_v55  ;;  %v2774_v59 = vunpack.i.l.bf16 %v2773_v55  ;;  %v2797_v60 = vunpack.i.h.bf16 %v2795_v56  ;;  %v2796_v61 = vunpack.i.l.bf16 %v2795_v56 }
  0x8d   : > { %v713_v63 = vmul.f32 %v2775_v58, %v3643_v53  ;;  %v712_v1 = vmul.f32 %v2774_v59, %v3643_v53  ;;  %v762_v2 = vmul.f32 %v2797_v60, %v3647_v54  ;;  %v761_v3 = vmul.f32 %v2796_v61, %v3647_v54  ;;  %v2818_v4 = vpop.permute.xlu2 %2817 }
  0x8e   : > { %v2820_v5 = vunpack.i.h.bf16 %v2818_v4  ;;  %v2819_v6 = vunpack.i.l.bf16 %v2818_v4  ;;  %v2786_v61 = vunpack.i.h.bf16 %v3601_v44  ;;  %v2809_v4 = vunpack.i.h.bf16 %v3631_v50 }
  0x8f   : > { %v721_v7 = vadd.f32 %v3652_v57, %v713_v63  ;;  %v720_v8 = vadd.f32 %v3652_v57, %v712_v1  ;;  %v2785_v63 = vunpack.i.l.bf16 %v3601_v44 }
  0x90   : > { %v811_v9 = vmul.f32 %v2820_v5, %v3655_v62  ;;  %v810_v10 = vmul.f32 %v2819_v6, %v3655_v62  ;;  %v2808_v5 = vunpack.i.l.bf16 %v3631_v50 }
  0x91   : > { %v769_v11 = vadd.f32 %v761_v3, %v720_v8  ;;  %v770_v12 = vadd.f32 %v762_v2, %v721_v7 }
  0x92   : > { %v2778_v13 = vpop.permute.xlu1 %2777 }
  0x93   : > { %v3665_v14 = vadd.f32 %v811_v9, %v770_v12  ;;  %v3667_v15 = vadd.f32 %v810_v10, %v769_v11  ;;  %v2824_v16 = vpop.permute.xlu0 %2823  ;;  %v2780_v17 = vunpack.i.h.bf16 %v2778_v13  ;;  %v2779_v18 = vunpack.i.l.bf16 %v2778_v13 }
  0x94   : > { %v2826_v8 = vunpack.i.h.bf16 %v2824_v16  ;;  %v2825_v9 = vunpack.i.l.bf16 %v2824_v16  ;;  %v758_v10 = vmul.f32 %v2786_v61, %v3647_v54  ;;  %v757_v11 = vmul.f32 %v2785_v63, %v3647_v54 }
  0x95   : > { %v715_v20 = vmul.f32 %v2780_v17, %v3643_v53  ;;  %v714_v21 = vmul.f32 %v2779_v18, %v3643_v53  ;;  %v2791_v13 = vunpack.i.h.bf16 %v3604_v45  ;;  %v3713_v17 = vperm.slane %v3639_v52, 3 }
  0x96   : > { %v807_v18 = vmul.f32 %v2809_v4, %v3655_v62 }
  0x97   : > { %v3669_v19 = vpop.permute.xlu2 %2835  ;;  %v723_v26 = vadd.f32 %v3652_v57, %v715_v20  ;;  %v722_v27 = vadd.f32 %v3652_v57, %v714_v21  ;;  %v806_v20 = vmul.f32 %v2808_v5, %v3655_v62  ;;  %v760_v63 = vmul.f32 %v2791_v13, %v3647_v54 }
  0x98   : > { %v3754_v13 = vperm.slane %v3639_v52, 7 }
  0x9b   : > { %v2801_v22 = vpop.permute.xlu1 %2800 }
  0x9c   : > { %v2803_v23 = vunpack.i.h.bf16 %v2801_v22  ;;  %v2802_v24 = vunpack.i.l.bf16 %v2801_v22  ;;  %v3673_v25 = vpop.permute.xlu0 %2851  ;;  %v813_v22 = vmul.f32 %v2826_v8, %v3655_v62 }
  0x9d   : > { %v2854_v4 = vunpack.i.h.bf16 %v3673_v25 }
  0x9e   : > { %v764_v28 = vmul.f32 %v2803_v23, %v3647_v54  ;;  %v763_v29 = vmul.f32 %v2802_v24, %v3647_v54  ;;  %v812_v23 = vmul.f32 %v2825_v9, %v3655_v62 }
  0x9f   : > { %v2846_v32 = vpop.permute.xlu2 %2845 }
  0xa0   : > { %v771_v30 = vadd.f32 %v763_v29, %v722_v27  ;;  %v772_v31 = vadd.f32 %v764_v28, %v723_v26  ;;  %v2848_v24 = vunpack.i.h.bf16 %v2846_v32  ;;  %v2847_v26 = vunpack.i.l.bf16 %v2846_v32 }
  0xa1   : > { %v2790_v28 = vunpack.i.l.bf16 %v3604_v45  ;;  %v2838_v29 = vunpack.i.h.bf16 %v3669_v19  ;;  %v2853_v32 = vunpack.i.l.bf16 %v3673_v25  ;;  %v3746_v25 = vperm.slane %v3639_v52, 6 }
  0xa2   : > { %v821_v8 = vadd.f32 %v813_v22, %v772_v31  ;;  %v862_v9 = vmul.f32 %v2848_v24, %v3713_v17 }
  0xa4   : > { %v3679_v33 = vpop.permute.xlu1 %2812  ;;  %v870_v22 = vadd.f32 %v862_v9, %v821_v8 }
  0xa5   : > { %v3681_v34 = vpop.permute.xlu0 %2880  ;;  %v2814_v31 = vunpack.i.l.bf16 %v3679_v33 }
  0xa6   : > { %v2883_v24 = vunpack.i.h.bf16 %v3681_v34 }
  0xa8   : > { %v3683_v35 = vpop.permute.xlu2 %2863 }
  0xad   : > { %v3685_v36 = vpop.permute.xlu1 %2829 }
  0xae   : > { %v3687_v37 = vpop.permute.xlu0 %2909 }
  0xb1   : > { %v3689_v48 = vpop.permute.xlu2 %2874 }
  0xb5   : > { %v3691_v55 = vpop.permute.xlu1 %2840 }
  0xb7   : > { %v3693_v56 = vpop.permute.xlu0 %2937 }
  0xb9   : > { %v3695_v58 = vpop.permute.xlu2 %2891 }
  0xbe   : > { %v3697_v59 = vpop.permute.xlu1 %2857 }
  0xc0   : > { %v2944_v60 = vpop.permute.xlu0 %2943 }
  0xc1   : > { %v2946_v1 = vunpack.i.h.bf16 %v2944_v60  ;;  %v2945_v2 = vunpack.i.l.bf16 %v2944_v60 }
  0xc2   : > { %v3701_v3 = vpop.permute.xlu2 %2903 }
  0xc3   : > { %v709_v6 = vmul.f32 %v2946_v1, %v3643_v53  ;;  %v708_v7 = vmul.f32 %v2945_v2, %v3643_v53  ;;  %v2837_v1 = vunpack.i.l.bf16 %v3669_v19  ;;  %v3730_v2 = vperm.slane %v3639_v52, 4 }
  0xc4   : > { %v3740_v19 = vmul.f32 %v2838_v29, %v3713_v17 }
  0xc5   : > { %v717_v44 = vadd.f32 %v3652_v57, %v709_v6  ;;  %v716_v12 = vadd.f32 %v3652_v57, %v708_v7  ;;  %v820_v7 = vadd.f32 %v812_v23, %v771_v30  ;;  %v2815_v30 = vunpack.i.h.bf16 %v3679_v33 }
  0xc6   : > { %v3715_v50 = vpop.permute.xlu1 %2868  ;;  %v2882_v33 = vunpack.i.l.bf16 %v3681_v34  ;;  %v2911_v34 = vunpack.i.l.bf16 %v3687_v37 }
  0xc7   : > { %v765_v16 = vadd.f32 %v757_v11, %v716_v12  ;;  %v766_v21 = vadd.f32 %v758_v10, %v717_v44  ;;  %v861_v10 = vmul.f32 %v2847_v26, %v3713_v17  ;;  %v759_v11 = vmul.f32 %v2790_v28, %v3647_v54 }
  0xc8   : > { %v2949_v27 = vpop.permute.xlu0 %2948  ;;  %v3743_v44 = vperm.slane %v3639_v52, 5  ;;  %v3749_v12 = vmul.f32 %v2837_v1, %v3713_v17  ;;  %v3757_v54 = vmul.f32 %v2854_v4, %v3730_v2  ;;  %v2866_v52 = vunpack.i.h.bf16 %v3683_v35 }
  0xc9   : > { %v3723_v60 = vadd.f32 %v806_v20, %v765_v16  ;;  %v3725_v61 = vadd.f32 %v807_v18, %v766_v21  ;;  %v2951_v5 = vunpack.i.h.bf16 %v2949_v27  ;;  %v2950_v6 = vunpack.i.l.bf16 %v2949_v27 }
  0xca   : > { %v3760_v18 = vmul.f32 %v2853_v32, %v3730_v2  ;;  %v869_v23 = vadd.f32 %v861_v10, %v820_v7  ;;  %v2865_v26 = vunpack.i.l.bf16 %v3683_v35  ;;  %v2843_v27 = vunpack.i.h.bf16 %v3691_v55 }
  0xcb   : > { %v3734_v45 = vpop.permute.xlu2 %2920  ;;  %v711_v20 = vmul.f32 %v2951_v5, %v3643_v53  ;;  %v710_v16 = vmul.f32 %v2950_v6, %v3643_v53  ;;  %v2842_v28 = vunpack.i.l.bf16 %v3691_v55  ;;  %v809_v29 = vmul.f32 %v2815_v30, %v3655_v62 }
  0xcc   : > { %v808_v53 = vmul.f32 %v2814_v31, %v3655_v62  ;;  %v2832_v1 = vunpack.i.h.bf16 %v3685_v36  ;;  %v2831_v4 = vunpack.i.l.bf16 %v3685_v36  ;;  %v2912_v32 = vunpack.i.h.bf16 %v3687_v37 }
  0xcd   : > { %v719_v5 = vadd.f32 %v3652_v57, %v711_v20  ;;  %v718_v35 = vadd.f32 %v3652_v57, %v710_v16  ;;  %v3783_v55 = vmul.f32 %v2883_v24, %v3743_v44  ;;  %v3786_v7 = vmul.f32 %v2882_v33, %v3743_v44 }
  0xce   : > { %v2877_v62 = vunpack.i.h.bf16 %v3689_v48  ;;  %v2876_v36 = vunpack.i.l.bf16 %v3689_v48  ;;  %v909_v8 = vmul.f32 %v2866_v52, %v3730_v2  ;;  %v908_v37 = vmul.f32 %v2865_v26, %v3730_v2 }
  0xcf   : > { %v3764_v21 = vpop.permute.xlu1 %2886  ;;  %v860_v9 = vmul.f32 %v2843_v27, %v3713_v17  ;;  %v859_v57 = vmul.f32 %v2842_v28, %v3713_v17  ;;  %v856_v10 = vmul.f32 %v2832_v1, %v3713_v17  ;;  %v855_v30 = vmul.f32 %v2831_v4, %v3713_v17 }
  0xd0   : > { %v2871_v31 = vunpack.i.h.bf16 %v3715_v50  ;;  %v2870_v20 = vunpack.i.l.bf16 %v3715_v50  ;;  %v3799_v16 = vmul.f32 %v2912_v32, %v3746_v25  ;;  %v3802_v48 = vmul.f32 %v2911_v34, %v3746_v25 }
  0xd1   : > { %v767_v24 = vadd.f32 %v759_v11, %v718_v35  ;;  %v768_v33 = vadd.f32 %v760_v63, %v719_v5  ;;  %v3805_v52 = vmul.f32 %v2877_v62, %v3743_v44  ;;  %v3808_v26 = vmul.f32 %v2876_v36, %v3743_v44 }
  0xd2   : > { %v2940_v17 = vunpack.i.h.bf16 %v3693_v56  ;;  %v2939_v27 = vunpack.i.l.bf16 %v3693_v56  ;;  %v867_v50 = vadd.f32 %v859_v57, %v3667_v15  ;;  %v868_v1 = vadd.f32 %v860_v9, %v3665_v14 }
  0xd3   : > { %v3780_v6 = vpop.permute.xlu2 %2931  ;;  %v2894_v4 = vunpack.i.h.bf16 %v3695_v58  ;;  %v2893_v11 = vunpack.i.l.bf16 %v3695_v58  ;;  %v2860_v63 = vunpack.i.h.bf16 %v3697_v59  ;;  %v2859_v32 = vunpack.i.l.bf16 %v3697_v59 }
  0xd4   : > { %v911_v34 = vmul.f32 %v2871_v31, %v3730_v2  ;;  %v910_v5 = vmul.f32 %v2870_v20, %v3730_v2  ;;  %v2906_v35 = vunpack.i.h.bf16 %v3701_v3  ;;  %v2905_v56 = vunpack.i.l.bf16 %v3701_v3 }
  0xd5   : > { %v816_v62 = vadd.f32 %v808_v53, %v767_v24  ;;  %v817_v15 = vadd.f32 %v809_v29, %v768_v33  ;;  %v1058_v14 = vmul.f32 %v2940_v17, %v3754_v13  ;;  %v1057_v58 = vmul.f32 %v2939_v27, %v3754_v13 }
  0xd6   : > { %v2889_v9 = vunpack.i.h.bf16 %v3764_v21  ;;  %v2888_v59 = vunpack.i.l.bf16 %v3764_v21  ;;  %v960_v57 = vmul.f32 %v2894_v4, %v3743_v44  ;;  %v959_v31 = vmul.f32 %v2893_v11, %v3743_v44 }
  0xd7   : > { %v916_v20 = vadd.f32 %v908_v37, %v867_v50  ;;  %v917_v42 = vadd.f32 %v909_v8, %v868_v1  ;;  %v907_v3 = vmul.f32 %v2860_v63, %v3730_v2  ;;  %v906_v29 = vmul.f32 %v2859_v32, %v3730_v2 }
  0xd8   : > { %v2898_v28 = vpop.permute.xlu1 %2897  ;;  %v918_v53 = vadd.f32 %v910_v5, %v869_v23  ;;  %v919_v24 = vadd.f32 %v911_v34, %v870_v22  ;;  %v1005_v33 = vmul.f32 %v2906_v35, %v3746_v25  ;;  %v1004_v17 = vmul.f32 %v2905_v56, %v3746_v25 }
  0xd9   : > { %v865_v27 = vadd.f32 %v3749_v12, %v816_v62  ;;  %v866_v21 = vadd.f32 %v3740_v19, %v817_v15  ;;  %v958_v4 = vmul.f32 %v2889_v9, %v3743_v44  ;;  %v957_v11 = vmul.f32 %v2888_v59, %v3743_v44 }
  0xda   : > { %v863_v8 = vadd.f32 %v855_v30, %v3723_v60  ;;  %v864_v37 = vadd.f32 %v856_v10, %v3725_v61  ;;  %v2923_v2 = vunpack.i.h.bf16 %v3734_v45  ;;  %v2922_v22 = vunpack.i.l.bf16 %v3734_v45 }
  0xdb   : > { %v3822_v36 = vpop.permute.xlu2 %2958  ;;  %v2900_v63 = vunpack.i.h.bf16 %v2898_v28  ;;  %v2899_v32 = vunpack.i.l.bf16 %v2898_v28  ;;  %v967_v12 = vadd.f32 %v959_v31, %v918_v53  ;;  %v968_v34 = vadd.f32 %v960_v57, %v919_v24 }
  0xdc   : > { %v914_v35 = vadd.f32 %v906_v29, %v865_v27  ;;  %v915_v60 = vadd.f32 %v907_v3, %v866_v21  ;;  %v965_v30 = vadd.f32 %v957_v11, %v916_v20  ;;  %v966_v61 = vadd.f32 %v958_v4, %v917_v42 }
  0xdd   : > { %v912_v10 = vadd.f32 %v3760_v18, %v863_v8  ;;  %v913_v56 = vadd.f32 %v3757_v54, %v864_v37  ;;  %v1052_v28 = vmul.f32 %v2923_v2, %v3754_v13  ;;  %v1051_v59 = vmul.f32 %v2922_v22, %v3754_v13 }
  0xde   : > { %v1003_v57 = vmul.f32 %v2900_v63, %v3746_v25  ;;  %v1002_v31 = vmul.f32 %v2899_v32, %v3746_v25  ;;  %v963_v42 = vadd.f32 %v3786_v7, %v914_v35  ;;  %v964_v18 = vadd.f32 %v3783_v55, %v915_v60 }
  0xdf   : > { %v2934_v54 = vunpack.i.h.bf16 %v3780_v6  ;;  %v2933_v20 = vunpack.i.l.bf16 %v3780_v6  ;;  %v961_v53 = vadd.f32 %v3808_v26, %v912_v10  ;;  %v962_v24 = vadd.f32 %v3805_v52, %v913_v56 }
  0xe0   : > { %v2915_v50 = vpop.permute.xlu1 %2914  ;;  %v1014_v11 = vadd.f32 %v3802_v48, %v965_v30  ;;  %v1012_v55 = vadd.f32 %v1004_v17, %v963_v42  ;;  %v1013_v37 = vadd.f32 %v1005_v33, %v964_v18  ;;  %v2960_v6 = vunpack.i.l.bf16 %v3822_v36  ;;  %v3948_v42 = vld [vmem:[%s4542_s6] ss:$0 sm:$0xff] }
  0xe1   : > { %v2917_v23 = vunpack.i.h.bf16 %v2915_v50  ;;  %v2916_v1 = vunpack.i.l.bf16 %v2915_v50  ;;  %v2961_v50 = vunpack.i.h.bf16 %v3822_v36  ;;  %v1056_v2 = vmul.f32 %v2934_v54, %v3754_v13 }
  0xe2   : > { %v1055_v48 = vmul.f32 %v2933_v20, %v3754_v13 }
  0xe3   : > { %v1009_v19 = vmul.f32 %v2917_v23, %v3746_v25  ;;  %v1008_v5 = vmul.f32 %v2916_v1, %v3746_v25  ;;  %v2969_v44 = vpop.permute.xlu2 %2968  ;;  %v1015_v25 = vadd.f32 %v3799_v16, %v966_v61 }
  0xe4   : > { %v2971_v15 = vunpack.i.h.bf16 %v2969_v44  ;;  %v2970_v9 = vunpack.i.l.bf16 %v2969_v44  ;;  %v1063_v44 = vadd.f32 %v1055_v48, %v1014_v11 }
  0xe5   : > { %v1016_v45 = vadd.f32 %v1008_v5, %v967_v12  ;;  %v1017_v62 = vadd.f32 %v1009_v19, %v968_v34  ;;  %v1064_v35 = vadd.f32 %v1056_v2, %v1015_v25 }
  0xe7   : > { %v1065_v29 = vadd.f32 %v1057_v58, %v1016_v45  ;;  %v1066_v3 = vadd.f32 %v1058_v14, %v1017_v62  ;;  %v1010_v14 = vadd.f32 %v1002_v31, %v961_v53  ;;  %v1011_v58 = vadd.f32 %v1003_v57, %v962_v24 }
  0xe8   : > { %v4560_v62 = vmov 6   ;;  %v3437_v31 = vmov 14   ;;  %v3438_v24 = vmov 15  }
  0xe9   : > { %v1105_v27 = vmul.f32 %v2970_v9, %v1065_v29  ;;  %v1106_v21 = vmul.f32 %v2971_v15, %v1066_v3  ;;  %v2927_v4 = vpop.permute.xlu1 %2926  ;;  %v1059_v23 = vadd.f32 %v1051_v59, %v1010_v14  ;;  %v1060_v1 = vadd.f32 %v1052_v28, %v1011_v58  ;;  %v3931_v59 = vld [vmem:[%s4541_s5] sm:$0xff]  }
  0xea   : > { %v2929_v7 = vunpack.i.h.bf16 %v2927_v4  ;;  %v2928_v8 = vunpack.i.l.bf16 %v2927_v4  ;;  %v3434_v15 = vmov 13   ;;  %v3435_v9 = vmov 9  }
  0xeb   : > { %v3864_v63 = vpack.i.bf16 %v1106_v21, %v1105_v27  ;;  %v3436_v28 = vmov 11   ;;  %v3936_v57 = vunpack.c.l.bf16 %v3931_v59 }
  0xec   : > { %v1054_v26 = vmul.f32 %v2929_v7, %v3754_v13  ;;  %v1053_v52 = vmul.f32 %v2928_v8, %v3754_v13 }
  0xed   : > { %v3942_v29 = vperm.slane %v3936_v57, 0 }
  0xee   : > { %v1061_v22 = vadd.f32 %v1053_v52, %v1012_v55  ;;  %v1062_v16 = vadd.f32 %v1054_v26, %v1013_v37 }
  0xf0   : > { %v1101_v17 = vmul.f32 %v2960_v6, %v1061_v22  ;;  %v1102_v33 = vmul.f32 %v2961_v50, %v1062_v16 }
  0xf1   : > { %v2954_v32 = vpop.permute.xlu1 %2953 }
  0xf2   : > { %v2956_v12 = vunpack.i.h.bf16 %v2954_v32  ;;  %v2955_v34 = vunpack.i.l.bf16 %v2954_v32  ;;  %v3866_v5 = vpack.i.bf16 %v1102_v33, %v1101_v17  ;;  %v3991_v33 = vperm.slane %v3936_v57, 2 }
  0xf4   : > { %v1099_v36 = vmul.f32 %v2955_v34, %v1059_v23  ;;  %v1100_v19 = vmul.f32 %v2956_v12, %v1060_v1  ;;  %2979 = vperm.xlu1 %2977, %v3866_v5  }
  0xf6   : > { %v3869_v61 = vpack.i.bf16 %v1100_v19, %v1099_v36 }
  0xf8   : > { %2973 = vperm.xlu0 %2941, %v3869_v61  }
  0xf9   : > { %v2964_v13 = vpop.permute.xlu1 %2963 }
  0xfa   : > { %v2966_v60 = vunpack.i.h.bf16 %v2964_v13  ;;  %v2965_v30 = vunpack.i.l.bf16 %v2964_v13 }
  0xfc   : > { %v1103_v10 = vmul.f32 %v2965_v30, %v1063_v44  ;;  %v1104_v56 = vmul.f32 %v2966_v60, %v1064_v35  ;;  %2990 = vperm.xlu1 %2977, %v3864_v63  }
  0xfe   : > { %v3873_v45 = vpack.i.bf16 %v1104_v56, %v1103_v10 }
 0x100   : > { %2985 = vperm.xlu2 %2983, %v3873_v45   ;;  %3000 = vset.pattern.permute.xlu0 %v3422_v0 }
 0x101   : > { %3002 = vperm.xlu0 %3000, %v3866_v5  }
 0x104   : > { %3006 = vset.pattern.permute.xlu1 %v3422_v0 }
 0x105   : > { %3008 = vperm.xlu1 %3006, %v3873_v45  }
 0x108   : > { %2994 = vset.pattern.permute.xlu2 %v3422_v0  ;;  %v3431_v0 = vmov 12  }
 0x109   : > { %2996 = vperm.xlu2 %2994, %v3869_v61   ;;  %3029 = vset.pattern.permute.xlu0 %v3424_v38 }
 0x10a   : > { %3031 = vperm.xlu0 %3029, %v3873_v45  }
 0x10d   : > { %3017 = vset.pattern.permute.xlu1 %v3424_v38 }
 0x10e   : > { %3019 = vperm.xlu1 %3017, %v3869_v61  }
 0x111   : > { %3013 = vperm.xlu2 %2994, %v3864_v63  }
 0x112   : > { %3057 = vset.pattern.permute.xlu0 %v3427_v41 }
 0x113   : > { %3059 = vperm.xlu0 %3057, %v3864_v63  }
 0x116   : > { %3036 = vperm.xlu1 %3017, %v3864_v63  }
 0x119   : > { %3023 = vset.pattern.permute.xlu2 %v3424_v38  ;;  %v3432_v38 = vmov 10  }
 0x11a   : > { %3025 = vperm.xlu2 %3023, %v3866_v5  }
 0x11b   : > { %3111 = vset.pattern.permute.xlu0 %v3431_v0 }
 0x11c   : > { %3113 = vperm.xlu0 %3111, %v3869_v61  }
 0x11e   : > { %3046 = vset.pattern.permute.xlu1 %v3427_v41 }
 0x11f   : > { %3048 = vperm.xlu1 %3046, %v3866_v5  }
 0x122   : > { %3040 = vset.pattern.permute.xlu2 %v3427_v41  ;;  %v3433_v41 = vmov 8  }
 0x123   : > { %3042 = vperm.xlu2 %3040, %v3869_v61  }
 0x124   : > { %3117 = vset.pattern.permute.xlu0 %v3429_v43 }
 0x125   : > { %3119 = vperm.xlu0 %3117, %v3869_v61  }
 0x127   : > { %3063 = vset.pattern.permute.xlu1 %v3425_v39 }
 0x128   : > { %3065 = vperm.xlu1 %3063, %v3869_v61  }
 0x12b   : > { %3053 = vperm.xlu2 %3040, %v3873_v45  }
 0x12d   : > { %3148 = vperm.xlu0 %3117, %v3866_v5  }
 0x130   : > { %3075 = vset.pattern.permute.xlu1 %v3426_v40 }
 0x131   : > { %3077 = vperm.xlu1 %3075, %v3869_v61  }
 0x133   : > { %3069 = vset.pattern.permute.xlu2 %v3425_v39 }
 0x134   : > { %3071 = vperm.xlu2 %3069, %v3866_v5  }
 0x135   : > { %3175 = vset.pattern.permute.xlu0 %v3432_v38 }
 0x136   : > { %3177 = vperm.xlu0 %3175, %v3866_v5  }
 0x139   : > { %3087 = vset.pattern.permute.xlu1 %v3433_v41 }
 0x13a   : > { %3089 = vperm.xlu1 %3087, %v3869_v61  }
 0x13c   : > { %3081 = vset.pattern.permute.xlu2 %v4560_v62 }
 0x13d   : > { %3083 = vperm.xlu2 %3081, %v3869_v61  }
 0x13e   : > { %3205 = vset.pattern.permute.xlu0 %v3434_v15 }
 0x13f   : > { %3207 = vperm.xlu0 %3205, %v3866_v5  }
 0x142   : > { %3099 = vset.pattern.permute.xlu1 %v3432_v38 }
 0x143   : > { %3101 = vperm.xlu1 %3099, %v3869_v61  }
 0x145   : > { %3093 = vset.pattern.permute.xlu2 %v3435_v9 }
 0x146   : > { %3095 = vperm.xlu2 %3093, %v3869_v61  }
 0x147   : > { %3235 = vset.pattern.permute.xlu0 %v3433_v41 }
 0x148   : > { %3237 = vperm.xlu0 %3235, %v3873_v45  }
 0x14b   : > { %3123 = vset.pattern.permute.xlu1 %v3426_v40 }
 0x14c   : > { %3125 = vperm.xlu1 %3123, %v3866_v5  }
 0x14e   : > { %3105 = vset.pattern.permute.xlu2 %v3436_v28 }
 0x14f   : > { %3107 = vperm.xlu2 %3105, %v3869_v61  }
 0x150   : > { %3264 = vset.pattern.permute.xlu0 %v3425_v39 }
 0x151   : > { %3266 = vperm.xlu0 %3264, %v3864_v63  }
 0x154   : > { %3135 = vset.pattern.permute.xlu1 %v4560_v62 }
 0x155   : > { %3137 = vperm.xlu1 %3135, %v3866_v5  }
 0x157   : > { %3129 = vset.pattern.permute.xlu2 %v3434_v15 }
 0x158   : > { %3131 = vperm.xlu2 %3129, %v3869_v61  }
 0x159   : > { %3294 = vset.pattern.permute.xlu0 %v3437_v31 }
 0x15a   : > { %v2986_v3 = vpop.permute.xlu2 %2985  ;;  %3296 = vperm.xlu0 %3294, %v3873_v45  }
 0x15b   : > { %v2988_v18 = vunpack.i.h.bf16 %v2986_v3  ;;  %v2987_v54 = vunpack.i.l.bf16 %v2986_v3 }
 0x15d   : > { %v1177_v20 = vmul.f32 %v2988_v18, %v3942_v29  ;;  %v1176_v53 = vmul.f32 %v2987_v54, %v3942_v29  ;;  %3152 = vset.pattern.permute.xlu1 %v3438_v24 }
 0x15e   : > { %3154 = vperm.xlu1 %3152, %v3869_v61  }
 0x15f   : > { %v3955_v27 = vadd.f32 %v3948_v42, %v1177_v20  ;;  %v3958_v21 = vadd.f32 %v3948_v42, %v1176_v53 }
 0x160   : > { %3141 = vset.pattern.permute.xlu2 %v3437_v31 }
 0x161   : > { %3143 = vperm.xlu2 %3141, %v3869_v61  }
 0x162   : > { %3325 = vrot.lane.b32.xlu0 %v3629_v49, %s3439_s18  ;;  %v3975_v49 = vperm.slane %v3936_v57, 1 }
 0x163   : > { %v3964_v4 = vpop.permute.xlu2 %2996  ;;  %3341 = vset.pattern.permute.xlu0 %v3431_v0 }
 0x166   : > { %v2980_v11 = vpop.permute.xlu1 %2979  ;;  %3164 = vset.pattern.permute.xlu1 %v3435_v9 }
 0x167   : > { %3166 = vperm.xlu1 %3164, %v3866_v5   ;;  %v2982_v8 = vunpack.i.h.bf16 %v2980_v11  ;;  %v2981_v55 = vunpack.i.l.bf16 %v2980_v11 }
 0x169   : > { %3158 = vset.pattern.permute.xlu2 %v3433_v41  ;;  %v1175_v22 = vmul.f32 %v2982_v8, %v3942_v29  ;;  %v1174_v16 = vmul.f32 %v2981_v55, %v3942_v29 }
 0x16a   : > { %3160 = vperm.xlu2 %3158, %v3866_v5   ;;  %3343 = vperm.xlu0 %3341, %v3864_v63   ;;  %v3972_v25 = vpop.permute.xlu0 %2973 }
 0x16b   : > { %v3014_v14 = vpop.permute.xlu2 %3013  ;;  %v1182_v13 = vadd.f32 %v3948_v42, %v1174_v16 }
 0x16c   : > { %v3016_v58 = vunpack.i.h.bf16 %v3014_v14  ;;  %v3015_v7 = vunpack.i.l.bf16 %v3014_v14 }
 0x16e   : > { %v1228_v37 = vmul.f32 %v3016_v58, %v3975_v49  ;;  %v1227_v50 = vmul.f32 %v3015_v7, %v3975_v49  ;;  %v2991_v6 = vpop.permute.xlu1 %2990 }
 0x16f   : > { %v2993_v26 = vunpack.i.h.bf16 %v2991_v6  ;;  %v2992_v52 = vunpack.i.l.bf16 %v2991_v6  ;;  %3181 = vset.pattern.permute.xlu1 %v3436_v28 }
 0x170   : > { %3183 = vperm.xlu1 %3181, %v3866_v5  }
 0x171   : > { %v1179_v2 = vmul.f32 %v2993_v26, %v3942_v29  ;;  %v1178_v48 = vmul.f32 %v2992_v52, %v3942_v29 }
 0x172   : > { %3171 = vrot.lane.b32.xlu2 %v3610_v46, %s3439_s18  ;;  %3370 = vset.pattern.permute.xlu0 %v3438_v24  ;;  %v1183_v46 = vadd.f32 %v3948_v42, %v1175_v22 }
 0x173   : > { %v1187_v23 = vadd.f32 %v3948_v42, %v1179_v2  ;;  %v1186_v1 = vadd.f32 %v3948_v42, %v1178_v48  ;;  %v3003_v17 = vpop.permute.xlu0 %3002  ;;  %3187 = vset.pattern.permute.xlu2 %v3425_v39 }
 0x174   : > { %v3005_v32 = vunpack.i.h.bf16 %v3003_v17  ;;  %v3004_v12 = vunpack.i.l.bf16 %v3003_v17  ;;  %v3026_v34 = vpop.permute.xlu2 %3025 }
 0x175   : > { %v3028_v36 = vunpack.i.h.bf16 %v3026_v34  ;;  %v3027_v19 = vunpack.i.l.bf16 %v3026_v34  ;;  %v1235_v44 = vadd.f32 %v1227_v50, %v1186_v1  ;;  %v1236_v35 = vadd.f32 %v1228_v37, %v1187_v23 }
 0x176   : > { %v1224_v60 = vmul.f32 %v3005_v32, %v3975_v49  ;;  %v1223_v30 = vmul.f32 %v3004_v12, %v3975_v49 }
 0x177   : > { %v1273_v61 = vmul.f32 %v3028_v36, %v3991_v33  ;;  %v1272_v10 = vmul.f32 %v3027_v19, %v3991_v33  ;;  %v3009_v39 = vpop.permute.xlu1 %3008 }
 0x178   : > { %v1232_v56 = vadd.f32 %v1224_v60, %v1183_v46  ;;  %v1231_v3 = vadd.f32 %v1223_v30, %v1182_v13  ;;  %v3011_v18 = vunpack.i.h.bf16 %v3009_v39  ;;  %v3010_v54 = vunpack.i.l.bf16 %v3009_v39  ;;  %3193 = vset.pattern.permute.xlu1 %v3431_v0 }
 0x179   : > { %3195 = vperm.xlu1 %3193, %v3866_v5  }
 0x17a   : > { %v1280_v20 = vadd.f32 %v1272_v10, %v1231_v3  ;;  %v1281_v53 = vadd.f32 %v1273_v61, %v1232_v56  ;;  %v1226_v11 = vmul.f32 %v3011_v18, %v3975_v49  ;;  %v1225_v14 = vmul.f32 %v3010_v54, %v3975_v49  ;;  %3189 = vperm.xlu2 %3187, %v3873_v45  }
 0x17c   : > { %v1234_v58 = vadd.f32 %v1226_v11, %v3955_v27  ;;  %v1233_v7 = vadd.f32 %v1225_v14, %v3958_v21  ;;  %v3032_v8 = vpop.permute.xlu0 %3031  ;;  %v4018_v27 = vperm.slane %v3936_v57, 3 }
 0x17d   : > { %v3034_v55 = vunpack.i.h.bf16 %v3032_v8  ;;  %v3033_v37 = vunpack.i.l.bf16 %v3032_v8  ;;  %v4007_v50 = vpop.permute.xlu2 %3042 }
 0x17f   : > { %v1275_v6 = vmul.f32 %v3034_v55, %v3991_v33  ;;  %v1274_v26 = vmul.f32 %v3033_v37, %v3991_v33 }
 0x180   : > { %v4011_v52 = vpop.permute.xlu1 %3019 }
 0x181   : > { %v1283_v2 = vadd.f32 %v1275_v6, %v1234_v58  ;;  %v1282_v48 = vadd.f32 %v1274_v26, %v1233_v7  ;;  %3211 = vset.pattern.permute.xlu1 %v4560_v62  ;;  %v4039_v7 = vperm.slane %v3936_v57, 4 }
 0x182   : > { %3213 = vperm.xlu1 %3211, %v3873_v45   ;;  %3199 = vset.pattern.permute.xlu2 %v3426_v40 }
 0x183   : > { %3201 = vperm.xlu2 %3199, %v3873_v45  }
 0x185   : > { %v3054_v21 = vpop.permute.xlu2 %3053  ;;  %v3060_v22 = vpop.permute.xlu0 %3059 }
 0x186   : > { %v3056_v16 = vunpack.i.h.bf16 %v3054_v21  ;;  %v3055_v23 = vunpack.i.l.bf16 %v3054_v21  ;;  %v3062_v1 = vunpack.i.h.bf16 %v3060_v22  ;;  %v3061_v17 = vunpack.i.l.bf16 %v3060_v22 }
 0x188   : > { %v1324_v32 = vmul.f32 %v3056_v16, %v4018_v27  ;;  %v1323_v12 = vmul.f32 %v3055_v23, %v4018_v27  ;;  %v1326_v34 = vmul.f32 %v3062_v1, %v4018_v27  ;;  %v1325_v36 = vmul.f32 %v3061_v17, %v4018_v27  ;;  %v3037_v19 = vpop.permute.xlu1 %3036 }
 0x189   : > { %v3039_v46 = vunpack.i.h.bf16 %v3037_v19  ;;  %v3038_v13 = vunpack.i.l.bf16 %v3037_v19  ;;  %v2975_v23 = vunpack.i.l.bf16 %v3972_v25  ;;  %v2976_v1 = vunpack.i.h.bf16 %v3972_v25 }
 0x18a   : > { %v4024_v60 = vadd.f32 %v1323_v12, %v1282_v48  ;;  %v4026_v30 = vadd.f32 %v1324_v32, %v1283_v2  ;;  %3223 = vset.pattern.permute.xlu1 %v3429_v43  ;;  %v2998_v17 = vunpack.i.l.bf16 %v3964_v4  ;;  %v3021_v32 = vunpack.i.l.bf16 %v4011_v52 }
 0x18b   : > { %v1277_v61 = vmul.f32 %v3039_v46, %v3991_v33  ;;  %v1276_v10 = vmul.f32 %v3038_v13, %v3991_v33  ;;  %3225 = vperm.xlu1 %3223, %v3873_v45   ;;  %3217 = vset.pattern.permute.xlu2 %v3437_v31  ;;  %v2999_v25 = vunpack.i.h.bf16 %v3964_v4  ;;  %v3022_v12 = vunpack.i.h.bf16 %v4011_v52 }
 0x18c   : > { %3219 = vperm.xlu2 %3217, %v3866_v5   ;;  %v1221_v19 = vmul.f32 %v2998_v17, %v3975_v49  ;;  %v1270_v46 = vmul.f32 %v3021_v32, %v3991_v33  ;;  %v3044_v52 = vunpack.i.l.bf16 %v4007_v50 }
 0x18d   : > { %v1284_v39 = vadd.f32 %v1276_v10, %v1235_v44  ;;  %v1285_v56 = vadd.f32 %v1277_v61, %v1236_v35  ;;  %v1271_v13 = vmul.f32 %v3022_v12, %v3991_v33 }
 0x18e   : > { %v3072_v3 = vpop.permute.xlu2 %3071  ;;  %v4078_v4 = vpop.permute.xlu0 %3113 }
 0x18f   : > { %v4034_v18 = vadd.f32 %v1325_v36, %v1284_v39  ;;  %v4036_v54 = vadd.f32 %v1326_v34, %v1285_v56  ;;  %v3074_v8 = vunpack.i.h.bf16 %v3072_v3  ;;  %v3073_v55 = vunpack.i.l.bf16 %v3072_v3 }
 0x191   : > { %v3049_v11 = vpop.permute.xlu1 %3048  ;;  %v1371_v26 = vmul.f32 %v3074_v8, %v4039_v7  ;;  %v1370_v2 = vmul.f32 %v3073_v55, %v4039_v7 }
 0x192   : > { %v3051_v14 = vunpack.i.h.bf16 %v3049_v11  ;;  %v3050_v58 = vunpack.i.l.bf16 %v3049_v11 }
 0x193   : > { %3241 = vset.pattern.permute.xlu1 %v3435_v9 }
 0x194   : > { %v1322_v37 = vmul.f32 %v3051_v14, %v4018_v27  ;;  %v1321_v44 = vmul.f32 %v3050_v58, %v4018_v27  ;;  %3243 = vperm.xlu1 %3241, %v3873_v45   ;;  %3229 = vset.pattern.permute.xlu2 %v3438_v24  ;;  %v1319_v58 = vmul.f32 %v3044_v52, %v4018_v27 }
 0x195   : > { %3231 = vperm.xlu2 %3229, %v3866_v5   ;;  %v1172_v5 = vmul.f32 %v2975_v23, %v3942_v29 }
 0x196   : > { %v1329_v35 = vadd.f32 %v1321_v44, %v1280_v20  ;;  %v1330_v6 = vadd.f32 %v1322_v37, %v1281_v53  ;;  %v1173_v20 = vmul.f32 %v2976_v1, %v3942_v29  ;;  %v1222_v29 = vmul.f32 %v2999_v25, %v3975_v49 }
 0x197   : > { %v4049_v48 = vpop.permute.xlu2 %3083  ;;  %v1180_v34 = vadd.f32 %v3948_v42, %v1172_v5  ;;  %v4086_v49 = vperm.slane %v3936_v57, 5  ;;  %v3120_v23 = vpop.permute.xlu0 %3119  ;;  %v4104_v5 = vunpack.c.h.bf16 %v3931_v59  ;;  %v4109_v25 = vperm.slane %v3936_v57, 7 }
 0x198   : > { %v4051_v21 = vadd.f32 %v1370_v2, %v1329_v35  ;;  %v4053_v22 = vadd.f32 %v1371_v26, %v1330_v6  ;;  %v4098_v2 = vperm.slane %v3936_v57, 6  ;;  %v3122_v12 = vunpack.i.h.bf16 %v3120_v23 }
 0x199   : > { %v1229_v61 = vadd.f32 %v1221_v19, %v1180_v34  ;;  %v3121_v34 = vunpack.i.l.bf16 %v3120_v23 }
 0x19a   : > { %v3066_v16 = vpop.permute.xlu1 %3065  ;;  %v1516_v57 = vmul.f32 %v3122_v12, %v4109_v25  ;;  %v3116_v12 = vunpack.i.h.bf16 %v4078_v4 }
 0x19b   : > { %v3068_v39 = vunpack.i.h.bf16 %v3066_v16  ;;  %v3067_v56 = vunpack.i.l.bf16 %v3066_v16  ;;  %v1278_v3 = vadd.f32 %v1270_v46, %v1229_v61  ;;  %v3085_v16 = vunpack.i.l.bf16 %v4049_v48 }
 0x19c   : > { %3252 = vset.pattern.permute.xlu1 %v3432_v38  ;;  %v1515_v61 = vmul.f32 %v3121_v34, %v4109_v25  ;;  %v3115_v34 = vunpack.i.l.bf16 %v4078_v4 }
 0x19d   : > { %3254 = vperm.xlu1 %3252, %v3873_v45   ;;  %3248 = vrot.lane.b32.xlu2 %v3616_v47, %s3439_s18  ;;  %v1181_v47 = vadd.f32 %v3948_v42, %v1173_v20  ;;  %v3045_v42 = vunpack.i.h.bf16 %v4007_v50  ;;  %v1369_v55 = vmul.f32 %v3068_v39, %v4039_v7  ;;  %v1368_v50 = vmul.f32 %v3067_v56, %v4039_v7 }
 0x19e   : > { %3258 = vset.pattern.permute.xlu2 %v3436_v28  ;;  %v1327_v44 = vadd.f32 %v1319_v58, %v1278_v3  ;;  %v4128_v39 = vperm.slane %v4104_v5, 1 }
 0x19f   : > { %v1230_v10 = vadd.f32 %v1222_v29, %v1181_v47  ;;  %v1320_v8 = vmul.f32 %v3045_v42, %v4018_v27  ;;  %v3086_v27 = vunpack.i.h.bf16 %v4049_v48  ;;  %v1466_v47 = vmul.f32 %v3085_v16, %v4098_v2  ;;  %v2682_v29 = vld [vmem:[%s4543_s7 + $0x8] sm:$0xff] }
 0x1a0   : > { %v4064_v53 = vpop.permute.xlu2 %3095  ;;  %2024 = vmatpush.bf16.msra.mxu0 %v2682_v29  ;;  %v4165_v29 = vperm.slane %v4104_v5, 5 }
 0x1a1   : > { %v1279_v11 = vadd.f32 %v1271_v13, %v1230_v10  ;;  %v1467_v48 = vmul.f32 %v3086_v27, %v4098_v2  ;;  %v3097_v56 = vunpack.i.l.bf16 %v4064_v53 }
 0x1a3   : > { %v3078_v36 = vpop.permute.xlu1 %3077  ;;  %v1328_v35 = vadd.f32 %v1320_v8, %v1279_v11  ;;  %v4136_v8 = vperm.slane %v4104_v5, 2 }
 0x1a4   : > { %v3080_v33 = vunpack.i.h.bf16 %v3078_v36  ;;  %v3079_v14 = vunpack.i.l.bf16 %v3078_v36  ;;  %v4112_v36 = vperm.slane %v4104_v5, 0 }
 0x1a5   : > { %3270 = vset.pattern.permute.xlu1 %v3431_v0  ;;  %3260 = vperm.xlu2 %3258, %v3873_v45   ;;  %v1377_v1 = vadd.f32 %v1369_v55, %v1328_v35 }
 0x1a6   : > { %3272 = vperm.xlu1 %3270, %v3873_v45   ;;  %v1418_v6 = vmul.f32 %v3080_v33, %v4086_v49  ;;  %v1417_v26 = vmul.f32 %v3079_v14, %v4086_v49 }
 0x1a8   : > { %v1426_v17 = vadd.f32 %v1418_v6, %v1377_v1 }
 0x1a9   : > { %v4083_v0 = vpop.permute.xlu2 %3107 }
 0x1aa   : > { %v1475_v52 = vadd.f32 %v1467_v48, %v1426_v17  ;;  %v3110_v27 = vunpack.i.h.bf16 %v4083_v0  ;;  %v3109_v16 = vunpack.i.l.bf16 %v4083_v0  ;;  %v4154_v17 = vperm.slane %v4104_v5, 4 }
 0x1ac   : > { %v3090_v37 = vpop.permute.xlu1 %3089  ;;  %v1524_v11 = vadd.f32 %v1516_v57, %v1475_v52 }
 0x1ad   : > { %3276 = vset.pattern.permute.xlu2 %v3426_v40  ;;  %v1376_v40 = vadd.f32 %v1368_v50, %v1327_v44  ;;  %v3092_v19 = vunpack.i.h.bf16 %v3090_v37  ;;  %v3091_v46 = vunpack.i.l.bf16 %v3090_v37  ;;  %v1613_v44 = vmul.f32 %v3097_v56, %v4128_v39 }
 0x1ae   : > { %3282 = vset.pattern.permute.xlu1 %v3434_v15  ;;  %3278 = vperm.xlu2 %3276, %v3864_v63  }
 0x1af   : > { %3284 = vperm.xlu1 %3282, %v3873_v45   ;;  %v1425_v20 = vadd.f32 %v1417_v26, %v1376_v40  ;;  %v1565_v42 = vmul.f32 %v3092_v19, %v4112_v36  ;;  %v1564_v10 = vmul.f32 %v3091_v46, %v4112_v36  ;;  %v4145_v26 = vperm.slane %v4104_v5, 3 }
 0x1b1   : > { %v1474_v13 = vadd.f32 %v1466_v47, %v1425_v20  ;;  %v1573_v50 = vadd.f32 %v1565_v42, %v1524_v11  ;;  %v1712_v48 = vmul.f32 %v3110_v27, %v4145_v26  ;;  %v1711_v0 = vmul.f32 %v3109_v16, %v4145_v26 }
 0x1b2   : > { %v4106_v32 = vpop.permute.xlu2 %3131 }
 0x1b3   : > { %v1523_v3 = vadd.f32 %v1515_v61, %v1474_v13  ;;  %v3134_v13 = vunpack.i.h.bf16 %v4106_v32  ;;  %v3133_v4 = vunpack.i.l.bf16 %v4106_v32  ;;  %v4174_v61 = vperm.slane %v4104_v5, 6 }
 0x1b5   : > { %v3102_v59 = vpop.permute.xlu1 %3101  ;;  %v1572_v55 = vadd.f32 %v1564_v10, %v1523_v3  ;;  %v1810_v42 = vmul.f32 %v3134_v13, %v4165_v29  ;;  %v1809_v10 = vmul.f32 %v3133_v4, %v4165_v29 }
 0x1b6   : > { %3288 = vset.pattern.permute.xlu2 %v4560_v62  ;;  %v3098_v62 = vunpack.i.h.bf16 %v4064_v53  ;;  %v3104_v33 = vunpack.i.h.bf16 %v3102_v59  ;;  %v3103_v14 = vunpack.i.l.bf16 %v3102_v59  ;;  %v1760_v59 = vmul.f32 %v3115_v34, %v4154_v17 }
 0x1b7   : > { %3300 = vset.pattern.permute.xlu1 %v3429_v43  ;;  %3290 = vperm.xlu2 %3288, %v3864_v63   ;;  %v2681_v43 = vld [vmem:[%s4543_s7] sm:$0xff]  ;;  %v1621_v23 = vadd.f32 %v1613_v44, %v1572_v55 }
 0x1b8   : > { %3302 = vperm.xlu1 %3300, %v3864_v63   ;;  %2025 = vmatpush.bf16.msra.mxu0 %v2681_v43  ;;  %v1614_v37 = vmul.f32 %v3098_v62, %v4128_v39  ;;  %v1663_v53 = vmul.f32 %v3104_v33, %v4136_v8  ;;  %v1662_v35 = vmul.f32 %v3103_v14, %v4136_v8 }
 0x1ba   : > { %v1622_v40 = vadd.f32 %v1614_v37, %v1573_v50  ;;  %v1670_v1 = vadd.f32 %v1662_v35, %v1621_v23  ;;  %v3149_v35 = vpop.permute.xlu0 %3148 }
 0x1bb   : > { %v3144_v58 = vpop.permute.xlu2 %3143 }
 0x1bc   : > { %v1671_v20 = vadd.f32 %v1663_v53, %v1622_v40  ;;  %v3146_v62 = vunpack.i.h.bf16 %v3144_v58  ;;  %v3145_v56 = vunpack.i.l.bf16 %v3144_v58 }
 0x1be   : > { %v4142_v6 = vpop.permute.xlu1 %3125  ;;  %v1720_v19 = vadd.f32 %v1712_v48, %v1671_v20  ;;  %v1859_v3 = vmul.f32 %v3146_v62, %v4174_v61  ;;  %v1858_v11 = vmul.f32 %v3145_v56, %v4174_v61 }
 0x1bf   : > { %3306 = vset.pattern.permute.xlu2 %v3438_v24  ;;  %v3128_v27 = vunpack.i.h.bf16 %v4142_v6  ;;  %v3127_v16 = vunpack.i.l.bf16 %v4142_v6  ;;  %v3151_v6 = vunpack.i.h.bf16 %v3149_v35 }
 0x1c0   : > { %3312 = vset.pattern.permute.xlu1 %v3433_v41  ;;  %3308 = vperm.xlu2 %3306, %v3873_v45   ;;  %v1719_v41 = vadd.f32 %v1711_v0, %v1670_v1  ;;  %v1761_v45 = vmul.f32 %v3116_v12, %v4154_v17 }
 0x1c1   : > { %3314 = vperm.xlu1 %3312, %v3864_v63   ;;  %v1420_v34 = vmul.f32 %v3128_v27, %v4086_v49  ;;  %v1419_v48 = vmul.f32 %v3127_v16, %v4086_v49 }
 0x1c2   : > { %v1768_v52 = vadd.f32 %v1760_v59, %v1719_v41  ;;  %v1769_v57 = vadd.f32 %v1761_v45, %v1720_v19  ;;  %v3150_v59 = vunpack.i.l.bf16 %v3149_v35 }
 0x1c3   : > { %v1428_v13 = vadd.f32 %v1420_v34, %v4053_v22 }
 0x1c4   : > { %v4160_v47 = vpop.permute.xlu2 %3160  ;;  %v1817_v43 = vadd.f32 %v1809_v10, %v1768_v52  ;;  %v3178_v52 = vpop.permute.xlu0 %3177  ;;  %v1517_v10 = vmul.f32 %v3150_v59, %v4109_v25 }
 0x1c5   : > { %v3162_v62 = vunpack.i.l.bf16 %v4160_v47 }
 0x1c6   : > { %v1866_v50 = vadd.f32 %v1858_v11, %v1817_v43 }
 0x1c7   : > { %v3138_v46 = vpop.permute.xlu1 %3137 }
 0x1c8   : > { %3318 = vset.pattern.permute.xlu2 %v3435_v9  ;;  %v1818_v9 = vadd.f32 %v1810_v42, %v1769_v57  ;;  %v3139_v1 = vunpack.i.l.bf16 %v3138_v46 }
 0x1c9   : > { %3329 = vset.pattern.permute.xlu1 %v3432_v38  ;;  %3320 = vperm.xlu2 %3318, %v3864_v63   ;;  %v4179_v38 = vperm.slane %v4104_v5, 7 }
 0x1ca   : > { %3331 = vperm.xlu1 %3329, %v3864_v63   ;;  %v1867_v37 = vadd.f32 %v1859_v3, %v1818_v9  ;;  %v1468_v45 = vmul.f32 %v3139_v1, %v4098_v2  ;;  %v1566_v9 = vmul.f32 %v3162_v62, %v4112_v36 }
 0x1cc   : > { %v3172_v32 = vpop.permute.xlu2 %3171 }
 0x1cd   : > { %v3174_v58 = vunpack.i.h.bf16 %v3172_v32  ;;  %v3173_v44 = vunpack.i.l.bf16 %v3172_v32 }
 0x1d0   : > { %v3155_v33 = vpop.permute.xlu1 %3154 }
 0x1d1   : > { %v3157_v14 = vunpack.i.h.bf16 %v3155_v33  ;;  %v3156_v55 = vunpack.i.l.bf16 %v3155_v33  ;;  %3335 = vset.pattern.permute.xlu2 %v3436_v28  ;;  %v3180_v33 = vunpack.i.h.bf16 %v3178_v52 }
 0x1d2   : > { %3347 = vset.pattern.permute.xlu1 %v3434_v15  ;;  %3337 = vperm.xlu2 %3335, %v3864_v63   ;;  %v3140_v15 = vunpack.i.h.bf16 %v3138_v46  ;;  %v1427_v46 = vadd.f32 %v1419_v48, %v4051_v21 }
 0x1d3   : > { %v1908_v5 = vmul.f32 %v3157_v14, %v4179_v38  ;;  %v1907_v53 = vmul.f32 %v3156_v55, %v4179_v38  ;;  %3349 = vperm.xlu1 %3347, %v3864_v63   ;;  %v3179_v14 = vunpack.i.l.bf16 %v3178_v52 }
 0x1d4   : > { %v4191_v28 = vpop.permute.xlu2 %3189  ;;  %v1469_v19 = vmul.f32 %v3140_v15, %v4098_v2  ;;  %v1476_v57 = vadd.f32 %v1468_v45, %v1427_v46 }
 0x1d5   : > { %v1915_v23 = vadd.f32 %v1907_v53, %v1866_v50  ;;  %v1916_v40 = vadd.f32 %v1908_v5, %v1867_v37  ;;  %v1664_v35 = vmul.f32 %v3179_v14, %v4136_v8 }
 0x1d6   : > { %v1477_v42 = vadd.f32 %v1469_v19, %v1428_v13  ;;  %v1525_v22 = vadd.f32 %v1517_v10, %v1476_v57 }
 0x1d7   : > { %v1947_v20 = vmul.f32 %v3173_v44, %v1915_v23  ;;  %v1948_v12 = vmul.f32 %v3174_v58, %v1916_v40  ;;  %v3208_v44 = vpop.permute.xlu0 %3207 }
 0x1d8   : > { %v1574_v55 = vadd.f32 %v1566_v9, %v1525_v22  ;;  %v3210_v23 = vunpack.i.h.bf16 %v3208_v44  ;;  %v3209_v40 = vunpack.i.l.bf16 %v3208_v44 }
 0x1d9   : > { %v3167_v0 = vpop.permute.xlu1 %3166  ;;  %v1986_v41 = vpack.c.bf16 %v1948_v12, %v1947_v20 }
 0x1da   : > { %3353 = vset.pattern.permute.xlu2 %v3437_v31  ;;  %v1518_v31 = vmul.f32 %v3151_v6, %v4109_v25  ;;  %v3169_v21 = vunpack.i.h.bf16 %v3167_v0  ;;  %v3168_v56 = vunpack.i.l.bf16 %v3167_v0  ;;  %v1812_v46 = vmul.f32 %v3210_v23, %v4165_v29 }
 0x1db   : > { %3359 = vset.pattern.permute.xlu1 %v3438_v24  ;;  %3355 = vperm.xlu2 %3353, %v3864_v63   ;;  %v3163_v24 = vunpack.i.h.bf16 %v4160_v47  ;;  %v1811_v13 = vmul.f32 %v3209_v40, %v4165_v29 }
 0x1dc   : > { %2631 = vmatmul.msk.bf16.vlgmr.msra.gmra.mxu0 %vm2005_vm0, %v1986_v41  ;;  %3361 = vperm.xlu1 %3359, %v3864_v63   ;;  %v1526_v32 = vadd.f32 %v1518_v31, %v1477_v42  ;;  %v1616_v3 = vmul.f32 %v3169_v21, %v4128_v39  ;;  %v1615_v11 = vmul.f32 %v3168_v56, %v4128_v39 }
 0x1dd   : > { %v4204_v4 = vpop.permute.xlu2 %3201  ;;  %v1567_v63 = vmul.f32 %v3163_v24, %v4112_v36 }
 0x1de   : > { %v1623_v5 = vadd.f32 %v1615_v11, %v1574_v55 }
 0x1df   : > { %v1575_v47 = vadd.f32 %v1567_v63, %v1526_v32 }
 0x1e0   : > { %v1672_v1 = vadd.f32 %v1664_v35, %v1623_v5  ;;  %v3238_v5 = vpop.permute.xlu0 %3237  ;;  %v3204_v35 = vunpack.i.h.bf16 %v4204_v4 }
 0x1e1   : > { %v1624_v53 = vadd.f32 %v1616_v3, %v1575_v47 }
 0x1e2   : > { %v3184_v43 = vpop.permute.xlu1 %3183 }
 0x1e3   : > { %3366 = vrot.lane.b32.xlu2 %v3637_v51, %s3439_s18  ;;  %v3186_v50 = vunpack.i.h.bf16 %v3184_v43  ;;  %v3185_v37 = vunpack.i.l.bf16 %v3184_v43  ;;  %v1665_v51 = vmul.f32 %v3180_v33, %v4136_v8 }
 0x1e5   : > { %v1714_v27 = vmul.f32 %v3186_v50, %v4145_v26  ;;  %v1713_v16 = vmul.f32 %v3185_v37, %v4145_v26  ;;  %v1673_v20 = vadd.f32 %v1665_v51, %v1624_v53  ;;  %v3192_v53 = vunpack.i.h.bf16 %v4191_v28 }
 0x1e6   : > { %v3220_v58 = vpop.permute.xlu2 %3219  ;;  %v3191_v51 = vunpack.i.l.bf16 %v4191_v28 }
 0x1e7   : > { %v3222_v48 = vunpack.i.h.bf16 %v3220_v58  ;;  %v3221_v0 = vunpack.i.l.bf16 %v3220_v58  ;;  %v1721_v41 = vadd.f32 %v1713_v16, %v1672_v1  ;;  %v1722_v19 = vadd.f32 %v1714_v27, %v1673_v20 }
 0x1e8   : > { %v3203_v27 = vunpack.i.l.bf16 %v4204_v4  ;;  %v1373_v16 = vmul.f32 %v3192_v53, %v4039_v7  ;;  %v1372_v23 = vmul.f32 %v3191_v51, %v4039_v7  ;;  %v1422_v20 = vmul.f32 %v3204_v35, %v4086_v49 }
 0x1e9   : > { %v1861_v42 = vmul.f32 %v3222_v48, %v4174_v61  ;;  %v1860_v31 = vmul.f32 %v3221_v0, %v4174_v61 }
 0x1ea   : > { %v1380_v28 = vadd.f32 %v1372_v23, %v4024_v60 }
 0x1eb   : > { %v3196_v15 = vpop.permute.xlu1 %3195 }
 0x1ec   : > { %v3198_v12 = vunpack.i.h.bf16 %v3196_v15  ;;  %v3197_v34 = vunpack.i.l.bf16 %v3196_v15 }
 0x1ee   : > { %v1763_v45 = vmul.f32 %v3198_v12, %v4154_v17  ;;  %v1762_v6 = vmul.f32 %v3197_v34, %v4154_v17  ;;  %v1421_v12 = vmul.f32 %v3203_v27, %v4086_v49 }
 0x1ef   : > { %v3232_v59 = vpop.permute.xlu2 %3231 }
 0x1f0   : > { %v1770_v52 = vadd.f32 %v1762_v6, %v1721_v41  ;;  %v1771_v57 = vadd.f32 %v1763_v45, %v1722_v19  ;;  %v3234_v62 = vunpack.i.h.bf16 %v3232_v59  ;;  %v3233_v21 = vunpack.i.l.bf16 %v3232_v59  ;;  %v4243_v45 = vpop.permute.xlu0 %3266 }
 0x1f1   : > { %v1381_v41 = vadd.f32 %v1373_v16, %v4026_v30  ;;  %v1429_v6 = vadd.f32 %v1421_v12, %v1380_v28 }
 0x1f2   : > { %v1819_v10 = vadd.f32 %v1811_v13, %v1770_v52  ;;  %v1820_v24 = vadd.f32 %v1812_v46, %v1771_v57  ;;  %v1910_v43 = vmul.f32 %v3234_v62, %v4179_v38  ;;  %v1909_v63 = vmul.f32 %v3233_v21, %v4179_v38 }
 0x1f3   : > { %v1430_v59 = vadd.f32 %v1422_v20, %v1381_v41  ;;  %v3240_v52 = vunpack.i.h.bf16 %v3238_v5  ;;  %v3239_v57 = vunpack.i.l.bf16 %v3238_v5 }
 0x1f4   : > { %v3214_v56 = vpop.permute.xlu1 %3213  ;;  %v1868_v22 = vadd.f32 %v1860_v31, %v1819_v10  ;;  %v1869_v32 = vadd.f32 %v1861_v42, %v1820_v24 }
 0x1f5   : > { %v3216_v40 = vunpack.i.h.bf16 %v3214_v56  ;;  %v3215_v15 = vunpack.i.l.bf16 %v3214_v56 }
 0x1f6   : > { %v1917_v33 = vadd.f32 %v1909_v63, %v1868_v22  ;;  %v1918_v14 = vadd.f32 %v1910_v43, %v1869_v32  ;;  %v1569_v22 = vmul.f32 %v3240_v52, %v4112_v36  ;;  %v1568_v32 = vmul.f32 %v3239_v57, %v4112_v36 }
 0x1f7   : > { %v3249_v9 = vpop.permute.xlu2 %3248  ;;  %v1471_v4 = vmul.f32 %v3216_v40, %v4098_v2  ;;  %v1470_v19 = vmul.f32 %v3215_v15, %v4098_v2 }
 0x1f8   : > { %v3251_v3 = vunpack.i.h.bf16 %v3249_v9  ;;  %v3250_v11 = vunpack.i.l.bf16 %v3249_v9 }
 0x1f9   : > { %v1478_v42 = vadd.f32 %v1470_v19, %v1429_v6  ;;  %v1479_v31 = vadd.f32 %v1471_v4, %v1430_v59 }
 0x1fa   : > { %v1949_v55 = vmul.f32 %v3250_v11, %v1917_v33  ;;  %v1950_v47 = vmul.f32 %v3251_v3, %v1918_v14 }
 0x1fc   : > { %v1987_v50 = vpack.c.bf16 %v1950_v47, %v1949_v55 }
 0x1fd   : > { %v3226_v37 = vpop.permute.xlu1 %3225 }
 0x1fe   : > { %2632 = vmatmul.msk.bf16.gmra.mxu0 %vm2005_vm0, %v1987_v50  ;;  %v3228_v34 = vunpack.i.h.bf16 %v3226_v37  ;;  %v3227_v48 = vunpack.i.l.bf16 %v3226_v37  ;;  %v3297_v50 = vpop.permute.xlu0 %3296 }
 0x1ff   : > { %v3261_v58 = vpop.permute.xlu2 %3260  ;;  %v3299_v20 = vunpack.i.h.bf16 %v3297_v50  ;;  %v3298_v12 = vunpack.i.l.bf16 %v3297_v50 }
 0x200   : > { %v1520_v46 = vmul.f32 %v3228_v34, %v4109_v25  ;;  %v1519_v13 = vmul.f32 %v3227_v48, %v4109_v25  ;;  %v3263_v55 = vunpack.i.h.bf16 %v3261_v58  ;;  %v3262_v47 = vunpack.i.l.bf16 %v3261_v58 }
 0x201   : > { %v1862_v52 = vmul.f32 %v3298_v12, %v4174_v61 }
 0x202   : > { %v1527_v24 = vadd.f32 %v1519_v13, %v1478_v42  ;;  %v1528_v30 = vadd.f32 %v1520_v46, %v1479_v31  ;;  %v1716_v27 = vmul.f32 %v3263_v55, %v4145_v26  ;;  %v1715_v16 = vmul.f32 %v3262_v47, %v4145_v26 }
 0x203   : > { %v1863_v13 = vmul.f32 %v3299_v20, %v4174_v61 }
 0x204   : > { %v1576_v3 = vadd.f32 %v1568_v32, %v1527_v24  ;;  %v1577_v11 = vadd.f32 %v1569_v22, %v1528_v30 }
 0x206   : > { %v3244_v44 = vpop.permute.xlu1 %3243  ;;  %v3326_v57 = vpop.permute.xlu0 %3325 }
 0x207   : > { %v3246_v10 = vunpack.i.h.bf16 %v3244_v44  ;;  %v3245_v60 = vunpack.i.l.bf16 %v3244_v44 }
 0x208   : > { %v4235_v1 = vpop.permute.xlu2 %3278 }
 0x209   : > { %v1618_v43 = vmul.f32 %v3246_v10, %v4128_v39  ;;  %v1617_v63 = vmul.f32 %v3245_v60, %v4128_v39  ;;  %v3328_v10 = vunpack.i.h.bf16 %v3326_v57  ;;  %v3327_v60 = vunpack.i.l.bf16 %v3326_v57 }
 0x20a   : > { %v3280_v55 = vunpack.i.l.bf16 %v4235_v1 }
 0x20b   : > { %v1625_v37 = vadd.f32 %v1617_v63, %v1576_v3  ;;  %v1626_v44 = vadd.f32 %v1618_v43, %v1577_v11  ;;  %v3269_v63 = vunpack.i.h.bf16 %v4243_v45 }
 0x20d   : > { %v1375_v47 = vmul.f32 %v3269_v63, %v4039_v7 }
 0x20f   : > { %v3255_v0 = vpop.permute.xlu1 %3254 }
 0x210   : > { %v3257_v62 = vunpack.i.h.bf16 %v3255_v0  ;;  %v3256_v21 = vunpack.i.l.bf16 %v3255_v0 }
 0x211   : > { %v4247_v56 = vpop.permute.xlu2 %3290 }
 0x212   : > { %v1667_v33 = vmul.f32 %v3257_v62, %v4136_v8  ;;  %v1666_v14 = vmul.f32 %v3256_v21, %v4136_v8 }
 0x214   : > { %v1674_v51 = vadd.f32 %v1666_v14, %v1625_v37  ;;  %v1675_v35 = vadd.f32 %v1667_v33, %v1626_v44  ;;  %v3281_v14 = vunpack.i.h.bf16 %v4235_v1  ;;  %v3293_v37 = vunpack.i.h.bf16 %v4247_v56 }
 0x215   : > { %v3292_v44 = vunpack.i.l.bf16 %v4247_v56 }
 0x216   : > { %v1723_v58 = vadd.f32 %v1715_v16, %v1674_v51  ;;  %v1724_v48 = vadd.f32 %v1716_v27, %v1675_v35  ;;  %v1383_v16 = vadd.f32 %v1375_v47, %v4036_v54 }
 0x218   : > { %v3273_v9 = vpop.permute.xlu1 %3272 }
 0x219   : > { %v3275_v5 = vunpack.i.h.bf16 %v3273_v9  ;;  %v3274_v53 = vunpack.i.l.bf16 %v3273_v9  ;;  %v3268_v9 = vunpack.i.l.bf16 %v4243_v45  ;;  %v1424_v45 = vmul.f32 %v3281_v14, %v4086_v49 }
 0x21a   : > { %v3309_v15 = vpop.permute.xlu2 %3308 }
 0x21b   : > { %v1765_v23 = vmul.f32 %v3275_v5, %v4154_v17  ;;  %v1764_v40 = vmul.f32 %v3274_v53, %v4154_v17  ;;  %v3311_v41 = vunpack.i.h.bf16 %v3309_v15  ;;  %v3310_v4 = vunpack.i.l.bf16 %v3309_v15 }
 0x21c   : > { %v1374_v50 = vmul.f32 %v3268_v9, %v4039_v7  ;;  %v1423_v53 = vmul.f32 %v3280_v55, %v4086_v49  ;;  %v1473_v7 = vmul.f32 %v3293_v37, %v4098_v2  ;;  %v1432_v56 = vadd.f32 %v1424_v45, %v1383_v16 }
 0x21d   : > { %v1772_v19 = vadd.f32 %v1764_v40, %v1723_v58  ;;  %v1773_v6 = vadd.f32 %v1765_v23, %v1724_v48  ;;  %v1912_v24 = vmul.f32 %v3311_v41, %v4179_v38  ;;  %v1911_v30 = vmul.f32 %v3310_v4, %v4179_v38 }
 0x21e   : > { %v1382_v1 = vadd.f32 %v1374_v50, %v4034_v18  ;;  %v1472_v23 = vmul.f32 %v3292_v44, %v4098_v2  ;;  %v1481_v58 = vadd.f32 %v1473_v7, %v1432_v56 }
 0x220   : > { %v1431_v20 = vadd.f32 %v1423_v53, %v1382_v1 }
 0x221   : > { %v3285_v34 = vpop.permute.xlu1 %3284 }
 0x222   : > { %v3287_v0 = vunpack.i.h.bf16 %v3285_v34  ;;  %v3286_v28 = vunpack.i.l.bf16 %v3285_v34  ;;  %v1480_v49 = vadd.f32 %v1472_v23, %v1431_v20 }
 0x223   : > { %v3321_v5 = vpop.permute.xlu2 %3320 }
 0x224   : > { %v1814_v59 = vmul.f32 %v3287_v0, %v4165_v29  ;;  %v1813_v46 = vmul.f32 %v3286_v28, %v4165_v29  ;;  %v3323_v0 = vunpack.i.h.bf16 %v3321_v5  ;;  %v3322_v54 = vunpack.i.l.bf16 %v3321_v5 }
 0x226   : > { %v1821_v42 = vadd.f32 %v1813_v46, %v1772_v19  ;;  %v1822_v31 = vadd.f32 %v1814_v59, %v1773_v6 }
 0x228   : > { %v1870_v62 = vadd.f32 %v1862_v52, %v1821_v42  ;;  %v1871_v21 = vadd.f32 %v1863_v13, %v1822_v31  ;;  %v1620_v13 = vmul.f32 %v3323_v0, %v4128_v39 }
 0x22a   : > { %v3303_v22 = vpop.permute.xlu1 %3302  ;;  %v1919_v32 = vadd.f32 %v1911_v30, %v1870_v62  ;;  %v1920_v43 = vadd.f32 %v1912_v24, %v1871_v21 }
 0x22b   : > { %v3305_v51 = vunpack.i.h.bf16 %v3303_v22  ;;  %v3304_v35 = vunpack.i.l.bf16 %v3303_v22 }
 0x22c   : > { %v1951_v3 = vmul.f32 %v3327_v60, %v1919_v32  ;;  %v1952_v11 = vmul.f32 %v3328_v10, %v1920_v43  ;;  %v3338_v4 = vpop.permute.xlu2 %3337  ;;  %v3344_v60 = vpop.permute.xlu0 %3343 }
 0x22d   : > { %v1522_v12 = vmul.f32 %v3305_v51, %v4109_v25  ;;  %v1521_v34 = vmul.f32 %v3304_v35, %v4109_v25  ;;  %v1619_v25 = vmul.f32 %v3322_v54, %v4128_v39  ;;  %v3340_v42 = vunpack.i.h.bf16 %v3338_v4 }
 0x22e   : > { %v1988_v33 = vpack.c.bf16 %v1952_v11, %v1951_v3  ;;  %v3346_v62 = vunpack.i.h.bf16 %v3344_v60  ;;  %v3345_v21 = vunpack.i.l.bf16 %v3344_v60 }
 0x22f   : > { %v1529_v28 = vadd.f32 %v1521_v34, %v1480_v49  ;;  %v1530_v41 = vadd.f32 %v1522_v12, %v1481_v58  ;;  %v1718_v22 = vmul.f32 %v3340_v42, %v4145_v26  ;;  %v631_v42 = vld [vmem:[%s4309_s29 + $0x10] sm:$0xff] }
 0x230   : > { %2633 = vmatmul.msk.bf16.gmra.mxu0 %vm2005_vm0, %v1988_v33  ;;  %v1766_v33 = vmul.f32 %v3345_v21, %v4154_v17  ;;  %v632_v21 = vld [vmem:[%s4309_s29 + $0x18] sm:$0xff] }
 0x233   : > { %v3315_v27 = vpop.permute.xlu1 %3314 }
 0x234   : > { %v3317_v40 = vunpack.i.h.bf16 %v3315_v27  ;;  %v3316_v15 = vunpack.i.l.bf16 %v3315_v27 }
 0x235   : > { %v3356_v43 = vpop.permute.xlu2 %3355 }
 0x236   : > { %v1571_v48 = vmul.f32 %v3317_v40, %v4112_v36  ;;  %v1570_v18 = vmul.f32 %v3316_v15, %v4112_v36  ;;  %v3339_v36 = vunpack.i.l.bf16 %v3338_v4  ;;  %v3358_v47 = vunpack.i.h.bf16 %v3356_v43 }
 0x237   : > { %v3357_v50 = vunpack.i.l.bf16 %v3356_v43 }
 0x238   : > { %v1578_v19 = vadd.f32 %v1570_v18, %v1529_v28  ;;  %v1579_v6 = vadd.f32 %v1571_v48, %v1530_v41  ;;  %v1717_v32 = vmul.f32 %v3339_v36, %v4145_v26  ;;  %v1865_v51 = vmul.f32 %v3358_v47, %v4174_v61  ;;  %v629_v48 = vld [vmem:[%s4309_s29] sm:$0xff] }
 0x239   : > { %v1864_v35 = vmul.f32 %v3357_v50, %v4174_v61  ;;  %v4302_v61 = vld [vmem:[%s4544_s8] ss:$0 sm:$0xff] }
 0x23a   : > { %v1627_v31 = vadd.f32 %v1619_v25, %v1578_v19  ;;  %v1628_v10 = vadd.f32 %v1620_v13, %v1579_v6  ;;  %v630_v19 = vld [vmem:[%s4309_s29 + $0x8] sm:$0xff] }
 0x23c   : > { %v3332_v2 = vpop.permute.xlu1 %3331 }
 0x23d   : > { %v3334_v59 = vunpack.i.h.bf16 %v3332_v2  ;;  %v3333_v46 = vunpack.i.l.bf16 %v3332_v2  ;;  %v3367_v45 = vpop.permute.xlu2 %3366 }
 0x23e   : > { %v3369_v1 = vunpack.i.h.bf16 %v3367_v45  ;;  %v3368_v16 = vunpack.i.l.bf16 %v3367_v45 }
 0x23f   : > { %v1669_v52 = vmul.f32 %v3334_v59, %v4136_v8  ;;  %v1668_v57 = vmul.f32 %v3333_v46, %v4136_v8  ;;  %v1767_v8 = vmul.f32 %v3346_v62, %v4154_v17 }
 0x241   : > { %v1676_v24 = vadd.f32 %v1668_v57, %v1627_v31  ;;  %v1677_v30 = vadd.f32 %v1669_v52, %v1628_v10 }
 0x243   : > { %v1725_v3 = vadd.f32 %v1717_v32, %v1676_v24  ;;  %v1726_v11 = vadd.f32 %v1718_v22, %v1677_v30 }
 0x245   : > { %v3350_v63 = vpop.permute.xlu1 %3349  ;;  %v1774_v37 = vadd.f32 %v1766_v33, %v1725_v3  ;;  %v1775_v44 = vadd.f32 %v1767_v8, %v1726_v11  ;;  %v633_v11 = vld [vmem:[%s4309_s29 + $0x20] sm:$0xff] }
 0x246   : > { %v3352_v39 = vunpack.i.h.bf16 %v3350_v63  ;;  %v3351_v9 = vunpack.i.l.bf16 %v3350_v63 }
 0x248   : > { %v1816_v14 = vmul.f32 %v3352_v39, %v4165_v29  ;;  %v1815_v55 = vmul.f32 %v3351_v9, %v4165_v29 }
 0x24a   : > { %v1823_v5 = vadd.f32 %v1815_v55, %v1774_v37  ;;  %v1824_v26 = vadd.f32 %v1816_v14, %v1775_v44  ;;  %v634_v44 = vld [vmem:[%s4309_s29 + $0x28] sm:$0xff] }
 0x24c   : > { %v1872_v23 = vadd.f32 %v1864_v35, %v1823_v5  ;;  %v1873_v40 = vadd.f32 %v1865_v51, %v1824_v26  ;;  %v3440_v26 = vmov 32.0  }
 0x24d   : > { %3380 = vrcp.f32 %v3440_v26 }
 0x24e   : > { %v3362_v53 = vpop.permute.xlu1 %3361 }
 0x24f   : > { %v3364_v27 = vunpack.i.h.bf16 %v3362_v53  ;;  %v3363_v17 = vunpack.i.l.bf16 %v3362_v53 }
 0x251   : > { %v1914_v29 = vmul.f32 %v3364_v27, %v4179_v38  ;;  %v1913_v7 = vmul.f32 %v3363_v17, %v4179_v38  ;;  %v4314_v38 = vld [vmem:[%s4545_s9] ss:$0 sm:$0xff] }
 0x253   : > { %v1921_v15 = vadd.f32 %v1913_v7, %v1872_v23  ;;  %v1922_v20 = vadd.f32 %v1914_v29, %v1873_v40  ;;  %v3381_v27 = vpop.eup %3380 }
 0x254   : > { %v2091_v17 = vmul.f32 32.0, %v3381_v27  ;;  %vm2095_vm1 = vweird.f32 %v3381_v27 }
 0x255   : > { %v1953_v56 = vmul.f32 %v3368_v16, %v1921_v15  ;;  %v1954_v12 = vmul.f32 %v3369_v1, %v1922_v20 }
 0x256   : > { %v2092_v1 = vsub.f32 1.0, %v2091_v17 }
 0x257   : > { %v1989_v34 = vpack.c.bf16 %v1954_v12, %v1953_v56 }
 0x258   : > { %v2093_v16 = vmul.f32 %v3381_v27, %v2092_v1  ;;  %v4421_v1 = vld [vmem:[%s4547_s11] ss:$0 sm:$0xff] }
 0x259   : > { %v2027_v49 = vpop.f32.mrf.mxu0  ;;  %2634 = vmatmul.msk.bf16.gmra.mxu0 %vm2005_vm0, %v1989_v34 }
 0x25a   : > { %v2028_v58 = vadd.f32 %v4302_v61, %v2027_v49  ;;  %v2094_v29 = vadd.f32 %v3381_v27, %v2093_v16  ;;  %v635_v49 = vld [vmem:[%s4309_s29 + $0x30] sm:$0xff] }
 0x25c   : > { %v2050_v18 = vmul.f32 %v4314_v38, %v2028_v58  ;;  %v4377_v7 = vsel %vm2095_vm1, %v3381_v27, %v2094_v29 }
 0x25e   : > { %v4320_v0 = vadd.f32 %v2050_v18, %v629_v48  ;;  %v2684_v18 = vld [vmem:[%s4548_s12 + $0x8] sm:$0xff] }
 0x25f   : > { %2324 = vmatpush.bf16.msra.mxu1 %v2684_v18 }
 0x260   : > { %v2066_v54 = vsel %vm2005_vm0, %v4320_v0, 0.0  ;;  %v2105_v28 = vmul.f32 %v4320_v0, %v4320_v0 }
 0x261   : > { %v2029_v41 = vpop.f32.mrf.mxu0  ;;  %2067 = vadd.xlane.f32.xlu0 %v2066_v54 }
 0x262   : > { %v2030_v4 = vadd.f32 %v4302_v61, %v2029_v41  ;;  %v2113_v2 = vsel %vm2005_vm0, %v2105_v28, 0.0 }
 0x263   : > { %2114 = vadd.xlane.f32.xlu2 %v2113_v2 }
 0x264   : > { %v2051_v6 = vmul.f32 %v4314_v38, %v2030_v4 }
 0x266   : > { %v4330_v59 = vadd.f32 %v2051_v6, %v630_v19 }
 0x268   : > { %v2069_v46 = vsel %vm2005_vm0, %v4330_v59, 0.0  ;;  %v2106_v13 = vmul.f32 %v4330_v59, %v4330_v59 }
 0x269   : > { %2070 = vadd.xlane.f32.xlu1 %v2069_v46 }
 0x26a   : > { %v2116_v25 = vsel %vm2005_vm0, %v2106_v13, 0.0 }
 0x26b   : > { %2117 = vadd.xlane.f32.xlu2 %v2116_v25 }
 0x27b   : > { %v2032_v52 = vpop.f32.mrf.mxu0 }
 0x27c   : > { %v2033_v57 = vadd.f32 %v4302_v61, %v2032_v52 }
 0x27e   : > { %v2052_v36 = vmul.f32 %v4314_v38, %v2033_v57  ;;  %v636_v57 = vld [vmem:[%s4309_s29 + $0x38] sm:$0xff] }
 0x280   : > { %v4340_v31 = vadd.f32 %v2052_v36, %v631_v42 }
 0x282   : > { %v2072_v10 = vsel %vm2005_vm0, %v4340_v31, 0.0  ;;  %v2107_v60 = vmul.f32 %v4340_v31, %v4340_v31 }
 0x283   : > { %v2034_v24 = vpop.f32.mrf.mxu0  ;;  %2073 = vadd.xlane.f32.xlu0 %v2072_v10 }
 0x284   : > { %v2035_v30 = vadd.f32 %v4302_v61, %v2034_v24  ;;  %v2119_v62 = vsel %vm2005_vm0, %v2107_v60, 0.0 }
 0x285   : > { %2120 = vadd.xlane.f32.xlu2 %v2119_v62 }
 0x286   : > { %v2053_v22 = vmul.f32 %v4314_v38, %v2035_v30 }
 0x288   : > { %v4350_v32 = vadd.f32 %v2053_v22, %v632_v21  ;;  %v2683_v21 = vld [vmem:[%s4548_s12] sm:$0xff] }
 0x289   : > { %2325 = vmatpush.bf16.msra.mxu1 %v2683_v21 }
 0x28a   : > { %v2075_v43 = vsel %vm2005_vm0, %v4350_v32, 0.0  ;;  %v2108_v63 = vmul.f32 %v4350_v32, %v4350_v32 }
 0x28b   : > { %2076 = vadd.xlane.f32.xlu1 %v2075_v43 }
 0x28c   : > { %v2122_v39 = vsel %vm2005_vm0, %v2108_v63, 0.0 }
 0x28d   : > { %2123 = vadd.xlane.f32.xlu0 %v2122_v39 }
 0x2ad   : > { %v2037_v9 = vpop.f32.mrf.mxu0 }
 0x2ae   : > { %v2038_v3 = vadd.f32 %v4302_v61, %v2037_v9 }
 0x2b0   : > { %v2054_v8 = vmul.f32 %v4314_v38, %v2038_v3 }
 0x2b2   : > { %v4360_v33 = vadd.f32 %v2054_v8, %v633_v11 }
 0x2b4   : > { %v2078_v14 = vsel %vm2005_vm0, %v4360_v33, 0.0  ;;  %v2109_v55 = vmul.f32 %v4360_v33, %v4360_v33 }
 0x2b5   : > { %v2039_v47 = vpop.f32.mrf.mxu0  ;;  %2079 = vadd.xlane.f32.xlu1 %v2078_v14 }
 0x2b6   : > { %v2040_v50 = vadd.f32 %v4302_v61, %v2039_v47  ;;  %v2125_v37 = vsel %vm2005_vm0, %v2109_v55, 0.0 }
 0x2b7   : > { %2126 = vadd.xlane.f32.xlu0 %v2125_v37 }
 0x2b8   : > { %v2055_v5 = vmul.f32 %v4314_v38, %v2040_v50 }
 0x2ba   : > { %v4370_v45 = vadd.f32 %v2055_v5, %v634_v44  ;;  %v4413_v44 = vld [vmem:[%s4546_s10] ss:$0 sm:$0xff] }
 0x2bc   : > { %v2081_v53 = vsel %vm2005_vm0, %v4370_v45, 0.0  ;;  %v2110_v51 = vmul.f32 %v4370_v45, %v4370_v45 }
 0x2bd   : > { %2082 = vadd.xlane.f32.xlu2 %v2081_v53 }
 0x2be   : > { %v2128_v35 = vsel %vm2005_vm0, %v2110_v51, 0.0 }
 0x2bf   : > { %2129 = vadd.xlane.f32.xlu1 %v2128_v35 }
 0x2d4   : > { %v2068_v23 = vpop.xlane.xlu0 %2067 }
 0x2d5   : > { %v2097_v40 = vmul.f32 %v4377_v7, %v2068_v23 }
 0x2d6   : > { %v2115_v15 = vpop.xlane.xlu2 %2114  ;;  %v2042_v20 = vpop.f32.mrf.mxu0 }
 0x2d7   : > { %v2145_v56 = vmul.f32 %v2097_v40, %v2097_v40  ;;  %v2137_v12 = vmul.f32 %v2115_v15, %v4377_v7  ;;  %v2043_v34 = vadd.f32 %v4302_v61, %v2042_v20  ;;  %v2161_v47 = vsub.f32 %v4320_v0, %v2097_v40 }
 0x2d9   : > { %v2153_v58 = vsub.f32 %v2137_v12, %v2145_v56  ;;  %v2056_v48 = vmul.f32 %v4314_v38, %v2043_v34 }
 0x2db   : > { %v2169_v54 = vadd.f32 1e-06, %v2153_v58  ;;  %v4387_v28 = vadd.f32 %v2056_v48, %v635_v49 }
 0x2dc   : > { %v2071_v41 = vpop.xlane.xlu1 %2070 }
 0x2dd   : > { %3382 = vrsqrt.f32 %v2169_v54  ;;  %v2098_v4 = vmul.f32 %v4377_v7, %v2071_v41  ;;  %v2084_v2 = vsel %vm2005_vm0, %v4387_v28, 0.0  ;;  %v2111_v46 = vmul.f32 %v4387_v28, %v4387_v28 }
 0x2de   : > { %v2118_v19 = vpop.xlane.xlu2 %2117  ;;  %v2044_v6 = vpop.f32.mrf.mxu0  ;;  %2085 = vadd.xlane.f32.xlu2 %v2084_v2  ;;  %vm2183_vm3 = vweird.f32 %v2169_v54 }
 0x2df   : > { %v2146_v13 = vmul.f32 %v2098_v4, %v2098_v4  ;;  %v2138_v25 = vmul.f32 %v2118_v19, %v4377_v7  ;;  %v2045_v52 = vadd.f32 %v4302_v61, %v2044_v6  ;;  %v2131_v42 = vsel %vm2005_vm0, %v2111_v46, 0.0 }
 0x2e0   : > { %2132 = vadd.xlane.f32.xlu1 %v2131_v42  ;;  %v2162_v26 = vsub.f32 %v4330_v59, %v2098_v4 }
 0x2e1   : > { %v2154_v36 = vsub.f32 %v2138_v25, %v2146_v13  ;;  %v2057_v10 = vmul.f32 %v4314_v38, %v2045_v52 }
 0x2e3   : > { %v3383_v60 = vpop.eup %3382  ;;  %v2170_v24 = vadd.f32 1e-06, %v2154_v36  ;;  %v4399_v30 = vadd.f32 %v2057_v10, %v636_v57 }
 0x2e4   : > { %v2178_v62 = vmul.f32 %v3383_v60, %v2169_v54  ;;  %vm2184_vm2 = vweird.f32 %v3383_v60 }
 0x2e5   : > { %3384 = vrsqrt.f32 %v2170_v24  ;;  %v2087_v61 = vsel %vm2005_vm0, %v4399_v30, 0.0  ;;  %v2112_v22 = vmul.f32 %v4399_v30, %v4399_v30  ;;  %vm2185_vm4 = vmor %vm2183_vm3, %vm2184_vm2  ;;  %vm2193_vm6 = vweird.f32 %v2170_v24 }
 0x2e6   : > { %v2179_v43 = vmul.f32 %v3383_v60, %v2178_v62  ;;  %2088 = vadd.xlane.f32.xlu0 %v2087_v61 }
 0x2e7   : > { %v2134_v38 = vsel %vm2005_vm0, %v2112_v22, 0.0 }
 0x2e8   : > { %v2180_v63 = vmul.f32 0.5, %v2179_v43  ;;  %2135 = vadd.xlane.f32.xlu2 %v2134_v38 }
 0x2ea   : > { %v2181_v39 = vsub.f32 1.5, %v2180_v63 }
 0x2eb   : > { %v3385_v9 = vpop.eup %3384 }
 0x2ec   : > { %v2182_v3 = vmul.f32 %v3383_v60, %v2181_v39  ;;  %v2188_v11 = vmul.f32 %v3385_v9, %v2170_v24  ;;  %vm2194_vm5 = vweird.f32 %v3385_v9 }
 0x2ed   : > { %vm2195_vm7 = vmor %vm2193_vm6, %vm2194_vm5 }
 0x2ee   : > { %v2189_v8 = vmul.f32 %v3385_v9, %v2188_v11  ;;  %v2186_v14 = vsel %vm2185_vm4, %v3383_v60, %v2182_v3 }
 0x2ef   : > { %v2257_v37 = vmul.f32 %v2186_v14, %v2161_v47 }
 0x2f0   : > { %v2190_v55 = vmul.f32 0.5, %v2189_v8 }
 0x2f1   : > { %v2268_v17 = vmul.f32 %v4413_v44, %v2257_v37 }
 0x2f2   : > { %v2191_v50 = vsub.f32 1.5, %v2190_v55 }
 0x2f3   : > { %v2279_v20 = vadd.f32 %v4421_v1, %v2268_v17 }
 0x2f4   : > { %v2192_v5 = vmul.f32 %v3385_v9, %v2191_v50 }
 0x2f6   : > { %v2196_v53 = vsel %vm2195_vm7, %v3385_v9, %v2192_v5  ;;  %v2074_v51 = vpop.xlane.xlu0 %2073 }
 0x2f7   : > { %v2099_v35 = vmul.f32 %v4377_v7, %v2074_v51  ;;  %v2258_v27 = vmul.f32 %v2196_v53, %v2162_v26 }
 0x2f8   : > { %v2121_v16 = vpop.xlane.xlu2 %2120 }
 0x2f9   : > { %v2147_v29 = vmul.f32 %v2099_v35, %v2099_v35  ;;  %v2139_v23 = vmul.f32 %v2121_v16, %v4377_v7  ;;  %v2269_v40 = vmul.f32 %v4413_v44, %v2258_v27  ;;  %v2163_v60 = vsub.f32 %v4340_v31, %v2099_v35 }
 0x2fb   : > { %v2155_v15 = vsub.f32 %v2139_v23, %v2147_v29  ;;  %v2280_v56 = vadd.f32 %v4421_v1, %v2269_v40 }
 0x2fd   : > { %v2171_v12 = vadd.f32 1e-06, %v2155_v15  ;;  %v2287_v34 = vpack.c.bf16 %v2280_v56, %v2279_v20 }
 0x2fe   : > { %v2077_v49 = vpop.xlane.xlu1 %2076 }
 0x2ff   : > { %3386 = vrsqrt.f32 %v2171_v12  ;;  %v2100_v58 = vmul.f32 %v4377_v7, %v2077_v49  ;;  %2643 = vmatmul.msk.bf16.vlgmr.msra.gmra.mxu1 %vm2005_vm0, %v2287_v34  ;;  %vm2203_vm9 = vweird.f32 %v2171_v12 }
 0x300   : > { %v2124_v48 = vpop.xlane.xlu0 %2123 }
 0x301   : > { %v2148_v18 = vmul.f32 %v2100_v58, %v2100_v58  ;;  %v2140_v54 = vmul.f32 %v2124_v48, %v4377_v7  ;;  %v2164_v61 = vsub.f32 %v4350_v32, %v2100_v58 }
 0x303   : > { %v2156_v41 = vsub.f32 %v2140_v54, %v2148_v18 }
 0x305   : > { %v3387_v4 = vpop.eup %3386  ;;  %v2172_v2 = vadd.f32 1e-06, %v2156_v41 }
 0x306   : > { %v2198_v19 = vmul.f32 %v3387_v4, %v2171_v12  ;;  %vm2204_vm8 = vweird.f32 %v3387_v4 }
 0x307   : > { %3388 = vrsqrt.f32 %v2172_v2  ;;  %vm2205_vm10 = vmor %vm2203_vm9, %vm2204_vm8  ;;  %vm2213_vm12 = vweird.f32 %v2172_v2 }
 0x308   : > { %v2199_v6 = vmul.f32 %v3387_v4, %v2198_v19 }
 0x30a   : > { %v2200_v46 = vmul.f32 0.5, %v2199_v6 }
 0x30c   : > { %v2201_v13 = vsub.f32 1.5, %v2200_v46 }
 0x30d   : > { %v3389_v25 = vpop.eup %3388 }
 0x30e   : > { %v2202_v52 = vmul.f32 %v3387_v4, %v2201_v13  ;;  %v2208_v57 = vmul.f32 %v3389_v25, %v2172_v2  ;;  %vm2214_vm11 = vweird.f32 %v3389_v25 }
 0x30f   : > { %vm2215_vm13 = vmor %vm2213_vm12, %vm2214_vm11 }
 0x310   : > { %v2209_v42 = vmul.f32 %v3389_v25, %v2208_v57  ;;  %v2206_v36 = vsel %vm2205_vm10, %v3387_v4, %v2202_v52 }
 0x311   : > { %v2259_v62 = vmul.f32 %v2206_v36, %v2163_v60 }
 0x312   : > { %v2210_v10 = vmul.f32 0.5, %v2209_v42 }
 0x313   : > { %v2270_v38 = vmul.f32 %v4413_v44, %v2259_v62 }
 0x314   : > { %v2211_v24 = vsub.f32 1.5, %v2210_v10 }
 0x315   : > { %v2281_v39 = vadd.f32 %v4421_v1, %v2270_v38 }
 0x316   : > { %v2212_v21 = vmul.f32 %v3389_v25, %v2211_v24 }
 0x318   : > { %v2216_v22 = vsel %vm2215_vm13, %v3389_v25, %v2212_v21 }
 0x319   : > { %v2260_v43 = vmul.f32 %v2216_v22, %v2164_v61 }
 0x31b   : > { %v2271_v63 = vmul.f32 %v4413_v44, %v2260_v43 }
 0x31d   : > { %v2282_v9 = vadd.f32 %v4421_v1, %v2271_v63 }
 0x31f   : > { %v2288_v3 = vpack.c.bf16 %v2282_v9, %v2281_v39 }
 0x321   : > { %2644 = vmatmul.msk.bf16.gmra.mxu1 %vm2005_vm0, %v2288_v3 }
 0x328   : > { %v2080_v11 = vpop.xlane.xlu1 %2079 }
 0x329   : > { %v2101_v8 = vmul.f32 %v4377_v7, %v2080_v11 }
 0x32a   : > { %v2127_v14 = vpop.xlane.xlu0 %2126 }
 0x32b   : > { %v2149_v55 = vmul.f32 %v2101_v8, %v2101_v8  ;;  %v2141_v47 = vmul.f32 %v2127_v14, %v4377_v7  ;;  %v2165_v48 = vsub.f32 %v4360_v33, %v2101_v8  ;;  %v2692_v8 = vld [vmem:[%s4550_s14 + $0x38] sm:$0xff] }
 0x32c   : > { %2474 = vmatpush.bf16.msra.mxu2 %v2692_v8  ;;  %2735 = vmatpush.bf16.msra.mxu3 %v2692_v8 }
 0x32d   : > { %v2157_v50 = vsub.f32 %v2141_v47, %v2149_v55 }
 0x32f   : > { %v2173_v37 = vadd.f32 1e-06, %v2157_v50 }
 0x330   : > { %v2083_v5 = vpop.xlane.xlu2 %2082 }
 0x331   : > { %3390 = vrsqrt.f32 %v2173_v37  ;;  %v2102_v26 = vmul.f32 %v4377_v7, %v2083_v5  ;;  %vm2223_vm15 = vweird.f32 %v2173_v37 }
 0x332   : > { %v2130_v53 = vpop.xlane.xlu1 %2129 }
 0x333   : > { %v2150_v51 = vmul.f32 %v2102_v26, %v2102_v26  ;;  %v2142_v35 = vmul.f32 %v2130_v53, %v4377_v7  ;;  %v2166_v4 = vsub.f32 %v4370_v45, %v2102_v26  ;;  %v2691_v53 = vld [vmem:[%s4550_s14 + $0x30] sm:$0xff] }
 0x334   : > { %2475 = vmatpush.bf16.msra.mxu2 %v2691_v53  ;;  %2736 = vmatpush.bf16.msra.mxu3 %v2691_v53 }
 0x335   : > { %v2158_v27 = vsub.f32 %v2142_v35, %v2150_v51 }
 0x337   : > { %v3391_v17 = vpop.eup %3390  ;;  %v2174_v16 = vadd.f32 1e-06, %v2158_v27  ;;  %v2690_v27 = vld [vmem:[%s4550_s14 + $0x28] sm:$0xff] }
 0x338   : > { %v2218_v29 = vmul.f32 %v3391_v17, %v2173_v37  ;;  %vm2224_vm14 = vweird.f32 %v3391_v17  ;;  %2476 = vmatpush.bf16.msra.mxu2 %v2690_v27  ;;  %2737 = vmatpush.bf16.msra.mxu3 %v2690_v27 }
 0x339   : > { %3392 = vrsqrt.f32 %v2174_v16  ;;  %vm2225_vm1 = vmor %vm2223_vm15, %vm2224_vm14  ;;  %vm2233_vm3 = vweird.f32 %v2174_v16 }
 0x33a   : > { %v2219_v23 = vmul.f32 %v3391_v17, %v2218_v29 }
 0x33c   : > { %v2220_v40 = vmul.f32 0.5, %v2219_v23 }
 0x33e   : > { %v2221_v15 = vsub.f32 1.5, %v2220_v40  ;;  %v2689_v40 = vld [vmem:[%s4550_s14 + $0x20] sm:$0xff] }
 0x33f   : > { %v3393_v20 = vpop.eup %3392  ;;  %2477 = vmatpush.bf16.msra.mxu2 %v2689_v40  ;;  %2738 = vmatpush.bf16.msra.mxu3 %v2689_v40 }
 0x340   : > { %v2222_v56 = vmul.f32 %v3391_v17, %v2221_v15  ;;  %v2228_v12 = vmul.f32 %v3393_v20, %v2174_v16  ;;  %vm2234_vm2 = vweird.f32 %v3393_v20 }
 0x341   : > { %vm2235_vm4 = vmor %vm2233_vm3, %vm2234_vm2 }
 0x342   : > { %v2229_v34 = vmul.f32 %v3393_v20, %v2228_v12  ;;  %v2226_v49 = vsel %vm2225_vm1, %v3391_v17, %v2222_v56  ;;  %v2688_v12 = vld [vmem:[%s4550_s14 + $0x18] sm:$0xff] }
 0x343   : > { %v2261_v54 = vmul.f32 %v2226_v49, %v2165_v48  ;;  %2478 = vmatpush.bf16.msra.mxu2 %v2688_v12  ;;  %2739 = vmatpush.bf16.msra.mxu3 %v2688_v12 }
 0x344   : > { %v2230_v58 = vmul.f32 0.5, %v2229_v34 }
 0x345   : > { %v2272_v6 = vmul.f32 %v4413_v44, %v2261_v54 }
 0x346   : > { %v2231_v18 = vsub.f32 1.5, %v2230_v58  ;;  %v4476_v58 = vld [vmem:[%s4549_s13] ss:$0 sm:$0xff] }
 0x347   : > { %v2283_v13 = vadd.f32 %v4421_v1, %v2272_v6 }
 0x348   : > { %v2232_v41 = vmul.f32 %v3393_v20, %v2231_v18 }
 0x34a   : > { %v2236_v2 = vsel %vm2235_vm4, %v3393_v20, %v2232_v41 }
 0x34b   : > { %v2262_v19 = vmul.f32 %v2236_v2, %v2166_v4 }
 0x34d   : > { %v2273_v46 = vmul.f32 %v4413_v44, %v2262_v19  ;;  %v2685_v19 = vld [vmem:[%s4550_s14] sm:$0xff] }
 0x34f   : > { %v2284_v25 = vadd.f32 %v4421_v1, %v2273_v46 }
 0x351   : > { %v2086_v52 = vpop.xlane.xlu2 %2085  ;;  %v2289_v57 = vpack.c.bf16 %v2284_v25, %v2283_v13 }
 0x352   : > { %v2103_v42 = vmul.f32 %v4377_v7, %v2086_v52 }
 0x353   : > { %2645 = vmatmul.msk.bf16.gmra.mxu1 %vm2005_vm0, %v2289_v57  ;;  %v2133_v10 = vpop.xlane.xlu1 %2132 }
 0x354   : > { %v2151_v36 = vmul.f32 %v2103_v42, %v2103_v42  ;;  %v2143_v60 = vmul.f32 %v2133_v10, %v4377_v7  ;;  %v2167_v51 = vsub.f32 %v4387_v28, %v2103_v42 }
 0x356   : > { %v2159_v24 = vsub.f32 %v2143_v60, %v2151_v36 }
 0x358   : > { %v2175_v62 = vadd.f32 1e-06, %v2159_v24 }
 0x359   : > { %v2089_v21 = vpop.xlane.xlu0 %2088 }
 0x35a   : > { %v2104_v61 = vmul.f32 %v4377_v7, %v2089_v21  ;;  %3394 = vrsqrt.f32 %v2175_v62  ;;  %vm2243_vm6 = vweird.f32 %v2175_v62 }
 0x35b   : > { %v2136_v22 = vpop.xlane.xlu2 %2135 }
 0x35c   : > { %v2152_v43 = vmul.f32 %v2104_v61, %v2104_v61  ;;  %v2144_v38 = vmul.f32 %v2136_v22, %v4377_v7  ;;  %v2168_v29 = vsub.f32 %v4399_v30, %v2104_v61 }
 0x35e   : > { %v2160_v63 = vsub.f32 %v2144_v38, %v2152_v43 }
 0x360   : > { %v2176_v39 = vadd.f32 1e-06, %v2160_v63  ;;  %v3395_v9 = vpop.eup %3394 }
 0x361   : > { %v2238_v3 = vmul.f32 %v3395_v9, %v2175_v62  ;;  %vm2244_vm5 = vweird.f32 %v3395_v9 }
 0x362   : > { %3396 = vrsqrt.f32 %v2176_v39  ;;  %vm2245_vm7 = vmor %vm2243_vm6, %vm2244_vm5  ;;  %vm2253_vm9 = vweird.f32 %v2176_v39 }
 0x363   : > { %v2239_v11 = vmul.f32 %v3395_v9, %v2238_v3 }
 0x365   : > { %v2240_v14 = vmul.f32 0.5, %v2239_v11 }
 0x367   : > { %v2241_v47 = vsub.f32 1.5, %v2240_v14 }
 0x368   : > { %v3397_v55 = vpop.eup %3396 }
 0x369   : > { %v2248_v50 = vmul.f32 %v3397_v55, %v2176_v39  ;;  %v2242_v37 = vmul.f32 %v3395_v9, %v2241_v47  ;;  %vm2254_vm8 = vweird.f32 %v3397_v55 }
 0x36a   : > { %vm2255_vm10 = vmor %vm2253_vm9, %vm2254_vm8 }
 0x36b   : > { %v2249_v7 = vmul.f32 %v3397_v55, %v2248_v50  ;;  %v2246_v5 = vsel %vm2245_vm7, %v3395_v9, %v2242_v37 }
 0x36c   : > { %v2263_v17 = vmul.f32 %v2246_v5, %v2167_v51 }
 0x36d   : > { %v2250_v26 = vmul.f32 0.5, %v2249_v7 }
 0x36e   : > { %v2274_v20 = vmul.f32 %v4413_v44, %v2263_v17 }
 0x36f   : > { %v2251_v35 = vsub.f32 1.5, %v2250_v26 }
 0x370   : > { %v2285_v34 = vadd.f32 %v4421_v1, %v2274_v20 }
 0x371   : > { %v2252_v16 = vmul.f32 %v3397_v55, %v2251_v35 }
 0x373   : > { %v2256_v23 = vsel %vm2255_vm10, %v3397_v55, %v2252_v16 }
 0x374   : > { %v2264_v15 = vmul.f32 %v2256_v23, %v2168_v29 }
 0x376   : > { %v2275_v56 = vmul.f32 %v4413_v44, %v2264_v15  ;;  %v2687_v44 = vld [vmem:[%s4550_s14 + $0x10] sm:$0xff] }
 0x377   : > { %2479 = vmatpush.bf16.msra.mxu2 %v2687_v44  ;;  %2740 = vmatpush.bf16.msra.mxu3 %v2687_v44 }
 0x378   : > { %v2286_v49 = vadd.f32 %v4421_v1, %v2275_v56  ;;  %v2686_v1 = vld [vmem:[%s4550_s14 + $0x8] sm:$0xff] }
 0x37a   : > { %v2290_v48 = vpack.c.bf16 %v2286_v49, %v2285_v34 }
 0x37b   : > { %2480 = vmatpush.bf16.msra.mxu2 %v2686_v1  ;;  %2741 = vmatpush.bf16.msra.mxu3 %v2686_v1 }
 0x37c   : > { %v2327_v18 = vpop.f32.mrf.mxu1  ;;  %2646 = vmatmul.msk.bf16.gmra.mxu1 %vm2005_vm0, %v2290_v48 }
 0x37d   : > { %v2328_v54 = vadd.f32 %v4476_v58, %v2327_v18 }
 0x37f   : > { %v2347_v41 = vmul.f32 %v2328_v54, %v2328_v54  ;;  %2481 = vmatpush.bf16.msra.mxu2 %v2685_v19  ;;  %2742 = vmatpush.bf16.msra.mxu3 %v2685_v19 }
 0x381   : > { %v2355_v4 = vmul.f32 %v2347_v41, %v2328_v54 }
 0x383   : > { %v2363_v2 = vmul.f32 0.044715, %v2355_v4 }
 0x384   : > { %v2329_v6 = vpop.f32.mrf.mxu1 }
 0x385   : > { %v2371_v46 = vadd.f32 %v2363_v2, %v2328_v54  ;;  %v2330_v13 = vadd.f32 %v4476_v58, %v2329_v6 }
 0x387   : > { %v2348_v25 = vmul.f32 %v2330_v13, %v2330_v13  ;;  %v2379_v52 = vmul.f32 0.7978846, %v2371_v46 }
 0x389   : > { %v2356_v57 = vmul.f32 %v2348_v25, %v2330_v13  ;;  %3398 = vtanh.f32 %v2379_v52 }
 0x38b   : > { %v2364_v42 = vmul.f32 0.044715, %v2356_v57 }
 0x38d   : > { %v2372_v36 = vadd.f32 %v2364_v42, %v2330_v13 }
 0x38f   : > { %v2380_v10 = vmul.f32 0.7978846, %v2372_v36  ;;  %v3399_v60 = vpop.eup %3398 }
 0x390   : > { %v2395_v24 = vadd.f32 1.0, %v3399_v60 }
 0x391   : > { %3400 = vtanh.f32 %v2380_v10 }
 0x392   : > { %v2403_v61 = vmul.f32 0.5, %v2395_v24 }
 0x394   : > { %v2411_v43 = vmul.f32 %v2403_v61, %v2328_v54 }
 0x397   : > { %v3401_v62 = vpop.eup %3400 }
 0x398   : > { %v2396_v21 = vadd.f32 1.0, %v3401_v62 }
 0x39a   : > { %v2404_v22 = vmul.f32 0.5, %v2396_v21 }
 0x39c   : > { %v2412_v38 = vmul.f32 %v2404_v22, %v2330_v13 }
 0x39e   : > { %v2332_v63 = vpop.f32.mrf.mxu1  ;;  %v2419_v39 = vpack.c.bf16 %v2412_v38, %v2411_v43 }
 0x39f   : > { %v2333_v9 = vadd.f32 %v4476_v58, %v2332_v63 }
 0x3a0   : > { %2482 = vmatmul.bf16.vlgmr.msra.gmra.mxu2 %v2419_v39 }
 0x3a1   : > { %v2349_v3 = vmul.f32 %v2333_v9, %v2333_v9 }
 0x3a3   : > { %v2357_v11 = vmul.f32 %v2349_v3, %v2333_v9 }
 0x3a5   : > { %v2365_v8 = vmul.f32 0.044715, %v2357_v11 }
 0x3a6   : > { %v2334_v14 = vpop.f32.mrf.mxu1 }
 0x3a7   : > { %v2373_v55 = vadd.f32 %v2365_v8, %v2333_v9  ;;  %v2335_v47 = vadd.f32 %v4476_v58, %v2334_v14 }
 0x3a9   : > { %v2350_v50 = vmul.f32 %v2335_v47, %v2335_v47  ;;  %v2381_v37 = vmul.f32 0.7978846, %v2373_v55 }
 0x3ab   : > { %v2358_v7 = vmul.f32 %v2350_v50, %v2335_v47  ;;  %3402 = vtanh.f32 %v2381_v37 }
 0x3ad   : > { %v2366_v5 = vmul.f32 0.044715, %v2358_v7 }
 0x3af   : > { %v2374_v26 = vadd.f32 %v2366_v5, %v2335_v47 }
 0x3b1   : > { %v2382_v53 = vmul.f32 0.7978846, %v2374_v26  ;;  %v3403_v51 = vpop.eup %3402 }
 0x3b2   : > { %v2397_v35 = vadd.f32 1.0, %v3403_v51  ;;  %v3379_v51 = vld [vmem:[%s4552_s16] ss:$0 sm:$0xff] }
 0x3b3   : > { %3404 = vtanh.f32 %v2382_v53 }
 0x3b4   : > { %v2405_v16 = vmul.f32 0.5, %v2397_v35 }
 0x3b6   : > { %v2413_v23 = vmul.f32 %v2405_v16, %v2333_v9 }
 0x3b9   : > { %v3405_v27 = vpop.eup %3404 }
 0x3ba   : > { %v2398_v17 = vadd.f32 1.0, %v3405_v27 }
 0x3bc   : > { %v2406_v29 = vmul.f32 0.5, %v2398_v17 }
 0x3be   : > { %v2414_v40 = vmul.f32 %v2406_v29, %v2335_v47 }
 0x3c0   : > { %v2420_v15 = vpack.c.bf16 %v2414_v40, %v2413_v23 }
 0x3c2   : > { %2487 = vmatmul.bf16.vlgmr.msra.gmra.mxu3 %v2420_v15 }
 0x3d0   : > { %v2337_v20 = vpop.f32.mrf.mxu1 }
 0x3d1   : > { %v2338_v56 = vadd.f32 %v4476_v58, %v2337_v20 }
 0x3d3   : > { %v2351_v12 = vmul.f32 %v2338_v56, %v2338_v56 }
 0x3d5   : > { %v2359_v34 = vmul.f32 %v2351_v12, %v2338_v56 }
 0x3d7   : > { %v2367_v49 = vmul.f32 0.044715, %v2359_v34 }
 0x3d8   : > { %v2339_v48 = vpop.f32.mrf.mxu1 }
 0x3d9   : > { %v2375_v44 = vadd.f32 %v2367_v49, %v2338_v56  ;;  %v2340_v18 = vadd.f32 %v4476_v58, %v2339_v48 }
 0x3db   : > { %v2352_v54 = vmul.f32 %v2340_v18, %v2340_v18  ;;  %v2383_v41 = vmul.f32 0.7978846, %v2375_v44 }
 0x3dd   : > { %v2360_v1 = vmul.f32 %v2352_v54, %v2340_v18  ;;  %3406 = vtanh.f32 %v2383_v41 }
 0x3df   : > { %v2368_v4 = vmul.f32 0.044715, %v2360_v1 }
 0x3e1   : > { %v2376_v2 = vadd.f32 %v2368_v4, %v2340_v18 }
 0x3e3   : > { %v2384_v19 = vmul.f32 0.7978846, %v2376_v2  ;;  %v3407_v6 = vpop.eup %3406 }
 0x3e4   : > { %v2399_v46 = vadd.f32 1.0, %v3407_v6 }
 0x3e5   : > { %3408 = vtanh.f32 %v2384_v19 }
 0x3e6   : > { %v2407_v52 = vmul.f32 0.5, %v2399_v46 }
 0x3e8   : > { %v2415_v42 = vmul.f32 %v2407_v52, %v2338_v56 }
 0x3eb   : > { %v3409_v13 = vpop.eup %3408 }
 0x3ec   : > { %v2400_v25 = vadd.f32 1.0, %v3409_v13 }
 0x3ee   : > { %v2408_v57 = vmul.f32 0.5, %v2400_v25 }
 0x3f0   : > { %v2416_v36 = vmul.f32 %v2408_v57, %v2340_v18 }
 0x3f2   : > { %v2421_v10 = vpack.c.bf16 %v2416_v36, %v2415_v42 }
 0x3f4   : > { %2492 = vmatmul.bf16.gmra.mxu3 %v2421_v10 }
 0x3f9   : > { %v2342_v60 = vpop.f32.mrf.mxu1 }
 0x3fa   : > { %v2343_v24 = vadd.f32 %v4476_v58, %v2342_v60 }
 0x3fc   : > { %v2353_v62 = vmul.f32 %v2343_v24, %v2343_v24 }
 0x3fe   : > { %v2361_v21 = vmul.f32 %v2353_v62, %v2343_v24 }
 0x400   : > { %v2369_v61 = vmul.f32 0.044715, %v2361_v21 }
 0x401   : > { %v2344_v22 = vpop.f32.mrf.mxu1 }
 0x402   : > { %v2377_v43 = vadd.f32 %v2369_v61, %v2343_v24  ;;  %v2345_v38 = vadd.f32 %v4476_v58, %v2344_v22  ;;  %v3378_v58 = vld [vmem:[%s4551_s15] ss:$0 sm:$0xff] }
 0x404   : > { %v2354_v63 = vmul.f32 %v2345_v38, %v2345_v38  ;;  %v2385_v39 = vmul.f32 0.7978846, %v2377_v43 }
 0x406   : > { %v2362_v9 = vmul.f32 %v2354_v63, %v2345_v38  ;;  %3410 = vtanh.f32 %v2385_v39 }
 0x408   : > { %v2370_v3 = vmul.f32 0.044715, %v2362_v9 }
 0x40a   : > { %v2378_v11 = vadd.f32 %v2370_v3, %v2345_v38 }
 0x40c   : > { %v2386_v8 = vmul.f32 0.7978846, %v2378_v11  ;;  %v3411_v14 = vpop.eup %3410 }
 0x40d   : > { %v2401_v55 = vadd.f32 1.0, %v3411_v14 }
 0x40e   : > { %3412 = vtanh.f32 %v2386_v8 }
 0x40f   : > { %v2409_v37 = vmul.f32 0.5, %v2401_v55 }
 0x411   : > { %v2417_v5 = vmul.f32 %v2409_v37, %v2343_v24 }
 0x414   : > { %v3413_v47 = vpop.eup %3412 }
 0x415   : > { %v2402_v50 = vadd.f32 1.0, %v3413_v47 }
 0x417   : > { %v2410_v7 = vmul.f32 0.5, %v2402_v50 }
 0x419   : > { %v2418_v26 = vmul.f32 %v2410_v7, %v2345_v38 }
 0x41b   : > { %v2422_v53 = vpack.c.bf16 %v2418_v26, %v2417_v5 }
 0x41d   : > { %2497 = vmatmul.bf16.gmra.mxu3 %v2422_v53 }
 0x423   : > { %v2483_v35 = vpop.f32.mrf.mxu2 }
 0x424   : > { %v2484_v27 = vadd.f32 %v3378_v58, %v2483_v35 }
 0x426   : > { %v2506_v17 = vmul.f32 %v3379_v51, %v2484_v27 }
 0x428   : > { %v2514_v16 = vadd.f32 %v2506_v17, %v4320_v0 }
 0x42a   : > { %2522 = vst.msk [vmem:[%s4507_s28] sm:$0xff] %vm2005_vm0, %v2514_v16 }
 0x42b   : > { %v2485_v29 = vpop.f32.mrf.mxu2 }
 0x42c   : > { %v2486_v23 = vadd.f32 %v3378_v58, %v2485_v29 }
 0x42e   : > { %v2507_v40 = vmul.f32 %v3379_v51, %v2486_v23 }
 0x430   : > { %v2515_v15 = vadd.f32 %v2507_v40, %v4330_v59 }
 0x432   : > { %2523 = vst.msk [vmem:[%s4507_s28 + $0x8] sm:$0xff] %vm2005_vm0, %v2515_v15 }
 0x445   : > { %v2488_v20 = vpop.f32.mrf.mxu3 }
 0x446   : > { %v2489_v56 = vadd.f32 %v3378_v58, %v2488_v20 }
 0x448   : > { %v2508_v12 = vmul.f32 %v3379_v51, %v2489_v56 }
 0x44a   : > { %v2516_v34 = vadd.f32 %v2508_v12, %v4340_v31 }
 0x44c   : > { %2524 = vst.msk [vmem:[%s4507_s28 + $0x10] sm:$0xff] %vm2005_vm0, %v2516_v34 }
 0x44d   : > { %v2490_v0 = vpop.f32.mrf.mxu3 }
 0x44e   : > { %v2491_v49 = vadd.f32 %v3378_v58, %v2490_v0 }
 0x450   : > { %v2509_v48 = vmul.f32 %v3379_v51, %v2491_v49 }
 0x452   : > { %v2517_v44 = vadd.f32 %v2509_v48, %v4350_v32 }
 0x454   : > { %2525 = vst.msk [vmem:[%s4507_s28 + $0x18] sm:$0xff] %vm2005_vm0, %v2517_v44 }
 0x477   : > { %v2493_v59 = vpop.f32.mrf.mxu3 }
 0x478   : > { %v2494_v18 = vadd.f32 %v3378_v58, %v2493_v59 }
 0x47a   : > { %v2510_v54 = vmul.f32 %v3379_v51, %v2494_v18 }
 0x47c   : > { %v2518_v41 = vadd.f32 %v2510_v54, %v4360_v33 }
 0x47e   : > { %2526 = vst.msk [vmem:[%s4507_s28 + $0x20] sm:$0xff] %vm2005_vm0, %v2518_v41 }
 0x47f   : > { %v2495_v31 = vpop.f32.mrf.mxu3 }
 0x480   : > { %v2496_v1 = vadd.f32 %v3378_v58, %v2495_v31 }
 0x482   : > { %v2511_v4 = vmul.f32 %v3379_v51, %v2496_v1 }
 0x484   : > { %v2519_v2 = vadd.f32 %v2511_v4, %v4370_v45 }
 0x486   : > { %2527 = vst.msk [vmem:[%s4507_s28 + $0x28] sm:$0xff] %vm2005_vm0, %v2519_v2 }
 0x4a0   : > { %v2498_v19 = vpop.f32.mrf.mxu3 }
 0x4a1   : > { %v2499_v32 = vadd.f32 %v3378_v58, %v2498_v19 }
 0x4a3   : > { %v2512_v6 = vmul.f32 %v3379_v51, %v2499_v32 }
 0x4a5   : > { %v2520_v46 = vadd.f32 %v2512_v6, %v4387_v28 }
 0x4a7   : > { %2528 = vst.msk [vmem:[%s4507_s28 + $0x30] sm:$0xff] %vm2005_vm0, %v2520_v46 }
 0x4a8   : > { %v2500_v13 = vpop.f32.mrf.mxu3 }
 0x4a9   : > { %v2501_v25 = vadd.f32 %v3378_v58, %v2500_v13 }
 0x4ab   : > { %v2513_v33 = vmul.f32 %v3379_v51, %v2501_v25 }
 0x4ad   : > { %v2521_v52 = vadd.f32 %v2513_v33, %v4399_v30 }
 0x4af   : > { %2529 = vst.msk [vmem:[%s4507_s28 + $0x38] sm:$0xff] %vm2005_vm0, %v2521_v52 }
 0x4b0 PF: > { %s27_s24 = sadd.s32 1, %s3420_s24  }
 0x4b1   : > { %p24_p4 = scmp.ge.s32.totalorder %s27_s24, 10  }
 0x4b3   :  { %26 = sbr.rel (!%p24_p4) target bundleno = 3 (0x3), region = 124 }

// kernel: _lambda_.7
= control target key start
LH: loop header
LB: loop body
LE: loop exit
PB: predicated region body
PF: predicated region fallthrough
CT: control target
= control target key end

     0   :  { %s3589_s12 = smov 0   ;;  %s3591_s13 = smov 0   ;;  %s5343_s0 = inlined_call_operand.vmem [shape: bf16[2,16,16,56], index: 0, kind: input, shape index: {}]   ;;  %s5344_s1 = inlined_call_operand.vmem [shape: f32[49,56], index: 1, kind: input, shape index: {}]   ;;  %s5345_s2 = inlined_call_operand.vmem [shape: f32[1,56], index: 2, kind: input, shape index: {}]   ;;  %s5346_s3 = inlined_call_operand.vmem [shape: bf16[2,16,16,56], index: 3, kind: output, shape index: {}]  }
   0x1   :  { %s3593_s14 = smov 0   ;;  %s3595_s15 = smov 0  }
   0x2   :  { %s3597_s16 = smov 0  }
   0x3 LB: > { %s22_s17 = sadd.s32 1, %s3558_s14  ;;  %s25_s18 = sadd.s32 1, %s3562_s15  ;;  %s3566_s16 = sphi %s3597_s16, %s13_s16   ;;  %s3562_s15 = sphi %s3595_s15, %s5350_s15   ;;  %s3558_s14 = sphi %s3593_s14, %s5349_s14   ;;  %s3554_s13 = sphi %s3591_s13, %s5348_s13   ;;  %s3550_s12 = sphi %s3589_s12, %s5347_s12  }
   0x4   : > { %p23_p0 = scmp.ge.s32.totalorder %s22_s17, 4  ;;  %p3305_p1 = scmp.ge.s32.totalorder %s3566_s16, 1 }
   0x5   : > { %p151_p2 = scmp.lt.s32.totalorder %s3566_s16, 9 }
   0x6   : > { %s5352_s17 = smov (%p23_p0, %s22_s17), 0  ;;  %s5354_s18 = smov (!%p23_p0, %s25_s18), %s3562_s15 }
   0x7   : > { %p152_p3 = pnand %p3305_p1, %p151_p2  ;;  %p27_p4 = scmp.ge.s32.totalorder %s5354_s18, 2 }
   0x8   : > { %p180_p5 = scmp.lt.s32.totalorder (!%p152_p3), %s3554_s13, 1  ;;  %s3308_s19 = sshll.u32 (!%p152_p3), %s3550_s12, 2 }
   0x9   : > { %s5356_s18 = smov (%p27_p4, %s5354_s18), 0  ;;  %155 = sbr.rel (%p152_p3) target bundleno = 597 (0x255), region = 32 }
   0xa   : > { %p188_p6 = scmp.lt.s32.totalorder (!%p152_p3), %s3308_s19, 15  ;;  %p3312_p7 = scmp.ne.s32.totalorder (!%p152_p3), %s3550_s12, 0 }
   0xe   : > { %s5358_s13 = smov (!%p180_p5, %s3554_s13), 1  ;;  %s5360_s19 = smov (!%p188_p6, %s3308_s19), 15 }
   0xf   : > { %s3401_s20 = sshll.u32 %s5358_s13, 7  ;;  %s3310_s21 = sshll.u32 %s5358_s13, 5 }
  0x10   : > { %s3625_s24 = scalar_lea.vmem %s5343_s0, %s3401_s20  ;;  %s3309_s25 = sshll.u32 %s5360_s19, 1 }
  0x11   : > { %s192_s26 = sadd.s32 %s3310_s21, %s3309_s25  ;;  %199 = sbr.rel (%p3312_p7) target bundleno = 121 (0x79), region = 36 }
  0x12   : > { %s3311_s27 = sshll.u32 %s192_s26, 2 }
  0x13   : > { %s3630_s30 = scalar_lea.vmem %s5346_s3, %s3311_s27 }
  0x16   : > { %vm200_vm0 = vcmask 457728   ;;  %v3568_v0 = vmov 0.0   ;;  %vm203_vm1 = vcmask 455680   ;;  %v3403_v1 = vld [vmem:[%s3625_s24] sm:$0xff]   ;;  %v3466_v2 = vld [vmem:[%s3625_s24 + $0x8] sm:$0xff]   ;;  %v3467_v5 = vld [vmem:[%s3625_s24 + $0x10] sm:$0xff]  }
  0x17   : > { %211 = vst.msk [vmem:[#allocation2 + $0x48] sm:$0xff] %vm200_vm0, %v3568_v0  ;;  %v3404_v3 = vunpack.c.l.bf16 %v3403_v1  ;;  %v3405_v4 = vunpack.c.h.bf16 %v3403_v1  ;;  %v3408_v6 = vunpack.c.l.bf16 %v3466_v2  ;;  %v3409_v7 = vunpack.c.h.bf16 %v3466_v2  ;;  %v3468_v8 = vld [vmem:[%s3625_s24 + $0x18] sm:$0xff]   ;;  %v3469_v11 = vld [vmem:[%s3625_s24 + $0x20] sm:$0xff]   ;;  %v3470_v14 = vld [vmem:[%s3625_s24 + $0x28] sm:$0xff]  }
  0x18   : > { %201 = vst.msk [vmem:[#allocation2] sm:$0xff] %vm200_vm0, %v3568_v0  ;;  %v3412_v9 = vunpack.c.l.bf16 %v3467_v5  ;;  %v3413_v10 = vunpack.c.h.bf16 %v3467_v5  ;;  %v3416_v12 = vunpack.c.l.bf16 %v3468_v8  ;;  %v3417_v13 = vunpack.c.h.bf16 %v3468_v8  ;;  %v3471_v17 = vld [vmem:[%s3625_s24 + $0x30] sm:$0xff]   ;;  %v3472_v20 = vld [vmem:[%s3625_s24 + $0x38] sm:$0xff]   ;;  %v3473_v23 = vld [vmem:[%s3625_s24 + $0x40] sm:$0xff]  }
  0x19   : > { %202 = vst.msk [vmem:[#allocation2 + $0x8] sm:$0xff] %vm200_vm0, %v3568_v0  ;;  %v3420_v15 = vunpack.c.l.bf16 %v3469_v11  ;;  %v3421_v16 = vunpack.c.h.bf16 %v3469_v11  ;;  %v3424_v18 = vunpack.c.l.bf16 %v3470_v14  ;;  %v3425_v19 = vunpack.c.h.bf16 %v3470_v14  ;;  %v3474_v26 = vld [vmem:[%s3625_s24 + $0x48] sm:$0xff]   ;;  %v3475_v29 = vld [vmem:[%s3625_s24 + $0x50] sm:$0xff]   ;;  %v3476_v32 = vld [vmem:[%s3625_s24 + $0x58] sm:$0xff]  }
  0x1a   : > { %205 = vst.msk [vmem:[#allocation2 + $0x18] sm:$0xff] %vm200_vm0, %v3568_v0  ;;  %v3428_v21 = vunpack.c.l.bf16 %v3471_v17  ;;  %v3429_v22 = vunpack.c.h.bf16 %v3471_v17  ;;  %v3432_v24 = vunpack.c.l.bf16 %v3472_v20  ;;  %v3433_v25 = vunpack.c.h.bf16 %v3472_v20  ;;  %v3477_v35 = vld [vmem:[%s3625_s24 + $0x60] sm:$0xff]   ;;  %v3478_v38 = vld [vmem:[%s3625_s24 + $0x68] sm:$0xff]   ;;  %v3479_v41 = vld [vmem:[%s3625_s24 + $0x70] sm:$0xff]  }
  0x1b   : > { %206 = vst.msk [vmem:[#allocation2 + $0x20] sm:$0xff] %vm200_vm0, %v3568_v0  ;;  %v3436_v27 = vunpack.c.l.bf16 %v3473_v23  ;;  %v3437_v28 = vunpack.c.h.bf16 %v3473_v23  ;;  %v3440_v30 = vunpack.c.l.bf16 %v3474_v26  ;;  %v3441_v31 = vunpack.c.h.bf16 %v3474_v26  ;;  %v3480_v44 = vld [vmem:[%s3625_s24 + $0x78] sm:$0xff]  }
  0x1c   : > { %208 = vst.msk [vmem:[#allocation2 + $0x30] sm:$0xff] %vm200_vm0, %v3568_v0  ;;  %v3444_v33 = vunpack.c.l.bf16 %v3475_v29  ;;  %v3445_v34 = vunpack.c.h.bf16 %v3475_v29  ;;  %v3448_v36 = vunpack.c.l.bf16 %v3476_v32  ;;  %v3449_v37 = vunpack.c.h.bf16 %v3476_v32 }
  0x1d   : > { %209 = vst.msk [vmem:[#allocation2 + $0x38] sm:$0xff] %vm200_vm0, %v3568_v0  ;;  %v3452_v39 = vunpack.c.l.bf16 %v3477_v35  ;;  %v3453_v40 = vunpack.c.h.bf16 %v3477_v35  ;;  %v3456_v42 = vunpack.c.l.bf16 %v3478_v38  ;;  %v3457_v43 = vunpack.c.h.bf16 %v3478_v38 }
  0x1e   : > { %212 = vst.msk [vmem:[#allocation2 + $0x50] sm:$0xff] %vm200_vm0, %v3568_v0  ;;  %v3460_v45 = vunpack.c.l.bf16 %v3479_v41  ;;  %v3461_v46 = vunpack.c.h.bf16 %v3479_v41  ;;  %v3464_v47 = vunpack.c.l.bf16 %v3480_v44  ;;  %v3465_v48 = vunpack.c.h.bf16 %v3480_v44 }
  0x1f   : > { %214 = vst.msk [vmem:[#allocation2 + $0x60] sm:$0xff] %vm200_vm0, %v3568_v0 }
  0x20   : > { %215 = vst.msk [vmem:[#allocation2 + $0x68] sm:$0xff] %vm200_vm0, %v3568_v0 }
  0x21   : > { %217 = vst.msk [vmem:[#allocation2 + $0x78] sm:$0xff] %vm200_vm0, %v3568_v0 }
  0x22   : > { %218 = vst.msk [vmem:[#allocation2 + $0x80] sm:$0xff] %vm200_vm0, %v3568_v0 }
  0x23   : > { %220 = vst.msk [vmem:[#allocation2 + $0x90] sm:$0xff] %vm200_vm0, %v3568_v0 }
  0x24   : > { %221 = vst.msk [vmem:[#allocation2 + $0x98] sm:$0xff] %vm200_vm0, %v3568_v0 }
  0x25   : > { %223 = vst.msk [vmem:[#allocation2 + $0xa8] sm:$0xff] %vm200_vm0, %v3568_v0 }
  0x26   : > { %224 = vst.msk [vmem:[#allocation2 + $0xb0] sm:$0xff] %vm200_vm0, %v3568_v0 }
  0x27   : > { %226 = vst.msk [vmem:[#allocation2 + $0xc0] sm:$0xff] %vm200_vm0, %v3568_v0 }
  0x28   : > { %227 = vst.msk [vmem:[#allocation2 + $0xc8] sm:$0xff] %vm200_vm0, %v3568_v0 }
  0x29   : > { %229 = vst.msk [vmem:[#allocation2 + $0xd8] sm:$0xff] %vm200_vm0, %v3568_v0 }
  0x2a   : > { %230 = vst.msk [vmem:[#allocation2 + $0xe0] sm:$0xff] %vm200_vm0, %v3568_v0 }
  0x2b   : > { %232 = vst.msk [vmem:[#allocation2 + $0xf0] sm:$0xff] %vm200_vm0, %v3568_v0 }
  0x2c   : > { %233 = vst.msk [vmem:[#allocation2 + $0xf8] sm:$0xff] %vm200_vm0, %v3568_v0 }
  0x2d   : > { %235 = vst.msk [vmem:[#allocation2 + $0x108] sm:$0xff] %vm200_vm0, %v3568_v0 }
  0x2e   : > { %236 = vst.msk [vmem:[#allocation2 + $0x110] sm:$0xff] %vm200_vm0, %v3568_v0 }
  0x2f   : > { %238 = vst.msk [vmem:[#allocation2 + $0x120] sm:$0xff] %vm200_vm0, %v3568_v0 }
  0x30   : > { %239 = vst.msk [vmem:[#allocation2 + $0x128] sm:$0xff] %vm200_vm0, %v3568_v0 }
  0x31   : > { %241 = vst.msk [vmem:[#allocation2 + $0x138] sm:$0xff] %vm200_vm0, %v3568_v0 }
  0x32   : > { %242 = vst.msk [vmem:[#allocation2 + $0x140] sm:$0xff] %vm200_vm0, %v3568_v0 }
  0x33   : > { %244 = vst.msk [vmem:[#allocation2 + $0x150] sm:$0xff] %vm200_vm0, %v3568_v0 }
  0x34   : > { %245 = vst.msk [vmem:[#allocation2 + $0x158] sm:$0xff] %vm200_vm0, %v3568_v0 }
  0x35   : > { %247 = vst.msk [vmem:[#allocation2 + $0x168] sm:$0xff] %vm200_vm0, %v3568_v0 }
  0x36   : > { %248 = vst.msk [vmem:[#allocation2 + $0x170] sm:$0xff] %vm200_vm0, %v3568_v0 }
  0x37   : > { %250 = vst.msk [vmem:[#allocation2 + $0x180] sm:$0xff] %vm200_vm0, %v3568_v0 }
  0x38   : > { %251 = vst.msk [vmem:[#allocation2 + $0x188] sm:$0xff] %vm200_vm0, %v3568_v0 }
  0x39   : > { %253 = vst.msk [vmem:[#allocation2 + $0x198] sm:$0xff] %vm200_vm0, %v3568_v0 }
  0x3a   : > { %254 = vst.msk [vmem:[#allocation2 + $0x1a0] sm:$0xff] %vm200_vm0, %v3568_v0 }
  0x3b   : > { %256 = vst.msk [vmem:[#allocation2 + $0x1b0] sm:$0xff] %vm200_vm0, %v3568_v0 }
  0x3c   : > { %257 = vst.msk [vmem:[#allocation2 + $0x1b8] sm:$0xff] %vm200_vm0, %v3568_v0 }
  0x3d   : > { %259 = vst.msk [vmem:[#allocation2 + $0x1c8] sm:$0xff] %vm200_vm0, %v3568_v0 }
  0x3e   : > { %260 = vst.msk [vmem:[#allocation2 + $0x1d0] sm:$0xff] %vm200_vm0, %v3568_v0 }
  0x3f   : > { %262 = vst.msk [vmem:[#allocation2 + $0x1e0] sm:$0xff] %vm200_vm0, %v3568_v0 }
  0x40   : > { %263 = vst.msk [vmem:[#allocation2 + $0x1e8] sm:$0xff] %vm200_vm0, %v3568_v0 }
  0x41   : > { %265 = vst.msk [vmem:[#allocation2 + $0x1f8] sm:$0xff] %vm200_vm0, %v3568_v0 }
  0x42   : > { %266 = vst.msk [vmem:[#allocation2 + $0x200] sm:$0xff] %vm200_vm0, %v3568_v0 }
  0x43   : > { %213 = vst.msk [vmem:[#allocation2 + $0x58] sm:$0x3f] %vm203_vm1, %v3568_v0 }
  0x44   : > { %204 = vst.msk [vmem:[#allocation2 + $0x10] sm:$0x3f] %vm203_vm1, %v3568_v0 }
  0x45   : > { %207 = vst.msk [vmem:[#allocation2 + $0x28] sm:$0x3f] %vm203_vm1, %v3568_v0 }
  0x46   : > { %210 = vst.msk [vmem:[#allocation2 + $0x40] sm:$0x3f] %vm203_vm1, %v3568_v0 }
  0x47   : > { %216 = vst.msk [vmem:[#allocation2 + $0x70] sm:$0x3f] %vm203_vm1, %v3568_v0 }
  0x48   : > { %219 = vst.msk [vmem:[#allocation2 + $0x88] sm:$0x3f] %vm203_vm1, %v3568_v0 }
  0x49   : > { %222 = vst.msk [vmem:[#allocation2 + $0xa0] sm:$0x3f] %vm203_vm1, %v3568_v0 }
  0x4a   : > { %225 = vst.msk [vmem:[#allocation2 + $0xb8] sm:$0x3f] %vm203_vm1, %v3568_v0 }
  0x4b   : > { %228 = vst.msk [vmem:[#allocation2 + $0xd0] sm:$0x3f] %vm203_vm1, %v3568_v0 }
  0x4c   : > { %231 = vst.msk [vmem:[#allocation2 + $0xe8] sm:$0x3f] %vm203_vm1, %v3568_v0 }
  0x4d   : > { %234 = vst.msk [vmem:[#allocation2 + $0x100] sm:$0x3f] %vm203_vm1, %v3568_v0 }
  0x4e   : > { %237 = vst.msk [vmem:[#allocation2 + $0x118] sm:$0x3f] %vm203_vm1, %v3568_v0 }
  0x4f   : > { %240 = vst.msk [vmem:[#allocation2 + $0x130] sm:$0x3f] %vm203_vm1, %v3568_v0 }
  0x50   : > { %243 = vst.msk [vmem:[#allocation2 + $0x148] sm:$0x3f] %vm203_vm1, %v3568_v0 }
  0x51   : > { %246 = vst.msk [vmem:[#allocation2 + $0x160] sm:$0x3f] %vm203_vm1, %v3568_v0 }
  0x52   : > { %249 = vst.msk [vmem:[#allocation2 + $0x178] sm:$0x3f] %vm203_vm1, %v3568_v0 }
  0x53   : > { %252 = vst.msk [vmem:[#allocation2 + $0x190] sm:$0x3f] %vm203_vm1, %v3568_v0 }
  0x54   : > { %255 = vst.msk [vmem:[#allocation2 + $0x1a8] sm:$0x3f] %vm203_vm1, %v3568_v0 }
  0x55   : > { %258 = vst.msk [vmem:[#allocation2 + $0x1c0] sm:$0x3f] %vm203_vm1, %v3568_v0 }
  0x56   : > { %261 = vst.msk [vmem:[#allocation2 + $0x1d8] sm:$0x3f] %vm203_vm1, %v3568_v0 }
  0x57   : > { %264 = vst.msk [vmem:[#allocation2 + $0x1f0] sm:$0x3f] %vm203_vm1, %v3568_v0 }
  0x58   : > { %267 = vst.msk [vmem:[#allocation2 + $0x208] sm:$0x3f] %vm203_vm1, %v3568_v0 }
  0x59   : > { %333 = vst.msk [vmem:[#allocation2 + $0x4b] sm:$0xff] %vm200_vm0, %v3404_v3 }
  0x5a   : > { %334 = vst.msk [vmem:[#allocation2 + $0x53] sm:$0xff] %vm200_vm0, %v3405_v4 }
  0x5b   : > { %335 = vst.msk [vmem:[#allocation2 + $0x63] sm:$0xff] %vm200_vm0, %v3408_v6 }
  0x5c   : > { %336 = vst.msk [vmem:[#allocation2 + $0x6b] sm:$0xff] %vm200_vm0, %v3409_v7 }
  0x5d   : > { %337 = vst.msk [vmem:[#allocation2 + $0x7b] sm:$0xff] %vm200_vm0, %v3412_v9 }
  0x5e   : > { %338 = vst.msk [vmem:[#allocation2 + $0x83] sm:$0xff] %vm200_vm0, %v3413_v10 }
  0x5f   : > { %339 = vst.msk [vmem:[#allocation2 + $0x93] sm:$0xff] %vm200_vm0, %v3416_v12 }
  0x60   : > { %340 = vst.msk [vmem:[#allocation2 + $0x9b] sm:$0xff] %vm200_vm0, %v3417_v13 }
  0x61   : > { %341 = vst.msk [vmem:[#allocation2 + $0xab] sm:$0xff] %vm200_vm0, %v3420_v15 }
  0x62   : > { %342 = vst.msk [vmem:[#allocation2 + $0xb3] sm:$0xff] %vm200_vm0, %v3421_v16 }
  0x63   : > { %343 = vst.msk [vmem:[#allocation2 + $0xc3] sm:$0xff] %vm200_vm0, %v3424_v18 }
  0x64   : > { %344 = vst.msk [vmem:[#allocation2 + $0xcb] sm:$0xff] %vm200_vm0, %v3425_v19 }
  0x65   : > { %345 = vst.msk [vmem:[#allocation2 + $0xdb] sm:$0xff] %vm200_vm0, %v3428_v21 }
  0x66   : > { %346 = vst.msk [vmem:[#allocation2 + $0xe3] sm:$0xff] %vm200_vm0, %v3429_v22 }
  0x67   : > { %347 = vst.msk [vmem:[#allocation2 + $0xf3] sm:$0xff] %vm200_vm0, %v3432_v24 }
  0x68   : > { %348 = vst.msk [vmem:[#allocation2 + $0xfb] sm:$0xff] %vm200_vm0, %v3433_v25 }
  0x69   : > { %349 = vst.msk [vmem:[#allocation2 + $0x10b] sm:$0xff] %vm200_vm0, %v3436_v27 }
  0x6a   : > { %350 = vst.msk [vmem:[#allocation2 + $0x113] sm:$0xff] %vm200_vm0, %v3437_v28 }
  0x6b   : > { %351 = vst.msk [vmem:[#allocation2 + $0x123] sm:$0xff] %vm200_vm0, %v3440_v30 }
  0x6c   : > { %352 = vst.msk [vmem:[#allocation2 + $0x12b] sm:$0xff] %vm200_vm0, %v3441_v31 }
  0x6d   : > { %353 = vst.msk [vmem:[#allocation2 + $0x13b] sm:$0xff] %vm200_vm0, %v3444_v33 }
  0x6e   : > { %354 = vst.msk [vmem:[#allocation2 + $0x143] sm:$0xff] %vm200_vm0, %v3445_v34 }
  0x6f   : > { %355 = vst.msk [vmem:[#allocation2 + $0x153] sm:$0xff] %vm200_vm0, %v3448_v36 }
  0x70   : > { %356 = vst.msk [vmem:[#allocation2 + $0x15b] sm:$0xff] %vm200_vm0, %v3449_v37 }
  0x71   : > { %357 = vst.msk [vmem:[#allocation2 + $0x16b] sm:$0xff] %vm200_vm0, %v3452_v39 }
  0x72   : > { %358 = vst.msk [vmem:[#allocation2 + $0x173] sm:$0xff] %vm200_vm0, %v3453_v40 }
  0x73   : > { %359 = vst.msk [vmem:[#allocation2 + $0x183] sm:$0xff] %vm200_vm0, %v3456_v42 }
  0x74   : > { %360 = vst.msk [vmem:[#allocation2 + $0x18b] sm:$0xff] %vm200_vm0, %v3457_v43 }
  0x75   : > { %361 = vst.msk [vmem:[#allocation2 + $0x19b] sm:$0xff] %vm200_vm0, %v3460_v45 }
  0x76   : > { %362 = vst.msk [vmem:[#allocation2 + $0x1a3] sm:$0xff] %vm200_vm0, %v3461_v46 }
  0x77   : > { %363 = vst.msk [vmem:[#allocation2 + $0x1b3] sm:$0xff] %vm200_vm0, %v3464_v47 }
  0x78   : > { %364 = vst.msk [vmem:[#allocation2 + $0x1bb] sm:$0xff] %vm200_vm0, %v3465_v48 }
  0x79 PF: > { %v3816_v49 = vld [vmem:[%s5344_s1] sm:$0xff]  ;;  %s3314_s6 = smul.u32 96, %s3550_s12  ;;  %vm433_vm2 = vcmask 1046528   ;;  %vm495_vm3 = vcmask 1045504   ;;  %vm557_vm4 = vcmask 1044480   ;;  %vm619_vm5 = vcmask 1043456  }
  0x7a   : > { %v391_v50 = vperm.slane %v3816_v49, 0  ;;  %v408_v51 = vperm.slane %v3816_v49, 1  ;;  %v3522_v52 = vld [vmem:[%s5345_s2] ss:$0 sm:$0xff]  ;;  %v3825_v53 = vperm.slane %v3816_v49, 2  ;;  %v3839_v57 = vperm.slane %v3816_v49, 3 }
  0x7b   : > { %s3827_s9 = scalar_lea.vmem [#allocation2], %s3314_s6  ;;  %v3842_v58 = vperm.slane %v3816_v49, 4  ;;  %vm681_vm6 = vcmask 1042432   ;;  %vm743_vm7 = vcmask 1041408   ;;  %vm3176_vm8 = vcmask 453632  }
  0x7f   : > { %v3830_v54 = vld [vmem:[%s3827_s9] sm:$0xff]  ;;  %v3833_v55 = vld [vmem:[%s3827_s9 + $0x8] sm:$0xff]  ;;  %v3836_v56 = vld [vmem:[%s3827_s9 + $0x10] sm:$0x3f] }
  0x80   : > { %v3845_v59 = vld [vmem:[%s3827_s9 + $0x18] sm:$0xff]  ;;  %v3848_v60 = vld [vmem:[%s3827_s9 + $0x20] sm:$0xff]  ;;  %v392_v61 = vmul.f32 %v391_v50, %v3830_v54  ;;  %v393_v62 = vmul.f32 %v391_v50, %v3833_v55  ;;  %v409_v63 = vmul.f32 %v408_v51, %v3830_v54  ;;  %v410_v0 = vmul.f32 %v408_v51, %v3833_v55  ;;  %v3855_v1 = vld [vmem:[%s3827_s9 + $0x28] sm:$0x3f] }
  0x81   : > { %v3858_v2 = vld [vmem:[%s3827_s9 + $0x30] sm:$0xff]  ;;  %v3861_v3 = vld [vmem:[%s3827_s9 + $0x38] sm:$0xff]  ;;  %v394_v4 = vmul.f32 %v391_v50, %v3845_v59  ;;  %v395_v5 = vmul.f32 %v391_v50, %v3848_v60  ;;  %v411_v6 = vmul.f32 %v408_v51, %v3836_v56  ;;  %v412_v7 = vmul.f32 %v408_v51, %v3845_v59  ;;  %v3868_v8 = vld [vmem:[%s3827_s9 + $0x48] sm:$0xff] }
  0x82   : > { %v3871_v9 = vld [vmem:[%s3827_s9 + $0x50] sm:$0xff]  ;;  %v396_v10 = vmul.f32 %v391_v50, %v3858_v2  ;;  %v397_v11 = vmul.f32 %v391_v50, %v3861_v3  ;;  %v400_v12 = vadd.f32 %v3522_v52, %v392_v61  ;;  %v401_v13 = vadd.f32 %v3522_v52, %v393_v62  ;;  %v3876_v14 = vld [vmem:[%s3827_s9 + $0x40] sm:$0x3f]  ;;  %v3879_v15 = vld [vmem:[%s3827_s9 + $0x58] sm:$0x3f] }
  0x83   : > { %v398_v16 = vmul.f32 %v391_v50, %v3868_v8  ;;  %v399_v17 = vmul.f32 %v391_v50, %v3871_v9  ;;  %v402_v18 = vadd.f32 %v3522_v52, %v394_v4  ;;  %v403_v19 = vadd.f32 %v3522_v52, %v395_v5 }
  0x84   : > { %v404_v20 = vadd.f32 %v3522_v52, %v396_v10  ;;  %v405_v21 = vadd.f32 %v3522_v52, %v397_v11  ;;  %v413_v22 = vmul.f32 %v408_v51, %v3848_v60  ;;  %v414_v23 = vmul.f32 %v408_v51, %v3855_v1 }
  0x85   : > { %v406_v24 = vadd.f32 %v3522_v52, %v398_v16  ;;  %v407_v25 = vadd.f32 %v3522_v52, %v399_v17  ;;  %v415_v26 = vmul.f32 %v408_v51, %v3858_v2  ;;  %v416_v27 = vmul.f32 %v408_v51, %v3861_v3 }
  0x86   : > { %v417_v28 = vmul.f32 %v408_v51, %v3876_v14  ;;  %v418_v29 = vmul.f32 %v408_v51, %v3868_v8  ;;  %v419_v30 = vmul.f32 %v408_v51, %v3871_v9  ;;  %v420_v31 = vmul.f32 %v408_v51, %v3879_v15 }
  0x87   : > { %v434_v32 = vrot.slane %v409_v63, 1  ;;  %v435_v33 = vrot.slane %v410_v0, 1  ;;  %v437_v34 = vrot.slane %v411_v6, 1  ;;  %v439_v35 = vrot.slane %v412_v7, 1 }
  0x88   : > { %v440_v36 = vrot.slane %v413_v22, 1  ;;  %v442_v37 = vrot.slane %v414_v23, 1  ;;  %v444_v38 = vrot.slane %v415_v26, 1  ;;  %v445_v39 = vrot.slane %v416_v27, 1 }
  0x89   : > { %v436_v40 = vsel %vm433_vm2, %v434_v32, %v435_v33  ;;  %v438_v41 = vsel %vm433_vm2, %v435_v33, %v437_v34  ;;  %v447_v42 = vrot.slane %v417_v28, 1  ;;  %v449_v43 = vrot.slane %v418_v29, 1 }
  0x8a   : > { %v441_v44 = vsel %vm433_vm2, %v439_v35, %v440_v36  ;;  %v443_v45 = vsel %vm433_vm2, %v440_v36, %v442_v37  ;;  %v446_v46 = vsel %vm433_vm2, %v444_v38, %v445_v39  ;;  %v450_v47 = vrot.slane %v419_v30, 1 }
  0x8b   : > { %v448_v48 = vsel %vm433_vm2, %v445_v39, %v447_v42  ;;  %v452_v50 = vrot.slane %v420_v31, 1  ;;  %v462_v51 = vadd.f32 %v436_v40, %v400_v12  ;;  %v463_v52 = vadd.f32 %v438_v41, %v401_v13 }
  0x8c   : > { %v451_v61 = vsel %vm433_vm2, %v449_v43, %v450_v47  ;;  %v464_v62 = vadd.f32 %v441_v44, %v402_v18  ;;  %v465_v63 = vadd.f32 %v443_v45, %v403_v19  ;;  %v466_v0 = vadd.f32 %v446_v46, %v404_v20 }
  0x8d   : > { %v453_v4 = vsel %vm433_vm2, %v450_v47, %v452_v50  ;;  %v467_v5 = vadd.f32 %v448_v48, %v405_v21  ;;  %v468_v6 = vadd.f32 %v451_v61, %v406_v24  ;;  %v471_v7 = vmul.f32 %v3825_v53, %v3830_v54 }
  0x8e   : > { %v469_v10 = vadd.f32 %v453_v4, %v407_v25  ;;  %v472_v11 = vmul.f32 %v3825_v53, %v3833_v55  ;;  %v473_v12 = vmul.f32 %v3825_v53, %v3836_v56  ;;  %v474_v13 = vmul.f32 %v3825_v53, %v3845_v59 }
  0x8f   : > { %v475_v16 = vmul.f32 %v3825_v53, %v3848_v60  ;;  %v476_v17 = vmul.f32 %v3825_v53, %v3855_v1  ;;  %v477_v18 = vmul.f32 %v3825_v53, %v3858_v2  ;;  %v478_v19 = vmul.f32 %v3825_v53, %v3861_v3 }
  0x90   : > { %v479_v20 = vmul.f32 %v3825_v53, %v3876_v14  ;;  %v480_v21 = vmul.f32 %v3825_v53, %v3868_v8  ;;  %v481_v22 = vmul.f32 %v3825_v53, %v3871_v9  ;;  %v482_v23 = vmul.f32 %v3825_v53, %v3879_v15 }
  0x91   : > { %v496_v24 = vrot.slane %v471_v7, 2  ;;  %v497_v25 = vrot.slane %v472_v11, 2  ;;  %v499_v26 = vrot.slane %v473_v12, 2  ;;  %v501_v27 = vrot.slane %v474_v13, 2 }
  0x92   : > { %v502_v28 = vrot.slane %v475_v16, 2  ;;  %v504_v29 = vrot.slane %v476_v17, 2  ;;  %v506_v30 = vrot.slane %v477_v18, 2  ;;  %v507_v31 = vrot.slane %v478_v19, 2 }
  0x93   : > { %v498_v32 = vsel %vm495_vm3, %v496_v24, %v497_v25  ;;  %v500_v33 = vsel %vm495_vm3, %v497_v25, %v499_v26  ;;  %v509_v34 = vrot.slane %v479_v20, 2  ;;  %v511_v35 = vrot.slane %v480_v21, 2 }
  0x94   : > { %v503_v36 = vsel %vm495_vm3, %v501_v27, %v502_v28  ;;  %v505_v37 = vsel %vm495_vm3, %v502_v28, %v504_v29  ;;  %v508_v53 = vsel %vm495_vm3, %v506_v30, %v507_v31  ;;  %v512_v38 = vrot.slane %v481_v22, 2 }
  0x95   : > { %v510_v39 = vsel %vm495_vm3, %v507_v31, %v509_v34  ;;  %v514_v40 = vrot.slane %v482_v23, 2  ;;  %v524_v41 = vadd.f32 %v498_v32, %v462_v51  ;;  %v525_v42 = vadd.f32 %v500_v33, %v463_v52 }
  0x96   : > { %v513_v43 = vsel %vm495_vm3, %v511_v35, %v512_v38  ;;  %v526_v44 = vadd.f32 %v503_v36, %v464_v62  ;;  %v527_v45 = vadd.f32 %v505_v37, %v465_v63  ;;  %v528_v46 = vadd.f32 %v508_v53, %v466_v0 }
  0x97   : > { %v515_v47 = vsel %vm495_vm3, %v512_v38, %v514_v40  ;;  %v529_v48 = vadd.f32 %v510_v39, %v467_v5  ;;  %v530_v50 = vadd.f32 %v513_v43, %v468_v6  ;;  %v533_v61 = vmul.f32 %v3839_v57, %v3830_v54 }
  0x98   : > { %v531_v4 = vadd.f32 %v515_v47, %v469_v10  ;;  %v534_v7 = vmul.f32 %v3839_v57, %v3833_v55  ;;  %v535_v51 = vmul.f32 %v3839_v57, %v3836_v56  ;;  %v536_v52 = vmul.f32 %v3839_v57, %v3845_v59 }
  0x99   : > { %v537_v62 = vmul.f32 %v3839_v57, %v3848_v60  ;;  %v538_v63 = vmul.f32 %v3839_v57, %v3855_v1  ;;  %v539_v0 = vmul.f32 %v3839_v57, %v3858_v2  ;;  %v540_v5 = vmul.f32 %v3839_v57, %v3861_v3 }
  0x9a   : > { %v541_v6 = vmul.f32 %v3839_v57, %v3876_v14  ;;  %v542_v10 = vmul.f32 %v3839_v57, %v3868_v8  ;;  %v543_v11 = vmul.f32 %v3839_v57, %v3871_v9  ;;  %v544_v12 = vmul.f32 %v3839_v57, %v3879_v15 }
  0x9b   : > { %v558_v13 = vrot.slane %v533_v61, 3  ;;  %v559_v16 = vrot.slane %v534_v7, 3  ;;  %v561_v17 = vrot.slane %v535_v51, 3  ;;  %v563_v18 = vrot.slane %v536_v52, 3 }
  0x9c   : > { %v564_v19 = vrot.slane %v537_v62, 3  ;;  %v566_v20 = vrot.slane %v538_v63, 3  ;;  %v568_v21 = vrot.slane %v539_v0, 3  ;;  %v569_v22 = vrot.slane %v540_v5, 3 }
  0x9d   : > { %v560_v23 = vsel %vm557_vm4, %v558_v13, %v559_v16  ;;  %v562_v24 = vsel %vm557_vm4, %v559_v16, %v561_v17  ;;  %v571_v25 = vrot.slane %v541_v6, 3  ;;  %v573_v26 = vrot.slane %v542_v10, 3 }
  0x9e   : > { %v565_v27 = vsel %vm557_vm4, %v563_v18, %v564_v19  ;;  %v567_v28 = vsel %vm557_vm4, %v564_v19, %v566_v20  ;;  %v570_v57 = vsel %vm557_vm4, %v568_v21, %v569_v22  ;;  %v574_v29 = vrot.slane %v543_v11, 3 }
  0x9f   : > { %v572_v30 = vsel %vm557_vm4, %v569_v22, %v571_v25  ;;  %v576_v31 = vrot.slane %v544_v12, 3  ;;  %v586_v32 = vadd.f32 %v560_v23, %v524_v41  ;;  %v587_v33 = vadd.f32 %v562_v24, %v525_v42  ;;  %v3996_v22 = vld [vmem:[%s5344_s1 + $0x8] sm:$0xff] }
  0xa0   : > { %v575_v34 = vsel %vm557_vm4, %v573_v26, %v574_v29  ;;  %v588_v35 = vadd.f32 %v565_v27, %v526_v44  ;;  %v589_v36 = vadd.f32 %v567_v28, %v527_v45  ;;  %v590_v37 = vadd.f32 %v570_v57, %v528_v46 }
  0xa1   : > { %v577_v53 = vsel %vm557_vm4, %v574_v29, %v576_v31  ;;  %v591_v38 = vadd.f32 %v572_v30, %v529_v48  ;;  %v592_v39 = vadd.f32 %v575_v34, %v530_v50  ;;  %v595_v40 = vmul.f32 %v3842_v58, %v3830_v54 }
  0xa2   : > { %v593_v43 = vadd.f32 %v577_v53, %v531_v4  ;;  %v596_v47 = vmul.f32 %v3842_v58, %v3833_v55  ;;  %v597_v41 = vmul.f32 %v3842_v58, %v3836_v56  ;;  %v598_v42 = vmul.f32 %v3842_v58, %v3845_v59 }
  0xa3   : > { %v599_v44 = vmul.f32 %v3842_v58, %v3848_v60  ;;  %v600_v45 = vmul.f32 %v3842_v58, %v3855_v1  ;;  %v601_v46 = vmul.f32 %v3842_v58, %v3858_v2  ;;  %v602_v48 = vmul.f32 %v3842_v58, %v3861_v3 }
  0xa4   : > { %v603_v50 = vmul.f32 %v3842_v58, %v3876_v14  ;;  %v604_v61 = vmul.f32 %v3842_v58, %v3868_v8  ;;  %v605_v4 = vmul.f32 %v3842_v58, %v3871_v9  ;;  %v606_v7 = vmul.f32 %v3842_v58, %v3879_v15 }
  0xa5   : > { %v620_v51 = vrot.slane %v595_v40, 4  ;;  %v621_v52 = vrot.slane %v596_v47, 4  ;;  %v623_v62 = vrot.slane %v597_v41, 4  ;;  %v625_v63 = vrot.slane %v598_v42, 4 }
  0xa6   : > { %v626_v0 = vrot.slane %v599_v44, 4  ;;  %v628_v5 = vrot.slane %v600_v45, 4  ;;  %v630_v6 = vrot.slane %v601_v46, 4  ;;  %v631_v12 = vrot.slane %v602_v48, 4 }
  0xa7   : > { %v622_v10 = vsel %vm619_vm5, %v620_v51, %v621_v52  ;;  %v624_v11 = vsel %vm619_vm5, %v621_v52, %v623_v62  ;;  %v633_v13 = vrot.slane %v603_v50, 4  ;;  %v635_v18 = vrot.slane %v604_v61, 4 }
  0xa8   : > { %v627_v16 = vsel %vm619_vm5, %v625_v63, %v626_v0  ;;  %v629_v17 = vsel %vm619_vm5, %v626_v0, %v628_v5  ;;  %v636_v58 = vrot.slane %v605_v4, 4  ;;  %v632_v19 = vsel %vm619_vm5, %v630_v6, %v631_v12 }
  0xa9   : > { %v634_v20 = vsel %vm619_vm5, %v631_v12, %v633_v13  ;;  %v638_v21 = vrot.slane %v606_v7, 4  ;;  %v648_v24 = vadd.f32 %v622_v10, %v586_v32  ;;  %v649_v25 = vadd.f32 %v624_v11, %v587_v33 }
  0xaa   : > { %v637_v23 = vsel %vm619_vm5, %v635_v18, %v636_v58  ;;  %v650_v26 = vadd.f32 %v627_v16, %v588_v35  ;;  %v651_v28 = vadd.f32 %v629_v17, %v589_v36  ;;  %v652_v57 = vadd.f32 %v632_v19, %v590_v37 }
  0xab   : > { %v639_v27 = vsel %vm619_vm5, %v636_v58, %v638_v21  ;;  %v653_v29 = vadd.f32 %v634_v20, %v591_v38  ;;  %v654_v30 = vadd.f32 %v637_v23, %v592_v39  ;;  %v656_v34 = vperm.slane %v3816_v49, 5 }
  0xac   : > { %v655_v31 = vadd.f32 %v639_v27, %v593_v43  ;;  %v718_v53 = vperm.slane %v3816_v49, 6  ;;  %v4003_v40 = vperm.slane %v3816_v49, 7  ;;  %v4006_v47 = vperm.slane %v3996_v22, 0 }
  0xad   : > { %v4009_v32 = vperm.slane %v3996_v22, 1  ;;  %v657_v33 = vmul.f32 %v656_v34, %v3830_v54  ;;  %v658_v35 = vmul.f32 %v656_v34, %v3833_v55  ;;  %v659_v36 = vmul.f32 %v656_v34, %v3836_v56 }
  0xae   : > { %v660_v37 = vmul.f32 %v656_v34, %v3845_v59  ;;  %v661_v38 = vmul.f32 %v656_v34, %v3848_v60  ;;  %v662_v39 = vmul.f32 %v656_v34, %v3855_v1  ;;  %v663_v49 = vmul.f32 %v656_v34, %v3858_v2 }
  0xaf   : > { %v664_v43 = vmul.f32 %v656_v34, %v3861_v3  ;;  %v665_v41 = vmul.f32 %v656_v34, %v3876_v14  ;;  %v666_v42 = vmul.f32 %v656_v34, %v3868_v8  ;;  %v667_v44 = vmul.f32 %v656_v34, %v3871_v9 }
  0xb0   : > { %v668_v45 = vmul.f32 %v656_v34, %v3879_v15  ;;  %v682_v46 = vrot.slane %v657_v33, 5  ;;  %v683_v48 = vrot.slane %v658_v35, 5  ;;  %v685_v50 = vrot.slane %v659_v36, 5 }
  0xb1   : > { %v687_v61 = vrot.slane %v660_v37, 5  ;;  %v688_v4 = vrot.slane %v661_v38, 5  ;;  %v690_v7 = vrot.slane %v662_v39, 5  ;;  %v692_v51 = vrot.slane %v663_v49, 5 }
  0xb2   : > { %v693_v52 = vrot.slane %v664_v43, 5  ;;  %v684_v62 = vsel %vm681_vm6, %v682_v46, %v683_v48  ;;  %v686_v63 = vsel %vm681_vm6, %v683_v48, %v685_v50  ;;  %v695_v0 = vrot.slane %v665_v41, 5 }
  0xb3   : > { %v697_v5 = vrot.slane %v666_v42, 5  ;;  %v689_v6 = vsel %vm681_vm6, %v687_v61, %v688_v4  ;;  %v691_v10 = vsel %vm681_vm6, %v688_v4, %v690_v7  ;;  %v698_v12 = vrot.slane %v667_v44, 5 }
  0xb4   : > { %v694_v11 = vsel %vm681_vm6, %v692_v51, %v693_v52  ;;  %v696_v13 = vsel %vm681_vm6, %v693_v52, %v695_v0  ;;  %v700_v16 = vrot.slane %v668_v45, 5  ;;  %v710_v17 = vadd.f32 %v684_v62, %v648_v24  ;;  %v4051_v0 = vld [vmem:[%s3827_s9 + $0x60] sm:$0xff] }
  0xb5   : > { %v711_v18 = vadd.f32 %v686_v63, %v649_v25  ;;  %v699_v58 = vsel %vm681_vm6, %v697_v5, %v698_v12  ;;  %v712_v19 = vadd.f32 %v689_v6, %v650_v26  ;;  %v713_v20 = vadd.f32 %v691_v10, %v651_v28  ;;  %v4054_v5 = vld [vmem:[%s3827_s9 + $0x68] sm:$0xff] }
  0xb6   : > { %v714_v21 = vadd.f32 %v694_v11, %v652_v57  ;;  %v701_v23 = vsel %vm681_vm6, %v698_v12, %v700_v16  ;;  %v715_v27 = vadd.f32 %v696_v13, %v653_v29  ;;  %v716_v34 = vadd.f32 %v699_v58, %v654_v30  ;;  %v4066_v58 = vld [vmem:[%s3827_s9 + $0x28] sm:$0x3f] }
  0xb7   : > { %v719_v33 = vmul.f32 %v718_v53, %v3830_v54  ;;  %v717_v35 = vadd.f32 %v701_v23, %v655_v31  ;;  %v720_v36 = vmul.f32 %v718_v53, %v3833_v55  ;;  %v721_v37 = vmul.f32 %v718_v53, %v3836_v56 }
  0xb8   : > { %v722_v38 = vmul.f32 %v718_v53, %v3845_v59  ;;  %v723_v24 = vmul.f32 %v718_v53, %v3848_v60  ;;  %v724_v25 = vmul.f32 %v718_v53, %v3855_v1  ;;  %v725_v26 = vmul.f32 %v718_v53, %v3858_v2 }
  0xb9   : > { %v726_v28 = vmul.f32 %v718_v53, %v3861_v3  ;;  %v727_v57 = vmul.f32 %v718_v53, %v3876_v14  ;;  %v728_v29 = vmul.f32 %v718_v53, %v3868_v8  ;;  %v729_v54 = vmul.f32 %v718_v53, %v3871_v9 }
  0xba   : > { %v730_v55 = vmul.f32 %v718_v53, %v3879_v15  ;;  %v744_v30 = vrot.slane %v719_v33, 6  ;;  %v745_v56 = vrot.slane %v720_v36, 6  ;;  %v747_v31 = vrot.slane %v721_v37, 6  ;;  %v4080_v37 = vld [vmem:[%s3827_s9 + $0x58] sm:$0x3f] }
  0xbb   : > { %v749_v39 = vrot.slane %v722_v38, 6  ;;  %v750_v49 = vrot.slane %v723_v24, 6  ;;  %v752_v43 = vrot.slane %v724_v25, 6  ;;  %v754_v41 = vrot.slane %v725_v26, 6  ;;  %v4083_v38 = vld [vmem:[%s3827_s9 + $0x70] sm:$0x3f] }
  0xbc   : > { %v755_v1 = vrot.slane %v726_v28, 6  ;;  %v746_v42 = vsel %vm743_vm7, %v744_v30, %v745_v56  ;;  %v748_v44 = vsel %vm743_vm7, %v745_v56, %v747_v31  ;;  %v757_v14 = vrot.slane %v727_v57, 6 }
  0xbd   : > { %v759_v45 = vrot.slane %v728_v29, 6  ;;  %v751_v46 = vsel %vm743_vm7, %v749_v39, %v750_v49  ;;  %v753_v15 = vsel %vm743_vm7, %v750_v49, %v752_v43  ;;  %v760_v48 = vrot.slane %v729_v54, 6 }
  0xbe   : > { %v756_v53 = vsel %vm743_vm7, %v754_v41, %v755_v1  ;;  %v758_v50 = vsel %vm743_vm7, %v755_v1, %v757_v14  ;;  %v762_v61 = vrot.slane %v730_v55, 6  ;;  %v772_v4 = vadd.f32 %v746_v42, %v710_v17 }
  0xbf   : > { %v773_v7 = vadd.f32 %v748_v44, %v711_v18  ;;  %v761_v51 = vsel %vm743_vm7, %v759_v45, %v760_v48  ;;  %v774_v52 = vadd.f32 %v751_v46, %v712_v19  ;;  %v775_v62 = vadd.f32 %v753_v15, %v713_v20 }
  0xc0   : > { %v776_v63 = vadd.f32 %v756_v53, %v714_v21  ;;  %v763_v6 = vsel %vm743_vm7, %v760_v48, %v762_v61  ;;  %v777_v10 = vadd.f32 %v758_v50, %v715_v27  ;;  %v778_v11 = vadd.f32 %v761_v51, %v716_v34  ;;  %v4077_v27 = vld [vmem:[%s3827_s9 + $0x40] sm:$0x3f] }
  0xc1   : > { %v796_v12 = vmul.f32 %v4003_v40, %v3845_v59  ;;  %v779_v13 = vadd.f32 %v763_v6, %v717_v35  ;;  %v797_v16 = vmul.f32 %v4003_v40, %v3848_v60  ;;  %v798_v17 = vmul.f32 %v4003_v40, %v3858_v2 }
  0xc2   : > { %v799_v18 = vmul.f32 %v4003_v40, %v3861_v3  ;;  %v800_v19 = vmul.f32 %v4003_v40, %v3868_v8  ;;  %v801_v20 = vmul.f32 %v4003_v40, %v3871_v9  ;;  %v802_v21 = vmul.f32 %v4051_v0, %v4003_v40 }
  0xc3   : > { %v803_v23 = vmul.f32 %v4054_v5, %v4003_v40  ;;  %v804_v34 = vadd.f32 %v796_v12, %v772_v4  ;;  %v805_v33 = vadd.f32 %v797_v16, %v773_v7  ;;  %v806_v35 = vadd.f32 %v798_v17, %v774_v52 }
  0xc4   : > { %v807_v36 = vadd.f32 %v799_v18, %v775_v62  ;;  %v808_v24 = vadd.f32 %v800_v19, %v776_v63  ;;  %v809_v25 = vadd.f32 %v801_v20, %v777_v10  ;;  %v810_v26 = vadd.f32 %v802_v21, %v778_v11 }
  0xc5   : > { %v811_v28 = vadd.f32 %v803_v23, %v779_v13  ;;  %v813_v57 = vmul.f32 %v4006_v47, %v3845_v59  ;;  %v814_v40 = vmul.f32 %v4006_v47, %v3848_v60  ;;  %v815_v29 = vmul.f32 %v4066_v58, %v4006_v47 }
  0xc6   : > { %v816_v54 = vmul.f32 %v4006_v47, %v3858_v2  ;;  %v817_v55 = vmul.f32 %v4006_v47, %v3861_v3  ;;  %v818_v30 = vmul.f32 %v4077_v27, %v4006_v47  ;;  %v819_v56 = vmul.f32 %v4006_v47, %v3868_v8 }
  0xc7   : > { %v820_v31 = vmul.f32 %v4006_v47, %v3871_v9  ;;  %v821_v39 = vmul.f32 %v4080_v37, %v4006_v47  ;;  %v822_v49 = vmul.f32 %v4051_v0, %v4006_v47  ;;  %v823_v43 = vmul.f32 %v4054_v5, %v4006_v47 }
  0xc8   : > { %v824_v41 = vmul.f32 %v4083_v38, %v4006_v47  ;;  %v837_v1 = vrot.slane %v813_v57, 1  ;;  %v838_v42 = vrot.slane %v814_v40, 1  ;;  %v840_v44 = vrot.slane %v815_v29, 1 }
  0xc9   : > { %v842_v14 = vrot.slane %v816_v54, 1  ;;  %v843_v45 = vrot.slane %v817_v55, 1  ;;  %v845_v46 = vrot.slane %v818_v30, 1  ;;  %v847_v15 = vrot.slane %v819_v56, 1 }
  0xca   : > { %v848_v53 = vrot.slane %v820_v31, 1  ;;  %v839_v48 = vsel %vm433_vm2, %v837_v1, %v838_v42  ;;  %v841_v50 = vsel %vm433_vm2, %v838_v42, %v840_v44  ;;  %v850_v61 = vrot.slane %v821_v39, 1 }
  0xcb   : > { %v852_v4 = vrot.slane %v822_v49, 1  ;;  %v844_v7 = vsel %vm433_vm2, %v842_v14, %v843_v45  ;;  %v846_v51 = vsel %vm433_vm2, %v843_v45, %v845_v46  ;;  %v853_v52 = vrot.slane %v823_v43, 1 }
  0xcc   : > { %v849_v47 = vsel %vm433_vm2, %v847_v15, %v848_v53  ;;  %v851_v62 = vsel %vm433_vm2, %v848_v53, %v850_v61  ;;  %v855_v63 = vrot.slane %v824_v41, 1  ;;  %v865_v6 = vadd.f32 %v839_v48, %v804_v34 }
  0xcd   : > { %v866_v10 = vadd.f32 %v841_v50, %v805_v33  ;;  %v854_v11 = vsel %vm433_vm2, %v852_v4, %v853_v52  ;;  %v867_v12 = vadd.f32 %v844_v7, %v806_v35  ;;  %v868_v13 = vadd.f32 %v846_v51, %v807_v36 }
  0xce   : > { %v869_v16 = vadd.f32 %v849_v47, %v808_v24  ;;  %v856_v17 = vsel %vm433_vm2, %v853_v52, %v855_v63  ;;  %v870_v18 = vadd.f32 %v851_v62, %v809_v25  ;;  %v871_v19 = vadd.f32 %v854_v11, %v810_v26 }
  0xcf   : > { %v874_v20 = vmul.f32 %v4009_v32, %v3845_v59  ;;  %v872_v21 = vadd.f32 %v856_v17, %v811_v28  ;;  %v875_v23 = vmul.f32 %v4009_v32, %v3848_v60  ;;  %v876_v34 = vmul.f32 %v4066_v58, %v4009_v32 }
  0xd0   : > { %v877_v33 = vmul.f32 %v4009_v32, %v3858_v2  ;;  %v878_v35 = vmul.f32 %v4009_v32, %v3861_v3  ;;  %v879_v36 = vmul.f32 %v4077_v27, %v4009_v32  ;;  %v880_v24 = vmul.f32 %v4009_v32, %v3868_v8 }
  0xd1   : > { %v881_v25 = vmul.f32 %v4009_v32, %v3871_v9  ;;  %v882_v26 = vmul.f32 %v4080_v37, %v4009_v32  ;;  %v883_v28 = vmul.f32 %v4051_v0, %v4009_v32  ;;  %v884_v57 = vmul.f32 %v4054_v5, %v4009_v32 }
  0xd2   : > { %v885_v40 = vmul.f32 %v4083_v38, %v4009_v32  ;;  %v898_v29 = vrot.slane %v874_v20, 2  ;;  %v899_v54 = vrot.slane %v875_v23, 2  ;;  %v901_v55 = vrot.slane %v876_v34, 2 }
  0xd3   : > { %v903_v30 = vrot.slane %v877_v33, 2  ;;  %v904_v56 = vrot.slane %v878_v35, 2  ;;  %v906_v31 = vrot.slane %v879_v36, 2  ;;  %v908_v39 = vrot.slane %v880_v24, 2 }
  0xd4   : > { %v909_v49 = vrot.slane %v881_v25, 2  ;;  %v900_v43 = vsel %vm495_vm3, %v898_v29, %v899_v54  ;;  %v902_v41 = vsel %vm495_vm3, %v899_v54, %v901_v55  ;;  %v911_v1 = vrot.slane %v882_v26, 2 }
  0xd5   : > { %v913_v42 = vrot.slane %v883_v28, 2  ;;  %v905_v44 = vsel %vm495_vm3, %v903_v30, %v904_v56  ;;  %v907_v14 = vsel %vm495_vm3, %v904_v56, %v906_v31  ;;  %v914_v45 = vrot.slane %v884_v57, 2 }
  0xd6   : > { %v910_v32 = vsel %vm495_vm3, %v908_v39, %v909_v49  ;;  %v912_v46 = vsel %vm495_vm3, %v909_v49, %v911_v1  ;;  %v916_v15 = vrot.slane %v885_v40, 2  ;;  %v926_v53 = vadd.f32 %v900_v43, %v865_v6 }
  0xd7   : > { %v927_v48 = vadd.f32 %v902_v41, %v866_v10  ;;  %v915_v50 = vsel %vm495_vm3, %v913_v42, %v914_v45  ;;  %v928_v61 = vadd.f32 %v905_v44, %v867_v12  ;;  %v929_v4 = vadd.f32 %v907_v14, %v868_v13 }
  0xd8   : > { %v930_v7 = vadd.f32 %v910_v32, %v869_v16  ;;  %v917_v51 = vsel %vm495_vm3, %v914_v45, %v916_v15  ;;  %v931_v47 = vadd.f32 %v912_v46, %v870_v18  ;;  %v932_v52 = vadd.f32 %v915_v50, %v871_v19 }
  0xd9   : > { %v934_v62 = vperm.slane %v3996_v22, 2  ;;  %v933_v63 = vadd.f32 %v917_v51, %v872_v21  ;;  %v995_v11 = vperm.slane %v3996_v22, 3  ;;  %v4152_v17 = vperm.slane %v3996_v22, 4 }
  0xda   : > { %v4155_v6 = vperm.slane %v3996_v22, 5 }
  0xdb   : > { %v935_v10 = vmul.f32 %v934_v62, %v3845_v59  ;;  %v936_v12 = vmul.f32 %v934_v62, %v3848_v60  ;;  %v937_v13 = vmul.f32 %v4066_v58, %v934_v62  ;;  %v938_v16 = vmul.f32 %v934_v62, %v3858_v2 }
  0xdc   : > { %v939_v18 = vmul.f32 %v934_v62, %v3861_v3  ;;  %v940_v19 = vmul.f32 %v4077_v27, %v934_v62  ;;  %v941_v20 = vmul.f32 %v934_v62, %v3868_v8  ;;  %v942_v21 = vmul.f32 %v934_v62, %v3871_v9 }
  0xdd   : > { %v943_v23 = vmul.f32 %v4080_v37, %v934_v62  ;;  %v944_v34 = vmul.f32 %v4051_v0, %v934_v62  ;;  %v945_v33 = vmul.f32 %v4054_v5, %v934_v62  ;;  %v946_v35 = vmul.f32 %v4083_v38, %v934_v62 }
  0xde   : > { %v959_v36 = vrot.slane %v935_v10, 3  ;;  %v960_v24 = vrot.slane %v936_v12, 3  ;;  %v962_v25 = vrot.slane %v937_v13, 3  ;;  %v964_v26 = vrot.slane %v938_v16, 3 }
  0xdf   : > { %v965_v28 = vrot.slane %v939_v18, 3  ;;  %v967_v57 = vrot.slane %v940_v19, 3  ;;  %v969_v40 = vrot.slane %v941_v20, 3  ;;  %v970_v29 = vrot.slane %v942_v21, 3 }
  0xe0   : > { %v961_v54 = vsel %vm557_vm4, %v959_v36, %v960_v24  ;;  %v963_v55 = vsel %vm557_vm4, %v960_v24, %v962_v25  ;;  %v972_v30 = vrot.slane %v943_v23, 3  ;;  %v974_v56 = vrot.slane %v944_v34, 3 }
  0xe1   : > { %v966_v31 = vsel %vm557_vm4, %v964_v26, %v965_v28  ;;  %v968_v39 = vsel %vm557_vm4, %v965_v28, %v967_v57  ;;  %v971_v49 = vsel %vm557_vm4, %v969_v40, %v970_v29  ;;  %v975_v43 = vrot.slane %v945_v33, 3 }
  0xe2   : > { %v973_v41 = vsel %vm557_vm4, %v970_v29, %v972_v30  ;;  %v977_v1 = vrot.slane %v946_v35, 3  ;;  %v987_v42 = vadd.f32 %v961_v54, %v926_v53  ;;  %v988_v44 = vadd.f32 %v963_v55, %v927_v48 }
  0xe3   : > { %v976_v14 = vsel %vm557_vm4, %v974_v56, %v975_v43  ;;  %v989_v32 = vadd.f32 %v966_v31, %v928_v61  ;;  %v990_v45 = vadd.f32 %v968_v39, %v929_v4  ;;  %v991_v46 = vadd.f32 %v971_v49, %v930_v7 }
  0xe4   : > { %v978_v15 = vsel %vm557_vm4, %v975_v43, %v977_v1  ;;  %v992_v50 = vadd.f32 %v973_v41, %v931_v47  ;;  %v993_v51 = vadd.f32 %v976_v14, %v932_v52  ;;  %v996_v62 = vmul.f32 %v995_v11, %v3845_v59 }
  0xe5   : > { %v994_v10 = vadd.f32 %v978_v15, %v933_v63  ;;  %v997_v12 = vmul.f32 %v995_v11, %v3848_v60  ;;  %v998_v13 = vmul.f32 %v4066_v58, %v995_v11  ;;  %v999_v16 = vmul.f32 %v995_v11, %v3858_v2 }
  0xe6   : > { %v1000_v53 = vmul.f32 %v995_v11, %v3861_v3  ;;  %v1001_v48 = vmul.f32 %v4077_v27, %v995_v11  ;;  %v1002_v61 = vmul.f32 %v995_v11, %v3868_v8  ;;  %v1003_v4 = vmul.f32 %v995_v11, %v3871_v9 }
  0xe7   : > { %v1004_v7 = vmul.f32 %v4080_v37, %v995_v11  ;;  %v1005_v47 = vmul.f32 %v4051_v0, %v995_v11  ;;  %v1006_v52 = vmul.f32 %v4054_v5, %v995_v11  ;;  %v1007_v63 = vmul.f32 %v4083_v38, %v995_v11 }
  0xe8   : > { %v1020_v18 = vrot.slane %v996_v62, 4  ;;  %v1021_v19 = vrot.slane %v997_v12, 4  ;;  %v1023_v20 = vrot.slane %v998_v13, 4  ;;  %v1025_v21 = vrot.slane %v999_v16, 4 }
  0xe9   : > { %v1026_v23 = vrot.slane %v1000_v53, 4  ;;  %v1028_v34 = vrot.slane %v1001_v48, 4  ;;  %v1030_v33 = vrot.slane %v1002_v61, 4  ;;  %v1031_v35 = vrot.slane %v1003_v4, 4 }
  0xea   : > { %v1022_v36 = vsel %vm619_vm5, %v1020_v18, %v1021_v19  ;;  %v1024_v24 = vsel %vm619_vm5, %v1021_v19, %v1023_v20  ;;  %v1033_v25 = vrot.slane %v1004_v7, 4  ;;  %v1035_v26 = vrot.slane %v1005_v47, 4 }
  0xeb   : > { %v1027_v28 = vsel %vm619_vm5, %v1025_v21, %v1026_v23  ;;  %v1029_v57 = vsel %vm619_vm5, %v1026_v23, %v1028_v34  ;;  %v1032_v11 = vsel %vm619_vm5, %v1030_v33, %v1031_v35  ;;  %v1036_v40 = vrot.slane %v1006_v52, 4 }
  0xec   : > { %v1034_v29 = vsel %vm619_vm5, %v1031_v35, %v1033_v25  ;;  %v1038_v54 = vrot.slane %v1007_v63, 4  ;;  %v1048_v55 = vadd.f32 %v1022_v36, %v987_v42  ;;  %v1049_v30 = vadd.f32 %v1024_v24, %v988_v44 }
  0xed   : > { %v1037_v56 = vsel %vm619_vm5, %v1035_v26, %v1036_v40  ;;  %v1050_v31 = vadd.f32 %v1027_v28, %v989_v32  ;;  %v1051_v39 = vadd.f32 %v1029_v57, %v990_v45  ;;  %v1052_v49 = vadd.f32 %v1032_v11, %v991_v46 }
  0xee   : > { %v1039_v43 = vsel %vm619_vm5, %v1036_v40, %v1038_v54  ;;  %v1053_v41 = vadd.f32 %v1034_v29, %v992_v50  ;;  %v1054_v1 = vadd.f32 %v1037_v56, %v993_v51  ;;  %v1057_v14 = vmul.f32 %v4152_v17, %v3845_v59 }
  0xef   : > { %v1055_v15 = vadd.f32 %v1039_v43, %v994_v10  ;;  %v1058_v62 = vmul.f32 %v4152_v17, %v3848_v60  ;;  %v1059_v42 = vmul.f32 %v4066_v58, %v4152_v17  ;;  %v1060_v44 = vmul.f32 %v4152_v17, %v3858_v2 }
  0xf0   : > { %v1061_v32 = vmul.f32 %v4152_v17, %v3861_v3  ;;  %v1062_v45 = vmul.f32 %v4077_v27, %v4152_v17  ;;  %v1063_v46 = vmul.f32 %v4152_v17, %v3868_v8  ;;  %v1064_v50 = vmul.f32 %v4152_v17, %v3871_v9 }
  0xf1   : > { %v1065_v51 = vmul.f32 %v4080_v37, %v4152_v17  ;;  %v1066_v10 = vmul.f32 %v4051_v0, %v4152_v17  ;;  %v1067_v12 = vmul.f32 %v4054_v5, %v4152_v17  ;;  %v1068_v13 = vmul.f32 %v4083_v38, %v4152_v17 }
  0xf2   : > { %v1081_v16 = vrot.slane %v1057_v14, 5  ;;  %v1082_v53 = vrot.slane %v1058_v62, 5  ;;  %v1084_v48 = vrot.slane %v1059_v42, 5  ;;  %v1086_v61 = vrot.slane %v1060_v44, 5 }
  0xf3   : > { %v1087_v4 = vrot.slane %v1061_v32, 5  ;;  %v1089_v7 = vrot.slane %v1062_v45, 5  ;;  %v1091_v47 = vrot.slane %v1063_v46, 5  ;;  %v1092_v52 = vrot.slane %v1064_v50, 5  ;;  %v4261_v50 = vld [vmem:[%s5344_s1 + $0x10] sm:$0xff] }
  0xf4   : > { %v1083_v63 = vsel %vm681_vm6, %v1081_v16, %v1082_v53  ;;  %v1085_v18 = vsel %vm681_vm6, %v1082_v53, %v1084_v48  ;;  %v1094_v19 = vrot.slane %v1065_v51, 5  ;;  %v1096_v20 = vrot.slane %v1066_v10, 5  ;;  %v4265_v16 = vld [vmem:[%s3827_s9 + $0x30] sm:$0xff] }
  0xf5   : > { %v1088_v21 = vsel %vm681_vm6, %v1086_v61, %v1087_v4  ;;  %v1090_v23 = vsel %vm681_vm6, %v1087_v4, %v1089_v7  ;;  %v1093_v17 = vsel %vm681_vm6, %v1091_v47, %v1092_v52  ;;  %v1097_v34 = vrot.slane %v1067_v12, 5  ;;  %v4269_v7 = vld [vmem:[%s3827_s9 + $0x38] sm:$0xff]  ;;  %v4272_v47 = vld [vmem:[%s3827_s9 + $0x48] sm:$0xff] }
  0xf6   : > { %v1095_v33 = vsel %vm681_vm6, %v1092_v52, %v1094_v19  ;;  %v1099_v35 = vrot.slane %v1068_v13, 5  ;;  %v1109_v36 = vadd.f32 %v1083_v63, %v1048_v55  ;;  %v1110_v24 = vadd.f32 %v1085_v18, %v1049_v30  ;;  %v4275_v52 = vld [vmem:[%s3827_s9 + $0x50] sm:$0xff] }
  0xf7   : > { %v1098_v25 = vsel %vm681_vm6, %v1096_v20, %v1097_v34  ;;  %v1111_v26 = vadd.f32 %v1088_v21, %v1050_v31  ;;  %v1112_v28 = vadd.f32 %v1090_v23, %v1051_v39  ;;  %v1113_v57 = vadd.f32 %v1093_v17, %v1052_v49  ;;  %v4279_v20 = vld [vmem:[%s3827_s9 + $0x78] sm:$0xff]  ;;  %v4282_v21 = vld [vmem:[%s3827_s9 + $0x80] sm:$0xff] }
  0xf8   : > { %v1100_v11 = vsel %vm681_vm6, %v1097_v34, %v1099_v35  ;;  %v1114_v40 = vadd.f32 %v1095_v33, %v1053_v41  ;;  %v1115_v29 = vadd.f32 %v1098_v25, %v1054_v1  ;;  %v1118_v54 = vmul.f32 %v4155_v6, %v3845_v59 }
  0xf9   : > { %v1116_v56 = vadd.f32 %v1100_v11, %v1055_v15  ;;  %v1119_v43 = vmul.f32 %v4155_v6, %v3848_v60  ;;  %v1120_v55 = vmul.f32 %v4066_v58, %v4155_v6  ;;  %v1121_v30 = vmul.f32 %v4155_v6, %v3858_v2 }
  0xfa   : > { %v1122_v31 = vmul.f32 %v4155_v6, %v3861_v3  ;;  %v1123_v39 = vmul.f32 %v4077_v27, %v4155_v6  ;;  %v1124_v49 = vmul.f32 %v4155_v6, %v3868_v8  ;;  %v1125_v59 = vmul.f32 %v4155_v6, %v3871_v9 }
  0xfb   : > { %v1126_v60 = vmul.f32 %v4080_v37, %v4155_v6  ;;  %v1127_v58 = vmul.f32 %v4051_v0, %v4155_v6  ;;  %v1128_v2 = vmul.f32 %v4054_v5, %v4155_v6  ;;  %v1129_v3 = vmul.f32 %v4083_v38, %v4155_v6 }
  0xfc   : > { %v1142_v41 = vrot.slane %v1118_v54, 6  ;;  %v1143_v27 = vrot.slane %v1119_v43, 6  ;;  %v1145_v1 = vrot.slane %v1120_v55, 6  ;;  %v1147_v14 = vrot.slane %v1121_v30, 6  ;;  %v4307_v30 = vld [vmem:[%s3827_s9 + $0x70] sm:$0x3f] }
  0xfd   : > { %v1148_v8 = vrot.slane %v1122_v31, 6  ;;  %v1150_v15 = vrot.slane %v1123_v39, 6  ;;  %v1152_v9 = vrot.slane %v1124_v49, 6  ;;  %v1153_v62 = vrot.slane %v1125_v59, 6  ;;  %v4310_v31 = vld [vmem:[%s3827_s9 + $0x88] sm:$0x3f] }
  0xfe   : > { %v1144_v37 = vsel %vm743_vm7, %v1142_v41, %v1143_v27  ;;  %v1146_v42 = vsel %vm743_vm7, %v1143_v27, %v1145_v1  ;;  %v1155_v44 = vrot.slane %v1126_v60, 6  ;;  %v1157_v32 = vrot.slane %v1127_v58, 6 }
  0xff   : > { %v1149_v45 = vsel %vm743_vm7, %v1147_v14, %v1148_v8  ;;  %v1151_v38 = vsel %vm743_vm7, %v1148_v8, %v1150_v15  ;;  %v1154_v6 = vsel %vm743_vm7, %v1152_v9, %v1153_v62  ;;  %v1158_v46 = vrot.slane %v1128_v2, 6 }
 0x100   : > { %v1156_v51 = vsel %vm743_vm7, %v1153_v62, %v1155_v44  ;;  %v1160_v10 = vrot.slane %v1129_v3, 6  ;;  %v1170_v12 = vadd.f32 %v1144_v37, %v1109_v36  ;;  %v1171_v13 = vadd.f32 %v1146_v42, %v1110_v24 }
 0x101   : > { %v1159_v53 = vsel %vm743_vm7, %v1157_v32, %v1158_v46  ;;  %v1172_v48 = vadd.f32 %v1149_v45, %v1111_v26  ;;  %v1173_v61 = vadd.f32 %v1151_v38, %v1112_v28  ;;  %v1174_v4 = vadd.f32 %v1154_v6, %v1113_v57  ;;  %v4297_v28 = vld [vmem:[%s3827_s9 + $0x40] sm:$0x3f] }
 0x102   : > { %v1161_v63 = vsel %vm743_vm7, %v1158_v46, %v1160_v10  ;;  %v1175_v18 = vadd.f32 %v1156_v51, %v1114_v40  ;;  %v1176_v19 = vadd.f32 %v1159_v53, %v1115_v29  ;;  %v1193_v23 = vperm.slane %v3996_v22, 6  ;;  %v4304_v29 = vld [vmem:[%s3827_s9 + $0x58] sm:$0x3f] }
 0x103   : > { %v1177_v17 = vadd.f32 %v1161_v63, %v1116_v56  ;;  %v1210_v34 = vperm.slane %v3996_v22, 7  ;;  %v4287_v33 = vperm.slane %v4261_v50, 0  ;;  %v4290_v35 = vperm.slane %v4261_v50, 1 }
 0x104   : > { %v1194_v36 = vmul.f32 %v4265_v16, %v1193_v23  ;;  %v1195_v24 = vmul.f32 %v4269_v7, %v1193_v23  ;;  %v1196_v25 = vmul.f32 %v4272_v47, %v1193_v23  ;;  %v1197_v26 = vmul.f32 %v4275_v52, %v1193_v23 }
 0x105   : > { %v1198_v22 = vmul.f32 %v4051_v0, %v1193_v23  ;;  %v1199_v57 = vmul.f32 %v4054_v5, %v1193_v23  ;;  %v1200_v11 = vmul.f32 %v4279_v20, %v1193_v23  ;;  %v1201_v40 = vmul.f32 %v4282_v21, %v1193_v23 }
 0x106   : > { %v1202_v54 = vadd.f32 %v1194_v36, %v1170_v12  ;;  %v1203_v56 = vadd.f32 %v1195_v24, %v1171_v13  ;;  %v1204_v43 = vadd.f32 %v1196_v25, %v1172_v48  ;;  %v1205_v55 = vadd.f32 %v1197_v26, %v1173_v61 }
 0x107   : > { %v1206_v39 = vadd.f32 %v1198_v22, %v1174_v4  ;;  %v1207_v49 = vadd.f32 %v1199_v57, %v1175_v18  ;;  %v1208_v59 = vadd.f32 %v1200_v11, %v1176_v19  ;;  %v1209_v60 = vadd.f32 %v1201_v40, %v1177_v17 }
 0x108   : > { %v1211_v58 = vmul.f32 %v4265_v16, %v1210_v34  ;;  %v1212_v2 = vmul.f32 %v4269_v7, %v1210_v34  ;;  %v1213_v3 = vmul.f32 %v4297_v28, %v1210_v34  ;;  %v1214_v41 = vmul.f32 %v4272_v47, %v1210_v34 }
 0x109   : > { %v1215_v27 = vmul.f32 %v4275_v52, %v1210_v34  ;;  %v1216_v1 = vmul.f32 %v4304_v29, %v1210_v34  ;;  %v1217_v14 = vmul.f32 %v4051_v0, %v1210_v34  ;;  %v1218_v8 = vmul.f32 %v4054_v5, %v1210_v34 }
 0x10a   : > { %v1219_v15 = vmul.f32 %v4307_v30, %v1210_v34  ;;  %v1220_v9 = vmul.f32 %v4279_v20, %v1210_v34  ;;  %v1221_v62 = vmul.f32 %v4282_v21, %v1210_v34  ;;  %v1222_v37 = vmul.f32 %v4310_v31, %v1210_v34 }
 0x10b   : > { %v1235_v42 = vrot.slane %v1211_v58, 1  ;;  %v1236_v44 = vrot.slane %v1212_v2, 1  ;;  %v1238_v32 = vrot.slane %v1213_v3, 1  ;;  %v1240_v45 = vrot.slane %v1214_v41, 1 }
 0x10c   : > { %v1241_v38 = vrot.slane %v1215_v27, 1  ;;  %v1243_v6 = vrot.slane %v1216_v1, 1  ;;  %v1245_v46 = vrot.slane %v1217_v14, 1  ;;  %v1246_v51 = vrot.slane %v1218_v8, 1 }
 0x10d   : > { %v1237_v10 = vsel %vm433_vm2, %v1235_v42, %v1236_v44  ;;  %v1239_v12 = vsel %vm433_vm2, %v1236_v44, %v1238_v32  ;;  %v1248_v13 = vrot.slane %v1219_v15, 1  ;;  %v1250_v53 = vrot.slane %v1220_v9, 1 }
 0x10e   : > { %v1242_v48 = vsel %vm433_vm2, %v1240_v45, %v1241_v38  ;;  %v1244_v61 = vsel %vm433_vm2, %v1241_v38, %v1243_v6  ;;  %v1247_v4 = vsel %vm433_vm2, %v1245_v46, %v1246_v51  ;;  %v1251_v63 = vrot.slane %v1221_v62, 1 }
 0x10f   : > { %v1249_v18 = vsel %vm433_vm2, %v1246_v51, %v1248_v13  ;;  %v1253_v19 = vrot.slane %v1222_v37, 1  ;;  %v1263_v23 = vadd.f32 %v1237_v10, %v1202_v54  ;;  %v1264_v17 = vadd.f32 %v1239_v12, %v1203_v56 }
 0x110   : > { %v1252_v34 = vsel %vm433_vm2, %v1250_v53, %v1251_v63  ;;  %v1265_v36 = vadd.f32 %v1242_v48, %v1204_v43  ;;  %v1266_v24 = vadd.f32 %v1244_v61, %v1205_v55  ;;  %v1267_v25 = vadd.f32 %v1247_v4, %v1206_v39 }
 0x111   : > { %v1254_v26 = vsel %vm433_vm2, %v1251_v63, %v1253_v19  ;;  %v1268_v22 = vadd.f32 %v1249_v18, %v1207_v49  ;;  %v1269_v57 = vadd.f32 %v1252_v34, %v1208_v59  ;;  %v1272_v11 = vmul.f32 %v4265_v16, %v4287_v33 }
 0x112   : > { %v1270_v40 = vadd.f32 %v1254_v26, %v1209_v60  ;;  %v1273_v58 = vmul.f32 %v4269_v7, %v4287_v33  ;;  %v1274_v54 = vmul.f32 %v4297_v28, %v4287_v33  ;;  %v1275_v56 = vmul.f32 %v4272_v47, %v4287_v33 }
 0x113   : > { %v1276_v43 = vmul.f32 %v4275_v52, %v4287_v33  ;;  %v1277_v55 = vmul.f32 %v4304_v29, %v4287_v33  ;;  %v1278_v39 = vmul.f32 %v4051_v0, %v4287_v33  ;;  %v1279_v49 = vmul.f32 %v4054_v5, %v4287_v33 }
 0x114   : > { %v1280_v59 = vmul.f32 %v4307_v30, %v4287_v33  ;;  %v1281_v60 = vmul.f32 %v4279_v20, %v4287_v33  ;;  %v1282_v2 = vmul.f32 %v4282_v21, %v4287_v33  ;;  %v1283_v3 = vmul.f32 %v4310_v31, %v4287_v33 }
 0x115   : > { %v1296_v41 = vrot.slane %v1272_v11, 2  ;;  %v1297_v27 = vrot.slane %v1273_v58, 2  ;;  %v1299_v1 = vrot.slane %v1274_v54, 2  ;;  %v1301_v14 = vrot.slane %v1275_v56, 2 }
 0x116   : > { %v1302_v8 = vrot.slane %v1276_v43, 2  ;;  %v1304_v15 = vrot.slane %v1277_v55, 2  ;;  %v1306_v9 = vrot.slane %v1278_v39, 2  ;;  %v1307_v62 = vrot.slane %v1279_v49, 2 }
 0x117   : > { %v1298_v37 = vsel %vm495_vm3, %v1296_v41, %v1297_v27  ;;  %v1300_v42 = vsel %vm495_vm3, %v1297_v27, %v1299_v1  ;;  %v1309_v44 = vrot.slane %v1280_v59, 2  ;;  %v1311_v32 = vrot.slane %v1281_v60, 2 }
 0x118   : > { %v1303_v45 = vsel %vm495_vm3, %v1301_v14, %v1302_v8  ;;  %v1305_v38 = vsel %vm495_vm3, %v1302_v8, %v1304_v15  ;;  %v1308_v33 = vsel %vm495_vm3, %v1306_v9, %v1307_v62  ;;  %v1312_v6 = vrot.slane %v1282_v2, 2 }
 0x119   : > { %v1310_v46 = vsel %vm495_vm3, %v1307_v62, %v1309_v44  ;;  %v1314_v51 = vrot.slane %v1283_v3, 2  ;;  %v1324_v10 = vadd.f32 %v1298_v37, %v1263_v23  ;;  %v1325_v12 = vadd.f32 %v1300_v42, %v1264_v17 }
 0x11a   : > { %v1313_v13 = vsel %vm495_vm3, %v1311_v32, %v1312_v6  ;;  %v1326_v53 = vadd.f32 %v1303_v45, %v1265_v36  ;;  %v1327_v48 = vadd.f32 %v1305_v38, %v1266_v24  ;;  %v1328_v61 = vadd.f32 %v1308_v33, %v1267_v25 }
 0x11b   : > { %v1315_v4 = vsel %vm495_vm3, %v1312_v6, %v1314_v51  ;;  %v1329_v63 = vadd.f32 %v1310_v46, %v1268_v22  ;;  %v1330_v18 = vadd.f32 %v1313_v13, %v1269_v57  ;;  %v1333_v19 = vmul.f32 %v4265_v16, %v4290_v35 }
 0x11c   : > { %v1331_v34 = vadd.f32 %v1315_v4, %v1270_v40  ;;  %v1334_v26 = vmul.f32 %v4269_v7, %v4290_v35  ;;  %v1335_v23 = vmul.f32 %v4297_v28, %v4290_v35  ;;  %v1336_v17 = vmul.f32 %v4272_v47, %v4290_v35 }
 0x11d   : > { %v1337_v36 = vmul.f32 %v4275_v52, %v4290_v35  ;;  %v1338_v24 = vmul.f32 %v4304_v29, %v4290_v35  ;;  %v1339_v25 = vmul.f32 %v4051_v0, %v4290_v35  ;;  %v1340_v22 = vmul.f32 %v4054_v5, %v4290_v35 }
 0x11e   : > { %v1341_v57 = vmul.f32 %v4307_v30, %v4290_v35  ;;  %v1342_v11 = vmul.f32 %v4279_v20, %v4290_v35  ;;  %v1343_v40 = vmul.f32 %v4282_v21, %v4290_v35  ;;  %v1344_v58 = vmul.f32 %v4310_v31, %v4290_v35 }
 0x11f   : > { %v1357_v54 = vrot.slane %v1333_v19, 3  ;;  %v1358_v56 = vrot.slane %v1334_v26, 3  ;;  %v1360_v43 = vrot.slane %v1335_v23, 3  ;;  %v1362_v55 = vrot.slane %v1336_v17, 3 }
 0x120   : > { %v1363_v39 = vrot.slane %v1337_v36, 3  ;;  %v1365_v49 = vrot.slane %v1338_v24, 3  ;;  %v1367_v59 = vrot.slane %v1339_v25, 3  ;;  %v1368_v60 = vrot.slane %v1340_v22, 3 }
 0x121   : > { %v1359_v2 = vsel %vm557_vm4, %v1357_v54, %v1358_v56  ;;  %v1361_v3 = vsel %vm557_vm4, %v1358_v56, %v1360_v43  ;;  %v1370_v41 = vrot.slane %v1341_v57, 3  ;;  %v1372_v27 = vrot.slane %v1342_v11, 3 }
 0x122   : > { %v1364_v1 = vsel %vm557_vm4, %v1362_v55, %v1363_v39  ;;  %v1366_v14 = vsel %vm557_vm4, %v1363_v39, %v1365_v49  ;;  %v1369_v35 = vsel %vm557_vm4, %v1367_v59, %v1368_v60  ;;  %v1373_v8 = vrot.slane %v1343_v40, 3 }
 0x123   : > { %v1371_v15 = vsel %vm557_vm4, %v1368_v60, %v1370_v41  ;;  %v1375_v9 = vrot.slane %v1344_v58, 3  ;;  %v1385_v62 = vadd.f32 %v1359_v2, %v1324_v10  ;;  %v1386_v37 = vadd.f32 %v1361_v3, %v1325_v12 }
 0x124   : > { %v1374_v42 = vsel %vm557_vm4, %v1372_v27, %v1373_v8  ;;  %v1387_v44 = vadd.f32 %v1364_v1, %v1326_v53  ;;  %v1388_v32 = vadd.f32 %v1366_v14, %v1327_v48  ;;  %v1389_v45 = vadd.f32 %v1369_v35, %v1328_v61 }
 0x125   : > { %v1376_v38 = vsel %vm557_vm4, %v1373_v8, %v1375_v9  ;;  %v1390_v33 = vadd.f32 %v1371_v15, %v1329_v63  ;;  %v1391_v6 = vadd.f32 %v1374_v42, %v1330_v18  ;;  %v1393_v46 = vperm.slane %v4261_v50, 2 }
 0x126   : > { %v1392_v51 = vadd.f32 %v1376_v38, %v1331_v34  ;;  %v1454_v13 = vperm.slane %v4261_v50, 3  ;;  %v4399_v4 = vperm.slane %v4261_v50, 4  ;;  %v4402_v10 = vperm.slane %v4261_v50, 5 }
 0x127   : > { %v1394_v12 = vmul.f32 %v4265_v16, %v1393_v46  ;;  %v1395_v53 = vmul.f32 %v4269_v7, %v1393_v46  ;;  %v1396_v48 = vmul.f32 %v4297_v28, %v1393_v46  ;;  %v1397_v61 = vmul.f32 %v4272_v47, %v1393_v46 }
 0x128   : > { %v1398_v63 = vmul.f32 %v4275_v52, %v1393_v46  ;;  %v1399_v18 = vmul.f32 %v4304_v29, %v1393_v46  ;;  %v1400_v19 = vmul.f32 %v4051_v0, %v1393_v46  ;;  %v1401_v34 = vmul.f32 %v4054_v5, %v1393_v46 }
 0x129   : > { %v1402_v26 = vmul.f32 %v4307_v30, %v1393_v46  ;;  %v1403_v23 = vmul.f32 %v4279_v20, %v1393_v46  ;;  %v1404_v17 = vmul.f32 %v4282_v21, %v1393_v46  ;;  %v1405_v36 = vmul.f32 %v4310_v31, %v1393_v46 }
 0x12a   : > { %v1418_v24 = vrot.slane %v1394_v12, 4  ;;  %v1419_v25 = vrot.slane %v1395_v53, 4  ;;  %v1421_v22 = vrot.slane %v1396_v48, 4  ;;  %v1423_v57 = vrot.slane %v1397_v61, 4 }
 0x12b   : > { %v1424_v11 = vrot.slane %v1398_v63, 4  ;;  %v1426_v40 = vrot.slane %v1399_v18, 4  ;;  %v1428_v58 = vrot.slane %v1400_v19, 4  ;;  %v1429_v54 = vrot.slane %v1401_v34, 4 }
 0x12c   : > { %v1420_v56 = vsel %vm619_vm5, %v1418_v24, %v1419_v25  ;;  %v1422_v43 = vsel %vm619_vm5, %v1419_v25, %v1421_v22  ;;  %v1431_v55 = vrot.slane %v1402_v26, 4  ;;  %v1433_v39 = vrot.slane %v1403_v23, 4 }
 0x12d   : > { %v1425_v49 = vsel %vm619_vm5, %v1423_v57, %v1424_v11  ;;  %v1427_v59 = vsel %vm619_vm5, %v1424_v11, %v1426_v40  ;;  %v1430_v60 = vsel %vm619_vm5, %v1428_v58, %v1429_v54  ;;  %v1434_v2 = vrot.slane %v1404_v17, 4 }
 0x12e   : > { %v1432_v3 = vsel %vm619_vm5, %v1429_v54, %v1431_v55  ;;  %v1436_v41 = vrot.slane %v1405_v36, 4  ;;  %v1446_v27 = vadd.f32 %v1420_v56, %v1385_v62  ;;  %v1447_v1 = vadd.f32 %v1422_v43, %v1386_v37 }
 0x12f   : > { %v1435_v14 = vsel %vm619_vm5, %v1433_v39, %v1434_v2  ;;  %v1448_v35 = vadd.f32 %v1425_v49, %v1387_v44  ;;  %v1449_v8 = vadd.f32 %v1427_v59, %v1388_v32  ;;  %v1450_v15 = vadd.f32 %v1430_v60, %v1389_v45 }
 0x130   : > { %v1437_v9 = vsel %vm619_vm5, %v1434_v2, %v1436_v41  ;;  %v1451_v42 = vadd.f32 %v1432_v3, %v1390_v33  ;;  %v1452_v38 = vadd.f32 %v1435_v14, %v1391_v6  ;;  %v1455_v46 = vmul.f32 %v4265_v16, %v1454_v13 }
 0x131   : > { %v1453_v12 = vadd.f32 %v1437_v9, %v1392_v51  ;;  %v1456_v53 = vmul.f32 %v4269_v7, %v1454_v13  ;;  %v1457_v48 = vmul.f32 %v4297_v28, %v1454_v13  ;;  %v1458_v61 = vmul.f32 %v4272_v47, %v1454_v13 }
 0x132   : > { %v1459_v62 = vmul.f32 %v4275_v52, %v1454_v13  ;;  %v1460_v37 = vmul.f32 %v4304_v29, %v1454_v13  ;;  %v1461_v44 = vmul.f32 %v4051_v0, %v1454_v13  ;;  %v1462_v32 = vmul.f32 %v4054_v5, %v1454_v13 }
 0x133   : > { %v1463_v45 = vmul.f32 %v4307_v30, %v1454_v13  ;;  %v1464_v33 = vmul.f32 %v4279_v20, %v1454_v13  ;;  %v1465_v6 = vmul.f32 %v4282_v21, %v1454_v13  ;;  %v1466_v51 = vmul.f32 %v4310_v31, %v1454_v13 }
 0x134   : > { %v1479_v63 = vrot.slane %v1455_v46, 5  ;;  %v1480_v18 = vrot.slane %v1456_v53, 5  ;;  %v1482_v19 = vrot.slane %v1457_v48, 5  ;;  %v1484_v34 = vrot.slane %v1458_v61, 5 }
 0x135   : > { %v1485_v26 = vrot.slane %v1459_v62, 5  ;;  %v1487_v23 = vrot.slane %v1460_v37, 5  ;;  %v1489_v17 = vrot.slane %v1461_v44, 5  ;;  %v1490_v36 = vrot.slane %v1462_v32, 5 }
 0x136   : > { %v1481_v24 = vsel %vm681_vm6, %v1479_v63, %v1480_v18  ;;  %v1483_v25 = vsel %vm681_vm6, %v1480_v18, %v1482_v19  ;;  %v1492_v22 = vrot.slane %v1463_v45, 5  ;;  %v1494_v57 = vrot.slane %v1464_v33, 5  ;;  %v4475_v19 = vld [vmem:[%s3827_s9 + $0x60] sm:$0xff] }
 0x137   : > { %v1486_v11 = vsel %vm681_vm6, %v1484_v34, %v1485_v26  ;;  %v1488_v40 = vsel %vm681_vm6, %v1485_v26, %v1487_v23  ;;  %v1491_v13 = vsel %vm681_vm6, %v1489_v17, %v1490_v36  ;;  %v1495_v58 = vrot.slane %v1465_v6, 5  ;;  %v4478_v34 = vld [vmem:[%s3827_s9 + $0x68] sm:$0xff] }
 0x138   : > { %v1493_v54 = vsel %vm681_vm6, %v1490_v36, %v1492_v22  ;;  %v1497_v56 = vrot.slane %v1466_v51, 5  ;;  %v1507_v43 = vadd.f32 %v1481_v24, %v1446_v27  ;;  %v1508_v55 = vadd.f32 %v1483_v25, %v1447_v1  ;;  %v4482_v24 = vld [vmem:[%s3827_s9 + $0x90] sm:$0xff]  ;;  %v4485_v25 = vld [vmem:[%s3827_s9 + $0x98] sm:$0xff] }
 0x139   : > { %v1496_v39 = vsel %vm681_vm6, %v1494_v57, %v1495_v58  ;;  %v1509_v49 = vadd.f32 %v1486_v11, %v1448_v35  ;;  %v1510_v59 = vadd.f32 %v1488_v40, %v1449_v8  ;;  %v1511_v60 = vadd.f32 %v1491_v13, %v1450_v15 }
 0x13a   : > { %v1498_v2 = vsel %vm681_vm6, %v1495_v58, %v1497_v56  ;;  %v1512_v3 = vadd.f32 %v1493_v54, %v1451_v42  ;;  %v1513_v41 = vadd.f32 %v1496_v39, %v1452_v38  ;;  %v1516_v14 = vmul.f32 %v4265_v16, %v4399_v4 }
 0x13b   : > { %v1514_v9 = vadd.f32 %v1498_v2, %v1453_v12  ;;  %v1517_v46 = vmul.f32 %v4269_v7, %v4399_v4  ;;  %v1518_v27 = vmul.f32 %v4297_v28, %v4399_v4  ;;  %v1519_v1 = vmul.f32 %v4272_v47, %v4399_v4 }
 0x13c   : > { %v1520_v35 = vmul.f32 %v4275_v52, %v4399_v4  ;;  %v1521_v8 = vmul.f32 %v4304_v29, %v4399_v4  ;;  %v1522_v15 = vmul.f32 %v4051_v0, %v4399_v4  ;;  %v1523_v16 = vmul.f32 %v4054_v5, %v4399_v4 }
 0x13d   : > { %v1524_v7 = vmul.f32 %v4307_v30, %v4399_v4  ;;  %v1525_v28 = vmul.f32 %v4279_v20, %v4399_v4  ;;  %v1526_v42 = vmul.f32 %v4282_v21, %v4399_v4  ;;  %v1527_v38 = vmul.f32 %v4310_v31, %v4399_v4 }
 0x13e   : > { %v1540_v12 = vrot.slane %v1516_v14, 6  ;;  %v1541_v29 = vrot.slane %v1517_v46, 6  ;;  %v1543_v53 = vrot.slane %v1518_v27, 6  ;;  %v1545_v48 = vrot.slane %v1519_v1, 6  ;;  %v4516_v46 = vld [vmem:[%s3827_s9 + $0x88] sm:$0x3f] }
 0x13f   : > { %v1546_v0 = vrot.slane %v1520_v35, 6  ;;  %v1548_v61 = vrot.slane %v1521_v8, 6  ;;  %v1550_v5 = vrot.slane %v1522_v15, 6  ;;  %v1551_v62 = vrot.slane %v1523_v16, 6  ;;  %v4520_v8 = vld [vmem:[%s3827_s9 + $0xa0] sm:$0x3f] }
 0x140   : > { %v1542_v30 = vsel %vm743_vm7, %v1540_v12, %v1541_v29  ;;  %v1544_v37 = vsel %vm743_vm7, %v1541_v29, %v1543_v53  ;;  %v1553_v44 = vrot.slane %v1524_v7, 6  ;;  %v1555_v32 = vrot.slane %v1525_v28, 6 }
 0x141   : > { %v1547_v31 = vsel %vm743_vm7, %v1545_v48, %v1546_v0  ;;  %v1549_v4 = vsel %vm743_vm7, %v1546_v0, %v1548_v61  ;;  %v1552_v45 = vsel %vm743_vm7, %v1550_v5, %v1551_v62  ;;  %v1556_v33 = vrot.slane %v1526_v42, 6 }
 0x142   : > { %v1554_v6 = vsel %vm743_vm7, %v1551_v62, %v1553_v44  ;;  %v1558_v51 = vrot.slane %v1527_v38, 6  ;;  %v1568_v63 = vadd.f32 %v1542_v30, %v1507_v43  ;;  %v1569_v18 = vadd.f32 %v1544_v37, %v1508_v55 }
 0x143   : > { %v1557_v26 = vsel %vm743_vm7, %v1555_v32, %v1556_v33  ;;  %v1570_v23 = vadd.f32 %v1547_v31, %v1509_v49  ;;  %v1571_v17 = vadd.f32 %v1549_v4, %v1510_v59  ;;  %v1572_v36 = vadd.f32 %v1552_v45, %v1511_v60  ;;  %v4507_v59 = vld [vmem:[%s5344_s1 + $0x18] sm:$0xff] }
 0x144   : > { %v1559_v22 = vsel %vm743_vm7, %v1556_v33, %v1558_v51  ;;  %v1573_v57 = vadd.f32 %v1554_v6, %v1512_v3  ;;  %v1574_v11 = vadd.f32 %v1557_v26, %v1513_v41  ;;  %v1592_v40 = vmul.f32 %v4272_v47, %v4402_v10  ;;  %v4510_v60 = vld [vmem:[%s3827_s9 + $0x58] sm:$0x3f] }
 0x145   : > { %v1575_v13 = vadd.f32 %v1559_v22, %v1514_v9  ;;  %v1593_v58 = vmul.f32 %v4275_v52, %v4402_v10  ;;  %v1594_v54 = vmul.f32 %v4475_v19, %v4402_v10  ;;  %v1595_v56 = vmul.f32 %v4478_v34, %v4402_v10  ;;  %v4513_v9 = vld [vmem:[%s3827_s9 + $0x70] sm:$0x3f] }
 0x146   : > { %v1596_v43 = vmul.f32 %v4279_v20, %v4402_v10  ;;  %v1597_v55 = vmul.f32 %v4282_v21, %v4402_v10  ;;  %v1598_v39 = vmul.f32 %v4482_v24, %v4402_v10  ;;  %v1599_v49 = vmul.f32 %v4485_v25, %v4402_v10 }
 0x147   : > { %v1600_v2 = vadd.f32 %v1592_v40, %v1568_v63  ;;  %v1601_v3 = vadd.f32 %v1593_v58, %v1569_v18  ;;  %v1602_v41 = vadd.f32 %v1594_v54, %v1570_v23  ;;  %v1603_v14 = vadd.f32 %v1595_v56, %v1571_v17 }
 0x148   : > { %v1604_v27 = vadd.f32 %v1596_v43, %v1572_v36  ;;  %v1605_v1 = vadd.f32 %v1597_v55, %v1573_v57  ;;  %v1606_v35 = vadd.f32 %v1598_v39, %v1574_v11  ;;  %v1608_v10 = vperm.slane %v4261_v50, 6 }
 0x149   : > { %v1607_v15 = vadd.f32 %v1599_v49, %v1575_v13  ;;  %v1669_v16 = vperm.slane %v4261_v50, 7  ;;  %v4524_v7 = vperm.slane %v4507_v59, 0  ;;  %v4527_v28 = vperm.slane %v4507_v59, 1 }
 0x14a   : > { %v1609_v42 = vmul.f32 %v4272_v47, %v1608_v10  ;;  %v1610_v38 = vmul.f32 %v4275_v52, %v1608_v10  ;;  %v1611_v12 = vmul.f32 %v4510_v60, %v1608_v10  ;;  %v1612_v29 = vmul.f32 %v4475_v19, %v1608_v10 }
 0x14b   : > { %v1613_v53 = vmul.f32 %v4478_v34, %v1608_v10  ;;  %v1614_v48 = vmul.f32 %v4513_v9, %v1608_v10  ;;  %v1615_v50 = vmul.f32 %v4279_v20, %v1608_v10  ;;  %v1616_v0 = vmul.f32 %v4282_v21, %v1608_v10 }
 0x14c   : > { %v1617_v61 = vmul.f32 %v4516_v46, %v1608_v10  ;;  %v1618_v5 = vmul.f32 %v4482_v24, %v1608_v10  ;;  %v1619_v62 = vmul.f32 %v4485_v25, %v1608_v10  ;;  %v1620_v30 = vmul.f32 %v4520_v8, %v1608_v10 }
 0x14d   : > { %v1633_v37 = vrot.slane %v1609_v42, 1  ;;  %v1634_v44 = vrot.slane %v1610_v38, 1  ;;  %v1636_v32 = vrot.slane %v1611_v12, 1  ;;  %v1638_v31 = vrot.slane %v1612_v29, 1 }
 0x14e   : > { %v1639_v4 = vrot.slane %v1613_v53, 1  ;;  %v1641_v45 = vrot.slane %v1614_v48, 1  ;;  %v1643_v33 = vrot.slane %v1615_v50, 1  ;;  %v1644_v6 = vrot.slane %v1616_v0, 1 }
 0x14f   : > { %v1635_v51 = vsel %vm433_vm2, %v1633_v37, %v1634_v44  ;;  %v1637_v63 = vsel %vm433_vm2, %v1634_v44, %v1636_v32  ;;  %v1646_v18 = vrot.slane %v1617_v61, 1  ;;  %v1648_v26 = vrot.slane %v1618_v5, 1 }
 0x150   : > { %v1640_v23 = vsel %vm433_vm2, %v1638_v31, %v1639_v4  ;;  %v1642_v17 = vsel %vm433_vm2, %v1639_v4, %v1641_v45  ;;  %v1645_v36 = vsel %vm433_vm2, %v1643_v33, %v1644_v6  ;;  %v1649_v22 = vrot.slane %v1619_v62, 1 }
 0x151   : > { %v1647_v57 = vsel %vm433_vm2, %v1644_v6, %v1646_v18  ;;  %v1651_v11 = vrot.slane %v1620_v30, 1  ;;  %v1661_v40 = vadd.f32 %v1635_v51, %v1600_v2  ;;  %v1662_v13 = vadd.f32 %v1637_v63, %v1601_v3 }
 0x152   : > { %v1650_v58 = vsel %vm433_vm2, %v1648_v26, %v1649_v22  ;;  %v1663_v54 = vadd.f32 %v1640_v23, %v1602_v41  ;;  %v1664_v56 = vadd.f32 %v1642_v17, %v1603_v14  ;;  %v1665_v43 = vadd.f32 %v1645_v36, %v1604_v27 }
 0x153   : > { %v1652_v55 = vsel %vm433_vm2, %v1649_v22, %v1651_v11  ;;  %v1666_v39 = vadd.f32 %v1647_v57, %v1605_v1  ;;  %v1667_v49 = vadd.f32 %v1650_v58, %v1606_v35  ;;  %v1670_v10 = vmul.f32 %v4272_v47, %v1669_v16 }
 0x154   : > { %v1668_v42 = vadd.f32 %v1652_v55, %v1607_v15  ;;  %v1671_v38 = vmul.f32 %v4275_v52, %v1669_v16  ;;  %v1672_v12 = vmul.f32 %v4510_v60, %v1669_v16  ;;  %v1673_v29 = vmul.f32 %v4475_v19, %v1669_v16 }
 0x155   : > { %v1674_v2 = vmul.f32 %v4478_v34, %v1669_v16  ;;  %v1675_v3 = vmul.f32 %v4513_v9, %v1669_v16  ;;  %v1676_v41 = vmul.f32 %v4279_v20, %v1669_v16  ;;  %v1677_v14 = vmul.f32 %v4282_v21, %v1669_v16 }
 0x156   : > { %v1678_v27 = vmul.f32 %v4516_v46, %v1669_v16  ;;  %v1679_v1 = vmul.f32 %v4482_v24, %v1669_v16  ;;  %v1680_v35 = vmul.f32 %v4485_v25, %v1669_v16  ;;  %v1681_v15 = vmul.f32 %v4520_v8, %v1669_v16 }
 0x157   : > { %v1694_v53 = vrot.slane %v1670_v10, 2  ;;  %v1695_v48 = vrot.slane %v1671_v38, 2  ;;  %v1697_v50 = vrot.slane %v1672_v12, 2  ;;  %v1699_v0 = vrot.slane %v1673_v29, 2 }
 0x158   : > { %v1700_v61 = vrot.slane %v1674_v2, 2  ;;  %v1702_v5 = vrot.slane %v1675_v3, 2  ;;  %v1704_v62 = vrot.slane %v1676_v41, 2  ;;  %v1705_v30 = vrot.slane %v1677_v14, 2 }
 0x159   : > { %v1696_v37 = vsel %vm495_vm3, %v1694_v53, %v1695_v48  ;;  %v1698_v44 = vsel %vm495_vm3, %v1695_v48, %v1697_v50  ;;  %v1707_v32 = vrot.slane %v1678_v27, 2  ;;  %v1709_v31 = vrot.slane %v1679_v1, 2 }
 0x15a   : > { %v1701_v4 = vsel %vm495_vm3, %v1699_v0, %v1700_v61  ;;  %v1703_v45 = vsel %vm495_vm3, %v1700_v61, %v1702_v5  ;;  %v1706_v16 = vsel %vm495_vm3, %v1704_v62, %v1705_v30  ;;  %v1710_v33 = vrot.slane %v1680_v35, 2 }
 0x15b   : > { %v1708_v6 = vsel %vm495_vm3, %v1705_v30, %v1707_v32  ;;  %v1712_v51 = vrot.slane %v1681_v15, 2  ;;  %v1722_v63 = vadd.f32 %v1696_v37, %v1661_v40  ;;  %v1723_v18 = vadd.f32 %v1698_v44, %v1662_v13 }
 0x15c   : > { %v1711_v26 = vsel %vm495_vm3, %v1709_v31, %v1710_v33  ;;  %v1724_v23 = vadd.f32 %v1701_v4, %v1663_v54  ;;  %v1725_v17 = vadd.f32 %v1703_v45, %v1664_v56  ;;  %v1726_v36 = vadd.f32 %v1706_v16, %v1665_v43 }
 0x15d   : > { %v1713_v22 = vsel %vm495_vm3, %v1710_v33, %v1712_v51  ;;  %v1727_v57 = vadd.f32 %v1708_v6, %v1666_v39  ;;  %v1728_v11 = vadd.f32 %v1711_v26, %v1667_v49  ;;  %v1731_v58 = vmul.f32 %v4272_v47, %v4524_v7 }
 0x15e   : > { %v1729_v55 = vadd.f32 %v1713_v22, %v1668_v42  ;;  %v1732_v10 = vmul.f32 %v4275_v52, %v4524_v7  ;;  %v1733_v40 = vmul.f32 %v4510_v60, %v4524_v7  ;;  %v1734_v13 = vmul.f32 %v4475_v19, %v4524_v7 }
 0x15f   : > { %v1735_v54 = vmul.f32 %v4478_v34, %v4524_v7  ;;  %v1736_v56 = vmul.f32 %v4513_v9, %v4524_v7  ;;  %v1737_v43 = vmul.f32 %v4279_v20, %v4524_v7  ;;  %v1738_v39 = vmul.f32 %v4282_v21, %v4524_v7 }
 0x160   : > { %v1739_v49 = vmul.f32 %v4516_v46, %v4524_v7  ;;  %v1740_v42 = vmul.f32 %v4482_v24, %v4524_v7  ;;  %v1741_v38 = vmul.f32 %v4485_v25, %v4524_v7  ;;  %v1742_v12 = vmul.f32 %v4520_v8, %v4524_v7 }
 0x161   : > { %v1755_v29 = vrot.slane %v1731_v58, 3  ;;  %v1756_v2 = vrot.slane %v1732_v10, 3  ;;  %v1758_v3 = vrot.slane %v1733_v40, 3  ;;  %v1760_v41 = vrot.slane %v1734_v13, 3 }
 0x162   : > { %v1761_v14 = vrot.slane %v1735_v54, 3  ;;  %v1763_v27 = vrot.slane %v1736_v56, 3  ;;  %v1765_v1 = vrot.slane %v1737_v43, 3  ;;  %v1766_v35 = vrot.slane %v1738_v39, 3 }
 0x163   : > { %v1757_v15 = vsel %vm557_vm4, %v1755_v29, %v1756_v2  ;;  %v1759_v53 = vsel %vm557_vm4, %v1756_v2, %v1758_v3  ;;  %v1768_v48 = vrot.slane %v1739_v49, 3  ;;  %v1770_v50 = vrot.slane %v1740_v42, 3 }
 0x164   : > { %v1762_v0 = vsel %vm557_vm4, %v1760_v41, %v1761_v14  ;;  %v1764_v61 = vsel %vm557_vm4, %v1761_v14, %v1763_v27  ;;  %v1767_v7 = vsel %vm557_vm4, %v1765_v1, %v1766_v35  ;;  %v1771_v5 = vrot.slane %v1741_v38, 3 }
 0x165   : > { %v1769_v62 = vsel %vm557_vm4, %v1766_v35, %v1768_v48  ;;  %v1773_v30 = vrot.slane %v1742_v12, 3  ;;  %v1783_v37 = vadd.f32 %v1757_v15, %v1722_v63  ;;  %v1784_v44 = vadd.f32 %v1759_v53, %v1723_v18 }
 0x166   : > { %v1772_v32 = vsel %vm557_vm4, %v1770_v50, %v1771_v5  ;;  %v1785_v31 = vadd.f32 %v1762_v0, %v1724_v23  ;;  %v1786_v4 = vadd.f32 %v1764_v61, %v1725_v17  ;;  %v1787_v45 = vadd.f32 %v1767_v7, %v1726_v36 }
 0x167   : > { %v1774_v16 = vsel %vm557_vm4, %v1771_v5, %v1773_v30  ;;  %v1788_v33 = vadd.f32 %v1769_v62, %v1727_v57  ;;  %v1789_v6 = vadd.f32 %v1772_v32, %v1728_v11  ;;  %v1792_v51 = vmul.f32 %v4272_v47, %v4527_v28 }
 0x168   : > { %v1790_v26 = vadd.f32 %v1774_v16, %v1729_v55  ;;  %v1793_v22 = vmul.f32 %v4275_v52, %v4527_v28  ;;  %v1794_v63 = vmul.f32 %v4510_v60, %v4527_v28  ;;  %v1795_v18 = vmul.f32 %v4475_v19, %v4527_v28 }
 0x169   : > { %v1796_v23 = vmul.f32 %v4478_v34, %v4527_v28  ;;  %v1797_v17 = vmul.f32 %v4513_v9, %v4527_v28  ;;  %v1798_v36 = vmul.f32 %v4279_v20, %v4527_v28  ;;  %v1799_v57 = vmul.f32 %v4282_v21, %v4527_v28 }
 0x16a   : > { %v1800_v11 = vmul.f32 %v4516_v46, %v4527_v28  ;;  %v1801_v58 = vmul.f32 %v4482_v24, %v4527_v28  ;;  %v1802_v55 = vmul.f32 %v4485_v25, %v4527_v28  ;;  %v1803_v10 = vmul.f32 %v4520_v8, %v4527_v28 }
 0x16b   : > { %v1816_v40 = vrot.slane %v1792_v51, 4  ;;  %v1817_v13 = vrot.slane %v1793_v22, 4  ;;  %v1819_v54 = vrot.slane %v1794_v63, 4  ;;  %v1821_v56 = vrot.slane %v1795_v18, 4 }
 0x16c   : > { %v1822_v43 = vrot.slane %v1796_v23, 4  ;;  %v1824_v39 = vrot.slane %v1797_v17, 4  ;;  %v1826_v49 = vrot.slane %v1798_v36, 4  ;;  %v1827_v42 = vrot.slane %v1799_v57, 4 }
 0x16d   : > { %v1818_v38 = vsel %vm619_vm5, %v1816_v40, %v1817_v13  ;;  %v1820_v12 = vsel %vm619_vm5, %v1817_v13, %v1819_v54  ;;  %v1829_v29 = vrot.slane %v1800_v11, 4  ;;  %v1831_v2 = vrot.slane %v1801_v58, 4 }
 0x16e   : > { %v1823_v3 = vsel %vm619_vm5, %v1821_v56, %v1822_v43  ;;  %v1825_v41 = vsel %vm619_vm5, %v1822_v43, %v1824_v39  ;;  %v1828_v28 = vsel %vm619_vm5, %v1826_v49, %v1827_v42  ;;  %v1832_v14 = vrot.slane %v1802_v55, 4 }
 0x16f   : > { %v1830_v27 = vsel %vm619_vm5, %v1827_v42, %v1829_v29  ;;  %v1834_v1 = vrot.slane %v1803_v10, 4  ;;  %v1844_v35 = vadd.f32 %v1818_v38, %v1783_v37  ;;  %v1845_v15 = vadd.f32 %v1820_v12, %v1784_v44 }
 0x170   : > { %v1833_v53 = vsel %vm619_vm5, %v1831_v2, %v1832_v14  ;;  %v1846_v48 = vadd.f32 %v1823_v3, %v1785_v31  ;;  %v1847_v50 = vadd.f32 %v1825_v41, %v1786_v4  ;;  %v1848_v0 = vadd.f32 %v1828_v28, %v1787_v45 }
 0x171   : > { %v1835_v61 = vsel %vm619_vm5, %v1832_v14, %v1834_v1  ;;  %v1849_v7 = vadd.f32 %v1830_v27, %v1788_v33  ;;  %v1850_v5 = vadd.f32 %v1833_v53, %v1789_v6  ;;  %v1852_v62 = vperm.slane %v4507_v59, 2 }
 0x172   : > { %v1851_v30 = vadd.f32 %v1835_v61, %v1790_v26  ;;  %v1913_v32 = vperm.slane %v4507_v59, 3  ;;  %v4636_v16 = vperm.slane %v4507_v59, 4  ;;  %v4639_v37 = vperm.slane %v4507_v59, 5 }
 0x173   : > { %v1853_v44 = vmul.f32 %v4272_v47, %v1852_v62  ;;  %v1854_v31 = vmul.f32 %v4275_v52, %v1852_v62  ;;  %v1855_v4 = vmul.f32 %v4510_v60, %v1852_v62  ;;  %v1856_v45 = vmul.f32 %v4475_v19, %v1852_v62 }
 0x174   : > { %v1857_v33 = vmul.f32 %v4478_v34, %v1852_v62  ;;  %v1858_v6 = vmul.f32 %v4513_v9, %v1852_v62  ;;  %v1859_v51 = vmul.f32 %v4279_v20, %v1852_v62  ;;  %v1860_v26 = vmul.f32 %v4282_v21, %v1852_v62 }
 0x175   : > { %v1861_v22 = vmul.f32 %v4516_v46, %v1852_v62  ;;  %v1862_v63 = vmul.f32 %v4482_v24, %v1852_v62  ;;  %v1863_v18 = vmul.f32 %v4485_v25, %v1852_v62  ;;  %v1864_v23 = vmul.f32 %v4520_v8, %v1852_v62 }
 0x176   : > { %v1877_v17 = vrot.slane %v1853_v44, 5  ;;  %v1878_v36 = vrot.slane %v1854_v31, 5  ;;  %v1880_v57 = vrot.slane %v1855_v4, 5  ;;  %v1882_v11 = vrot.slane %v1856_v45, 5 }
 0x177   : > { %v1883_v58 = vrot.slane %v1857_v33, 5  ;;  %v1885_v55 = vrot.slane %v1858_v6, 5  ;;  %v1887_v10 = vrot.slane %v1859_v51, 5  ;;  %v1888_v40 = vrot.slane %v1860_v26, 5 }
 0x178   : > { %v1879_v13 = vsel %vm681_vm6, %v1877_v17, %v1878_v36  ;;  %v1881_v54 = vsel %vm681_vm6, %v1878_v36, %v1880_v57  ;;  %v1890_v56 = vrot.slane %v1861_v22, 5  ;;  %v1892_v43 = vrot.slane %v1862_v63, 5 }
 0x179   : > { %v1884_v39 = vsel %vm681_vm6, %v1882_v11, %v1883_v58  ;;  %v1886_v49 = vsel %vm681_vm6, %v1883_v58, %v1885_v55  ;;  %v1889_v42 = vsel %vm681_vm6, %v1887_v10, %v1888_v40  ;;  %v1893_v38 = vrot.slane %v1863_v18, 5  ;;  %v4680_v11 = vld [vmem:[%s3827_s9 + $0x78] sm:$0xff]  ;;  %v4683_v58 = vld [vmem:[%s3827_s9 + $0x80] sm:$0xff] }
 0x17a   : > { %v1891_v12 = vsel %vm681_vm6, %v1888_v40, %v1890_v56  ;;  %v1895_v29 = vrot.slane %v1864_v23, 5  ;;  %v1905_v2 = vadd.f32 %v1879_v13, %v1844_v35  ;;  %v1906_v3 = vadd.f32 %v1881_v54, %v1845_v15  ;;  %v4687_v54 = vld [vmem:[%s3827_s9 + $0xa8] sm:$0xff]  ;;  %v4690_v56 = vld [vmem:[%s3827_s9 + $0xb0] sm:$0xff] }
 0x17b   : > { %v1894_v41 = vsel %vm681_vm6, %v1892_v43, %v1893_v38  ;;  %v1907_v28 = vadd.f32 %v1884_v39, %v1846_v48  ;;  %v1908_v14 = vadd.f32 %v1886_v49, %v1847_v50  ;;  %v1909_v27 = vadd.f32 %v1889_v42, %v1848_v0 }
 0x17c   : > { %v1896_v1 = vsel %vm681_vm6, %v1893_v38, %v1895_v29  ;;  %v1910_v53 = vadd.f32 %v1891_v12, %v1849_v7  ;;  %v1911_v61 = vadd.f32 %v1894_v41, %v1850_v5  ;;  %v1914_v62 = vmul.f32 %v4272_v47, %v1913_v32 }
 0x17d   : > { %v1912_v44 = vadd.f32 %v1896_v1, %v1851_v30  ;;  %v1915_v31 = vmul.f32 %v4275_v52, %v1913_v32  ;;  %v1916_v4 = vmul.f32 %v4510_v60, %v1913_v32  ;;  %v1917_v45 = vmul.f32 %v4475_v19, %v1913_v32  ;;  %v4713_v1 = vld [vmem:[%s3827_s9 + $0x88] sm:$0x3f] }
 0x17e   : > { %v1918_v35 = vmul.f32 %v4478_v34, %v1913_v32  ;;  %v1919_v15 = vmul.f32 %v4513_v9, %v1913_v32  ;;  %v1920_v48 = vmul.f32 %v4279_v20, %v1913_v32  ;;  %v1921_v50 = vmul.f32 %v4282_v21, %v1913_v32 }
 0x17f   : > { %v1922_v0 = vmul.f32 %v4516_v46, %v1913_v32  ;;  %v1923_v7 = vmul.f32 %v4482_v24, %v1913_v32  ;;  %v1924_v47 = vmul.f32 %v4485_v25, %v1913_v32  ;;  %v1925_v52 = vmul.f32 %v4520_v8, %v1913_v32 }
 0x180   : > { %v1938_v5 = vrot.slane %v1914_v62, 6  ;;  %v1939_v60 = vrot.slane %v1915_v31, 6  ;;  %v1941_v30 = vrot.slane %v1916_v4, 6  ;;  %v1943_v33 = vrot.slane %v1917_v45, 6  ;;  %v4716_v31 = vld [vmem:[%s3827_s9 + $0xa0] sm:$0x3f] }
 0x181   : > { %v1944_v6 = vrot.slane %v1918_v35, 6  ;;  %v1946_v51 = vrot.slane %v1919_v15, 6  ;;  %v1948_v9 = vrot.slane %v1920_v48, 6  ;;  %v1949_v20 = vrot.slane %v1921_v50, 6  ;;  %v4719_v4 = vld [vmem:[%s3827_s9 + $0xb8] sm:$0x3f] }
 0x182   : > { %v1940_v21 = vsel %vm743_vm7, %v1938_v5, %v1939_v60  ;;  %v1942_v46 = vsel %vm743_vm7, %v1939_v60, %v1941_v30  ;;  %v1951_v26 = vrot.slane %v1922_v0, 6  ;;  %v1953_v22 = vrot.slane %v1923_v7, 6 }
 0x183   : > { %v1945_v8 = vsel %vm743_vm7, %v1943_v33, %v1944_v6  ;;  %v1947_v32 = vsel %vm743_vm7, %v1944_v6, %v1946_v51  ;;  %v1950_v63 = vsel %vm743_vm7, %v1948_v9, %v1949_v20  ;;  %v1954_v18 = vrot.slane %v1924_v47, 6 }
 0x184   : > { %v1952_v23 = vsel %vm743_vm7, %v1949_v20, %v1951_v26  ;;  %v1956_v17 = vrot.slane %v1925_v52, 6  ;;  %v1966_v36 = vadd.f32 %v1940_v21, %v1905_v2  ;;  %v1967_v57 = vadd.f32 %v1942_v46, %v1906_v3  ;;  %v4702_v3 = vld [vmem:[%s3827_s9 + $0x70] sm:$0x3f] }
 0x185   : > { %v1955_v55 = vsel %vm743_vm7, %v1953_v22, %v1954_v18  ;;  %v1968_v10 = vadd.f32 %v1945_v8, %v1907_v28  ;;  %v1969_v40 = vadd.f32 %v1947_v32, %v1908_v14  ;;  %v1970_v13 = vadd.f32 %v1950_v63, %v1909_v27 }
 0x186   : > { %v1957_v43 = vsel %vm743_vm7, %v1954_v18, %v1956_v17  ;;  %v1971_v39 = vadd.f32 %v1952_v23, %v1910_v53  ;;  %v1972_v49 = vadd.f32 %v1955_v55, %v1911_v61  ;;  %v1990_v42 = vmul.f32 %v4475_v19, %v4636_v16 }
 0x187   : > { %v1973_v38 = vadd.f32 %v1957_v43, %v1912_v44  ;;  %v1991_v12 = vmul.f32 %v4478_v34, %v4636_v16  ;;  %v1992_v29 = vmul.f32 %v4680_v11, %v4636_v16  ;;  %v1993_v2 = vmul.f32 %v4683_v58, %v4636_v16 }
 0x188   : > { %v1994_v41 = vmul.f32 %v4482_v24, %v4636_v16  ;;  %v1995_v28 = vmul.f32 %v4485_v25, %v4636_v16  ;;  %v1996_v14 = vmul.f32 %v4687_v54, %v4636_v16  ;;  %v1997_v27 = vmul.f32 %v4690_v56, %v4636_v16 }
 0x189   : > { %v1998_v53 = vadd.f32 %v1990_v42, %v1966_v36  ;;  %v1999_v61 = vadd.f32 %v1991_v12, %v1967_v57  ;;  %v2000_v62 = vadd.f32 %v1992_v29, %v1968_v10  ;;  %v2001_v44 = vadd.f32 %v1993_v2, %v1969_v40  ;;  %v4753_v10 = vld [vmem:[%s5344_s1 + $0x20] sm:$0xff] }
 0x18a   : > { %v2002_v45 = vadd.f32 %v1994_v41, %v1970_v13  ;;  %v2003_v35 = vadd.f32 %v1995_v28, %v1971_v39  ;;  %v2004_v15 = vadd.f32 %v1996_v14, %v1972_v49  ;;  %v2005_v48 = vadd.f32 %v1997_v27, %v1973_v38 }
 0x18b   : > { %v2007_v50 = vmul.f32 %v4475_v19, %v4639_v37  ;;  %v2008_v16 = vmul.f32 %v4478_v34, %v4639_v37  ;;  %v2009_v0 = vmul.f32 %v4702_v3, %v4639_v37  ;;  %v2010_v7 = vmul.f32 %v4680_v11, %v4639_v37 }
 0x18c   : > { %v2011_v47 = vmul.f32 %v4683_v58, %v4639_v37  ;;  %v2012_v52 = vmul.f32 %v4713_v1, %v4639_v37  ;;  %v2013_v5 = vmul.f32 %v4482_v24, %v4639_v37  ;;  %v2014_v60 = vmul.f32 %v4485_v25, %v4639_v37 }
 0x18d   : > { %v2015_v30 = vmul.f32 %v4716_v31, %v4639_v37  ;;  %v2016_v33 = vmul.f32 %v4687_v54, %v4639_v37  ;;  %v2017_v6 = vmul.f32 %v4690_v56, %v4639_v37  ;;  %v2018_v51 = vmul.f32 %v4719_v4, %v4639_v37 }
 0x18e   : > { %v2031_v9 = vrot.slane %v2007_v50, 1  ;;  %v2032_v20 = vrot.slane %v2008_v16, 1  ;;  %v2034_v21 = vrot.slane %v2009_v0, 1  ;;  %v2036_v46 = vrot.slane %v2010_v7, 1 }
 0x18f   : > { %v2037_v26 = vrot.slane %v2011_v47, 1  ;;  %v2039_v22 = vrot.slane %v2012_v52, 1  ;;  %v2041_v8 = vrot.slane %v2013_v5, 1  ;;  %v2042_v32 = vrot.slane %v2014_v60, 1 }
 0x190   : > { %v2033_v63 = vsel %vm433_vm2, %v2031_v9, %v2032_v20  ;;  %v2035_v18 = vsel %vm433_vm2, %v2032_v20, %v2034_v21  ;;  %v2044_v23 = vrot.slane %v2015_v30, 1  ;;  %v2046_v17 = vrot.slane %v2016_v33, 1 }
 0x191   : > { %v2038_v36 = vsel %vm433_vm2, %v2036_v46, %v2037_v26  ;;  %v2040_v57 = vsel %vm433_vm2, %v2037_v26, %v2039_v22  ;;  %v2043_v37 = vsel %vm433_vm2, %v2041_v8, %v2042_v32  ;;  %v2047_v55 = vrot.slane %v2017_v6, 1 }
 0x192   : > { %v2045_v40 = vsel %vm433_vm2, %v2042_v32, %v2044_v23  ;;  %v2049_v13 = vrot.slane %v2018_v51, 1  ;;  %v2059_v43 = vadd.f32 %v2033_v63, %v1998_v53  ;;  %v2060_v39 = vadd.f32 %v2035_v18, %v1999_v61 }
 0x193   : > { %v2048_v49 = vsel %vm433_vm2, %v2046_v17, %v2047_v55  ;;  %v2061_v42 = vadd.f32 %v2038_v36, %v2000_v62  ;;  %v2062_v38 = vadd.f32 %v2040_v57, %v2001_v44  ;;  %v2063_v12 = vadd.f32 %v2043_v37, %v2002_v45 }
 0x194   : > { %v2050_v29 = vsel %vm433_vm2, %v2047_v55, %v2049_v13  ;;  %v2064_v2 = vadd.f32 %v2045_v40, %v2003_v35  ;;  %v2065_v41 = vadd.f32 %v2048_v49, %v2004_v15  ;;  %v2067_v28 = vperm.slane %v4507_v59, 6 }
 0x195   : > { %v2066_v14 = vadd.f32 %v2050_v29, %v2005_v48  ;;  %v2128_v27 = vperm.slane %v4507_v59, 7  ;;  %v4761_v50 = vperm.slane %v4753_v10, 0  ;;  %v4764_v53 = vperm.slane %v4753_v10, 1 }
 0x196   : > { %v2068_v61 = vmul.f32 %v4475_v19, %v2067_v28  ;;  %v2069_v62 = vmul.f32 %v4478_v34, %v2067_v28  ;;  %v2070_v44 = vmul.f32 %v4702_v3, %v2067_v28  ;;  %v2071_v45 = vmul.f32 %v4680_v11, %v2067_v28 }
 0x197   : > { %v2072_v35 = vmul.f32 %v4683_v58, %v2067_v28  ;;  %v2073_v15 = vmul.f32 %v4713_v1, %v2067_v28  ;;  %v2074_v59 = vmul.f32 %v4482_v24, %v2067_v28  ;;  %v2075_v48 = vmul.f32 %v4485_v25, %v2067_v28 }
 0x198   : > { %v2076_v16 = vmul.f32 %v4716_v31, %v2067_v28  ;;  %v2077_v0 = vmul.f32 %v4687_v54, %v2067_v28  ;;  %v2078_v7 = vmul.f32 %v4690_v56, %v2067_v28  ;;  %v2079_v47 = vmul.f32 %v4719_v4, %v2067_v28 }
 0x199   : > { %v2092_v52 = vrot.slane %v2068_v61, 2  ;;  %v2093_v5 = vrot.slane %v2069_v62, 2  ;;  %v2095_v60 = vrot.slane %v2070_v44, 2  ;;  %v2097_v30 = vrot.slane %v2071_v45, 2 }
 0x19a   : > { %v2098_v33 = vrot.slane %v2072_v35, 2  ;;  %v2100_v6 = vrot.slane %v2073_v15, 2  ;;  %v2102_v51 = vrot.slane %v2074_v59, 2  ;;  %v2103_v9 = vrot.slane %v2075_v48, 2 }
 0x19b   : > { %v2094_v20 = vsel %vm495_vm3, %v2092_v52, %v2093_v5  ;;  %v2096_v21 = vsel %vm495_vm3, %v2093_v5, %v2095_v60  ;;  %v2105_v46 = vrot.slane %v2076_v16, 2  ;;  %v2107_v26 = vrot.slane %v2077_v0, 2 }
 0x19c   : > { %v2099_v22 = vsel %vm495_vm3, %v2097_v30, %v2098_v33  ;;  %v2101_v8 = vsel %vm495_vm3, %v2098_v33, %v2100_v6  ;;  %v2104_v32 = vsel %vm495_vm3, %v2102_v51, %v2103_v9  ;;  %v2108_v63 = vrot.slane %v2078_v7, 2 }
 0x19d   : > { %v2106_v18 = vsel %vm495_vm3, %v2103_v9, %v2105_v46  ;;  %v2110_v23 = vrot.slane %v2079_v47, 2  ;;  %v2120_v17 = vadd.f32 %v2094_v20, %v2059_v43  ;;  %v2121_v36 = vadd.f32 %v2096_v21, %v2060_v39 }
 0x19e   : > { %v2109_v57 = vsel %vm495_vm3, %v2107_v26, %v2108_v63  ;;  %v2122_v37 = vadd.f32 %v2099_v22, %v2061_v42  ;;  %v2123_v55 = vadd.f32 %v2101_v8, %v2062_v38  ;;  %v2124_v40 = vadd.f32 %v2104_v32, %v2063_v12 }
 0x19f   : > { %v2111_v13 = vsel %vm495_vm3, %v2108_v63, %v2110_v23  ;;  %v2125_v49 = vadd.f32 %v2106_v18, %v2064_v2  ;;  %v2126_v29 = vadd.f32 %v2109_v57, %v2065_v41  ;;  %v2129_v28 = vmul.f32 %v4475_v19, %v2128_v27 }
 0x1a0   : > { %v2127_v61 = vadd.f32 %v2111_v13, %v2066_v14  ;;  %v2130_v62 = vmul.f32 %v4478_v34, %v2128_v27  ;;  %v2131_v44 = vmul.f32 %v4702_v3, %v2128_v27  ;;  %v2132_v45 = vmul.f32 %v4680_v11, %v2128_v27 }
 0x1a1   : > { %v2133_v43 = vmul.f32 %v4683_v58, %v2128_v27  ;;  %v2134_v39 = vmul.f32 %v4713_v1, %v2128_v27  ;;  %v2135_v42 = vmul.f32 %v4482_v24, %v2128_v27  ;;  %v2136_v38 = vmul.f32 %v4485_v25, %v2128_v27 }
 0x1a2   : > { %v2137_v12 = vmul.f32 %v4716_v31, %v2128_v27  ;;  %v2138_v2 = vmul.f32 %v4687_v54, %v2128_v27  ;;  %v2139_v41 = vmul.f32 %v4690_v56, %v2128_v27  ;;  %v2140_v14 = vmul.f32 %v4719_v4, %v2128_v27 }
 0x1a3   : > { %v2153_v35 = vrot.slane %v2129_v28, 3  ;;  %v2154_v15 = vrot.slane %v2130_v62, 3  ;;  %v2156_v59 = vrot.slane %v2131_v44, 3  ;;  %v2158_v48 = vrot.slane %v2132_v45, 3 }
 0x1a4   : > { %v2159_v16 = vrot.slane %v2133_v43, 3  ;;  %v2161_v0 = vrot.slane %v2134_v39, 3  ;;  %v2163_v7 = vrot.slane %v2135_v42, 3  ;;  %v2164_v47 = vrot.slane %v2136_v38, 3 }
 0x1a5   : > { %v2155_v52 = vsel %vm557_vm4, %v2153_v35, %v2154_v15  ;;  %v2157_v5 = vsel %vm557_vm4, %v2154_v15, %v2156_v59  ;;  %v2166_v60 = vrot.slane %v2137_v12, 3  ;;  %v2168_v30 = vrot.slane %v2138_v2, 3 }
 0x1a6   : > { %v2160_v33 = vsel %vm557_vm4, %v2158_v48, %v2159_v16  ;;  %v2162_v6 = vsel %vm557_vm4, %v2159_v16, %v2161_v0  ;;  %v2165_v27 = vsel %vm557_vm4, %v2163_v7, %v2164_v47  ;;  %v2169_v51 = vrot.slane %v2139_v41, 3 }
 0x1a7   : > { %v2167_v9 = vsel %vm557_vm4, %v2164_v47, %v2166_v60  ;;  %v2171_v20 = vrot.slane %v2140_v14, 3  ;;  %v2181_v21 = vadd.f32 %v2155_v52, %v2120_v17  ;;  %v2182_v46 = vadd.f32 %v2157_v5, %v2121_v36 }
 0x1a8   : > { %v2170_v26 = vsel %vm557_vm4, %v2168_v30, %v2169_v51  ;;  %v2183_v22 = vadd.f32 %v2160_v33, %v2122_v37  ;;  %v2184_v8 = vadd.f32 %v2162_v6, %v2123_v55  ;;  %v2185_v32 = vadd.f32 %v2165_v27, %v2124_v40 }
 0x1a9   : > { %v2172_v63 = vsel %vm557_vm4, %v2169_v51, %v2171_v20  ;;  %v2186_v18 = vadd.f32 %v2167_v9, %v2125_v49  ;;  %v2187_v23 = vadd.f32 %v2170_v26, %v2126_v29  ;;  %v2190_v57 = vmul.f32 %v4475_v19, %v4761_v50 }
 0x1aa   : > { %v2188_v13 = vadd.f32 %v2172_v63, %v2127_v61  ;;  %v2191_v28 = vmul.f32 %v4478_v34, %v4761_v50  ;;  %v2192_v17 = vmul.f32 %v4702_v3, %v4761_v50  ;;  %v2193_v36 = vmul.f32 %v4680_v11, %v4761_v50 }
 0x1ab   : > { %v2194_v37 = vmul.f32 %v4683_v58, %v4761_v50  ;;  %v2195_v55 = vmul.f32 %v4713_v1, %v4761_v50  ;;  %v2196_v40 = vmul.f32 %v4482_v24, %v4761_v50  ;;  %v2197_v49 = vmul.f32 %v4485_v25, %v4761_v50 }
 0x1ac   : > { %v2198_v29 = vmul.f32 %v4716_v31, %v4761_v50  ;;  %v2199_v61 = vmul.f32 %v4687_v54, %v4761_v50  ;;  %v2200_v62 = vmul.f32 %v4690_v56, %v4761_v50  ;;  %v2201_v44 = vmul.f32 %v4719_v4, %v4761_v50 }
 0x1ad   : > { %v2214_v45 = vrot.slane %v2190_v57, 4  ;;  %v2215_v43 = vrot.slane %v2191_v28, 4  ;;  %v2217_v39 = vrot.slane %v2192_v17, 4  ;;  %v2219_v42 = vrot.slane %v2193_v36, 4 }
 0x1ae   : > { %v2220_v38 = vrot.slane %v2194_v37, 4  ;;  %v2222_v12 = vrot.slane %v2195_v55, 4  ;;  %v2224_v2 = vrot.slane %v2196_v40, 4  ;;  %v2225_v41 = vrot.slane %v2197_v49, 4 }
 0x1af   : > { %v2216_v14 = vsel %vm619_vm5, %v2214_v45, %v2215_v43  ;;  %v2218_v35 = vsel %vm619_vm5, %v2215_v43, %v2217_v39  ;;  %v2227_v15 = vrot.slane %v2198_v29, 4  ;;  %v2229_v59 = vrot.slane %v2199_v61, 4 }
 0x1b0   : > { %v2221_v48 = vsel %vm619_vm5, %v2219_v42, %v2220_v38  ;;  %v2223_v16 = vsel %vm619_vm5, %v2220_v38, %v2222_v12  ;;  %v2226_v50 = vsel %vm619_vm5, %v2224_v2, %v2225_v41  ;;  %v2230_v0 = vrot.slane %v2200_v62, 4 }
 0x1b1   : > { %v2228_v7 = vsel %vm619_vm5, %v2225_v41, %v2227_v15  ;;  %v2232_v47 = vrot.slane %v2201_v44, 4  ;;  %v2242_v52 = vadd.f32 %v2216_v14, %v2181_v21  ;;  %v2243_v5 = vadd.f32 %v2218_v35, %v2182_v46 }
 0x1b2   : > { %v2231_v60 = vsel %vm619_vm5, %v2229_v59, %v2230_v0  ;;  %v2244_v30 = vadd.f32 %v2221_v48, %v2183_v22  ;;  %v2245_v33 = vadd.f32 %v2223_v16, %v2184_v8  ;;  %v2246_v6 = vadd.f32 %v2226_v50, %v2185_v32 }
 0x1b3   : > { %v2233_v27 = vsel %vm619_vm5, %v2230_v0, %v2232_v47  ;;  %v2247_v51 = vadd.f32 %v2228_v7, %v2186_v18  ;;  %v2248_v9 = vadd.f32 %v2231_v60, %v2187_v23  ;;  %v2251_v20 = vmul.f32 %v4475_v19, %v4764_v53  ;;  %v3524_v47 = vld [vmem:[%s3827_s9 + $0x60] sm:$0xff] }
 0x1b4   : > { %v2249_v26 = vadd.f32 %v2233_v27, %v2188_v13  ;;  %v2252_v63 = vmul.f32 %v4478_v34, %v4764_v53  ;;  %v2253_v21 = vmul.f32 %v4702_v3, %v4764_v53  ;;  %v2254_v46 = vmul.f32 %v4680_v11, %v4764_v53 }
 0x1b5   : > { %v2255_v22 = vmul.f32 %v4683_v58, %v4764_v53  ;;  %v2256_v8 = vmul.f32 %v4713_v1, %v4764_v53  ;;  %v2257_v32 = vmul.f32 %v4482_v24, %v4764_v53  ;;  %v2258_v19 = vmul.f32 %v4485_v25, %v4764_v53 }
 0x1b6   : > { %v2259_v34 = vmul.f32 %v4716_v31, %v4764_v53  ;;  %v2260_v18 = vmul.f32 %v4687_v54, %v4764_v53  ;;  %v2261_v23 = vmul.f32 %v4690_v56, %v4764_v53  ;;  %v2262_v57 = vmul.f32 %v4719_v4, %v4764_v53 }
 0x1b7   : > { %v2275_v13 = vrot.slane %v2251_v20, 5  ;;  %v2276_v28 = vrot.slane %v2252_v63, 5  ;;  %v2278_v17 = vrot.slane %v2253_v21, 5  ;;  %v2280_v36 = vrot.slane %v2254_v46, 5  ;;  %v3527_v20 = vld [vmem:[%s3827_s9 + $0x98] sm:$0xff] }
 0x1b8   : > { %v2281_v24 = vrot.slane %v2255_v22, 5  ;;  %v2283_v37 = vrot.slane %v2256_v8, 5  ;;  %v2285_v55 = vrot.slane %v2257_v32, 5  ;;  %v2286_v25 = vrot.slane %v2258_v19, 5 }
 0x1b9   : > { %v2277_v40 = vsel %vm681_vm6, %v2275_v13, %v2276_v28  ;;  %v2279_v49 = vsel %vm681_vm6, %v2276_v28, %v2278_v17  ;;  %v2288_v29 = vrot.slane %v2259_v34, 5  ;;  %v2290_v61 = vrot.slane %v2260_v18, 5 }
 0x1ba   : > { %v2282_v62 = vsel %vm681_vm6, %v2280_v36, %v2281_v24  ;;  %v2284_v44 = vsel %vm681_vm6, %v2281_v24, %v2283_v37  ;;  %v2287_v53 = vsel %vm681_vm6, %v2285_v55, %v2286_v25  ;;  %v2291_v45 = vrot.slane %v2261_v23, 5 }
 0x1bb   : > { %v2289_v43 = vsel %vm681_vm6, %v2286_v25, %v2288_v29  ;;  %v2293_v39 = vrot.slane %v2262_v57, 5  ;;  %v2303_v42 = vadd.f32 %v2277_v40, %v2242_v52  ;;  %v2304_v38 = vadd.f32 %v2279_v49, %v2243_v5  ;;  %v3525_v5 = vld [vmem:[%s3827_s9 + $0x68] sm:$0xff]  ;;  %v4897_v49 = vld [vmem:[%s3827_s9 + $0x90] sm:$0xff]  ;;  %v4900_v29 = vld [vmem:[%s3827_s9 + $0x98] sm:$0xff] }
 0x1bc   : > { %v2292_v12 = vsel %vm681_vm6, %v2290_v61, %v2291_v45  ;;  %v2305_v2 = vadd.f32 %v2282_v62, %v2244_v30  ;;  %v2306_v41 = vadd.f32 %v2284_v44, %v2245_v33  ;;  %v2307_v14 = vadd.f32 %v2287_v53, %v2246_v6 }
 0x1bd   : > { %v2294_v35 = vsel %vm681_vm6, %v2291_v45, %v2293_v39  ;;  %v2308_v15 = vadd.f32 %v2289_v43, %v2247_v51  ;;  %v2309_v59 = vadd.f32 %v2292_v12, %v2248_v9  ;;  %v2311_v48 = vperm.slane %v4753_v10, 2  ;;  %v3526_v51 = vld [vmem:[%s3827_s9 + $0x90] sm:$0xff]  ;;  %v4904_v45 = vld [vmem:[%s3827_s9 + $0xc0] sm:$0xff]  ;;  %v4907_v43 = vld [vmem:[%s3827_s9 + $0xc8] sm:$0xff] }
 0x1be   : > { %v2310_v16 = vadd.f32 %v2294_v35, %v2249_v26  ;;  %v2387_v50 = vperm.slane %v4753_v10, 3  ;;  %v4873_v0 = vperm.slane %v4753_v10, 4  ;;  %v4876_v7 = vperm.slane %v4753_v10, 5 }
 0x1bf   : > { %v2312_v52 = vmul.f32 %v3524_v47, %v2311_v48  ;;  %v2313_v60 = vmul.f32 %v3525_v5, %v2311_v48  ;;  %v2314_v30 = vmul.f32 %v4702_v3, %v2311_v48  ;;  %v2315_v33 = vmul.f32 %v4680_v11, %v2311_v48  ;;  %v4922_v5 = vld [vmem:[%s3827_s9 + $0xa0] sm:$0x3f] }
 0x1c0   : > { %v2316_v6 = vmul.f32 %v4683_v58, %v2311_v48  ;;  %v2317_v27 = vmul.f32 %v4713_v1, %v2311_v48  ;;  %v2318_v9 = vmul.f32 %v3526_v51, %v2311_v48  ;;  %v2319_v26 = vmul.f32 %v3527_v20, %v2311_v48 }
 0x1c1   : > { %v2320_v63 = vmul.f32 %v4716_v31, %v2311_v48  ;;  %v2321_v21 = vmul.f32 %v4687_v54, %v2311_v48  ;;  %v2322_v46 = vmul.f32 %v4690_v56, %v2311_v48  ;;  %v2323_v22 = vmul.f32 %v4719_v4, %v2311_v48 }
 0x1c2   : > { %v2336_v8 = vrot.slane %v2312_v52, 6  ;;  %v2337_v3 = vrot.slane %v2313_v60, 6  ;;  %v2339_v32 = vrot.slane %v2314_v30, 6  ;;  %v2341_v19 = vrot.slane %v2315_v33, 6 }
 0x1c3   : > { %v2342_v34 = vrot.slane %v2316_v6, 6  ;;  %v2344_v18 = vrot.slane %v2317_v27, 6  ;;  %v2346_v1 = vrot.slane %v2318_v9, 6  ;;  %v2347_v23 = vrot.slane %v2319_v26, 6  ;;  %v4925_v6 = vld [vmem:[%s3827_s9 + $0xb8] sm:$0x3f] }
 0x1c4   : > { %v2338_v57 = vsel %vm743_vm7, %v2336_v8, %v2337_v3  ;;  %v2340_v31 = vsel %vm743_vm7, %v2337_v3, %v2339_v32  ;;  %v2349_v13 = vrot.slane %v2320_v63, 6  ;;  %v2351_v28 = vrot.slane %v2321_v21, 6  ;;  %v4928_v27 = vld [vmem:[%s3827_s9 + $0xd0] sm:$0x3f] }
 0x1c5   : > { %v2343_v4 = vsel %vm743_vm7, %v2341_v19, %v2342_v34  ;;  %v2345_v17 = vsel %vm743_vm7, %v2342_v34, %v2344_v18  ;;  %v2348_v36 = vsel %vm743_vm7, %v2346_v1, %v2347_v23  ;;  %v2352_v24 = vrot.slane %v2322_v46, 6 }
 0x1c6   : > { %v2350_v37 = vsel %vm743_vm7, %v2347_v23, %v2349_v13  ;;  %v2354_v55 = vrot.slane %v2323_v22, 6  ;;  %v2364_v25 = vadd.f32 %v2338_v57, %v2303_v42  ;;  %v2365_v40 = vadd.f32 %v2340_v31, %v2304_v38 }
 0x1c7   : > { %v2353_v61 = vsel %vm743_vm7, %v2351_v28, %v2352_v24  ;;  %v2366_v62 = vadd.f32 %v2343_v4, %v2305_v2  ;;  %v2367_v44 = vadd.f32 %v2345_v17, %v2306_v41  ;;  %v2368_v53 = vadd.f32 %v2348_v36, %v2307_v14  ;;  %v4915_v14 = vld [vmem:[%s3827_s9 + $0x88] sm:$0x3f] }
 0x1c8   : > { %v2355_v39 = vsel %vm743_vm7, %v2352_v24, %v2354_v55  ;;  %v2369_v12 = vadd.f32 %v2350_v37, %v2308_v15  ;;  %v2370_v42 = vadd.f32 %v2353_v61, %v2309_v59  ;;  %v2388_v38 = vmul.f32 %v4680_v11, %v2387_v50 }
 0x1c9   : > { %v2371_v35 = vadd.f32 %v2355_v39, %v2310_v16  ;;  %v2389_v48 = vmul.f32 %v4683_v58, %v2387_v50  ;;  %v2390_v2 = vmul.f32 %v4897_v49, %v2387_v50  ;;  %v2391_v41 = vmul.f32 %v4900_v29, %v2387_v50 }
 0x1ca   : > { %v2392_v47 = vmul.f32 %v4687_v54, %v2387_v50  ;;  %v2393_v52 = vmul.f32 %v4690_v56, %v2387_v50  ;;  %v2394_v15 = vmul.f32 %v4904_v45, %v2387_v50  ;;  %v2395_v59 = vmul.f32 %v4907_v43, %v2387_v50 }
 0x1cb   : > { %v2396_v60 = vadd.f32 %v2388_v38, %v2364_v25  ;;  %v2397_v16 = vadd.f32 %v2389_v48, %v2365_v40  ;;  %v2398_v30 = vadd.f32 %v2390_v2, %v2366_v62  ;;  %v2399_v33 = vadd.f32 %v2391_v41, %v2367_v44 }
 0x1cc   : > { %v2400_v51 = vadd.f32 %v2392_v47, %v2368_v53  ;;  %v2401_v9 = vadd.f32 %v2393_v52, %v2369_v12  ;;  %v2402_v20 = vadd.f32 %v2394_v15, %v2370_v42  ;;  %v2403_v26 = vadd.f32 %v2395_v59, %v2371_v35 }
 0x1cd   : > { %v2405_v63 = vmul.f32 %v4680_v11, %v4873_v0  ;;  %v2406_v50 = vmul.f32 %v4683_v58, %v4873_v0  ;;  %v2407_v21 = vmul.f32 %v4915_v14, %v4873_v0  ;;  %v2408_v46 = vmul.f32 %v4897_v49, %v4873_v0 }
 0x1ce   : > { %v2409_v22 = vmul.f32 %v4900_v29, %v4873_v0  ;;  %v2410_v8 = vmul.f32 %v4922_v5, %v4873_v0  ;;  %v2411_v3 = vmul.f32 %v4687_v54, %v4873_v0  ;;  %v2412_v32 = vmul.f32 %v4690_v56, %v4873_v0 }
 0x1cf   : > { %v2413_v19 = vmul.f32 %v4925_v6, %v4873_v0  ;;  %v2414_v34 = vmul.f32 %v4904_v45, %v4873_v0  ;;  %v2415_v18 = vmul.f32 %v4907_v43, %v4873_v0  ;;  %v2416_v1 = vmul.f32 %v4928_v27, %v4873_v0 }
 0x1d0   : > { %v2429_v23 = vrot.slane %v2405_v63, 1  ;;  %v2430_v57 = vrot.slane %v2406_v50, 1  ;;  %v2432_v31 = vrot.slane %v2407_v21, 1  ;;  %v2434_v13 = vrot.slane %v2408_v46, 1 }
 0x1d1   : > { %v2435_v28 = vrot.slane %v2409_v22, 1  ;;  %v2437_v4 = vrot.slane %v2410_v8, 1  ;;  %v2439_v17 = vrot.slane %v2411_v3, 1  ;;  %v2440_v36 = vrot.slane %v2412_v32, 1 }
 0x1d2   : > { %v2431_v24 = vsel %vm433_vm2, %v2429_v23, %v2430_v57  ;;  %v2433_v37 = vsel %vm433_vm2, %v2430_v57, %v2432_v31  ;;  %v2442_v55 = vrot.slane %v2413_v19, 1  ;;  %v2444_v25 = vrot.slane %v2414_v34, 1 }
 0x1d3   : > { %v2436_v40 = vsel %vm433_vm2, %v2434_v13, %v2435_v28  ;;  %v2438_v61 = vsel %vm433_vm2, %v2435_v28, %v2437_v4  ;;  %v2441_v0 = vsel %vm433_vm2, %v2439_v17, %v2440_v36  ;;  %v2445_v62 = vrot.slane %v2415_v18, 1  ;;  %v4994_v4 = vld [vmem:[%s5344_s1 + $0x28] sm:$0xff] }
 0x1d4   : > { %v2443_v44 = vsel %vm433_vm2, %v2440_v36, %v2442_v55  ;;  %v2447_v53 = vrot.slane %v2416_v1, 1  ;;  %v2457_v39 = vadd.f32 %v2431_v24, %v2396_v60  ;;  %v2458_v12 = vadd.f32 %v2433_v37, %v2397_v16 }
 0x1d5   : > { %v2446_v42 = vsel %vm433_vm2, %v2444_v25, %v2445_v62  ;;  %v2459_v38 = vadd.f32 %v2436_v40, %v2398_v30  ;;  %v2460_v35 = vadd.f32 %v2438_v61, %v2399_v33  ;;  %v2461_v48 = vadd.f32 %v2441_v0, %v2400_v51 }
 0x1d6   : > { %v2448_v2 = vsel %vm433_vm2, %v2445_v62, %v2447_v53  ;;  %v2462_v41 = vadd.f32 %v2443_v44, %v2401_v9  ;;  %v2463_v47 = vadd.f32 %v2446_v42, %v2402_v20  ;;  %v2466_v52 = vmul.f32 %v4680_v11, %v4876_v7 }
 0x1d7   : > { %v2464_v15 = vadd.f32 %v2448_v2, %v2403_v26  ;;  %v2467_v59 = vmul.f32 %v4683_v58, %v4876_v7  ;;  %v2468_v60 = vmul.f32 %v4915_v14, %v4876_v7  ;;  %v2469_v16 = vmul.f32 %v4897_v49, %v4876_v7 }
 0x1d8   : > { %v2470_v30 = vmul.f32 %v4900_v29, %v4876_v7  ;;  %v2471_v33 = vmul.f32 %v4922_v5, %v4876_v7  ;;  %v2472_v51 = vmul.f32 %v4687_v54, %v4876_v7  ;;  %v2473_v9 = vmul.f32 %v4690_v56, %v4876_v7 }
 0x1d9   : > { %v2474_v20 = vmul.f32 %v4925_v6, %v4876_v7  ;;  %v2475_v26 = vmul.f32 %v4904_v45, %v4876_v7  ;;  %v2476_v63 = vmul.f32 %v4907_v43, %v4876_v7  ;;  %v2477_v50 = vmul.f32 %v4928_v27, %v4876_v7 }
 0x1da   : > { %v2490_v21 = vrot.slane %v2466_v52, 2  ;;  %v2491_v46 = vrot.slane %v2467_v59, 2  ;;  %v2493_v22 = vrot.slane %v2468_v60, 2  ;;  %v2495_v8 = vrot.slane %v2469_v16, 2 }
 0x1db   : > { %v2496_v3 = vrot.slane %v2470_v30, 2  ;;  %v2498_v32 = vrot.slane %v2471_v33, 2  ;;  %v2500_v19 = vrot.slane %v2472_v51, 2  ;;  %v2501_v34 = vrot.slane %v2473_v9, 2 }
 0x1dc   : > { %v2492_v18 = vsel %vm495_vm3, %v2490_v21, %v2491_v46  ;;  %v2494_v1 = vsel %vm495_vm3, %v2491_v46, %v2493_v22  ;;  %v2503_v23 = vrot.slane %v2474_v20, 2  ;;  %v2505_v57 = vrot.slane %v2475_v26, 2 }
 0x1dd   : > { %v2497_v31 = vsel %vm495_vm3, %v2495_v8, %v2496_v3  ;;  %v2499_v13 = vsel %vm495_vm3, %v2496_v3, %v2498_v32  ;;  %v2502_v7 = vsel %vm495_vm3, %v2500_v19, %v2501_v34  ;;  %v2506_v28 = vrot.slane %v2476_v63, 2 }
 0x1de   : > { %v2504_v17 = vsel %vm495_vm3, %v2501_v34, %v2503_v23  ;;  %v2508_v36 = vrot.slane %v2477_v50, 2  ;;  %v2518_v24 = vadd.f32 %v2492_v18, %v2457_v39  ;;  %v2519_v37 = vadd.f32 %v2494_v1, %v2458_v12 }
 0x1df   : > { %v2507_v55 = vsel %vm495_vm3, %v2505_v57, %v2506_v28  ;;  %v2520_v25 = vadd.f32 %v2497_v31, %v2459_v38  ;;  %v2521_v40 = vadd.f32 %v2499_v13, %v2460_v35  ;;  %v2522_v61 = vadd.f32 %v2502_v7, %v2461_v48 }
 0x1e0   : > { %v2509_v0 = vsel %vm495_vm3, %v2506_v28, %v2508_v36  ;;  %v2523_v62 = vadd.f32 %v2504_v17, %v2462_v41  ;;  %v2524_v44 = vadd.f32 %v2507_v55, %v2463_v47  ;;  %v2526_v53 = vperm.slane %v4753_v10, 6 }
 0x1e1   : > { %v2525_v42 = vadd.f32 %v2509_v0, %v2464_v15  ;;  %v2587_v2 = vperm.slane %v4753_v10, 7  ;;  %v5002_v52 = vperm.slane %v4994_v4, 0  ;;  %v5005_v39 = vperm.slane %v4994_v4, 1 }
 0x1e2   : > { %v2527_v12 = vmul.f32 %v4680_v11, %v2526_v53  ;;  %v2528_v38 = vmul.f32 %v4683_v58, %v2526_v53  ;;  %v2529_v35 = vmul.f32 %v4915_v14, %v2526_v53  ;;  %v2530_v48 = vmul.f32 %v4897_v49, %v2526_v53 }
 0x1e3   : > { %v2531_v41 = vmul.f32 %v4900_v29, %v2526_v53  ;;  %v2532_v47 = vmul.f32 %v4922_v5, %v2526_v53  ;;  %v2533_v10 = vmul.f32 %v4687_v54, %v2526_v53  ;;  %v2534_v15 = vmul.f32 %v4690_v56, %v2526_v53 }
 0x1e4   : > { %v2535_v59 = vmul.f32 %v4925_v6, %v2526_v53  ;;  %v2536_v60 = vmul.f32 %v4904_v45, %v2526_v53  ;;  %v2537_v16 = vmul.f32 %v4907_v43, %v2526_v53  ;;  %v2538_v30 = vmul.f32 %v4928_v27, %v2526_v53 }
 0x1e5   : > { %v2551_v33 = vrot.slane %v2527_v12, 3  ;;  %v2552_v51 = vrot.slane %v2528_v38, 3  ;;  %v2554_v9 = vrot.slane %v2529_v35, 3  ;;  %v2556_v20 = vrot.slane %v2530_v48, 3 }
 0x1e6   : > { %v2557_v26 = vrot.slane %v2531_v41, 3  ;;  %v2559_v63 = vrot.slane %v2532_v47, 3  ;;  %v2561_v50 = vrot.slane %v2533_v10, 3  ;;  %v2562_v21 = vrot.slane %v2534_v15, 3 }
 0x1e7   : > { %v2553_v46 = vsel %vm557_vm4, %v2551_v33, %v2552_v51  ;;  %v2555_v22 = vsel %vm557_vm4, %v2552_v51, %v2554_v9  ;;  %v2564_v8 = vrot.slane %v2535_v59, 3  ;;  %v2566_v3 = vrot.slane %v2536_v60, 3 }
 0x1e8   : > { %v2558_v32 = vsel %vm557_vm4, %v2556_v20, %v2557_v26  ;;  %v2560_v19 = vsel %vm557_vm4, %v2557_v26, %v2559_v63  ;;  %v2563_v34 = vsel %vm557_vm4, %v2561_v50, %v2562_v21  ;;  %v2567_v18 = vrot.slane %v2537_v16, 3 }
 0x1e9   : > { %v2565_v1 = vsel %vm557_vm4, %v2562_v21, %v2564_v8  ;;  %v2569_v23 = vrot.slane %v2538_v30, 3  ;;  %v2579_v57 = vadd.f32 %v2553_v46, %v2518_v24  ;;  %v2580_v31 = vadd.f32 %v2555_v22, %v2519_v37 }
 0x1ea   : > { %v2568_v13 = vsel %vm557_vm4, %v2566_v3, %v2567_v18  ;;  %v2581_v7 = vadd.f32 %v2558_v32, %v2520_v25  ;;  %v2582_v28 = vadd.f32 %v2560_v19, %v2521_v40  ;;  %v2583_v17 = vadd.f32 %v2563_v34, %v2522_v61 }
 0x1eb   : > { %v2570_v36 = vsel %vm557_vm4, %v2567_v18, %v2569_v23  ;;  %v2584_v55 = vadd.f32 %v2565_v1, %v2523_v62  ;;  %v2585_v0 = vadd.f32 %v2568_v13, %v2524_v44  ;;  %v2588_v53 = vmul.f32 %v4680_v11, %v2587_v2 }
 0x1ec   : > { %v2586_v12 = vadd.f32 %v2570_v36, %v2525_v42  ;;  %v2589_v38 = vmul.f32 %v4683_v58, %v2587_v2  ;;  %v2590_v35 = vmul.f32 %v4915_v14, %v2587_v2  ;;  %v2591_v48 = vmul.f32 %v4897_v49, %v2587_v2 }
 0x1ed   : > { %v2592_v24 = vmul.f32 %v4900_v29, %v2587_v2  ;;  %v2593_v37 = vmul.f32 %v4922_v5, %v2587_v2  ;;  %v2594_v25 = vmul.f32 %v4687_v54, %v2587_v2  ;;  %v2595_v40 = vmul.f32 %v4690_v56, %v2587_v2 }
 0x1ee   : > { %v2596_v61 = vmul.f32 %v4925_v6, %v2587_v2  ;;  %v2597_v62 = vmul.f32 %v4904_v45, %v2587_v2  ;;  %v2598_v44 = vmul.f32 %v4907_v43, %v2587_v2  ;;  %v2599_v42 = vmul.f32 %v4928_v27, %v2587_v2 }
 0x1ef   : > { %v2612_v41 = vrot.slane %v2588_v53, 4  ;;  %v2613_v47 = vrot.slane %v2589_v38, 4  ;;  %v2615_v10 = vrot.slane %v2590_v35, 4  ;;  %v2617_v15 = vrot.slane %v2591_v48, 4 }
 0x1f0   : > { %v2618_v59 = vrot.slane %v2592_v24, 4  ;;  %v2620_v60 = vrot.slane %v2593_v37, 4  ;;  %v2622_v16 = vrot.slane %v2594_v25, 4  ;;  %v2623_v30 = vrot.slane %v2595_v40, 4 }
 0x1f1   : > { %v2614_v33 = vsel %vm619_vm5, %v2612_v41, %v2613_v47  ;;  %v2616_v51 = vsel %vm619_vm5, %v2613_v47, %v2615_v10  ;;  %v2625_v9 = vrot.slane %v2596_v61, 4  ;;  %v2627_v20 = vrot.slane %v2597_v62, 4 }
 0x1f2   : > { %v2619_v26 = vsel %vm619_vm5, %v2617_v15, %v2618_v59  ;;  %v2621_v63 = vsel %vm619_vm5, %v2618_v59, %v2620_v60  ;;  %v2624_v2 = vsel %vm619_vm5, %v2622_v16, %v2623_v30  ;;  %v2628_v50 = vrot.slane %v2598_v44, 4 }
 0x1f3   : > { %v2626_v21 = vsel %vm619_vm5, %v2623_v30, %v2625_v9  ;;  %v2630_v46 = vrot.slane %v2599_v42, 4  ;;  %v2640_v22 = vadd.f32 %v2614_v33, %v2579_v57  ;;  %v2641_v8 = vadd.f32 %v2616_v51, %v2580_v31 }
 0x1f4   : > { %v2629_v3 = vsel %vm619_vm5, %v2627_v20, %v2628_v50  ;;  %v2642_v32 = vadd.f32 %v2619_v26, %v2581_v7  ;;  %v2643_v19 = vadd.f32 %v2621_v63, %v2582_v28  ;;  %v2644_v34 = vadd.f32 %v2624_v2, %v2583_v17 }
 0x1f5   : > { %v2631_v18 = vsel %vm619_vm5, %v2628_v50, %v2630_v46  ;;  %v2645_v1 = vadd.f32 %v2626_v21, %v2584_v55  ;;  %v2646_v23 = vadd.f32 %v2629_v3, %v2585_v0  ;;  %v2649_v13 = vmul.f32 %v4680_v11, %v5002_v52 }
 0x1f6   : > { %v2647_v36 = vadd.f32 %v2631_v18, %v2586_v12  ;;  %v2650_v53 = vmul.f32 %v4683_v58, %v5002_v52  ;;  %v2651_v57 = vmul.f32 %v4915_v14, %v5002_v52  ;;  %v2652_v31 = vmul.f32 %v4897_v49, %v5002_v52 }
 0x1f7   : > { %v2653_v7 = vmul.f32 %v4900_v29, %v5002_v52  ;;  %v2654_v28 = vmul.f32 %v4922_v5, %v5002_v52  ;;  %v2655_v17 = vmul.f32 %v4687_v54, %v5002_v52  ;;  %v2656_v55 = vmul.f32 %v4690_v56, %v5002_v52 }
 0x1f8   : > { %v2657_v0 = vmul.f32 %v4925_v6, %v5002_v52  ;;  %v2658_v12 = vmul.f32 %v4904_v45, %v5002_v52  ;;  %v2659_v38 = vmul.f32 %v4907_v43, %v5002_v52  ;;  %v2660_v35 = vmul.f32 %v4928_v27, %v5002_v52 }
 0x1f9   : > { %v2673_v48 = vrot.slane %v2649_v13, 5  ;;  %v2674_v24 = vrot.slane %v2650_v53, 5  ;;  %v2676_v37 = vrot.slane %v2651_v57, 5  ;;  %v2678_v25 = vrot.slane %v2652_v31, 5 }
 0x1fa   : > { %v2679_v40 = vrot.slane %v2653_v7, 5  ;;  %v2681_v61 = vrot.slane %v2654_v28, 5  ;;  %v2683_v62 = vrot.slane %v2655_v17, 5  ;;  %v2684_v44 = vrot.slane %v2656_v55, 5 }
 0x1fb   : > { %v2675_v42 = vsel %vm681_vm6, %v2673_v48, %v2674_v24  ;;  %v2677_v41 = vsel %vm681_vm6, %v2674_v24, %v2676_v37  ;;  %v2686_v47 = vrot.slane %v2657_v0, 5  ;;  %v2688_v10 = vrot.slane %v2658_v12, 5 }
 0x1fc   : > { %v2680_v15 = vsel %vm681_vm6, %v2678_v25, %v2679_v40  ;;  %v2682_v59 = vsel %vm681_vm6, %v2679_v40, %v2681_v61  ;;  %v2685_v52 = vsel %vm681_vm6, %v2683_v62, %v2684_v44  ;;  %v2689_v60 = vrot.slane %v2659_v38, 5  ;;  %v5111_v61 = vld [vmem:[%s3827_s9 + $0xa8] sm:$0xff]  ;;  %v5114_v62 = vld [vmem:[%s3827_s9 + $0xb0] sm:$0xff] }
 0x1fd   : > { %v2687_v16 = vsel %vm681_vm6, %v2684_v44, %v2686_v47  ;;  %v2691_v30 = vrot.slane %v2660_v35, 5  ;;  %v2701_v33 = vadd.f32 %v2675_v42, %v2640_v22  ;;  %v2702_v51 = vadd.f32 %v2677_v41, %v2641_v8  ;;  %v5118_v47 = vld [vmem:[%s3827_s9 + $0xd8] sm:$0xff] }
 0x1fe   : > { %v2690_v9 = vsel %vm681_vm6, %v2688_v10, %v2689_v60  ;;  %v2703_v20 = vadd.f32 %v2680_v15, %v2642_v32  ;;  %v2704_v26 = vadd.f32 %v2682_v59, %v2643_v19  ;;  %v2705_v63 = vadd.f32 %v2685_v52, %v2644_v34  ;;  %v5121_v10 = vld [vmem:[%s3827_s9 + $0xe0] sm:$0xff] }
 0x1ff   : > { %v2692_v2 = vsel %vm681_vm6, %v2689_v60, %v2691_v30  ;;  %v2706_v50 = vadd.f32 %v2687_v16, %v2645_v1  ;;  %v2707_v21 = vadd.f32 %v2690_v9, %v2646_v23  ;;  %v2710_v46 = vmul.f32 %v4680_v11, %v5005_v39 }
 0x200   : > { %v2708_v3 = vadd.f32 %v2692_v2, %v2647_v36  ;;  %v2711_v18 = vmul.f32 %v4683_v58, %v5005_v39  ;;  %v2712_v22 = vmul.f32 %v4915_v14, %v5005_v39  ;;  %v2713_v8 = vmul.f32 %v4897_v49, %v5005_v39 }
 0x201   : > { %v2714_v32 = vmul.f32 %v4900_v29, %v5005_v39  ;;  %v2715_v19 = vmul.f32 %v4922_v5, %v5005_v39  ;;  %v2716_v34 = vmul.f32 %v4687_v54, %v5005_v39  ;;  %v2717_v11 = vmul.f32 %v4690_v56, %v5005_v39 }
 0x202   : > { %v2718_v58 = vmul.f32 %v4925_v6, %v5005_v39  ;;  %v2719_v14 = vmul.f32 %v4904_v45, %v5005_v39  ;;  %v2720_v1 = vmul.f32 %v4907_v43, %v5005_v39  ;;  %v2721_v23 = vmul.f32 %v4928_v27, %v5005_v39 }
 0x203   : > { %v2734_v13 = vrot.slane %v2710_v46, 6  ;;  %v2735_v5 = vrot.slane %v2711_v18, 6  ;;  %v2737_v36 = vrot.slane %v2712_v22, 6  ;;  %v2739_v53 = vrot.slane %v2713_v8, 6  ;;  %v5146_v8 = vld [vmem:[%s3827_s9 + $0xd0] sm:$0x3f] }
 0x204   : > { %v2740_v54 = vrot.slane %v2714_v32, 6  ;;  %v2742_v57 = vrot.slane %v2715_v19, 6  ;;  %v2744_v31 = vrot.slane %v2716_v34, 6  ;;  %v2745_v56 = vrot.slane %v2717_v11, 6  ;;  %v5149_v32 = vld [vmem:[%s3827_s9 + $0xe8] sm:$0x3f] }
 0x205   : > { %v2736_v7 = vsel %vm743_vm7, %v2734_v13, %v2735_v5  ;;  %v2738_v6 = vsel %vm743_vm7, %v2735_v5, %v2737_v36  ;;  %v2747_v28 = vrot.slane %v2718_v58, 6  ;;  %v2749_v17 = vrot.slane %v2719_v14, 6 }
 0x206   : > { %v2741_v55 = vsel %vm743_vm7, %v2739_v53, %v2740_v54  ;;  %v2743_v27 = vsel %vm743_vm7, %v2740_v54, %v2742_v57  ;;  %v2746_v39 = vsel %vm743_vm7, %v2744_v31, %v2745_v56  ;;  %v2750_v0 = vrot.slane %v2720_v1, 6 }
 0x207   : > { %v2748_v12 = vsel %vm743_vm7, %v2745_v56, %v2747_v28  ;;  %v2752_v38 = vrot.slane %v2721_v23, 6  ;;  %v2762_v35 = vadd.f32 %v2736_v7, %v2701_v33  ;;  %v2763_v48 = vadd.f32 %v2738_v6, %v2702_v51 }
 0x208   : > { %v2751_v24 = vsel %vm743_vm7, %v2749_v17, %v2750_v0  ;;  %v2764_v37 = vadd.f32 %v2741_v55, %v2703_v20  ;;  %v2765_v25 = vadd.f32 %v2743_v27, %v2704_v26  ;;  %v2766_v40 = vadd.f32 %v2746_v39, %v2705_v63  ;;  %v5136_v20 = vld [vmem:[%s3827_s9 + $0xa0] sm:$0x3f] }
 0x209   : > { %v2753_v44 = vsel %vm743_vm7, %v2750_v0, %v2752_v38  ;;  %v2767_v42 = vadd.f32 %v2748_v12, %v2706_v50  ;;  %v2768_v41 = vadd.f32 %v2751_v24, %v2707_v21  ;;  %v2785_v15 = vperm.slane %v4994_v4, 2  ;;  %v5143_v21 = vld [vmem:[%s3827_s9 + $0xb8] sm:$0x3f] }
 0x20a   : > { %v2769_v59 = vadd.f32 %v2753_v44, %v2708_v3  ;;  %v2802_v52 = vperm.slane %v4994_v4, 3  ;;  %v5126_v60 = vperm.slane %v4994_v4, 4  ;;  %v5129_v16 = vperm.slane %v4994_v4, 5 }
 0x20b   : > { %v2786_v30 = vmul.f32 %v4897_v49, %v2785_v15  ;;  %v2787_v33 = vmul.f32 %v4900_v29, %v2785_v15  ;;  %v2788_v51 = vmul.f32 %v5111_v61, %v2785_v15  ;;  %v2789_v9 = vmul.f32 %v5114_v62, %v2785_v15 }
 0x20c   : > { %v2790_v26 = vmul.f32 %v4904_v45, %v2785_v15  ;;  %v2791_v63 = vmul.f32 %v4907_v43, %v2785_v15  ;;  %v2792_v2 = vmul.f32 %v5118_v47, %v2785_v15  ;;  %v2793_v50 = vmul.f32 %v5121_v10, %v2785_v15 }
 0x20d   : > { %v2794_v46 = vadd.f32 %v2786_v30, %v2762_v35  ;;  %v2795_v3 = vadd.f32 %v2787_v33, %v2763_v48  ;;  %v2796_v18 = vadd.f32 %v2788_v51, %v2764_v37  ;;  %v2797_v22 = vadd.f32 %v2789_v9, %v2765_v25 }
 0x20e   : > { %v2798_v19 = vadd.f32 %v2790_v26, %v2766_v40  ;;  %v2799_v34 = vadd.f32 %v2791_v63, %v2767_v42  ;;  %v2800_v11 = vadd.f32 %v2792_v2, %v2768_v41  ;;  %v2801_v58 = vadd.f32 %v2793_v50, %v2769_v59 }
 0x20f   : > { %v2803_v14 = vmul.f32 %v4897_v49, %v2802_v52  ;;  %v2804_v1 = vmul.f32 %v4900_v29, %v2802_v52  ;;  %v2805_v23 = vmul.f32 %v5136_v20, %v2802_v52  ;;  %v2806_v13 = vmul.f32 %v5111_v61, %v2802_v52 }
 0x210   : > { %v2807_v5 = vmul.f32 %v5114_v62, %v2802_v52  ;;  %v2808_v36 = vmul.f32 %v5143_v21, %v2802_v52  ;;  %v2809_v53 = vmul.f32 %v4904_v45, %v2802_v52  ;;  %v2810_v54 = vmul.f32 %v4907_v43, %v2802_v52 }
 0x211   : > { %v2811_v57 = vmul.f32 %v5146_v8, %v2802_v52  ;;  %v2812_v31 = vmul.f32 %v5118_v47, %v2802_v52  ;;  %v2813_v56 = vmul.f32 %v5121_v10, %v2802_v52  ;;  %v2814_v7 = vmul.f32 %v5149_v32, %v2802_v52 }
 0x212   : > { %v2827_v6 = vrot.slane %v2803_v14, 1  ;;  %v2828_v28 = vrot.slane %v2804_v1, 1  ;;  %v2830_v17 = vrot.slane %v2805_v23, 1  ;;  %v2832_v55 = vrot.slane %v2806_v13, 1 }
 0x213   : > { %v2833_v27 = vrot.slane %v2807_v5, 1  ;;  %v2835_v39 = vrot.slane %v2808_v36, 1  ;;  %v2837_v0 = vrot.slane %v2809_v53, 1  ;;  %v2838_v12 = vrot.slane %v2810_v54, 1 }
 0x214   : > { %v2829_v38 = vsel %vm433_vm2, %v2827_v6, %v2828_v28  ;;  %v2831_v35 = vsel %vm433_vm2, %v2828_v28, %v2830_v17  ;;  %v2840_v48 = vrot.slane %v2811_v57, 1  ;;  %v2842_v24 = vrot.slane %v2812_v31, 1 }
 0x215   : > { %v2834_v37 = vsel %vm433_vm2, %v2832_v55, %v2833_v27  ;;  %v2836_v25 = vsel %vm433_vm2, %v2833_v27, %v2835_v39  ;;  %v2839_v40 = vsel %vm433_vm2, %v2837_v0, %v2838_v12  ;;  %v2843_v44 = vrot.slane %v2813_v56, 1 }
 0x216   : > { %v2841_v42 = vsel %vm433_vm2, %v2838_v12, %v2840_v48  ;;  %v2845_v41 = vrot.slane %v2814_v7, 1  ;;  %v2855_v15 = vadd.f32 %v2829_v38, %v2794_v46  ;;  %v2856_v59 = vadd.f32 %v2831_v35, %v2795_v3 }
 0x217   : > { %v2844_v52 = vsel %vm433_vm2, %v2842_v24, %v2843_v44  ;;  %v2857_v30 = vadd.f32 %v2834_v37, %v2796_v18  ;;  %v2858_v33 = vadd.f32 %v2836_v25, %v2797_v22  ;;  %v2859_v51 = vadd.f32 %v2839_v40, %v2798_v19 }
 0x218   : > { %v2846_v9 = vsel %vm433_vm2, %v2843_v44, %v2845_v41  ;;  %v2860_v26 = vadd.f32 %v2841_v42, %v2799_v34  ;;  %v2861_v63 = vadd.f32 %v2844_v52, %v2800_v11  ;;  %v2864_v2 = vmul.f32 %v4897_v49, %v5126_v60 }
 0x219   : > { %v2862_v50 = vadd.f32 %v2846_v9, %v2801_v58  ;;  %v2865_v14 = vmul.f32 %v4900_v29, %v5126_v60  ;;  %v2866_v46 = vmul.f32 %v5136_v20, %v5126_v60  ;;  %v2867_v3 = vmul.f32 %v5111_v61, %v5126_v60 }
 0x21a   : > { %v2868_v18 = vmul.f32 %v5114_v62, %v5126_v60  ;;  %v2869_v22 = vmul.f32 %v5143_v21, %v5126_v60  ;;  %v2870_v19 = vmul.f32 %v4904_v45, %v5126_v60  ;;  %v2871_v34 = vmul.f32 %v4907_v43, %v5126_v60 }
 0x21b   : > { %v2872_v11 = vmul.f32 %v5146_v8, %v5126_v60  ;;  %v2873_v58 = vmul.f32 %v5118_v47, %v5126_v60  ;;  %v2874_v1 = vmul.f32 %v5121_v10, %v5126_v60  ;;  %v2875_v23 = vmul.f32 %v5149_v32, %v5126_v60 }
 0x21c   : > { %v2888_v13 = vrot.slane %v2864_v2, 2  ;;  %v2889_v5 = vrot.slane %v2865_v14, 2  ;;  %v2891_v36 = vrot.slane %v2866_v46, 2  ;;  %v2893_v53 = vrot.slane %v2867_v3, 2 }
 0x21d   : > { %v2894_v54 = vrot.slane %v2868_v18, 2  ;;  %v2896_v57 = vrot.slane %v2869_v22, 2  ;;  %v2898_v31 = vrot.slane %v2870_v19, 2  ;;  %v2899_v56 = vrot.slane %v2871_v34, 2 }
 0x21e   : > { %v2890_v7 = vsel %vm495_vm3, %v2888_v13, %v2889_v5  ;;  %v2892_v6 = vsel %vm495_vm3, %v2889_v5, %v2891_v36  ;;  %v2901_v28 = vrot.slane %v2872_v11, 2  ;;  %v2903_v17 = vrot.slane %v2873_v58, 2 }
 0x21f   : > { %v2895_v55 = vsel %vm495_vm3, %v2893_v53, %v2894_v54  ;;  %v2897_v27 = vsel %vm495_vm3, %v2894_v54, %v2896_v57  ;;  %v2900_v60 = vsel %vm495_vm3, %v2898_v31, %v2899_v56  ;;  %v2904_v39 = vrot.slane %v2874_v1, 2  ;;  %v5235_v57 = vld [vmem:[%s5344_s1 + $0x30] ss:$0 sm:$0xff] }
 0x220   : > { %v2902_v0 = vsel %vm495_vm3, %v2899_v56, %v2901_v28  ;;  %v2906_v12 = vrot.slane %v2875_v23, 2  ;;  %v2916_v38 = vadd.f32 %v2890_v7, %v2855_v15  ;;  %v2917_v35 = vadd.f32 %v2892_v6, %v2856_v59 }
 0x221   : > { %v2905_v48 = vsel %vm495_vm3, %v2903_v17, %v2904_v39  ;;  %v2918_v24 = vadd.f32 %v2895_v55, %v2857_v30  ;;  %v2919_v37 = vadd.f32 %v2897_v27, %v2858_v33  ;;  %v2920_v25 = vadd.f32 %v2900_v60, %v2859_v51 }
 0x222   : > { %v2907_v40 = vsel %vm495_vm3, %v2904_v39, %v2906_v12  ;;  %v2921_v44 = vadd.f32 %v2902_v0, %v2860_v26  ;;  %v2922_v42 = vadd.f32 %v2905_v48, %v2861_v63  ;;  %v2925_v41 = vmul.f32 %v4897_v49, %v5129_v16 }
 0x223   : > { %v2923_v52 = vadd.f32 %v2907_v40, %v2862_v50  ;;  %v2926_v9 = vmul.f32 %v4900_v29, %v5129_v16  ;;  %v2927_v15 = vmul.f32 %v5136_v20, %v5129_v16  ;;  %v2928_v59 = vmul.f32 %v5111_v61, %v5129_v16 }
 0x224   : > { %v2929_v30 = vmul.f32 %v5114_v62, %v5129_v16  ;;  %v2930_v33 = vmul.f32 %v5143_v21, %v5129_v16  ;;  %v2931_v51 = vmul.f32 %v4904_v45, %v5129_v16  ;;  %v2932_v26 = vmul.f32 %v4907_v43, %v5129_v16 }
 0x225   : > { %v2933_v63 = vmul.f32 %v5146_v8, %v5129_v16  ;;  %v2934_v2 = vmul.f32 %v5118_v47, %v5129_v16  ;;  %v2935_v50 = vmul.f32 %v5121_v10, %v5129_v16  ;;  %v2936_v14 = vmul.f32 %v5149_v32, %v5129_v16 }
 0x226   : > { %v2949_v46 = vrot.slane %v2925_v41, 3  ;;  %v2950_v3 = vrot.slane %v2926_v9, 3  ;;  %v2952_v18 = vrot.slane %v2927_v15, 3  ;;  %v2954_v22 = vrot.slane %v2928_v59, 3 }
 0x227   : > { %v2955_v19 = vrot.slane %v2929_v30, 3  ;;  %v2957_v34 = vrot.slane %v2930_v33, 3  ;;  %v2959_v11 = vrot.slane %v2931_v51, 3  ;;  %v2960_v58 = vrot.slane %v2932_v26, 3 }
 0x228   : > { %v2951_v1 = vsel %vm557_vm4, %v2949_v46, %v2950_v3  ;;  %v2953_v23 = vsel %vm557_vm4, %v2950_v3, %v2952_v18  ;;  %v2962_v13 = vrot.slane %v2933_v63, 3  ;;  %v2964_v5 = vrot.slane %v2934_v2, 3 }
 0x229   : > { %v2956_v36 = vsel %vm557_vm4, %v2954_v22, %v2955_v19  ;;  %v2958_v53 = vsel %vm557_vm4, %v2955_v19, %v2957_v34  ;;  %v2961_v16 = vsel %vm557_vm4, %v2959_v11, %v2960_v58  ;;  %v2965_v54 = vrot.slane %v2935_v50, 3 }
 0x22a   : > { %v2963_v31 = vsel %vm557_vm4, %v2960_v58, %v2962_v13  ;;  %v2967_v56 = vrot.slane %v2936_v14, 3  ;;  %v2977_v7 = vadd.f32 %v2951_v1, %v2916_v38  ;;  %v2978_v6 = vadd.f32 %v2953_v23, %v2917_v35 }
 0x22b   : > { %v2966_v28 = vsel %vm557_vm4, %v2964_v5, %v2965_v54  ;;  %v2979_v17 = vadd.f32 %v2956_v36, %v2918_v24  ;;  %v2980_v55 = vadd.f32 %v2958_v53, %v2919_v37  ;;  %v2981_v27 = vadd.f32 %v2961_v16, %v2920_v25 }
 0x22c   : > { %v2968_v60 = vsel %vm557_vm4, %v2965_v54, %v2967_v56  ;;  %v2982_v39 = vadd.f32 %v2963_v31, %v2921_v44  ;;  %v2983_v0 = vadd.f32 %v2966_v28, %v2922_v42  ;;  %v2985_v12 = vperm.slane %v4994_v4, 6 }
 0x22d   : > { %v2984_v48 = vadd.f32 %v2968_v60, %v2923_v52  ;;  %v3046_v40 = vperm.slane %v4994_v4, 7  ;;  %v5244_v41 = vmul.f32 %v5235_v57, %v4897_v49  ;;  %v5248_v38 = vmul.f32 %v5235_v57, %v4900_v29 }
 0x22e   : > { %v2986_v35 = vmul.f32 %v4897_v49, %v2985_v12  ;;  %v2987_v24 = vmul.f32 %v4900_v29, %v2985_v12  ;;  %v2988_v37 = vmul.f32 %v5136_v20, %v2985_v12  ;;  %v2989_v25 = vmul.f32 %v5111_v61, %v2985_v12 }
 0x22f   : > { %v2990_v44 = vmul.f32 %v5114_v62, %v2985_v12  ;;  %v2991_v4 = vmul.f32 %v5143_v21, %v2985_v12  ;;  %v2992_v42 = vmul.f32 %v4904_v45, %v2985_v12  ;;  %v2993_v52 = vmul.f32 %v4907_v43, %v2985_v12 }
 0x230   : > { %v2994_v9 = vmul.f32 %v5146_v8, %v2985_v12  ;;  %v2995_v15 = vmul.f32 %v5118_v47, %v2985_v12  ;;  %v2996_v59 = vmul.f32 %v5121_v10, %v2985_v12  ;;  %v2997_v30 = vmul.f32 %v5149_v32, %v2985_v12 }
 0x231   : > { %v3010_v33 = vrot.slane %v2986_v35, 4  ;;  %v3011_v51 = vrot.slane %v2987_v24, 4  ;;  %v3013_v26 = vrot.slane %v2988_v37, 4  ;;  %v3015_v63 = vrot.slane %v2989_v25, 4 }
 0x232   : > { %v3016_v2 = vrot.slane %v2990_v44, 4  ;;  %v3018_v50 = vrot.slane %v2991_v4, 4  ;;  %v3020_v14 = vrot.slane %v2992_v42, 4  ;;  %v3021_v46 = vrot.slane %v2993_v52, 4 }
 0x233   : > { %v3012_v3 = vsel %vm619_vm5, %v3010_v33, %v3011_v51  ;;  %v3014_v18 = vsel %vm619_vm5, %v3011_v51, %v3013_v26  ;;  %v3023_v22 = vrot.slane %v2994_v9, 4  ;;  %v3025_v19 = vrot.slane %v2995_v15, 4 }
 0x234   : > { %v3017_v34 = vsel %vm619_vm5, %v3015_v63, %v3016_v2  ;;  %v3019_v11 = vsel %vm619_vm5, %v3016_v2, %v3018_v50  ;;  %v3022_v58 = vsel %vm619_vm5, %v3020_v14, %v3021_v46  ;;  %v3026_v1 = vrot.slane %v2996_v59, 4 }
 0x235   : > { %v3024_v23 = vsel %vm619_vm5, %v3021_v46, %v3023_v22  ;;  %v3028_v13 = vrot.slane %v2997_v30, 4  ;;  %v3038_v5 = vadd.f32 %v3012_v3, %v2977_v7  ;;  %v3039_v36 = vadd.f32 %v3014_v18, %v2978_v6 }
 0x236   : > { %v3027_v53 = vsel %vm619_vm5, %v3025_v19, %v3026_v1  ;;  %v3040_v16 = vadd.f32 %v3017_v34, %v2979_v17  ;;  %v3041_v54 = vadd.f32 %v3019_v11, %v2980_v55  ;;  %v3042_v31 = vadd.f32 %v3022_v58, %v2981_v27 }
 0x237   : > { %v3029_v56 = vsel %vm619_vm5, %v3026_v1, %v3028_v13  ;;  %v3043_v28 = vadd.f32 %v3024_v23, %v2982_v39  ;;  %v3044_v60 = vadd.f32 %v3027_v53, %v2983_v0  ;;  %v3047_v12 = vmul.f32 %v4897_v49, %v3046_v40 }
 0x238   : > { %v3045_v35 = vadd.f32 %v3029_v56, %v2984_v48  ;;  %v3048_v24 = vmul.f32 %v4900_v29, %v3046_v40  ;;  %v3049_v37 = vmul.f32 %v5136_v20, %v3046_v40  ;;  %v3050_v25 = vmul.f32 %v5111_v61, %v3046_v40 }
 0x239   : > { %v3051_v7 = vmul.f32 %v5114_v62, %v3046_v40  ;;  %v3052_v6 = vmul.f32 %v5143_v21, %v3046_v40  ;;  %v3053_v17 = vmul.f32 %v4904_v45, %v3046_v40  ;;  %v3054_v55 = vmul.f32 %v4907_v43, %v3046_v40 }
 0x23a   : > { %v3055_v27 = vmul.f32 %v5146_v8, %v3046_v40  ;;  %v3056_v39 = vmul.f32 %v5118_v47, %v3046_v40  ;;  %v3057_v49 = vmul.f32 %v5121_v10, %v3046_v40  ;;  %v3058_v29 = vmul.f32 %v5149_v32, %v3046_v40 }
 0x23b   : > { %v3071_v0 = vrot.slane %v3047_v12, 5  ;;  %v3072_v48 = vrot.slane %v3048_v24, 5  ;;  %v3074_v44 = vrot.slane %v3049_v37, 5  ;;  %v3076_v4 = vrot.slane %v3050_v25, 5 }
 0x23c   : > { %v3077_v42 = vrot.slane %v3051_v7, 5  ;;  %v3079_v52 = vrot.slane %v3052_v6, 5  ;;  %v3081_v9 = vrot.slane %v3053_v17, 5  ;;  %v3082_v15 = vrot.slane %v3054_v55, 5 }
 0x23d   : > { %v3073_v59 = vsel %vm681_vm6, %v3071_v0, %v3072_v48  ;;  %v3075_v30 = vsel %vm681_vm6, %v3072_v48, %v3074_v44  ;;  %v3084_v33 = vrot.slane %v3055_v27, 5  ;;  %v3086_v51 = vrot.slane %v3056_v39, 5 }
 0x23e   : > { %v3078_v26 = vsel %vm681_vm6, %v3076_v4, %v3077_v42  ;;  %v3080_v63 = vsel %vm681_vm6, %v3077_v42, %v3079_v52  ;;  %v3083_v40 = vsel %vm681_vm6, %v3081_v9, %v3082_v15  ;;  %v3087_v2 = vrot.slane %v3057_v49, 5 }
 0x23f   : > { %v3085_v50 = vsel %vm681_vm6, %v3082_v15, %v3084_v33  ;;  %v3089_v14 = vrot.slane %v3058_v29, 5  ;;  %v3099_v46 = vadd.f32 %v3073_v59, %v3038_v5  ;;  %v3100_v3 = vadd.f32 %v3075_v30, %v3039_v36 }
 0x240   : > { %v3088_v18 = vsel %vm681_vm6, %v3086_v51, %v3087_v2  ;;  %v3101_v22 = vadd.f32 %v3078_v26, %v3040_v16  ;;  %v3102_v19 = vadd.f32 %v3080_v63, %v3041_v54  ;;  %v3103_v34 = vadd.f32 %v3083_v40, %v3042_v31 }
 0x241   : > { %v3090_v11 = vsel %vm681_vm6, %v3087_v2, %v3089_v14  ;;  %v3104_v58 = vadd.f32 %v3085_v50, %v3043_v28  ;;  %v3105_v1 = vadd.f32 %v3088_v18, %v3044_v60  ;;  %v3110_v23 = vmul.f32 %v5235_v57, %v5136_v20 }
 0x242   : > { %v3106_v13 = vadd.f32 %v3090_v11, %v3045_v35  ;;  %v3111_v53 = vmul.f32 %v5235_v57, %v5111_v61  ;;  %v3112_v5 = vmul.f32 %v5235_v57, %v5114_v62  ;;  %v3113_v36 = vmul.f32 %v5235_v57, %v5143_v21 }
 0x243   : > { %v3114_v16 = vmul.f32 %v5235_v57, %v4904_v45  ;;  %v3115_v54 = vmul.f32 %v5235_v57, %v4907_v43  ;;  %v3116_v31 = vmul.f32 %v5235_v57, %v5146_v8  ;;  %v3117_v20 = vmul.f32 %v5235_v57, %v5118_v47 }
 0x244   : > { %v3118_v61 = vmul.f32 %v5235_v57, %v5121_v10  ;;  %v3119_v62 = vmul.f32 %v5235_v57, %v5149_v32  ;;  %v3132_v21 = vrot.slane %v5244_v41, 6  ;;  %v3133_v56 = vrot.slane %v5248_v38, 6 }
 0x245   : > { %v3135_v45 = vrot.slane %v3110_v23, 6  ;;  %v3137_v28 = vrot.slane %v3111_v53, 6  ;;  %v3138_v60 = vrot.slane %v3112_v5, 6  ;;  %v3140_v43 = vrot.slane %v3113_v36, 6 }
 0x246   : > { %v3134_v12 = vsel %vm743_vm7, %v3132_v21, %v3133_v56  ;;  %v3142_v8 = vrot.slane %v3114_v16, 6  ;;  %v3143_v35 = vrot.slane %v3115_v54, 6  ;;  %v3145_v24 = vrot.slane %v3116_v31, 6 }
 0x247   : > { %v3136_v47 = vsel %vm743_vm7, %v3133_v56, %v3135_v45  ;;  %v3139_v10 = vsel %vm743_vm7, %v3137_v28, %v3138_v60  ;;  %v3141_v37 = vsel %vm743_vm7, %v3138_v60, %v3140_v43  ;;  %v3147_v32 = vrot.slane %v3117_v20, 6 }
 0x248   : > { %v3144_v57 = vsel %vm743_vm7, %v3142_v8, %v3143_v35  ;;  %v3146_v41 = vsel %vm743_vm7, %v3143_v35, %v3145_v24  ;;  %v3148_v38 = vrot.slane %v3118_v61, 6  ;;  %v3150_v25 = vrot.slane %v3119_v62, 6 }
 0x249   : > { %v3160_v7 = vadd.f32 %v3134_v12, %v3099_v46  ;;  %v3161_v6 = vadd.f32 %v3136_v47, %v3100_v3  ;;  %v3162_v17 = vadd.f32 %v3139_v10, %v3101_v22  ;;  %v3163_v55 = vadd.f32 %v3141_v37, %v3102_v19 }
 0x24a   : > { %v3149_v27 = vsel %vm743_vm7, %v3147_v32, %v3148_v38  ;;  %v3151_v39 = vsel %vm743_vm7, %v3148_v38, %v3150_v25  ;;  %v3164_v49 = vadd.f32 %v3144_v57, %v3103_v34  ;;  %v3165_v29 = vadd.f32 %v3146_v41, %v3104_v58 }
 0x24b   : > { %v3168_v0 = vpack.c.bf16 %v3160_v7, %v3160_v7  ;;  %v3169_v48 = vpack.c.bf16 %v3161_v6, %v3161_v6  ;;  %v3166_v44 = vadd.f32 %v3149_v27, %v3105_v1  ;;  %v3170_v4 = vpack.c.bf16 %v3162_v17, %v3162_v17 }
 0x24c   : > { %v3167_v42 = vadd.f32 %v3151_v39, %v3106_v13  ;;  %v3171_v52 = vpack.c.bf16 %v3163_v55, %v3163_v55  ;;  %v3172_v9 = vpack.c.bf16 %v3164_v49, %v3164_v49  ;;  %v3173_v15 = vpack.c.bf16 %v3165_v29, %v3165_v29 }
 0x24d   : > { %3177 = vst.msk [vmem:[%s3630_s30] sm:$0xf] %vm3176_vm8, %v3168_v0  ;;  %v3174_v59 = vpack.c.bf16 %v3166_v44, %v3166_v44 }
 0x24e   : > { %3178 = vst.msk [vmem:[%s3630_s30 + $0x4] sm:$0xf] %vm3176_vm8, %v3169_v48  ;;  %v3175_v30 = vpack.c.bf16 %v3167_v42, %v3167_v42 }
 0x24f   : > { %3179 = vst.msk [vmem:[%s3630_s30 + $0x8] sm:$0xf] %vm3176_vm8, %v3170_v4 }
 0x250   : > { %3180 = vst.msk [vmem:[%s3630_s30 + $0xc] sm:$0xf] %vm3176_vm8, %v3171_v52 }
 0x251   : > { %3181 = vst.msk [vmem:[%s3630_s30 + $0x10] sm:$0xf] %vm3176_vm8, %v3172_v9 }
 0x252   : > { %3182 = vst.msk [vmem:[%s3630_s30 + $0x14] sm:$0xf] %vm3176_vm8, %v3173_v15 }
 0x253   : > { %3183 = vst.msk [vmem:[%s3630_s30 + $0x18] sm:$0xf] %vm3176_vm8, %v3174_v59 }
 0x254   : > { %3184 = vst.msk [vmem:[%s3630_s30 + $0x1c] sm:$0xf] %vm3176_vm8, %v3175_v30 }
 0x255 PF: > { %s13_s16 = sadd.s32 1, %s3566_s16   ;;  %s5347_s12 = smov %s3558_s14 }
 0x256   : > { %p10_p8 = scmp.ge.s32.totalorder %s13_s16, 10   ;;  %s5348_s13 = smov %s3562_s15 }
 0x257   : > { %s5349_s14 = smov %s5352_s17  ;;  %s5350_s15 = smov %s5356_s18 }
 0x258   :  { %12 = sbr.rel (!%p10_p8) target bundleno = 3 (0x3), region = 74 }

</bundles_post_ra>
